<compile_context>
chip_gen: v5e
topology: v5e:2x2
jax: 0.10.0
libtpu: 0.0.40
codegen_flags: <defaults>
</compile_context>

<pallas_src>
import jax
import jax.numpy as jnp
from jax.experimental import pallas as pl
from jax.experimental.pallas import tpu as pltpu


# ----------------------------------------------------------------------------
# Kernel 1: conv1 (1 -> 32, 3x3, VALID) + bias + ReLU.
#   grid over batch ("parallel"); patches are pre-built in XLA (Cin=1 so the
#   im2col expansion is tiny) and padded K=9 -> 16 for a clean MXU contraction.
# ----------------------------------------------------------------------------
def _conv1_kernel(p_ref, w_ref, b_ref, o_ref):
    # p_ref: (1, 676, 16) bf16   w_ref: (16, 32) bf16   b_ref: (1, 32) f32
    acc = jnp.dot(p_ref[0], w_ref[...], preferred_element_type=jnp.float32)
    o_ref[0] = jnp.maximum(acc + b_ref[...], 0.0).astype(o_ref.dtype)


def conv1(patches, w_mat, bias):
    B = patches.shape[0]
    return pl.pallas_call(
        _conv1_kernel,
        out_shape=jax.ShapeDtypeStruct((B, 26 * 26, 32), jnp.float32),
        grid=(B,),
        in_specs=[
            pl.BlockSpec((1, 26 * 26, 16), lambda b: (b, 0, 0)),
            pl.BlockSpec((16, 32), lambda b: (0, 0)),
            pl.BlockSpec((1, 32), lambda b: (0, 0)),
        ],
        out_specs=pl.BlockSpec((1, 26 * 26, 32), lambda b: (b, 0, 0)),
        compiler_params=pltpu.CompilerParams(
            dimension_semantics=("parallel",)),
    )(patches, w_mat, bias)


# ----------------------------------------------------------------------------
# Kernel 2: conv2 (32 -> 64, 3x3, VALID) + bias + ReLU + fused 2x2 max pool.
#   In-kernel im2col: 9 shifted taps of the NHWC input block, one MXU dot per
#   tap, f32 accumulation.  Pooling via a (24,24,64) VMEM scratch and
#   stride-2 reads.  Output is bf16 (it feeds the bf16 fc matmul anyway).
# ----------------------------------------------------------------------------
def _conv2_pool_kernel(x_ref, w_ref, b_ref, o_ref, a_scr):
    # x_ref: (1, 26, 26, 32) f32   w_ref: (9, 32, 64) bf16   b_ref: (1, 64) f32
    # o_ref: (1, 12, 12, 64) bf16  a_scr: (24, 24, 64) f32 VMEM scratch
    acc = jnp.zeros((576, 64), jnp.float32)
    for kh in range(3):
        for kw in range(3):
            tap = x_ref[0, kh:kh + 24, kw:kw + 24, :]            # (24,24,32) f32
            tap = tap.reshape(576, 32).astype(jnp.bfloat16)
            acc = acc + jnp.dot(tap, w_ref[kh * 3 + kw],
                                preferred_element_type=jnp.float32)
    acc = jnp.maximum(acc + b_ref[...], 0.0)                     # bias + ReLU (f32)
    a_scr[...] = acc.reshape(24, 24, 64)
    # 2x2 / stride-2 max pool: 4 strided taps read back from the VMEM scratch.
    ev = pl.ds(0, 12, stride=2)
    od = pl.ds(1, 12, stride=2)
    p = jnp.maximum(
        jnp.maximum(a_scr[ev, ev, :], a_scr[ev, od, :]),
        jnp.maximum(a_scr[od, ev, :], a_scr[od, od, :]),
    )
    o_ref[0] = p.astype(o_ref.dtype)


def conv2_pool(a1_nhwc, w_mat, bias):
    B = a1_nhwc.shape[0]
    return pl.pallas_call(
        _conv2_pool_kernel,
        out_shape=jax.ShapeDtypeStruct((B, 12, 12, 64), jnp.bfloat16),
        grid=(B,),
        in_specs=[
            pl.BlockSpec((1, 26, 26, 32), lambda b: (b, 0, 0, 0)),
            pl.BlockSpec((9, 32, 64), lambda b: (0, 0, 0)),
            pl.BlockSpec((1, 64), lambda b: (0, 0)),
        ],
        out_specs=pl.BlockSpec((1, 12, 12, 64), lambda b: (b, 0, 0, 0)),
        scratch_shapes=[pltpu.VMEM((24, 24, 64), jnp.float32)],
        compiler_params=pltpu.CompilerParams(
            dimension_semantics=("parallel",)),
    )(a1_nhwc, w_mat, bias)


# ----------------------------------------------------------------------------
# Kernel 3: fc1 (9216 -> 128, ReLU) K-tiled reduction + fused fc2 (128 -> 10).
#   fc1's weight streams in TK-sized chunks (double-buffered); an f32 VMEM
#   accumulator is initialized/finalized with pl.when.  fc2 + bias happen in
#   the finalize step so the 128-wide activation never leaves VMEM.
# ----------------------------------------------------------------------------
def _fc_kernel(x_ref, w1_ref, b1_ref, w2_ref, b2_ref, o_ref, acc_ref):
    k = pl.program_id(0)

    @pl.when(k == 0)
    def _():
        acc_ref[...] = jnp.zeros_like(acc_ref)

    acc_ref[...] += jnp.dot(x_ref[...], w1_ref[...],
                            preferred_element_type=jnp.float32)

    @pl.when(k == pl.num_programs(0) - 1)
    def _():
        h = jnp.maximum(acc_ref[...] + b1_ref[...], 0.0)         # fc1 + ReLU (f32)
        out = jnp.dot(h.astype(jnp.bfloat16), w2_ref[...],
                      preferred_element_type=jnp.float32) + b2_ref[...]
        o_ref[...] = out.astype(o_ref.dtype)


def fc_head(x_flat, w1, b1, w2, b2, *, tk=2304):
    B, K = x_flat.shape
    assert K % tk == 0
    N1 = w1.shape[1]
    N2 = w2.shape[1]
    return pl.pallas_call(
        _fc_kernel,
        out_shape=jax.ShapeDtypeStruct((B, N2), jnp.float32),
        grid=(K // tk,),
        in_specs=[
            pl.BlockSpec((B, tk), lambda k: (0, k)),
            pl.BlockSpec((tk, N1), lambda k: (k, 0)),
            pl.BlockSpec((1, N1), lambda k: (0, 0)),
            pl.BlockSpec((N1, N2), lambda k: (0, 0)),
            pl.BlockSpec((1, N2), lambda k: (0, 0)),
        ],
        out_specs=pl.BlockSpec((B, N2), lambda k: (0, 0)),
        scratch_shapes=[pltpu.VMEM((B, N1), jnp.float32)],
        compiler_params=pltpu.CompilerParams(
            dimension_semantics=("arbitrary",)),
    )(x_flat, w1, b1, w2, b2)


# ----------------------------------------------------------------------------
# Parameter prep (once, outside the per-call path).
# ----------------------------------------------------------------------------
def prepare_params(params):
    # conv weights -> (kh, kw, cin, cout) matmul layout, bf16 for the MXU.
    w1 = jnp.transpose(params["w1"], (2, 3, 1, 0)).reshape(9, 32)
    w1 = jnp.pad(w1, ((0, 7), (0, 0)))                           # K: 9 -> 16
    w2 = jnp.transpose(params["w2"], (2, 3, 1, 0)).reshape(9, 32, 64)
    # Fold the NCHW flatten order of torch.flatten(x, 1) into fc1's weight:
    # rows of wf1 are indexed (c, h, w); permute to (h, w, c) so the pooled
    # NHWC tensor can be flattened directly.
    wf1 = params["wf1"].reshape(64, 12, 12, 128)
    wf1 = jnp.transpose(wf1, (1, 2, 0, 3)).reshape(9216, 128)
    return dict(
        w1=w1.astype(jnp.bfloat16),
        b1=params["b1"].reshape(1, 32).astype(jnp.float32),
        w2=w2.astype(jnp.bfloat16),
        b2=params["b2"].reshape(1, 64).astype(jnp.float32),
        wf1=wf1.astype(jnp.bfloat16),
        bf1=params["bf1"].reshape(1, 128).astype(jnp.float32),
        wf2=params["wf2"].astype(jnp.bfloat16),
        bf2=params["bf2"].reshape(1, 10).astype(jnp.float32),
    )


# ----------------------------------------------------------------------------
# Net forward
# ----------------------------------------------------------------------------
def net_forward(x_nchw, p):
    B = x_nchw.shape[0]
    x2 = x_nchw[:, 0, :, :]                                      # [B,28,28] (Cin=1)
    # conv1 im2col in XLA (cheap for Cin=1); K padded 9 -> 16 with zeros.
    taps = [x2[:, i:i + 26, j:j + 26] for i in range(3) for j in range(3)]
    patches = jnp.stack(taps, axis=-1)                           # [B,26,26,9]
    patches = jnp.pad(patches, ((0, 0), (0, 0), (0, 0), (0, 7)))
    patches = patches.reshape(B, 26 * 26, 16).astype(jnp.bfloat16)

    a1 = conv1(patches, p["w1"], p["b1"])                        # [B,676,32] f32
    a1 = a1.reshape(B, 26, 26, 32)                               # NHWC
    pooled = conv2_pool(a1, p["w2"], p["b2"])                    # [B,12,12,64] bf16
    # dropout1 / dropout2: identity at inference.
    x_flat = pooled.reshape(B, 12 * 12 * 64)                     # NHWC flatten
    out = fc_head(x_flat, p["wf1"], p["bf1"], p["wf2"], p["bf2"])  # [B,10] f32
    return out


def init_params(key):
    """Deterministic synthetic parameters with the nn.Module's shapes."""
    ks = jax.random.split(key, 8)

    def rnd(k, shape, scale):
        return jax.random.normal(k, shape, jnp.float32) * scale

    return dict(
        w1=rnd(ks[0], (32, 1, 3, 3), 0.10),     # conv1.weight [Cout,Cin,KH,KW]
        b1=rnd(ks[1], (32,), 0.10),             # conv1.bias
        w2=rnd(ks[2], (64, 32, 3, 3), 0.05),    # conv2.weight
        b2=rnd(ks[3], (64,), 0.05),             # conv2.bias
        wf1=rnd(ks[4], (9216, 128), 0.01),      # fc1 weight stored as [in,out]
        bf1=rnd(ks[5], (128,), 0.01),           # fc1.bias
        wf2=rnd(ks[6], (128, 10), 0.05),        # fc2 weight stored as [in,out]
        bf2=rnd(ks[7], (10,), 0.05),            # fc2.bias
    )


if __name__ == "__main__":
    key = jax.random.PRNGKey(0)
    kx, kp = jax.random.split(key)
    # fc1 expects 9216 = 64*12*12 features => input spatial must be 28x28.
    x = jax.random.normal(kx, (2, 1, 28, 28), jnp.float32)       # NCHW, batch=2
    params = init_params(kp)
    prep = prepare_params(params)                                # once, at init

    out = jax.jit(net_forward)(x, prep)
    out = jax.block_until_ready(out)
    assert out.shape == (2, 10) and out.dtype == jnp.float32
    assert bool(jnp.all(jnp.isfinite(out)))
    print("KERNEL_OK")
</pallas_src>

<mosaic_0001>
module attributes {stable_mosaic.version = 11 : i64} {
  func.func @_conv1_kernel(%arg0: i32, %arg1: memref<1x676x16xbf16, #tpu.memory_space<vmem>>, %arg2: memref<16x32xbf16, #tpu.memory_space<vmem>>, %arg3: memref<1x32xf32, #tpu.memory_space<vmem>>, %arg4: memref<1x676x32xf32, #tpu.memory_space<vmem>>) attributes {dimension_semantics = [#tpu.dimension_semantics<parallel>], iteration_bounds = array<i64: 2>, scalar_prefetch = 0 : i64, scratch_operands = 0 : i64, tpu.core_type = #tpu.core_type<tc>, window_params = [{transform_indices = @transform_0, window_bounds = array<i64: 1, 676, 16>}, {pipeline_mode = #tpu.pipeline_mode<synchronous>, transform_indices = @transform_1, window_bounds = array<i64: 16, 32>}, {pipeline_mode = #tpu.pipeline_mode<synchronous>, transform_indices = @transform_2, window_bounds = array<i64: 1, 32>}, {transform_indices = @transform_3, window_bounds = array<i64: 1, 676, 32>}]} {
    %c0 = arith.constant 0 : index
    %c0_0 = arith.constant 0 : index
    %c0_1 = arith.constant 0 : index
    %0 = vector.load %arg1[%c0, %c0_0, %c0_1] : memref<1x676x16xbf16, #tpu.memory_space<vmem>>, vector<1x676x16xbf16>
    %1 = vector.shape_cast %0 : vector<1x676x16xbf16> to vector<676x16xbf16>
    %c0_2 = arith.constant 0 : index
    %c0_3 = arith.constant 0 : index
    %2 = vector.load %arg2[%c0_2, %c0_3] : memref<16x32xbf16, #tpu.memory_space<vmem>>, vector<16x32xbf16>
    %cst = arith.constant dense<0.000000e+00> : vector<676x32xf32>
    %3 = tpu.matmul %1, %2, %cst {dimension_numbers = #tpu.dot_dimension_numbers<[1], [0], [0], [1], [0, 0, 1, 1], [], []>} : vector<676x16xbf16>, vector<16x32xbf16>, vector<676x32xf32> -> vector<676x32xf32>
    %c0_4 = arith.constant 0 : index
    %c0_5 = arith.constant 0 : index
    %4 = vector.load %arg3[%c0_4, %c0_5] : memref<1x32xf32, #tpu.memory_space<vmem>>, vector<1x32xf32>
    %5 = vector.broadcast %4 : vector<1x32xf32> to vector<676x32xf32>
    %6 = arith.addf %3, %5 : vector<676x32xf32>
    %cst_6 = arith.constant 0.000000e+00 : f32
    %7 = vector.broadcast %cst_6 : f32 to vector<676x32xf32>
    %8 = arith.maximumf %6, %7 : vector<676x32xf32>
    %c0_7 = arith.constant 0 : index
    %c0_8 = arith.constant 0 : index
    %c0_9 = arith.constant 0 : index
    %9 = vector.load %arg4[%c0_7, %c0_8, %c0_9] : memref<1x676x32xf32, #tpu.memory_space<vmem>>, vector<1x676x32xf32>
    %10 = vector.shape_cast %9 : vector<1x676x32xf32> to vector<676x32xf32>
    %11 = vector.shape_cast %8 : vector<676x32xf32> to vector<1x676x32xf32>
    tpu.vector_store %arg4[%c0_7, %c0_8, %c0_9], %11 {strides = array<i32>} : memref<1x676x32xf32, #tpu.memory_space<vmem>>, vector<1x676x32xf32>,
    return
  }
  func.func @transform_0(%arg0: i32) -> (i32, i32, i32) {
    %c0_i32 = arith.constant 0 : i32
    %c0_i32_0 = arith.constant 0 : i32
    %c0_i32_1 = arith.constant 0 : i32
    return %arg0, %c0_i32, %c0_i32_0 : i32, i32, i32
  }
  func.func @transform_1(%arg0: i32) -> (i32, i32) {
    %c0_i32 = arith.constant 0 : i32
    %c0_i32_0 = arith.constant 0 : i32
    %c0_i32_1 = arith.constant 0 : i32
    return %c0_i32, %c0_i32_0 : i32, i32
  }
  func.func @transform_2(%arg0: i32) -> (i32, i32) {
    %c0_i32 = arith.constant 0 : i32
    %c0_i32_0 = arith.constant 0 : i32
    %c0_i32_1 = arith.constant 0 : i32
    return %c0_i32, %c0_i32_0 : i32, i32
  }
  func.func @transform_3(%arg0: i32) -> (i32, i32, i32) {
    %c0_i32 = arith.constant 0 : i32
    %c0_i32_0 = arith.constant 0 : i32
    %c0_i32_1 = arith.constant 0 : i32
    return %arg0, %c0_i32, %c0_i32_0 : i32, i32, i32
  }
}

module attributes {stable_mosaic.version = 11 : i64} {
  func.func @_conv2_pool_kernel(%arg0: i32, %arg1: memref<1x26x26x32xf32, #tpu.memory_space<vmem>>, %arg2: memref<9x32x64xbf16, #tpu.memory_space<vmem>>, %arg3: memref<1x64xf32, #tpu.memory_space<vmem>>, %arg4: memref<1x12x12x64xbf16, #tpu.memory_space<vmem>>, %arg5: memref<24x24x64xf32, #tpu.memory_space<vmem>>) attributes {dimension_semantics = [#tpu.dimension_semantics<parallel>], iteration_bounds = array<i64: 2>, scalar_prefetch = 0 : i64, scratch_operands = 1 : i64, tpu.core_type = #tpu.core_type<tc>, window_params = [{transform_indices = @transform_0, window_bounds = array<i64: 1, 26, 26, 32>}, {pipeline_mode = #tpu.pipeline_mode<synchronous>, transform_indices = @transform_1, window_bounds = array<i64: 9, 32, 64>}, {pipeline_mode = #tpu.pipeline_mode<synchronous>, transform_indices = @transform_2, window_bounds = array<i64: 1, 64>}, {transform_indices = @transform_3, window_bounds = array<i64: 1, 12, 12, 64>}]} {
    %cst = arith.constant 0.000000e+00 : f32
    %0 = vector.broadcast %cst : f32 to vector<576x64xf32>
    %c0 = arith.constant 0 : index
    %c0_0 = arith.constant 0 : index
    %c0_1 = arith.constant 0 : index
    %c0_2 = arith.constant 0 : index
    %1 = vector.load %arg1[%c0, %c0_0, %c0_1, %c0_2] : memref<1x26x26x32xf32, #tpu.memory_space<vmem>>, vector<1x24x24x32xf32>
    %2 = vector.shape_cast %1 : vector<1x24x24x32xf32> to vector<24x24x32xf32>
    %3 = vector.shape_cast %2 : vector<24x24x32xf32> to vector<576x32xf32>
    %4 = arith.truncf %3 : vector<576x32xf32> to vector<576x32xbf16>
    %c0_3 = arith.constant 0 : index
    %c0_4 = arith.constant 0 : index
    %c0_5 = arith.constant 0 : index
    %5 = vector.load %arg2[%c0_3, %c0_4, %c0_5] : memref<9x32x64xbf16, #tpu.memory_space<vmem>>, vector<1x32x64xbf16>
    %6 = vector.shape_cast %5 : vector<1x32x64xbf16> to vector<32x64xbf16>
    %cst_6 = arith.constant dense<0.000000e+00> : vector<576x64xf32>
    %7 = tpu.matmul %4, %6, %cst_6 {dimension_numbers = #tpu.dot_dimension_numbers<[1], [0], [0], [1], [0, 0, 1, 1], [], []>} : vector<576x32xbf16>, vector<32x64xbf16>, vector<576x64xf32> -> vector<576x64xf32>
    %8 = arith.addf %0, %7 : vector<576x64xf32>
    %c0_7 = arith.constant 0 : index
    %c0_8 = arith.constant 0 : index
    %c1 = arith.constant 1 : index
    %c0_9 = arith.constant 0 : index
    %9 = vector.load %arg1[%c0_7, %c0_8, %c1, %c0_9] : memref<1x26x26x32xf32, #tpu.memory_space<vmem>>, vector<1x24x24x32xf32>
    %10 = vector.shape_cast %9 : vector<1x24x24x32xf32> to vector<24x24x32xf32>
    %11 = vector.shape_cast %10 : vector<24x24x32xf32> to vector<576x32xf32>
    %12 = arith.truncf %11 : vector<576x32xf32> to vector<576x32xbf16>
    %c1_10 = arith.constant 1 : index
    %c0_11 = arith.constant 0 : index
    %c0_12 = arith.constant 0 : index
    %13 = vector.load %arg2[%c1_10, %c0_11, %c0_12] : memref<9x32x64xbf16, #tpu.memory_space<vmem>>, vector<1x32x64xbf16>
    %14 = vector.shape_cast %13 : vector<1x32x64xbf16> to vector<32x64xbf16>
    %cst_13 = arith.constant dense<0.000000e+00> : vector<576x64xf32>
    %15 = tpu.matmul %12, %14, %cst_13 {dimension_numbers = #tpu.dot_dimension_numbers<[1], [0], [0], [1], [0, 0, 1, 1], [], []>} : vector<576x32xbf16>, vector<32x64xbf16>, vector<576x64xf32> -> vector<576x64xf32>
    %16 = arith.addf %8, %15 : vector<576x64xf32>
    %c0_14 = arith.constant 0 : index
    %c0_15 = arith.constant 0 : index
    %c2 = arith.constant 2 : index
    %c0_16 = arith.constant 0 : index
    %17 = vector.load %arg1[%c0_14, %c0_15, %c2, %c0_16] : memref<1x26x26x32xf32, #tpu.memory_space<vmem>>, vector<1x24x24x32xf32>
    %18 = vector.shape_cast %17 : vector<1x24x24x32xf32> to vector<24x24x32xf32>
    %19 = vector.shape_cast %18 : vector<24x24x32xf32> to vector<576x32xf32>
    %20 = arith.truncf %19 : vector<576x32xf32> to vector<576x32xbf16>
    %c2_17 = arith.constant 2 : index
    %c0_18 = arith.constant 0 : index
    %c0_19 = arith.constant 0 : index
    %21 = vector.load %arg2[%c2_17, %c0_18, %c0_19] : memref<9x32x64xbf16, #tpu.memory_space<vmem>>, vector<1x32x64xbf16>
    %22 = vector.shape_cast %21 : vector<1x32x64xbf16> to vector<32x64xbf16>
    %cst_20 = arith.constant dense<0.000000e+00> : vector<576x64xf32>
    %23 = tpu.matmul %20, %22, %cst_20 {dimension_numbers = #tpu.dot_dimension_numbers<[1], [0], [0], [1], [0, 0, 1, 1], [], []>} : vector<576x32xbf16>, vector<32x64xbf16>, vector<576x64xf32> -> vector<576x64xf32>
    %24 = arith.addf %16, %23 : vector<576x64xf32>
    %c0_21 = arith.constant 0 : index
    %c1_22 = arith.constant 1 : index
    %c0_23 = arith.constant 0 : index
    %c0_24 = arith.constant 0 : index
    %25 = vector.load %arg1[%c0_21, %c1_22, %c0_23, %c0_24] : memref<1x26x26x32xf32, #tpu.memory_space<vmem>>, vector<1x24x24x32xf32>
    %26 = vector.shape_cast %25 : vector<1x24x24x32xf32> to vector<24x24x32xf32>
    %27 = vector.shape_cast %26 : vector<24x24x32xf32> to vector<576x32xf32>
    %28 = arith.truncf %27 : vector<576x32xf32> to vector<576x32xbf16>
    %c3 = arith.constant 3 : index
    %c0_25 = arith.constant 0 : index
    %c0_26 = arith.constant 0 : index
    %29 = vector.load %arg2[%c3, %c0_25, %c0_26] : memref<9x32x64xbf16, #tpu.memory_space<vmem>>, vector<1x32x64xbf16>
    %30 = vector.shape_cast %29 : vector<1x32x64xbf16> to vector<32x64xbf16>
    %cst_27 = arith.constant dense<0.000000e+00> : vector<576x64xf32>
    %31 = tpu.matmul %28, %30, %cst_27 {dimension_numbers = #tpu.dot_dimension_numbers<[1], [0], [0], [1], [0, 0, 1, 1], [], []>} : vector<576x32xbf16>, vector<32x64xbf16>, vector<576x64xf32> -> vector<576x64xf32>
    %32 = arith.addf %24, %31 : vector<576x64xf32>
    %c0_28 = arith.constant 0 : index
    %c1_29 = arith.constant 1 : index
    %c1_30 = arith.constant 1 : index
    %c0_31 = arith.constant 0 : index
    %33 = vector.load %arg1[%c0_28, %c1_29, %c1_30, %c0_31] : memref<1x26x26x32xf32, #tpu.memory_space<vmem>>, vector<1x24x24x32xf32>
    %34 = vector.shape_cast %33 : vector<1x24x24x32xf32> to vector<24x24x32xf32>
    %35 = vector.shape_cast %34 : vector<24x24x32xf32> to vector<576x32xf32>
    %36 = arith.truncf %35 : vector<576x32xf32> to vector<576x32xbf16>
    %c4 = arith.constant 4 : index
    %c0_32 = arith.constant 0 : index
    %c0_33 = arith.constant 0 : index
    %37 = vector.load %arg2[%c4, %c0_32, %c0_33] : memref<9x32x64xbf16, #tpu.memory_space<vmem>>, vector<1x32x64xbf16>
    %38 = vector.shape_cast %37 : vector<1x32x64xbf16> to vector<32x64xbf16>
    %cst_34 = arith.constant dense<0.000000e+00> : vector<576x64xf32>
    %39 = tpu.matmul %36, %38, %cst_34 {dimension_numbers = #tpu.dot_dimension_numbers<[1], [0], [0], [1], [0, 0, 1, 1], [], []>} : vector<576x32xbf16>, vector<32x64xbf16>, vector<576x64xf32> -> vector<576x64xf32>
    %40 = arith.addf %32, %39 : vector<576x64xf32>
    %c0_35 = arith.constant 0 : index
    %c1_36 = arith.constant 1 : index
    %c2_37 = arith.constant 2 : index
    %c0_38 = arith.constant 0 : index
    %41 = vector.load %arg1[%c0_35, %c1_36, %c2_37, %c0_38] : memref<1x26x26x32xf32, #tpu.memory_space<vmem>>, vector<1x24x24x32xf32>
    %42 = vector.shape_cast %41 : vector<1x24x24x32xf32> to vector<24x24x32xf32>
    %43 = vector.shape_cast %42 : vector<24x24x32xf32> to vector<576x32xf32>
    %44 = arith.truncf %43 : vector<576x32xf32> to vector<576x32xbf16>
    %c5 = arith.constant 5 : index
    %c0_39 = arith.constant 0 : index
    %c0_40 = arith.constant 0 : index
    %45 = vector.load %arg2[%c5, %c0_39, %c0_40] : memref<9x32x64xbf16, #tpu.memory_space<vmem>>, vector<1x32x64xbf16>
    %46 = vector.shape_cast %45 : vector<1x32x64xbf16> to vector<32x64xbf16>
    %cst_41 = arith.constant dense<0.000000e+00> : vector<576x64xf32>
    %47 = tpu.matmul %44, %46, %cst_41 {dimension_numbers = #tpu.dot_dimension_numbers<[1], [0], [0], [1], [0, 0, 1, 1], [], []>} : vector<576x32xbf16>, vector<32x64xbf16>, vector<576x64xf32> -> vector<576x64xf32>
    %48 = arith.addf %40, %47 : vector<576x64xf32>
    %c0_42 = arith.constant 0 : index
    %c2_43 = arith.constant 2 : index
    %c0_44 = arith.constant 0 : index
    %c0_45 = arith.constant 0 : index
    %49 = vector.load %arg1[%c0_42, %c2_43, %c0_44, %c0_45] : memref<1x26x26x32xf32, #tpu.memory_space<vmem>>, vector<1x24x24x32xf32>
    %50 = vector.shape_cast %49 : vector<1x24x24x32xf32> to vector<24x24x32xf32>
    %51 = vector.shape_cast %50 : vector<24x24x32xf32> to vector<576x32xf32>
    %52 = arith.truncf %51 : vector<576x32xf32> to vector<576x32xbf16>
    %c6 = arith.constant 6 : index
    %c0_46 = arith.constant 0 : index
    %c0_47 = arith.constant 0 : index
    %53 = vector.load %arg2[%c6, %c0_46, %c0_47] : memref<9x32x64xbf16, #tpu.memory_space<vmem>>, vector<1x32x64xbf16>
    %54 = vector.shape_cast %53 : vector<1x32x64xbf16> to vector<32x64xbf16>
    %cst_48 = arith.constant dense<0.000000e+00> : vector<576x64xf32>
    %55 = tpu.matmul %52, %54, %cst_48 {dimension_numbers = #tpu.dot_dimension_numbers<[1], [0], [0], [1], [0, 0, 1, 1], [], []>} : vector<576x32xbf16>, vector<32x64xbf16>, vector<576x64xf32> -> vector<576x64xf32>
    %56 = arith.addf %48, %55 : vector<576x64xf32>
    %c0_49 = arith.constant 0 : index
    %c2_50 = arith.constant 2 : index
    %c1_51 = arith.constant 1 : index
    %c0_52 = arith.constant 0 : index
    %57 = vector.load %arg1[%c0_49, %c2_50, %c1_51, %c0_52] : memref<1x26x26x32xf32, #tpu.memory_space<vmem>>, vector<1x24x24x32xf32>
    %58 = vector.shape_cast %57 : vector<1x24x24x32xf32> to vector<24x24x32xf32>
    %59 = vector.shape_cast %58 : vector<24x24x32xf32> to vector<576x32xf32>
    %60 = arith.truncf %59 : vector<576x32xf32> to vector<576x32xbf16>
    %c7 = arith.constant 7 : index
    %c0_53 = arith.constant 0 : index
    %c0_54 = arith.constant 0 : index
    %61 = vector.load %arg2[%c7, %c0_53, %c0_54] : memref<9x32x64xbf16, #tpu.memory_space<vmem>>, vector<1x32x64xbf16>
    %62 = vector.shape_cast %61 : vector<1x32x64xbf16> to vector<32x64xbf16>
    %cst_55 = arith.constant dense<0.000000e+00> : vector<576x64xf32>
    %63 = tpu.matmul %60, %62, %cst_55 {dimension_numbers = #tpu.dot_dimension_numbers<[1], [0], [0], [1], [0, 0, 1, 1], [], []>} : vector<576x32xbf16>, vector<32x64xbf16>, vector<576x64xf32> -> vector<576x64xf32>
    %64 = arith.addf %56, %63 : vector<576x64xf32>
    %c0_56 = arith.constant 0 : index
    %c2_57 = arith.constant 2 : index
    %c2_58 = arith.constant 2 : index
    %c0_59 = arith.constant 0 : index
    %65 = vector.load %arg1[%c0_56, %c2_57, %c2_58, %c0_59] : memref<1x26x26x32xf32, #tpu.memory_space<vmem>>, vector<1x24x24x32xf32>
    %66 = vector.shape_cast %65 : vector<1x24x24x32xf32> to vector<24x24x32xf32>
    %67 = vector.shape_cast %66 : vector<24x24x32xf32> to vector<576x32xf32>
    %68 = arith.truncf %67 : vector<576x32xf32> to vector<576x32xbf16>
    %c8 = arith.constant 8 : index
    %c0_60 = arith.constant 0 : index
    %c0_61 = arith.constant 0 : index
    %69 = vector.load %arg2[%c8, %c0_60, %c0_61] : memref<9x32x64xbf16, #tpu.memory_space<vmem>>, vector<1x32x64xbf16>
    %70 = vector.shape_cast %69 : vector<1x32x64xbf16> to vector<32x64xbf16>
    %cst_62 = arith.constant dense<0.000000e+00> : vector<576x64xf32>
    %71 = tpu.matmul %68, %70, %cst_62 {dimension_numbers = #tpu.dot_dimension_numbers<[1], [0], [0], [1], [0, 0, 1, 1], [], []>} : vector<576x32xbf16>, vector<32x64xbf16>, vector<576x64xf32> -> vector<576x64xf32>
    %72 = arith.addf %64, %71 : vector<576x64xf32>
    %c0_63 = arith.constant 0 : index
    %c0_64 = arith.constant 0 : index
    %73 = vector.load %arg3[%c0_63, %c0_64] : memref<1x64xf32, #tpu.memory_space<vmem>>, vector<1x64xf32>
    %74 = vector.broadcast %73 : vector<1x64xf32> to vector<576x64xf32>
    %75 = arith.addf %72, %74 : vector<576x64xf32>
    %cst_65 = arith.constant 0.000000e+00 : f32
    %76 = vector.broadcast %cst_65 : f32 to vector<576x64xf32>
    %77 = arith.maximumf %75, %76 : vector<576x64xf32>
    %78 = vector.shape_cast %77 : vector<576x64xf32> to vector<24x24x64xf32>
    %c0_66 = arith.constant 0 : index
    %c0_67 = arith.constant 0 : index
    %c0_68 = arith.constant 0 : index
    %79 = vector.load %arg5[%c0_66, %c0_67, %c0_68] : memref<24x24x64xf32, #tpu.memory_space<vmem>>, vector<24x24x64xf32>
    tpu.vector_store %arg5[%c0_66, %c0_67, %c0_68], %78 {strides = array<i32>} : memref<24x24x64xf32, #tpu.memory_space<vmem>>, vector<24x24x64xf32>,
    %c0_69 = arith.constant 0 : index
    %c0_70 = arith.constant 0 : index
    %c0_71 = arith.constant 0 : index
    %80 = tpu.strided_load %arg5[%c0_69, %c0_70, %c0_71] {strides = array<i32: 2, 2, 1>} : memref<24x24x64xf32, #tpu.memory_space<vmem>>, vector<12x12x64xf32>
    %c0_72 = arith.constant 0 : index
    %c1_73 = arith.constant 1 : index
    %c0_74 = arith.constant 0 : index
    %81 = tpu.strided_load %arg5[%c0_72, %c1_73, %c0_74] {strides = array<i32: 2, 2, 1>} : memref<24x24x64xf32, #tpu.memory_space<vmem>>, vector<12x12x64xf32>
    %82 = arith.maximumf %80, %81 : vector<12x12x64xf32>
    %c1_75 = arith.constant 1 : index
    %c0_76 = arith.constant 0 : index
    %c0_77 = arith.constant 0 : index
    %83 = tpu.strided_load %arg5[%c1_75, %c0_76, %c0_77] {strides = array<i32: 2, 2, 1>} : memref<24x24x64xf32, #tpu.memory_space<vmem>>, vector<12x12x64xf32>
    %c1_78 = arith.constant 1 : index
    %c1_79 = arith.constant 1 : index
    %c0_80 = arith.constant 0 : index
    %84 = tpu.strided_load %arg5[%c1_78, %c1_79, %c0_80] {strides = array<i32: 2, 2, 1>} : memref<24x24x64xf32, #tpu.memory_space<vmem>>, vector<12x12x64xf32>
    %85 = arith.maximumf %83, %84 : vector<12x12x64xf32>
    %86 = arith.maximumf %82, %85 : vector<12x12x64xf32>
    %87 = arith.truncf %86 : vector<12x12x64xf32> to vector<12x12x64xbf16>
    %c0_81 = arith.constant 0 : index
    %c0_82 = arith.constant 0 : index
    %c0_83 = arith.constant 0 : index
    %c0_84 = arith.constant 0 : index
    %88 = vector.load %arg4[%c0_81, %c0_82, %c0_83, %c0_84] : memref<1x12x12x64xbf16, #tpu.memory_space<vmem>>, vector<1x12x12x64xbf16>
    %89 = vector.shape_cast %88 : vector<1x12x12x64xbf16> to vector<12x12x64xbf16>
    %90 = vector.shape_cast %87 : vector<12x12x64xbf16> to vector<1x12x12x64xbf16>
    tpu.vector_store %arg4[%c0_81, %c0_82, %c0_83, %c0_84], %90 {strides = array<i32>} : memref<1x12x12x64xbf16, #tpu.memory_space<vmem>>, vector<1x12x12x64xbf16>,
    return
  }
  func.func @transform_0(%arg0: i32) -> (i32, i32, i32, i32) {
    %c0_i32 = arith.constant 0 : i32
    %c0_i32_0 = arith.constant 0 : i32
    %c0_i32_1 = arith.constant 0 : i32
    %c0_i32_2 = arith.constant 0 : i32
    return %arg0, %c0_i32, %c0_i32_0, %c0_i32_1 : i32, i32, i32, i32
  }
  func.func @transform_1(%arg0: i32) -> (i32, i32, i32) {
    %c0_i32 = arith.constant 0 : i32
    %c0_i32_0 = arith.constant 0 : i32
    %c0_i32_1 = arith.constant 0 : i32
    %c0_i32_2 = arith.constant 0 : i32
    return %c0_i32, %c0_i32_0, %c0_i32_1 : i32, i32, i32
  }
  func.func @transform_2(%arg0: i32) -> (i32, i32) {
    %c0_i32 = arith.constant 0 : i32
    %c0_i32_0 = arith.constant 0 : i32
    %c0_i32_1 = arith.constant 0 : i32
    return %c0_i32, %c0_i32_0 : i32, i32
  }
  func.func @transform_3(%arg0: i32) -> (i32, i32, i32, i32) {
    %c0_i32 = arith.constant 0 : i32
    %c0_i32_0 = arith.constant 0 : i32
    %c0_i32_1 = arith.constant 0 : i32
    %c0_i32_2 = arith.constant 0 : i32
    return %arg0, %c0_i32, %c0_i32_0, %c0_i32_1 : i32, i32, i32, i32
  }
}

module attributes {stable_mosaic.version = 11 : i64} {
  func.func @_fc_kernel(%arg0: i32, %arg1: memref<2x2304xbf16, #tpu.memory_space<vmem>>, %arg2: memref<2304x128xbf16, #tpu.memory_space<vmem>>, %arg3: memref<1x128xf32, #tpu.memory_space<vmem>>, %arg4: memref<128x10xbf16, #tpu.memory_space<vmem>>, %arg5: memref<1x10xf32, #tpu.memory_space<vmem>>, %arg6: memref<2x10xf32, #tpu.memory_space<vmem>>, %arg7: memref<2x128xf32, #tpu.memory_space<vmem>>) attributes {dimension_semantics = [#tpu.dimension_semantics<arbitrary>], iteration_bounds = array<i64: 4>, scalar_prefetch = 0 : i64, scratch_operands = 1 : i64, tpu.core_type = #tpu.core_type<tc>, window_params = [{transform_indices = @transform_0, window_bounds = array<i64: 2, 2304>}, {transform_indices = @transform_1, window_bounds = array<i64: 2304, 128>}, {pipeline_mode = #tpu.pipeline_mode<synchronous>, transform_indices = @transform_2, window_bounds = array<i64: 1, 128>}, {pipeline_mode = #tpu.pipeline_mode<synchronous>, transform_indices = @transform_3, window_bounds = array<i64: 128, 10>}, {pipeline_mode = #tpu.pipeline_mode<synchronous>, transform_indices = @transform_4, window_bounds = array<i64: 1, 10>}, {pipeline_mode = #tpu.pipeline_mode<synchronous>, transform_indices = @transform_5, window_bounds = array<i64: 2, 10>}]} {
    %c0_i32 = arith.constant 0 : i32
    %0 = arith.cmpi eq, %arg0, %c0_i32 : i32
    %1 = arith.extui %0 : i1 to i32
    %c0_i32_0 = arith.constant 0 : i32
    %2 = arith.cmpi ne, %1, %c0_i32_0 : i32
    scf.if %2 {
      %cst_9 = arith.constant 0.000000e+00 : f32
      %12 = vector.broadcast %cst_9 : f32 to vector<2x128xf32>
      %c0_10 = arith.constant 0 : index
      %c0_11 = arith.constant 0 : index
      %13 = vector.load %arg7[%c0_10, %c0_11] : memref<2x128xf32, #tpu.memory_space<vmem>>, vector<2x128xf32>
      tpu.vector_store %arg7[%c0_10, %c0_11], %12 {strides = array<i32>} : memref<2x128xf32, #tpu.memory_space<vmem>>, vector<2x128xf32>,
    } else {
    }
    %c0 = arith.constant 0 : index
    %c0_1 = arith.constant 0 : index
    %3 = vector.load %arg7[%c0, %c0_1] : memref<2x128xf32, #tpu.memory_space<vmem>>, vector<2x128xf32>
    %c0_2 = arith.constant 0 : index
    %c0_3 = arith.constant 0 : index
    %4 = vector.load %arg1[%c0_2, %c0_3] : memref<2x2304xbf16, #tpu.memory_space<vmem>>, vector<2x2304xbf16>
    %c0_4 = arith.constant 0 : index
    %c0_5 = arith.constant 0 : index
    %5 = vector.load %arg2[%c0_4, %c0_5] : memref<2304x128xbf16, #tpu.memory_space<vmem>>, vector<2304x128xbf16>
    %cst = arith.constant dense<0.000000e+00> : vector<2x128xf32>
    %6 = tpu.matmul %4, %5, %cst {dimension_numbers = #tpu.dot_dimension_numbers<[1], [0], [0], [1], [0, 0, 1, 1], [], []>} : vector<2x2304xbf16>, vector<2304x128xbf16>, vector<2x128xf32> -> vector<2x128xf32>
    %7 = arith.addf %3, %6 : vector<2x128xf32>
    %c0_6 = arith.constant 0 : index
    %c0_7 = arith.constant 0 : index
    %8 = vector.load %arg7[%c0_6, %c0_7] : memref<2x128xf32, #tpu.memory_space<vmem>>, vector<2x128xf32>
    tpu.vector_store %arg7[%c0_6, %c0_7], %7 {strides = array<i32>} : memref<2x128xf32, #tpu.memory_space<vmem>>, vector<2x128xf32>,
    %c3_i32 = arith.constant 3 : i32
    %9 = arith.cmpi eq, %arg0, %c3_i32 : i32
    %10 = arith.extui %9 : i1 to i32
    %c0_i32_8 = arith.constant 0 : i32
    %11 = arith.cmpi ne, %10, %c0_i32_8 : i32
    scf.if %11 {
      %c0_9 = arith.constant 0 : index
      %c0_10 = arith.constant 0 : index
      %12 = vector.load %arg7[%c0_9, %c0_10] : memref<2x128xf32, #tpu.memory_space<vmem>>, vector<2x128xf32>
      %c0_11 = arith.constant 0 : index
      %c0_12 = arith.constant 0 : index
      %13 = vector.load %arg3[%c0_11, %c0_12] : memref<1x128xf32, #tpu.memory_space<vmem>>, vector<1x128xf32>
      %14 = vector.broadcast %13 : vector<1x128xf32> to vector<2x128xf32>
      %15 = arith.addf %12, %14 : vector<2x128xf32>
      %cst_13 = arith.constant 0.000000e+00 : f32
      %16 = vector.broadcast %cst_13 : f32 to vector<2x128xf32>
      %17 = arith.maximumf %15, %16 : vector<2x128xf32>
      %18 = arith.truncf %17 : vector<2x128xf32> to vector<2x128xbf16>
      %c0_14 = arith.constant 0 : index
      %c0_15 = arith.constant 0 : index
      %19 = vector.load %arg4[%c0_14, %c0_15] : memref<128x10xbf16, #tpu.memory_space<vmem>>, vector<128x10xbf16>
      %cst_16 = arith.constant dense<0.000000e+00> : vector<2x10xf32>
      %20 = tpu.matmul %18, %19, %cst_16 {dimension_numbers = #tpu.dot_dimension_numbers<[1], [0], [0], [1], [0, 0, 1, 1], [], []>} : vector<2x128xbf16>, vector<128x10xbf16>, vector<2x10xf32> -> vector<2x10xf32>
      %c0_17 = arith.constant 0 : index
      %c0_18 = arith.constant 0 : index
      %21 = vector.load %arg5[%c0_17, %c0_18] : memref<1x10xf32, #tpu.memory_space<vmem>>, vector<1x10xf32>
      %22 = vector.broadcast %21 : vector<1x10xf32> to vector<2x10xf32>
      %23 = arith.addf %20, %22 : vector<2x10xf32>
      %c0_19 = arith.constant 0 : index
      %c0_20 = arith.constant 0 : index
      %24 = vector.load %arg6[%c0_19, %c0_20] : memref<2x10xf32, #tpu.memory_space<vmem>>, vector<2x10xf32>
      tpu.vector_store %arg6[%c0_19, %c0_20], %23 {strides = array<i32>} : memref<2x10xf32, #tpu.memory_space<vmem>>, vector<2x10xf32>,
    } else {
    }
    return
  }
  func.func @transform_0(%arg0: i32) -> (i32, i32) {
    %c0_i32 = arith.constant 0 : i32
    %c0_i32_0 = arith.constant 0 : i32
    return %c0_i32, %arg0 : i32, i32
  }
  func.func @transform_1(%arg0: i32) -> (i32, i32) {
    %c0_i32 = arith.constant 0 : i32
    %c0_i32_0 = arith.constant 0 : i32
    return %arg0, %c0_i32 : i32, i32
  }
  func.func @transform_2(%arg0: i32) -> (i32, i32) {
    %c0_i32 = arith.constant 0 : i32
    %c0_i32_0 = arith.constant 0 : i32
    %c0_i32_1 = arith.constant 0 : i32
    return %c0_i32, %c0_i32_0 : i32, i32
  }
  func.func @transform_3(%arg0: i32) -> (i32, i32) {
    %c0_i32 = arith.constant 0 : i32
    %c0_i32_0 = arith.constant 0 : i32
    %c0_i32_1 = arith.constant 0 : i32
    return %c0_i32, %c0_i32_0 : i32, i32
  }
  func.func @transform_4(%arg0: i32) -> (i32, i32) {
    %c0_i32 = arith.constant 0 : i32
    %c0_i32_0 = arith.constant 0 : i32
    %c0_i32_1 = arith.constant 0 : i32
    return %c0_i32, %c0_i32_0 : i32, i32
  }
  func.func @transform_5(%arg0: i32) -> (i32, i32) {
    %c0_i32 = arith.constant 0 : i32
    %c0_i32_0 = arith.constant 0 : i32
    %c0_i32_1 = arith.constant 0 : i32
    return %c0_i32, %c0_i32_0 : i32, i32
  }
}

</mosaic_0001>

<bundles_post_ra>
// kernel: net_forward.3
= control target key start
LH: loop header
LB: loop body
LE: loop exit
PB: predicated region body
PF: predicated region fallthrough
CT: control target
= control target key end

     0   :  { %8 = vsyncpa [#allocation3], 0  ;;  %s1910_s0 = inlined_call_operand.vmem [shape: bf16[2,676,16], index: 0, kind: input, shape index: {}]   ;;  %s1911_s1 = inlined_call_operand.hbm [shape: bf16[16,32], index: 1, kind: input, shape index: {}]   ;;  %s1912_s2 = inlined_call_operand.hbm [shape: f32[1,32], index: 2, kind: input, shape index: {}]   ;;  %s1913_s3 = inlined_call_operand.vmem [shape: f32[2,676,32], index: 3, kind: output, shape index: {}]  }
   0x1   :  { %9 = vsyncpa [#allocation5], 0  ;;  %s1524_s12 = smov 0  }
   0x2 LB: > { %s125_s15 = sshll.u32 %s1911_s1, 4  ;;  %s1116_s16 = sadd.s32 4294967295, %s1498_s12   ;;  %s1498_s12 = sphi %s1524_s12, %s15_s12   ;;  %s126_s15 = int_to_ptr.hbm [resolvable:$true] %s125_s15 }
   0x3   : > { %p1118_p0 = scmp.ge.s32.totalorder %s1498_s12, 1  ;;  %p114_p1 = scmp.lt.s32.totalorder %s1498_s12, 3 }
   0x4   : > { %p1407_p2 = scmp.eq.s32.totalorder %s1116_s16, 0  ;;  %s1500_s18 = smov [#allocation2]  }
   0x5   : > { %p1535_p3 = pnand %p1118_p0, %p114_p1  ;;  %s127_s19 = sshll.u32 %s1500_s18, 4  ;;  %s128_s19 = int_to_ptr.vmem [resolvable:$true] %s127_s19 }
   0x6   : > { %s140_s22 = sshll.u32 %s1912_s2, 4  ;;  %s1501_s23 = smov [#allocation4]   ;;  %s141_s22 = int_to_ptr.hbm [resolvable:$true] %s140_s22 }
   0x7   : > { %p1400_p4 = pneg %p1535_p3  ;;  %s142_s24 = sshll.u32 %s1501_s23, 4  ;;  %s143_s24 = int_to_ptr.vmem [resolvable:$true] %s142_s24 }
   0x8   : > { %s1502_s25 = smov 64   ;;  %s1503_s26 = smov 4  }
   0x9   : > { %p1401_p5 = pnand %p1407_p2, %p1400_p4  ;;  %163 = sbr.rel (%p1535_p3) target bundleno = 330 (0x14a), region = 32 }
   0xb   : > { %1403 = dma.hbm_to_vmem [thread:$0]  (!%p1401_p5), %s126_s15, 128, %s128_s19, [#allocation3], %s1502_s25, %s1502_s25, %s1503_s26  }
   0xc   : > { %1406 = dma.hbm_to_vmem [thread:$0]  (!%p1401_p5), %s141_s22, 16, %s143_s24, [#allocation5]  }
   0xe   : > { %1489 = dma.done.wait (%p1407_p2), [#allocation3], 128  }
   0xf   : > { %1491 = vsyncadd (%p1407_p2), [#allocation3], 4294967168 }
  0x10   : > { %1493 = dma.done.wait (%p1407_p2), [#allocation5], 16  }
  0x11   : > { %1495 = vsyncadd (%p1407_p2), [#allocation5], 4294967280  ;;  %p193_p6 = scmp.lt.s32.totalorder %s1116_s16, 1  ;;  %v1386_v0 = vld [vmem:[#allocation2] sm:$0xff]  ;;  %vm514_vm0 = vcmask 130048   ;;  %vm952_vm1 = vcmask 261120  }
  0x12   : > { %651 = vmatpush.bf16.msra.mxu0 %v1386_v0  ;;  %1387 = vmatpush.bf16.msra.mxu1 %v1386_v0  ;;  %v1623_v33 = vld [vmem:[#allocation4] ss:$0 sm:$0xff]  ;;  %vm1037_vm2 = vcmask 257024  }
  0x13   : > { %s1916_s16 = smov (!%p193_p6, %s1116_s16), 1  ;;  %1388 = vmatpush.bf16.msra.mxu2 %v1386_v0  ;;  %1389 = vmatpush.bf16.msra.mxu3 %v1386_v0 }
  0x14   : > { %s1390_s27 = smul.u32 340, %s1916_s16 }
  0x15   : > { %s1391_s4 = smul.u32 680, %s1916_s16 }
  0x16   : > { %s1557_s30 = scalar_lea.vmem %s1910_s0, %s1390_s27 }
  0x17   : > { %v1344_v1 = vld [vmem:[%s1557_s30] sm:$0xff]  ;;  %v1355_v2 = vld [vmem:[%s1557_s30 + $0x58] sm:$0xff]  ;;  %v1366_v3 = vld [vmem:[%s1557_s30 + $0xb0] sm:$0xff]  ;;  %s1635_s7 = scalar_lea.vmem %s1913_s3, %s1391_s4 }
  0x18   : > { %v1377_v4 = vld [vmem:[%s1557_s30 + $0x108] sm:$0xff]  ;;  %1299 = vmatmul.msk.bf16.vlgmr.msra.gmra.mxu0 %vm514_vm0, %v1344_v1  ;;  %1310 = vmatmul.msk.bf16.vlgmr.msra.gmra.mxu1 %vm514_vm0, %v1355_v2  ;;  %v1356_v6 = vld [vmem:[%s1557_s30 + $0x60] sm:$0xff]  ;;  %v1367_v7 = vld [vmem:[%s1557_s30 + $0xb8] sm:$0xff] }
  0x19   : > { %1321 = vmatmul.msk.bf16.vlgmr.msra.gmra.mxu2 %vm514_vm0, %v1366_v3  ;;  %1332 = vmatmul.msk.bf16.vlgmr.msra.gmra.mxu3 %vm514_vm0, %v1377_v4  ;;  %v1345_v5 = vld [vmem:[%s1557_s30 + $0x8] sm:$0xff]  ;;  %v1378_v8 = vld [vmem:[%s1557_s30 + $0x110] sm:$0xff]  ;;  %v1368_v11 = vld [vmem:[%s1557_s30 + $0xc0] sm:$0xff] }
  0x1a   : > { %v1346_v9 = vld [vmem:[%s1557_s30 + $0x10] sm:$0xff]  ;;  %v1357_v10 = vld [vmem:[%s1557_s30 + $0x68] sm:$0xff]  ;;  %v1379_v12 = vld [vmem:[%s1557_s30 + $0x118] sm:$0xff] }
  0x1b   : > { %v1347_v13 = vld [vmem:[%s1557_s30 + $0x18] sm:$0xff]  ;;  %v1358_v14 = vld [vmem:[%s1557_s30 + $0x70] sm:$0xff]  ;;  %v1369_v15 = vld [vmem:[%s1557_s30 + $0xc8] sm:$0xff] }
  0x1c   : > { %v1380_v16 = vld [vmem:[%s1557_s30 + $0x120] sm:$0xff]  ;;  %v1359_v18 = vld [vmem:[%s1557_s30 + $0x78] sm:$0xff]  ;;  %v1370_v19 = vld [vmem:[%s1557_s30 + $0xd0] sm:$0xff] }
  0x1d   : > { %v1348_v17 = vld [vmem:[%s1557_s30 + $0x20] sm:$0xff]  ;;  %v1381_v20 = vld [vmem:[%s1557_s30 + $0x128] sm:$0xff]  ;;  %v1371_v23 = vld [vmem:[%s1557_s30 + $0xd8] sm:$0xff] }
  0x1e   : > { %v1349_v21 = vld [vmem:[%s1557_s30 + $0x28] sm:$0xff]  ;;  %v1360_v22 = vld [vmem:[%s1557_s30 + $0x80] sm:$0xff]  ;;  %v1382_v24 = vld [vmem:[%s1557_s30 + $0x130] sm:$0xff] }
  0x1f   : > { %v1350_v25 = vld [vmem:[%s1557_s30 + $0x30] sm:$0xff]  ;;  %v1361_v26 = vld [vmem:[%s1557_s30 + $0x88] sm:$0xff]  ;;  %v1372_v27 = vld [vmem:[%s1557_s30 + $0xe0] sm:$0xff] }
  0x20   : > { %v1383_v28 = vld [vmem:[%s1557_s30 + $0x138] sm:$0xff]  ;;  %v1362_v30 = vld [vmem:[%s1557_s30 + $0x90] sm:$0xff]  ;;  %v1373_v31 = vld [vmem:[%s1557_s30 + $0xe8] sm:$0xff] }
  0x21   : > { %v1351_v29 = vld [vmem:[%s1557_s30 + $0x38] sm:$0xff]  ;;  %v1384_v32 = vld [vmem:[%s1557_s30 + $0x140] sm:$0xff]  ;;  %v1374_v38 = vld [vmem:[%s1557_s30 + $0xf0] sm:$0xff] }
  0x22   : > { %v1352_v34 = vld [vmem:[%s1557_s30 + $0x40] sm:$0xff]  ;;  %v1363_v35 = vld [vmem:[%s1557_s30 + $0x98] sm:$0xff]  ;;  %v1385_v39 = vld [vmem:[%s1557_s30 + $0x148] sm:$0xff] }
  0x23   : > { %v288_v52 = vld [vmem:[%s1557_s30 + $0x150] sm:$0x3]  ;;  %v1353_v59 = vld [vmem:[%s1557_s30 + $0x48] sm:$0xff]  ;;  %v1364_v60 = vld [vmem:[%s1557_s30 + $0xa0] sm:$0xff] }
  0x24   : > { %v464_v57 = vunpack.c.l.b16 %v288_v52  ;;  %v1375_v1 = vld [vmem:[%s1557_s30 + $0xf8] sm:$0xff] }
  0x26   : > { %v507_v3 = vpack.c.b16 %v464_v57, %v464_v57 }
  0x28   : > { %1300 = vmatmul.msk.bf16.gmra.mxu0 %vm514_vm0, %v1345_v5  ;;  %1311 = vmatmul.msk.bf16.gmra.mxu1 %vm514_vm0, %v1356_v6 }
  0x29   : > { %1322 = vmatmul.msk.bf16.gmra.mxu2 %vm514_vm0, %v1367_v7  ;;  %1333 = vmatmul.msk.bf16.gmra.mxu3 %vm514_vm0, %v1378_v8 }
  0x38   : > { %1301 = vmatmul.msk.bf16.gmra.mxu0 %vm514_vm0, %v1346_v9  ;;  %1312 = vmatmul.msk.bf16.gmra.mxu1 %vm514_vm0, %v1357_v10 }
  0x39   : > { %1323 = vmatmul.msk.bf16.gmra.mxu2 %vm514_vm0, %v1368_v11  ;;  %1334 = vmatmul.msk.bf16.gmra.mxu3 %vm514_vm0, %v1379_v12 }
  0x48   : > { %1302 = vmatmul.msk.bf16.gmra.mxu0 %vm514_vm0, %v1347_v13  ;;  %1313 = vmatmul.msk.bf16.gmra.mxu1 %vm514_vm0, %v1358_v14 }
  0x49   : > { %1324 = vmatmul.msk.bf16.gmra.mxu2 %vm514_vm0, %v1369_v15  ;;  %1335 = vmatmul.msk.bf16.gmra.mxu3 %vm514_vm0, %v1380_v16 }
  0x58   : > { %1303 = vmatmul.msk.bf16.gmra.mxu0 %vm514_vm0, %v1348_v17  ;;  %1314 = vmatmul.msk.bf16.gmra.mxu1 %vm514_vm0, %v1359_v18 }
  0x59   : > { %1325 = vmatmul.msk.bf16.gmra.mxu2 %vm514_vm0, %v1370_v19  ;;  %1336 = vmatmul.msk.bf16.gmra.mxu3 %vm514_vm0, %v1381_v20 }
  0x68   : > { %1304 = vmatmul.msk.bf16.gmra.mxu0 %vm514_vm0, %v1349_v21  ;;  %1315 = vmatmul.msk.bf16.gmra.mxu1 %vm514_vm0, %v1360_v22 }
  0x69   : > { %1326 = vmatmul.msk.bf16.gmra.mxu2 %vm514_vm0, %v1371_v23  ;;  %1337 = vmatmul.msk.bf16.gmra.mxu3 %vm514_vm0, %v1382_v24  ;;  %v1354_v23 = vld [vmem:[%s1557_s30 + $0x50] sm:$0xff]  ;;  %v1365_v24 = vld [vmem:[%s1557_s30 + $0xa8] sm:$0xff] }
  0x78   : > { %1305 = vmatmul.msk.bf16.gmra.mxu0 %vm514_vm0, %v1350_v25  ;;  %1316 = vmatmul.msk.bf16.gmra.mxu1 %vm514_vm0, %v1361_v26 }
  0x79   : > { %1327 = vmatmul.msk.bf16.gmra.mxu2 %vm514_vm0, %v1372_v27  ;;  %1338 = vmatmul.msk.bf16.gmra.mxu3 %vm514_vm0, %v1383_v28 }
  0x88   : > { %1306 = vmatmul.msk.bf16.gmra.mxu0 %vm514_vm0, %v1351_v29  ;;  %1317 = vmatmul.msk.bf16.gmra.mxu1 %vm514_vm0, %v1362_v30  ;;  %v1376_v29 = vld [vmem:[%s1557_s30 + $0x100] sm:$0xff] }
  0x89   : > { %1328 = vmatmul.msk.bf16.gmra.mxu2 %vm514_vm0, %v1373_v31  ;;  %1339 = vmatmul.msk.bf16.gmra.mxu3 %vm514_vm0, %v1384_v32 }
  0x95   : > { %v653_v36 = vpop.f32.mrf.mxu0  ;;  %v708_v37 = vpop.f32.mrf.mxu1 }
  0x96   : > { %v654_v40 = vadd.f32 %v1623_v33, %v653_v36  ;;  %v709_v41 = vadd.f32 %v1623_v33, %v708_v37 }
  0x98   : > { %v867_v42 = vmax.f32 %v654_v40, 0.0  ;;  %v889_v43 = vmax.f32 %v709_v41, 0.0  ;;  %1307 = vmatmul.msk.bf16.gmra.mxu0 %vm514_vm0, %v1352_v34  ;;  %1318 = vmatmul.msk.bf16.gmra.mxu1 %vm514_vm0, %v1363_v35 }
  0x99   : > { %1329 = vmatmul.msk.bf16.gmra.mxu2 %vm514_vm0, %v1374_v38  ;;  %1340 = vmatmul.msk.bf16.gmra.mxu3 %vm514_vm0, %v1385_v39 }
  0x9a   : > { %953 = vst.msk [vmem:[%s1635_s7] sm:$0xff] %vm952_vm1, %v867_v42 }
  0x9b   : > { %975 = vst.msk [vmem:[%s1635_s7 + $0xb0] sm:$0xff] %vm952_vm1, %v889_v43 }
  0x9c   : > { %v763_v44 = vpop.f32.mrf.mxu2  ;;  %v818_v45 = vpop.f32.mrf.mxu3 }
  0x9d   : > { %v764_v46 = vadd.f32 %v1623_v33, %v763_v44  ;;  %v655_v47 = vpop.f32.mrf.mxu0  ;;  %v710_v48 = vpop.f32.mrf.mxu1  ;;  %v819_v49 = vadd.f32 %v1623_v33, %v818_v45 }
  0x9e   : > { %v656_v50 = vadd.f32 %v1623_v33, %v655_v47  ;;  %v711_v51 = vadd.f32 %v1623_v33, %v710_v48 }
  0x9f   : > { %v911_v53 = vmax.f32 %v764_v46, 0.0  ;;  %v933_v56 = vmax.f32 %v819_v49, 0.0 }
  0xa0   : > { %v868_v54 = vmax.f32 %v656_v50, 0.0  ;;  %v890_v55 = vmax.f32 %v711_v51, 0.0 }
  0xa1   : > { %997 = vst.msk [vmem:[%s1635_s7 + $0x160] sm:$0xff] %vm952_vm1, %v911_v53 }
  0xa2   : > { %954 = vst.msk [vmem:[%s1635_s7 + $0x8] sm:$0xff] %vm952_vm1, %v868_v54 }
  0xa3   : > { %976 = vst.msk [vmem:[%s1635_s7 + $0xb8] sm:$0xff] %vm952_vm1, %v890_v55 }
  0xa4   : > { %v765_v58 = vpop.f32.mrf.mxu2  ;;  %1019 = vst.msk [vmem:[%s1635_s7 + $0x210] sm:$0xff] %vm952_vm1, %v933_v56  ;;  %v820_v61 = vpop.f32.mrf.mxu3 }
  0xa5   : > { %v766_v62 = vadd.f32 %v1623_v33, %v765_v58  ;;  %v658_v63 = vpop.f32.mrf.mxu0  ;;  %v713_v0 = vpop.f32.mrf.mxu1  ;;  %v821_v2 = vadd.f32 %v1623_v33, %v820_v61 }
  0xa6   : > { %v659_v4 = vadd.f32 %v1623_v33, %v658_v63  ;;  %v714_v5 = vadd.f32 %v1623_v33, %v713_v0 }
  0xa7   : > { %v912_v6 = vmax.f32 %v766_v62, 0.0  ;;  %v934_v9 = vmax.f32 %v821_v2, 0.0 }
  0xa8   : > { %v869_v7 = vmax.f32 %v659_v4, 0.0  ;;  %v891_v8 = vmax.f32 %v714_v5, 0.0  ;;  %1308 = vmatmul.msk.bf16.gmra.mxu0 %vm514_vm0, %v1353_v59  ;;  %1319 = vmatmul.msk.bf16.gmra.mxu1 %vm514_vm0, %v1364_v60 }
  0xa9   : > { %998 = vst.msk [vmem:[%s1635_s7 + $0x168] sm:$0xff] %vm952_vm1, %v912_v6  ;;  %1330 = vmatmul.msk.bf16.gmra.mxu2 %vm514_vm0, %v1375_v1  ;;  %1341 = vmatmul.msk.bf16.gmra.mxu3 %vm514_vm0, %v507_v3 }
  0xaa   : > { %955 = vst.msk [vmem:[%s1635_s7 + $0x10] sm:$0xff] %vm952_vm1, %v869_v7 }
  0xab   : > { %977 = vst.msk [vmem:[%s1635_s7 + $0xc0] sm:$0xff] %vm952_vm1, %v891_v8 }
  0xac   : > { %v768_v10 = vpop.f32.mrf.mxu2  ;;  %1020 = vst.msk [vmem:[%s1635_s7 + $0x218] sm:$0xff] %vm952_vm1, %v934_v9  ;;  %v823_v11 = vpop.f32.mrf.mxu3 }
  0xad   : > { %v769_v12 = vadd.f32 %v1623_v33, %v768_v10  ;;  %v660_v13 = vpop.f32.mrf.mxu0  ;;  %v715_v14 = vpop.f32.mrf.mxu1  ;;  %v824_v15 = vadd.f32 %v1623_v33, %v823_v11 }
  0xae   : > { %v661_v16 = vadd.f32 %v1623_v33, %v660_v13  ;;  %v716_v17 = vadd.f32 %v1623_v33, %v715_v14 }
  0xaf   : > { %v913_v18 = vmax.f32 %v769_v12, 0.0  ;;  %v935_v21 = vmax.f32 %v824_v15, 0.0 }
  0xb0   : > { %v870_v19 = vmax.f32 %v661_v16, 0.0  ;;  %v892_v20 = vmax.f32 %v716_v17, 0.0 }
  0xb1   : > { %999 = vst.msk [vmem:[%s1635_s7 + $0x170] sm:$0xff] %vm952_vm1, %v913_v18 }
  0xb2   : > { %956 = vst.msk [vmem:[%s1635_s7 + $0x18] sm:$0xff] %vm952_vm1, %v870_v19 }
  0xb3   : > { %978 = vst.msk [vmem:[%s1635_s7 + $0xc8] sm:$0xff] %vm952_vm1, %v892_v20 }
  0xb4   : > { %v770_v22 = vpop.f32.mrf.mxu2  ;;  %1021 = vst.msk [vmem:[%s1635_s7 + $0x220] sm:$0xff] %vm952_vm1, %v935_v21  ;;  %v825_v25 = vpop.f32.mrf.mxu3 }
  0xb5   : > { %v771_v26 = vadd.f32 %v1623_v33, %v770_v22  ;;  %v663_v27 = vpop.f32.mrf.mxu0  ;;  %v718_v28 = vpop.f32.mrf.mxu1  ;;  %v826_v30 = vadd.f32 %v1623_v33, %v825_v25 }
  0xb6   : > { %v664_v31 = vadd.f32 %v1623_v33, %v663_v27  ;;  %v719_v32 = vadd.f32 %v1623_v33, %v718_v28 }
  0xb7   : > { %v914_v34 = vmax.f32 %v771_v26, 0.0  ;;  %v936_v37 = vmax.f32 %v826_v30, 0.0 }
  0xb8   : > { %v871_v35 = vmax.f32 %v664_v31, 0.0  ;;  %v893_v36 = vmax.f32 %v719_v32, 0.0  ;;  %1309 = vmatmul.msk.bf16.gmra.mxu0 %vm514_vm0, %v1354_v23  ;;  %1320 = vmatmul.msk.bf16.gmra.mxu1 %vm514_vm0, %v1365_v24 }
  0xb9   : > { %1000 = vst.msk [vmem:[%s1635_s7 + $0x178] sm:$0xff] %vm952_vm1, %v914_v34  ;;  %1331 = vmatmul.msk.bf16.gmra.mxu2 %vm514_vm0, %v1376_v29 }
  0xba   : > { %957 = vst.msk [vmem:[%s1635_s7 + $0x20] sm:$0xff] %vm952_vm1, %v871_v35 }
  0xbb   : > { %979 = vst.msk [vmem:[%s1635_s7 + $0xd0] sm:$0xff] %vm952_vm1, %v893_v36 }
  0xbc   : > { %v773_v38 = vpop.f32.mrf.mxu2  ;;  %1022 = vst.msk [vmem:[%s1635_s7 + $0x228] sm:$0xff] %vm952_vm1, %v936_v37  ;;  %v828_v39 = vpop.f32.mrf.mxu3 }
  0xbd   : > { %v774_v40 = vadd.f32 %v1623_v33, %v773_v38  ;;  %v665_v41 = vpop.f32.mrf.mxu0  ;;  %v720_v42 = vpop.f32.mrf.mxu1  ;;  %v829_v43 = vadd.f32 %v1623_v33, %v828_v39 }
  0xbe   : > { %v666_v44 = vadd.f32 %v1623_v33, %v665_v41  ;;  %v721_v45 = vadd.f32 %v1623_v33, %v720_v42 }
  0xbf   : > { %v915_v46 = vmax.f32 %v774_v40, 0.0  ;;  %v937_v49 = vmax.f32 %v829_v43, 0.0 }
  0xc0   : > { %v872_v47 = vmax.f32 %v666_v44, 0.0  ;;  %v894_v48 = vmax.f32 %v721_v45, 0.0 }
  0xc1   : > { %1001 = vst.msk [vmem:[%s1635_s7 + $0x180] sm:$0xff] %vm952_vm1, %v915_v46 }
  0xc2   : > { %958 = vst.msk [vmem:[%s1635_s7 + $0x28] sm:$0xff] %vm952_vm1, %v872_v47 }
  0xc3   : > { %980 = vst.msk [vmem:[%s1635_s7 + $0xd8] sm:$0xff] %vm952_vm1, %v894_v48 }
  0xc4   : > { %v775_v50 = vpop.f32.mrf.mxu2  ;;  %1023 = vst.msk [vmem:[%s1635_s7 + $0x230] sm:$0xff] %vm952_vm1, %v937_v49  ;;  %v830_v51 = vpop.f32.mrf.mxu3 }
  0xc5   : > { %v776_v52 = vadd.f32 %v1623_v33, %v775_v50  ;;  %v668_v53 = vpop.f32.mrf.mxu0  ;;  %v723_v54 = vpop.f32.mrf.mxu1  ;;  %v831_v55 = vadd.f32 %v1623_v33, %v830_v51 }
  0xc6   : > { %v669_v56 = vadd.f32 %v1623_v33, %v668_v53  ;;  %v724_v57 = vadd.f32 %v1623_v33, %v723_v54 }
  0xc7   : > { %v916_v58 = vmax.f32 %v776_v52, 0.0  ;;  %v938_v61 = vmax.f32 %v831_v55, 0.0 }
  0xc8   : > { %v873_v59 = vmax.f32 %v669_v56, 0.0  ;;  %v895_v60 = vmax.f32 %v724_v57, 0.0 }
  0xc9   : > { %1002 = vst.msk [vmem:[%s1635_s7 + $0x188] sm:$0xff] %vm952_vm1, %v916_v58 }
  0xca   : > { %959 = vst.msk [vmem:[%s1635_s7 + $0x30] sm:$0xff] %vm952_vm1, %v873_v59 }
  0xcb   : > { %981 = vst.msk [vmem:[%s1635_s7 + $0xe0] sm:$0xff] %vm952_vm1, %v895_v60 }
  0xcc   : > { %v778_v62 = vpop.f32.mrf.mxu2  ;;  %1024 = vst.msk [vmem:[%s1635_s7 + $0x238] sm:$0xff] %vm952_vm1, %v938_v61  ;;  %v833_v63 = vpop.f32.mrf.mxu3 }
  0xcd   : > { %v779_v0 = vadd.f32 %v1623_v33, %v778_v62  ;;  %v670_v1 = vpop.f32.mrf.mxu0  ;;  %v725_v2 = vpop.f32.mrf.mxu1  ;;  %v834_v3 = vadd.f32 %v1623_v33, %v833_v63 }
  0xce   : > { %v671_v4 = vadd.f32 %v1623_v33, %v670_v1  ;;  %v726_v5 = vadd.f32 %v1623_v33, %v725_v2 }
  0xcf   : > { %v917_v6 = vmax.f32 %v779_v0, 0.0  ;;  %v939_v9 = vmax.f32 %v834_v3, 0.0 }
  0xd0   : > { %v874_v7 = vmax.f32 %v671_v4, 0.0  ;;  %v896_v8 = vmax.f32 %v726_v5, 0.0 }
  0xd1   : > { %1003 = vst.msk [vmem:[%s1635_s7 + $0x190] sm:$0xff] %vm952_vm1, %v917_v6 }
  0xd2   : > { %960 = vst.msk [vmem:[%s1635_s7 + $0x38] sm:$0xff] %vm952_vm1, %v874_v7 }
  0xd3   : > { %982 = vst.msk [vmem:[%s1635_s7 + $0xe8] sm:$0xff] %vm952_vm1, %v896_v8 }
  0xd4   : > { %v780_v10 = vpop.f32.mrf.mxu2  ;;  %1025 = vst.msk [vmem:[%s1635_s7 + $0x240] sm:$0xff] %vm952_vm1, %v939_v9  ;;  %v835_v11 = vpop.f32.mrf.mxu3 }
  0xd5   : > { %v781_v12 = vadd.f32 %v1623_v33, %v780_v10  ;;  %v673_v13 = vpop.f32.mrf.mxu0  ;;  %v728_v14 = vpop.f32.mrf.mxu1  ;;  %v836_v15 = vadd.f32 %v1623_v33, %v835_v11 }
  0xd6   : > { %v674_v16 = vadd.f32 %v1623_v33, %v673_v13  ;;  %v729_v17 = vadd.f32 %v1623_v33, %v728_v14 }
  0xd7   : > { %v918_v18 = vmax.f32 %v781_v12, 0.0  ;;  %v940_v21 = vmax.f32 %v836_v15, 0.0 }
  0xd8   : > { %v875_v19 = vmax.f32 %v674_v16, 0.0  ;;  %v897_v20 = vmax.f32 %v729_v17, 0.0 }
  0xd9   : > { %1004 = vst.msk [vmem:[%s1635_s7 + $0x198] sm:$0xff] %vm952_vm1, %v918_v18 }
  0xda   : > { %961 = vst.msk [vmem:[%s1635_s7 + $0x40] sm:$0xff] %vm952_vm1, %v875_v19 }
  0xdb   : > { %983 = vst.msk [vmem:[%s1635_s7 + $0xf0] sm:$0xff] %vm952_vm1, %v897_v20 }
  0xdc   : > { %v783_v22 = vpop.f32.mrf.mxu2  ;;  %1026 = vst.msk [vmem:[%s1635_s7 + $0x248] sm:$0xff] %vm952_vm1, %v940_v21  ;;  %v838_v23 = vpop.f32.mrf.mxu3 }
  0xdd   : > { %v784_v24 = vadd.f32 %v1623_v33, %v783_v22  ;;  %v675_v25 = vpop.f32.mrf.mxu0  ;;  %v730_v26 = vpop.f32.mrf.mxu1  ;;  %v839_v27 = vadd.f32 %v1623_v33, %v838_v23 }
  0xde   : > { %v676_v28 = vadd.f32 %v1623_v33, %v675_v25  ;;  %v731_v29 = vadd.f32 %v1623_v33, %v730_v26 }
  0xdf   : > { %v919_v30 = vmax.f32 %v784_v24, 0.0  ;;  %v941_v34 = vmax.f32 %v839_v27, 0.0 }
  0xe0   : > { %v876_v31 = vmax.f32 %v676_v28, 0.0  ;;  %v898_v32 = vmax.f32 %v731_v29, 0.0 }
  0xe1   : > { %1005 = vst.msk [vmem:[%s1635_s7 + $0x1a0] sm:$0xff] %vm952_vm1, %v919_v30 }
  0xe2   : > { %962 = vst.msk [vmem:[%s1635_s7 + $0x48] sm:$0xff] %vm952_vm1, %v876_v31 }
  0xe3   : > { %984 = vst.msk [vmem:[%s1635_s7 + $0xf8] sm:$0xff] %vm952_vm1, %v898_v32 }
  0xe4   : > { %v785_v35 = vpop.f32.mrf.mxu2  ;;  %1027 = vst.msk [vmem:[%s1635_s7 + $0x250] sm:$0xff] %vm952_vm1, %v941_v34  ;;  %v840_v36 = vpop.f32.mrf.mxu3 }
  0xe5   : > { %v786_v37 = vadd.f32 %v1623_v33, %v785_v35  ;;  %v678_v38 = vpop.f32.mrf.mxu0  ;;  %v733_v39 = vpop.f32.mrf.mxu1  ;;  %v841_v40 = vadd.f32 %v1623_v33, %v840_v36 }
  0xe6   : > { %v679_v41 = vadd.f32 %v1623_v33, %v678_v38  ;;  %v734_v42 = vadd.f32 %v1623_v33, %v733_v39 }
  0xe7   : > { %v920_v43 = vmax.f32 %v786_v37, 0.0  ;;  %v942_v46 = vmax.f32 %v841_v40, 0.0 }
  0xe8   : > { %v877_v44 = vmax.f32 %v679_v41, 0.0  ;;  %v899_v45 = vmax.f32 %v734_v42, 0.0 }
  0xe9   : > { %1006 = vst.msk [vmem:[%s1635_s7 + $0x1a8] sm:$0xff] %vm952_vm1, %v920_v43 }
  0xea   : > { %963 = vst.msk [vmem:[%s1635_s7 + $0x50] sm:$0xff] %vm952_vm1, %v877_v44 }
  0xeb   : > { %985 = vst.msk [vmem:[%s1635_s7 + $0x100] sm:$0xff] %vm952_vm1, %v899_v45 }
  0xec   : > { %v788_v47 = vpop.f32.mrf.mxu2  ;;  %1028 = vst.msk [vmem:[%s1635_s7 + $0x258] sm:$0xff] %vm952_vm1, %v942_v46  ;;  %v843_v48 = vpop.f32.mrf.mxu3 }
  0xed   : > { %v789_v49 = vadd.f32 %v1623_v33, %v788_v47  ;;  %v680_v50 = vpop.f32.mrf.mxu0  ;;  %v735_v51 = vpop.f32.mrf.mxu1  ;;  %v844_v52 = vadd.f32 %v1623_v33, %v843_v48 }
  0xee   : > { %v681_v53 = vadd.f32 %v1623_v33, %v680_v50  ;;  %v736_v54 = vadd.f32 %v1623_v33, %v735_v51 }
  0xef   : > { %v921_v55 = vmax.f32 %v789_v49, 0.0  ;;  %v943_v58 = vmax.f32 %v844_v52, 0.0 }
  0xf0   : > { %v878_v56 = vmax.f32 %v681_v53, 0.0  ;;  %v900_v57 = vmax.f32 %v736_v54, 0.0 }
  0xf1   : > { %1007 = vst.msk [vmem:[%s1635_s7 + $0x1b0] sm:$0xff] %vm952_vm1, %v921_v55 }
  0xf2   : > { %964 = vst.msk [vmem:[%s1635_s7 + $0x58] sm:$0xff] %vm952_vm1, %v878_v56 }
  0xf3   : > { %986 = vst.msk [vmem:[%s1635_s7 + $0x108] sm:$0xff] %vm952_vm1, %v900_v57 }
  0xf4   : > { %v790_v59 = vpop.f32.mrf.mxu2  ;;  %1029 = vst.msk [vmem:[%s1635_s7 + $0x260] sm:$0xff] %vm952_vm1, %v943_v58  ;;  %v845_v60 = vpop.f32.mrf.mxu3 }
  0xf5   : > { %v791_v61 = vadd.f32 %v1623_v33, %v790_v59  ;;  %v683_v62 = vpop.f32.mrf.mxu0  ;;  %v738_v63 = vpop.f32.mrf.mxu1  ;;  %v846_v0 = vadd.f32 %v1623_v33, %v845_v60 }
  0xf6   : > { %v684_v1 = vadd.f32 %v1623_v33, %v683_v62  ;;  %v739_v2 = vadd.f32 %v1623_v33, %v738_v63 }
  0xf7   : > { %v922_v3 = vmax.f32 %v791_v61, 0.0  ;;  %v944_v6 = vmax.f32 %v846_v0, 0.0 }
  0xf8   : > { %v879_v4 = vmax.f32 %v684_v1, 0.0  ;;  %v901_v5 = vmax.f32 %v739_v2, 0.0 }
  0xf9   : > { %1008 = vst.msk [vmem:[%s1635_s7 + $0x1b8] sm:$0xff] %vm952_vm1, %v922_v3 }
  0xfa   : > { %965 = vst.msk [vmem:[%s1635_s7 + $0x60] sm:$0xff] %vm952_vm1, %v879_v4 }
  0xfb   : > { %987 = vst.msk [vmem:[%s1635_s7 + $0x110] sm:$0xff] %vm952_vm1, %v901_v5 }
  0xfc   : > { %v793_v7 = vpop.f32.mrf.mxu2  ;;  %1030 = vst.msk [vmem:[%s1635_s7 + $0x268] sm:$0xff] %vm952_vm1, %v944_v6  ;;  %v848_v8 = vpop.f32.mrf.mxu3 }
  0xfd   : > { %v794_v9 = vadd.f32 %v1623_v33, %v793_v7  ;;  %v685_v10 = vpop.f32.mrf.mxu0  ;;  %v740_v11 = vpop.f32.mrf.mxu1  ;;  %v849_v12 = vadd.f32 %v1623_v33, %v848_v8 }
  0xfe   : > { %v686_v13 = vadd.f32 %v1623_v33, %v685_v10  ;;  %v741_v14 = vadd.f32 %v1623_v33, %v740_v11 }
  0xff   : > { %v923_v15 = vmax.f32 %v794_v9, 0.0  ;;  %v945_v18 = vmax.f32 %v849_v12, 0.0 }
 0x100   : > { %v880_v16 = vmax.f32 %v686_v13, 0.0  ;;  %v902_v17 = vmax.f32 %v741_v14, 0.0 }
 0x101   : > { %1009 = vst.msk [vmem:[%s1635_s7 + $0x1c0] sm:$0xff] %vm952_vm1, %v923_v15 }
 0x102   : > { %966 = vst.msk [vmem:[%s1635_s7 + $0x68] sm:$0xff] %vm952_vm1, %v880_v16 }
 0x103   : > { %988 = vst.msk [vmem:[%s1635_s7 + $0x118] sm:$0xff] %vm952_vm1, %v902_v17 }
 0x104   : > { %v795_v19 = vpop.f32.mrf.mxu2  ;;  %1031 = vst.msk [vmem:[%s1635_s7 + $0x270] sm:$0xff] %vm952_vm1, %v945_v18  ;;  %v850_v20 = vpop.f32.mrf.mxu3 }
 0x105   : > { %v796_v21 = vadd.f32 %v1623_v33, %v795_v19  ;;  %v688_v22 = vpop.f32.mrf.mxu0  ;;  %v743_v23 = vpop.f32.mrf.mxu1  ;;  %v851_v24 = vadd.f32 %v1623_v33, %v850_v20 }
 0x106   : > { %v689_v25 = vadd.f32 %v1623_v33, %v688_v22  ;;  %v744_v26 = vadd.f32 %v1623_v33, %v743_v23 }
 0x107   : > { %v924_v27 = vmax.f32 %v796_v21, 0.0  ;;  %v946_v30 = vmax.f32 %v851_v24, 0.0 }
 0x108   : > { %v881_v28 = vmax.f32 %v689_v25, 0.0  ;;  %v903_v29 = vmax.f32 %v744_v26, 0.0 }
 0x109   : > { %1010 = vst.msk [vmem:[%s1635_s7 + $0x1c8] sm:$0xff] %vm952_vm1, %v924_v27 }
 0x10a   : > { %967 = vst.msk [vmem:[%s1635_s7 + $0x70] sm:$0xff] %vm952_vm1, %v881_v28 }
 0x10b   : > { %989 = vst.msk [vmem:[%s1635_s7 + $0x120] sm:$0xff] %vm952_vm1, %v903_v29 }
 0x10c   : > { %v798_v31 = vpop.f32.mrf.mxu2  ;;  %1032 = vst.msk [vmem:[%s1635_s7 + $0x278] sm:$0xff] %vm952_vm1, %v946_v30  ;;  %v853_v32 = vpop.f32.mrf.mxu3 }
 0x10d   : > { %v799_v34 = vadd.f32 %v1623_v33, %v798_v31  ;;  %v690_v35 = vpop.f32.mrf.mxu0  ;;  %v745_v36 = vpop.f32.mrf.mxu1  ;;  %v854_v37 = vadd.f32 %v1623_v33, %v853_v32 }
 0x10e   : > { %v691_v38 = vadd.f32 %v1623_v33, %v690_v35  ;;  %v746_v39 = vadd.f32 %v1623_v33, %v745_v36 }
 0x10f   : > { %v925_v40 = vmax.f32 %v799_v34, 0.0  ;;  %v947_v43 = vmax.f32 %v854_v37, 0.0 }
 0x110   : > { %v882_v41 = vmax.f32 %v691_v38, 0.0  ;;  %v904_v42 = vmax.f32 %v746_v39, 0.0 }
 0x111   : > { %1011 = vst.msk [vmem:[%s1635_s7 + $0x1d0] sm:$0xff] %vm952_vm1, %v925_v40 }
 0x112   : > { %968 = vst.msk [vmem:[%s1635_s7 + $0x78] sm:$0xff] %vm952_vm1, %v882_v41 }
 0x113   : > { %990 = vst.msk [vmem:[%s1635_s7 + $0x128] sm:$0xff] %vm952_vm1, %v904_v42 }
 0x114   : > { %v800_v44 = vpop.f32.mrf.mxu2  ;;  %1033 = vst.msk [vmem:[%s1635_s7 + $0x280] sm:$0xff] %vm952_vm1, %v947_v43  ;;  %v855_v45 = vpop.f32.mrf.mxu3 }
 0x115   : > { %v801_v46 = vadd.f32 %v1623_v33, %v800_v44  ;;  %v693_v47 = vpop.f32.mrf.mxu0  ;;  %v748_v48 = vpop.f32.mrf.mxu1  ;;  %v856_v49 = vadd.f32 %v1623_v33, %v855_v45 }
 0x116   : > { %v694_v50 = vadd.f32 %v1623_v33, %v693_v47  ;;  %v749_v51 = vadd.f32 %v1623_v33, %v748_v48 }
 0x117   : > { %v926_v52 = vmax.f32 %v801_v46, 0.0  ;;  %v948_v55 = vmax.f32 %v856_v49, 0.0 }
 0x118   : > { %v883_v53 = vmax.f32 %v694_v50, 0.0  ;;  %v905_v54 = vmax.f32 %v749_v51, 0.0 }
 0x119   : > { %1012 = vst.msk [vmem:[%s1635_s7 + $0x1d8] sm:$0xff] %vm952_vm1, %v926_v52 }
 0x11a   : > { %969 = vst.msk [vmem:[%s1635_s7 + $0x80] sm:$0xff] %vm952_vm1, %v883_v53 }
 0x11b   : > { %991 = vst.msk [vmem:[%s1635_s7 + $0x130] sm:$0xff] %vm952_vm1, %v905_v54 }
 0x11c   : > { %v803_v56 = vpop.f32.mrf.mxu2  ;;  %1034 = vst.msk [vmem:[%s1635_s7 + $0x288] sm:$0xff] %vm952_vm1, %v948_v55  ;;  %v858_v57 = vpop.f32.mrf.mxu3 }
 0x11d   : > { %v804_v58 = vadd.f32 %v1623_v33, %v803_v56  ;;  %v695_v59 = vpop.f32.mrf.mxu0  ;;  %v750_v60 = vpop.f32.mrf.mxu1  ;;  %v859_v61 = vadd.f32 %v1623_v33, %v858_v57 }
 0x11e   : > { %v696_v62 = vadd.f32 %v1623_v33, %v695_v59  ;;  %v751_v63 = vadd.f32 %v1623_v33, %v750_v60 }
 0x11f   : > { %v927_v0 = vmax.f32 %v804_v58, 0.0  ;;  %v949_v3 = vmax.f32 %v859_v61, 0.0 }
 0x120   : > { %v884_v1 = vmax.f32 %v696_v62, 0.0  ;;  %v906_v2 = vmax.f32 %v751_v63, 0.0 }
 0x121   : > { %1013 = vst.msk [vmem:[%s1635_s7 + $0x1e0] sm:$0xff] %vm952_vm1, %v927_v0 }
 0x122   : > { %970 = vst.msk [vmem:[%s1635_s7 + $0x88] sm:$0xff] %vm952_vm1, %v884_v1 }
 0x123   : > { %992 = vst.msk [vmem:[%s1635_s7 + $0x138] sm:$0xff] %vm952_vm1, %v906_v2 }
 0x124   : > { %v805_v4 = vpop.f32.mrf.mxu2  ;;  %1035 = vst.msk [vmem:[%s1635_s7 + $0x290] sm:$0xff] %vm952_vm1, %v949_v3  ;;  %v860_v5 = vpop.f32.mrf.mxu3 }
 0x125   : > { %v806_v6 = vadd.f32 %v1623_v33, %v805_v4  ;;  %v698_v7 = vpop.f32.mrf.mxu0  ;;  %v753_v8 = vpop.f32.mrf.mxu1  ;;  %v861_v9 = vadd.f32 %v1623_v33, %v860_v5 }
 0x126   : > { %v699_v10 = vadd.f32 %v1623_v33, %v698_v7  ;;  %v754_v11 = vadd.f32 %v1623_v33, %v753_v8 }
 0x127   : > { %v928_v12 = vmax.f32 %v806_v6, 0.0  ;;  %v950_v15 = vmax.f32 %v861_v9, 0.0 }
 0x128   : > { %v885_v13 = vmax.f32 %v699_v10, 0.0  ;;  %v907_v14 = vmax.f32 %v754_v11, 0.0 }
 0x129   : > { %1014 = vst.msk [vmem:[%s1635_s7 + $0x1e8] sm:$0xff] %vm952_vm1, %v928_v12 }
 0x12a   : > { %971 = vst.msk [vmem:[%s1635_s7 + $0x90] sm:$0xff] %vm952_vm1, %v885_v13 }
 0x12b   : > { %993 = vst.msk [vmem:[%s1635_s7 + $0x140] sm:$0xff] %vm952_vm1, %v907_v14 }
 0x12c   : > { %v808_v16 = vpop.f32.mrf.mxu2  ;;  %1036 = vst.msk [vmem:[%s1635_s7 + $0x298] sm:$0xff] %vm952_vm1, %v950_v15  ;;  %v863_v17 = vpop.f32.mrf.mxu3 }
 0x12d   : > { %v809_v18 = vadd.f32 %v1623_v33, %v808_v16  ;;  %v700_v19 = vpop.f32.mrf.mxu0  ;;  %v755_v20 = vpop.f32.mrf.mxu1  ;;  %v864_v21 = vadd.f32 %v1623_v33, %v863_v17 }
 0x12e   : > { %v701_v22 = vadd.f32 %v1623_v33, %v700_v19  ;;  %v756_v23 = vadd.f32 %v1623_v33, %v755_v20 }
 0x12f   : > { %v929_v24 = vmax.f32 %v809_v18, 0.0  ;;  %v951_v27 = vmax.f32 %v864_v21, 0.0 }
 0x130   : > { %v886_v25 = vmax.f32 %v701_v22, 0.0  ;;  %v908_v26 = vmax.f32 %v756_v23, 0.0 }
 0x131   : > { %1015 = vst.msk [vmem:[%s1635_s7 + $0x1f0] sm:$0xff] %vm952_vm1, %v929_v24 }
 0x132   : > { %972 = vst.msk [vmem:[%s1635_s7 + $0x98] sm:$0xff] %vm952_vm1, %v886_v25 }
 0x133   : > { %994 = vst.msk [vmem:[%s1635_s7 + $0x148] sm:$0xff] %vm952_vm1, %v908_v26 }
 0x134   : > { %v810_v28 = vpop.f32.mrf.mxu2  ;;  %1038 = vst.msk [vmem:[%s1635_s7 + $0x2a0] sm:$0xf] %vm1037_vm2, %v951_v27  ;;  %v865_v29 = vpop.f32.mrf.mxu3 }
 0x135   : > { %v811_v30 = vadd.f32 %v1623_v33, %v810_v28  ;;  %v703_v31 = vpop.f32.mrf.mxu0  ;;  %v758_v32 = vpop.f32.mrf.mxu1 }
 0x136   : > { %v704_v34 = vadd.f32 %v1623_v33, %v703_v31  ;;  %v759_v35 = vadd.f32 %v1623_v33, %v758_v32 }
 0x137   : > { %v930_v36 = vmax.f32 %v811_v30, 0.0 }
 0x138   : > { %v887_v37 = vmax.f32 %v704_v34, 0.0  ;;  %v909_v38 = vmax.f32 %v759_v35, 0.0 }
 0x139   : > { %1016 = vst.msk [vmem:[%s1635_s7 + $0x1f8] sm:$0xff] %vm952_vm1, %v930_v36 }
 0x13a   : > { %973 = vst.msk [vmem:[%s1635_s7 + $0xa0] sm:$0xff] %vm952_vm1, %v887_v37 }
 0x13b   : > { %995 = vst.msk [vmem:[%s1635_s7 + $0x150] sm:$0xff] %vm952_vm1, %v909_v38 }
 0x13c   : > { %v813_v39 = vpop.f32.mrf.mxu2 }
 0x13d   : > { %v814_v40 = vadd.f32 %v1623_v33, %v813_v39  ;;  %v705_v41 = vpop.f32.mrf.mxu0  ;;  %v760_v42 = vpop.f32.mrf.mxu1 }
 0x13e   : > { %v706_v43 = vadd.f32 %v1623_v33, %v705_v41  ;;  %v761_v44 = vadd.f32 %v1623_v33, %v760_v42 }
 0x13f   : > { %v931_v45 = vmax.f32 %v814_v40, 0.0 }
 0x140   : > { %v888_v46 = vmax.f32 %v706_v43, 0.0  ;;  %v910_v47 = vmax.f32 %v761_v44, 0.0 }
 0x141   : > { %1017 = vst.msk [vmem:[%s1635_s7 + $0x200] sm:$0xff] %vm952_vm1, %v931_v45 }
 0x142   : > { %974 = vst.msk [vmem:[%s1635_s7 + $0xa8] sm:$0xff] %vm952_vm1, %v888_v46 }
 0x143   : > { %996 = vst.msk [vmem:[%s1635_s7 + $0x158] sm:$0xff] %vm952_vm1, %v910_v47 }
 0x144   : > { %v815_v48 = vpop.f32.mrf.mxu2 }
 0x145   : > { %v816_v49 = vadd.f32 %v1623_v33, %v815_v48 }
 0x147   : > { %v932_v50 = vmax.f32 %v816_v49, 0.0 }
 0x149   : > { %1018 = vst.msk [vmem:[%s1635_s7 + $0x208] sm:$0xff] %vm952_vm1, %v932_v50 }
 0x14a PF: > { %s15_s12 = sadd.s32 1, %s1498_s12  }
 0x14b   : > { %p12_p7 = scmp.ge.s32.totalorder %s15_s12, 4  }
 0x14d   :  { %14 = sbr.rel (!%p12_p7) target bundleno = 2 (0x2), region = 71 }
 0x152   :  { %1060 = vsyncpa [#allocation3], 1 }
 0x153   :  { %1062 = vsyncpa [#allocation3 + $0x1], 1 }
 0x154   :  { %1063 = vsyncpa [#allocation5], 1 }

// kernel: net_forward.5
= control target key start
LH: loop header
LB: loop body
LE: loop exit
PB: predicated region body
PF: predicated region fallthrough
CT: control target
= control target key end

     0   :  { %10 = vsyncpa [#allocation4], 0  ;;  %s2684_s18 = smov 0   ;;  %s2904_s0 = inlined_call_operand.vmem [shape: bf16[2,9216], index: 0, kind: input, shape index: {}]   ;;  %s2905_s1 = inlined_call_operand.vmem [shape: bf16[9216,128], index: 1, kind: input, shape index: {}]   ;;  %s2906_s2 = inlined_call_operand.vmem [shape: f32[1,128], index: 2, kind: input, shape index: {}]   ;;  %s2907_s3 = inlined_call_operand.vmem [shape: bf16[128,10], index: 3, kind: input, shape index: {}]   ;;  %s2908_s4 = inlined_call_operand.vmem [shape: f32[1,10], index: 4, kind: input, shape index: {}]   ;;  %s2909_s5 = inlined_call_operand.hbm [shape: f32[2,10], index: 5, kind: output, shape index: {}]  }
   0x1 LB: > { %s2690_s19 = sadd.s32 4294967295, %s2650_s18   ;;  %p1826_p0 = scmp.ge.s32.totalorder %s2650_s18, 1  ;;  %s2650_s18 = sphi %s2684_s18, %s16_s18  }
   0x2   : > { %p194_p1 = scmp.lt.s32.totalorder %s2650_s18, 5 }
   0x4   : > { %p195_p2 = pnand %p1826_p0, %p194_p1 }
   0x5   : > { %s221_s20 = smul.u32 (!%p195_p2), 18, %s2690_s19  ;;  %p1828_p5 = scmp.ne.s32.totalorder (!%p195_p2), %s2690_s19, 0 }
   0x6   : > { %198 = sbr.rel (%p195_p2) target bundleno = 486 (0x1e6), region = 40 }
   0x7   : > { %s226_s21 = smul.u32 (!%p195_p2), 288, %s2690_s19  ;;  %p222_p3 = scmp.lt.s32.totalorder (!%p195_p2), %s221_s20, 71 }
   0x9   : > { %p227_p4 = scmp.lt.s32.totalorder (!%p195_p2), %s226_s21, 1151 }
   0xb   : > { %s2911_s20 = smov (!%p222_p3, %s221_s20), 71  ;;  %s2913_s21 = smov (!%p227_p4, %s226_s21), 1151 }
   0xc   : > { %s2699_s24 = scalar_lea.vmem %s2904_s0, %s2911_s20  ;;  %s1827_s25 = sshll.u32 %s2913_s21, 2 }
   0xd   : > { %s2704_s28 = scalar_lea.vmem %s2905_s1, %s1827_s25  ;;  %235 = sbr.rel (%p1828_p5) target bundleno = 20 (0x14), region = 44 }
  0x12   : > { %v2652_v0 = vmov 0.0  }
  0x13   : > { %236 = vst [vmem:[#allocation2] sm:$0x3] %v2652_v0 }
  0x14 PF: > { %v2449_v1 = vld [vmem:[%s2704_s28 + $0x38] sm:$0xff]  ;;  %v2448_v5 = vld [vmem:[%s2704_s28 + $0x30] sm:$0xff]  ;;  %v2447_v9 = vld [vmem:[%s2704_s28 + $0x28] sm:$0xff]  ;;  %p2405_p6 = scmp.ne.s32.totalorder %s2690_s19, 3 }
  0x15   : > { %v2457_v2 = vld [vmem:[%s2704_s28 + $0x78] sm:$0xff]  ;;  %1435 = vmatpush.bf16.msra.mxu0 %v2449_v1  ;;  %v2456_v6 = vld [vmem:[%s2704_s28 + $0x70] sm:$0xff]  ;;  %v2455_v10 = vld [vmem:[%s2704_s28 + $0x68] sm:$0xff] }
  0x16   : > { %v2465_v3 = vld [vmem:[%s2704_s28 + $0xb8] sm:$0xff]  ;;  %1448 = vmatpush.bf16.msra.mxu1 %v2457_v2  ;;  %v2464_v7 = vld [vmem:[%s2704_s28 + $0xb0] sm:$0xff]  ;;  %v2463_v11 = vld [vmem:[%s2704_s28 + $0xa8] sm:$0xff] }
  0x17   : > { %v2473_v4 = vld [vmem:[%s2704_s28 + $0xf8] sm:$0xff]  ;;  %1461 = vmatpush.bf16.msra.mxu2 %v2465_v3  ;;  %v2472_v8 = vld [vmem:[%s2704_s28 + $0xf0] sm:$0xff]  ;;  %v2471_v12 = vld [vmem:[%s2704_s28 + $0xe8] sm:$0xff] }
  0x18   : > { %1474 = vmatpush.bf16.msra.mxu3 %v2473_v4  ;;  %v2446_v13 = vld [vmem:[%s2704_s28 + $0x20] sm:$0xff]  ;;  %v2445_v17 = vld [vmem:[%s2704_s28 + $0x18] sm:$0xff]  ;;  %v2444_v22 = vld [vmem:[%s2704_s28 + $0x10] sm:$0xff] }
  0x19   : > { %1436 = vmatpush.bf16.msra.mxu0 %v2448_v5  ;;  %v2454_v14 = vld [vmem:[%s2704_s28 + $0x60] sm:$0xff]  ;;  %v2453_v18 = vld [vmem:[%s2704_s28 + $0x58] sm:$0xff]  ;;  %v2452_v23 = vld [vmem:[%s2704_s28 + $0x50] sm:$0xff] }
  0x1a   : > { %1449 = vmatpush.bf16.msra.mxu1 %v2456_v6  ;;  %v2462_v15 = vld [vmem:[%s2704_s28 + $0xa0] sm:$0xff]  ;;  %v2461_v19 = vld [vmem:[%s2704_s28 + $0x98] sm:$0xff]  ;;  %v2460_v24 = vld [vmem:[%s2704_s28 + $0x90] sm:$0xff] }
  0x1b   : > { %1462 = vmatpush.bf16.msra.mxu2 %v2464_v7  ;;  %v2470_v16 = vld [vmem:[%s2704_s28 + $0xe0] sm:$0xff]  ;;  %v2469_v20 = vld [vmem:[%s2704_s28 + $0xd8] sm:$0xff]  ;;  %v2468_v25 = vld [vmem:[%s2704_s28 + $0xd0] sm:$0xff] }
  0x1c   : > { %1475 = vmatpush.bf16.msra.mxu3 %v2472_v8  ;;  %v238_v21 = vld [vmem:[%s2699_s24] sm:$0xff]  ;;  %v2443_v26 = vld [vmem:[%s2704_s28 + $0x8] sm:$0xff]  ;;  %v2481_v33 = vld [vmem:[%s2704_s28 + $0x138] sm:$0xff] }
  0x1d   : > { %1437 = vmatpush.bf16.msra.mxu0 %v2447_v9  ;;  %530 = vst [vmem:[#allocation1] ss:$9 sm:$0xff] %v238_v21  ;;  %v2451_v27 = vld [vmem:[%s2704_s28 + $0x48] sm:$0xff]  ;;  %v2442_v30 = vld [vmem:[%s2704_s28] sm:$0xff]  ;;  %v2489_v34 = vld [vmem:[%s2704_s28 + $0x178] sm:$0xff] }
  0x1e   : > { %1450 = vmatpush.bf16.msra.mxu1 %v2455_v10  ;;  %v2459_v28 = vld [vmem:[%s2704_s28 + $0x88] sm:$0xff]  ;;  %v2450_v31 = vld [vmem:[%s2704_s28 + $0x40] sm:$0xff]  ;;  %v2497_v35 = vld [vmem:[%s2704_s28 + $0x1b8] sm:$0xff] }
  0x1f   : > { %1463 = vmatpush.bf16.msra.mxu2 %v2463_v11  ;;  %v2467_v29 = vld [vmem:[%s2704_s28 + $0xc8] sm:$0xff]  ;;  %v2458_v32 = vld [vmem:[%s2704_s28 + $0x80] sm:$0xff]  ;;  %v2505_v37 = vld [vmem:[%s2704_s28 + $0x1f8] sm:$0xff] }
  0x20   : > { %1476 = vmatpush.bf16.msra.mxu3 %v2471_v12  ;;  %v2466_v36 = vld [vmem:[%s2704_s28 + $0xc0] sm:$0xff]  ;;  %v2480_v39 = vld [vmem:[%s2704_s28 + $0x130] sm:$0xff]  ;;  %v2479_v45 = vld [vmem:[%s2704_s28 + $0x128] sm:$0xff] }
  0x21   : > { %1438 = vmatpush.bf16.msra.mxu0 %v2446_v13  ;;  %v2488_v41 = vld [vmem:[%s2704_s28 + $0x170] sm:$0xff]  ;;  %v239_v50 = vld [vmem:[%s2699_s24 + $0x8] sm:$0xff]  ;;  %v2478_v55 = vld [vmem:[%s2704_s28 + $0x120] sm:$0xff] }
  0x22   : > { %1451 = vmatpush.bf16.msra.mxu1 %v2454_v14  ;;  %v2496_v42 = vld [vmem:[%s2704_s28 + $0x1b0] sm:$0xff]  ;;  %v2487_v52 = vld [vmem:[%s2704_s28 + $0x168] sm:$0xff]  ;;  %v2486_v56 = vld [vmem:[%s2704_s28 + $0x160] sm:$0xff] }
  0x23   : > { %1464 = vmatpush.bf16.msra.mxu2 %v2462_v15  ;;  %v2504_v44 = vld [vmem:[%s2704_s28 + $0x1f0] sm:$0xff]  ;;  %v2495_v53 = vld [vmem:[%s2704_s28 + $0x1a8] sm:$0xff]  ;;  %v2494_v57 = vld [vmem:[%s2704_s28 + $0x1a0] sm:$0xff] }
  0x24   : > { %1477 = vmatpush.bf16.msra.mxu3 %v2470_v16  ;;  %v531_v38 = vld [vmem:[#allocation1] sm:$0xff]  ;;  %v533_v40 = vld [vmem:[#allocation1 + $0x12] sm:$0xff]  ;;  %v532_v43 = vld [vmem:[#allocation1 + $0x9] sm:$0xff] }
  0x25   : > { %1439 = vmatpush.bf16.msra.mxu0 %v2445_v17  ;;  %v534_v46 = vld [vmem:[#allocation1 + $0x1b] sm:$0xff]  ;;  %v2751_v48 = vld [vmem:[#allocation1 + $0x24] sm:$0xff]  ;;  %v2756_v51 = vld [vmem:[#allocation1 + $0x2d] sm:$0xff] }
  0x26   : > { %1452 = vmatpush.bf16.msra.mxu1 %v2453_v18  ;;  %v2749_v47 = vld [vmem:[#allocation1 + $0x36] sm:$0xff]  ;;  %v2753_v49 = vld [vmem:[#allocation1 + $0x3f] sm:$0xff]  ;;  %v2503_v54 = vld [vmem:[%s2704_s28 + $0x1e8] sm:$0xff] }
  0x27   : > { %1465 = vmatpush.bf16.msra.mxu2 %v2461_v19  ;;  %540 = vst [vmem:[#allocation1] ss:$9 sm:$0xff] %v239_v50  ;;  %v2502_v58 = vld [vmem:[%s2704_s28 + $0x1e0] sm:$0xff]  ;;  %v2477_v59 = vld [vmem:[%s2704_s28 + $0x118] sm:$0xff]  ;;  %v2476_v63 = vld [vmem:[%s2704_s28 + $0x110] sm:$0xff] }
  0x28   : > { %1478 = vmatpush.bf16.msra.mxu3 %v2469_v20  ;;  %v2485_v60 = vld [vmem:[%s2704_s28 + $0x158] sm:$0xff]  ;;  %v2484_v0 = vld [vmem:[%s2704_s28 + $0x150] sm:$0xff]  ;;  %v2475_v3 = vld [vmem:[%s2704_s28 + $0x108] sm:$0xff] }
  0x29   : > { %1440 = vmatpush.bf16.msra.mxu0 %v2444_v22  ;;  %v2493_v61 = vld [vmem:[%s2704_s28 + $0x198] sm:$0xff]  ;;  %v2492_v1 = vld [vmem:[%s2704_s28 + $0x190] sm:$0xff]  ;;  %v2483_v4 = vld [vmem:[%s2704_s28 + $0x148] sm:$0xff] }
  0x2a   : > { %1453 = vmatpush.bf16.msra.mxu1 %v2452_v23  ;;  %v2501_v62 = vld [vmem:[%s2704_s28 + $0x1d8] sm:$0xff]  ;;  %v2500_v2 = vld [vmem:[%s2704_s28 + $0x1d0] sm:$0xff]  ;;  %v2491_v5 = vld [vmem:[%s2704_s28 + $0x188] sm:$0xff] }
  0x2b   : > { %1466 = vmatpush.bf16.msra.mxu2 %v2460_v24  ;;  %v2499_v6 = vld [vmem:[%s2704_s28 + $0x1c8] sm:$0xff]  ;;  %v2474_v7 = vld [vmem:[%s2704_s28 + $0x100] sm:$0xff]  ;;  %v2513_v10 = vld [vmem:[%s2704_s28 + $0x238] sm:$0xff] }
  0x2c   : > { %1479 = vmatpush.bf16.msra.mxu3 %v2468_v25  ;;  %v2482_v8 = vld [vmem:[%s2704_s28 + $0x140] sm:$0xff]  ;;  %v2521_v11 = vld [vmem:[%s2704_s28 + $0x278] sm:$0xff]  ;;  %v2512_v15 = vld [vmem:[%s2704_s28 + $0x230] sm:$0xff] }
  0x2d   : > { %1441 = vmatpush.bf16.msra.mxu0 %v2443_v26  ;;  %v2490_v9 = vld [vmem:[%s2704_s28 + $0x180] sm:$0xff]  ;;  %v2529_v12 = vld [vmem:[%s2704_s28 + $0x2b8] sm:$0xff]  ;;  %v2520_v16 = vld [vmem:[%s2704_s28 + $0x270] sm:$0xff] }
  0x2e   : > { %1454 = vmatpush.bf16.msra.mxu1 %v2451_v27  ;;  %v2498_v13 = vld [vmem:[%s2704_s28 + $0x1c0] sm:$0xff]  ;;  %v2537_v14 = vld [vmem:[%s2704_s28 + $0x2f8] sm:$0xff]  ;;  %v2528_v17 = vld [vmem:[%s2704_s28 + $0x2b0] sm:$0xff] }
  0x2f   : > { %1467 = vmatpush.bf16.msra.mxu2 %v2459_v28  ;;  %v2536_v18 = vld [vmem:[%s2704_s28 + $0x2f0] sm:$0xff]  ;;  %v2511_v19 = vld [vmem:[%s2704_s28 + $0x228] sm:$0xff]  ;;  %v2510_v23 = vld [vmem:[%s2704_s28 + $0x220] sm:$0xff] }
  0x30   : > { %1480 = vmatpush.bf16.msra.mxu3 %v2467_v29  ;;  %v2519_v20 = vld [vmem:[%s2704_s28 + $0x268] sm:$0xff]  ;;  %v2518_v24 = vld [vmem:[%s2704_s28 + $0x260] sm:$0xff]  ;;  %v2509_v27 = vld [vmem:[%s2704_s28 + $0x218] sm:$0xff] }
  0x31   : > { %1442 = vmatpush.bf16.msra.mxu0 %v2442_v30  ;;  %v2527_v21 = vld [vmem:[%s2704_s28 + $0x2a8] sm:$0xff]  ;;  %v2526_v25 = vld [vmem:[%s2704_s28 + $0x2a0] sm:$0xff]  ;;  %v2517_v28 = vld [vmem:[%s2704_s28 + $0x258] sm:$0xff] }
  0x32   : > { %1455 = vmatpush.bf16.msra.mxu1 %v2450_v31  ;;  %v2535_v22 = vld [vmem:[%s2704_s28 + $0x2e8] sm:$0xff]  ;;  %v2534_v26 = vld [vmem:[%s2704_s28 + $0x2e0] sm:$0xff]  ;;  %v2525_v29 = vld [vmem:[%s2704_s28 + $0x298] sm:$0xff] }
  0x33   : > { %1468 = vmatpush.bf16.msra.mxu2 %v2458_v32  ;;  %v2533_v30 = vld [vmem:[%s2704_s28 + $0x2d8] sm:$0xff]  ;;  %v2508_v31 = vld [vmem:[%s2704_s28 + $0x210] sm:$0xff] }
  0x34   : > { %1481 = vmatpush.bf16.msra.mxu3 %v2466_v36  ;;  %1443 = vmatmul.bf16.vlgmr.msra.gmra.mxu0 %v531_v38  ;;  %v2516_v32 = vld [vmem:[%s2704_s28 + $0x250] sm:$0xff]  ;;  %v2515_v36 = vld [vmem:[%s2704_s28 + $0x248] sm:$0xff] }
  0x35   : > { %1487 = vmatpush.bf16.msrb.mxu0 %v2481_v33  ;;  %1456 = vmatmul.bf16.vlgmr.msra.gmra.mxu1 %v532_v43  ;;  %v2524_v33 = vld [vmem:[%s2704_s28 + $0x290] sm:$0xff]  ;;  %v2531_v38 = vld [vmem:[%s2704_s28 + $0x2c8] sm:$0xff]  ;;  %v2553_v43 = vld [vmem:[%s2704_s28 + $0x378] sm:$0xff] }
  0x36   : > { %1500 = vmatpush.bf16.msrb.mxu1 %v2489_v34  ;;  %1469 = vmatmul.bf16.vlgmr.msra.gmra.mxu2 %v533_v40  ;;  %v2532_v34 = vld [vmem:[%s2704_s28 + $0x2d0] sm:$0xff]  ;;  %v2514_v40 = vld [vmem:[%s2704_s28 + $0x240] sm:$0xff] }
  0x37   : > { %1513 = vmatpush.bf16.msrb.mxu2 %v2497_v35  ;;  %1482 = vmatmul.bf16.vlgmr.msra.gmra.mxu3 %v534_v46  ;;  %v2507_v35 = vld [vmem:[%s2704_s28 + $0x208] sm:$0xff]  ;;  %v541_v46 = vld [vmem:[#allocation1] sm:$0xff] }
  0x38   : > { %1526 = vmatpush.bf16.msrb.mxu3 %v2505_v37  ;;  %v2523_v37 = vld [vmem:[%s2704_s28 + $0x288] sm:$0xff] }
  0x39   : > { %1488 = vmatpush.bf16.msrb.mxu0 %v2480_v39  ;;  %v2506_v39 = vld [vmem:[%s2704_s28 + $0x200] sm:$0xff]  ;;  %v542_v50 = vld [vmem:[#allocation1 + $0x9] sm:$0xff] }
  0x3a   : > { %1501 = vmatpush.bf16.msrb.mxu1 %v2488_v41  ;;  %v2522_v41 = vld [vmem:[%s2704_s28 + $0x280] sm:$0xff] }
  0x3b   : > { %1514 = vmatpush.bf16.msrb.mxu2 %v2496_v42  ;;  %v2545_v42 = vld [vmem:[%s2704_s28 + $0x338] sm:$0xff] }
  0x3c   : > { %1527 = vmatpush.bf16.msrb.mxu3 %v2504_v44  ;;  %v2561_v44 = vld [vmem:[%s2704_s28 + $0x3b8] sm:$0xff] }
  0x3d   : > { %1489 = vmatpush.bf16.msrb.mxu0 %v2479_v45  ;;  %v2530_v45 = vld [vmem:[%s2704_s28 + $0x2c0] sm:$0xff] }
  0x3e   : > { %1502 = vmatpush.bf16.msrb.mxu1 %v2487_v52  ;;  %v544_v52 = vld [vmem:[#allocation1 + $0x1b] sm:$0xff] }
  0x3f   : > { %1515 = vmatpush.bf16.msrb.mxu2 %v2495_v53  ;;  %v2560_v53 = vld [vmem:[%s2704_s28 + $0x3b0] sm:$0xff] }
  0x40   : > { %1528 = vmatpush.bf16.msrb.mxu3 %v2503_v54  ;;  %v2568_v54 = vld [vmem:[%s2704_s28 + $0x3f0] sm:$0xff] }
  0x41   : > { %1490 = vmatpush.bf16.msrb.mxu0 %v2478_v55  ;;  %v2543_v55 = vld [vmem:[%s2704_s28 + $0x328] sm:$0xff] }
  0x42   : > { %1503 = vmatpush.bf16.msrb.mxu1 %v2486_v56  ;;  %v2551_v56 = vld [vmem:[%s2704_s28 + $0x368] sm:$0xff] }
  0x43   : > { %1516 = vmatpush.bf16.msrb.mxu2 %v2494_v57  ;;  %v2559_v57 = vld [vmem:[%s2704_s28 + $0x3a8] sm:$0xff] }
  0x44   : > { %1529 = vmatpush.bf16.msrb.mxu3 %v2502_v58  ;;  %v2567_v58 = vld [vmem:[%s2704_s28 + $0x3e8] sm:$0xff] }
  0x45   : > { %1491 = vmatpush.bf16.msrb.mxu0 %v2477_v59  ;;  %v2542_v59 = vld [vmem:[%s2704_s28 + $0x320] sm:$0xff] }
  0x46   : > { %1504 = vmatpush.bf16.msrb.mxu1 %v2485_v60  ;;  %v2550_v60 = vld [vmem:[%s2704_s28 + $0x360] sm:$0xff] }
  0x47   : > { %1517 = vmatpush.bf16.msrb.mxu2 %v2493_v61  ;;  %v2558_v61 = vld [vmem:[%s2704_s28 + $0x3a0] sm:$0xff] }
  0x48   : > { %1530 = vmatpush.bf16.msrb.mxu3 %v2501_v62  ;;  %v2566_v62 = vld [vmem:[%s2704_s28 + $0x3e0] sm:$0xff] }
  0x49   : > { %1492 = vmatpush.bf16.msrb.mxu0 %v2476_v63  ;;  %v2541_v63 = vld [vmem:[%s2704_s28 + $0x318] sm:$0xff] }
  0x4a   : > { %1505 = vmatpush.bf16.msrb.mxu1 %v2484_v0  ;;  %v2549_v0 = vld [vmem:[%s2704_s28 + $0x358] sm:$0xff] }
  0x4b   : > { %1518 = vmatpush.bf16.msrb.mxu2 %v2492_v1  ;;  %v2557_v1 = vld [vmem:[%s2704_s28 + $0x398] sm:$0xff] }
  0x4c   : > { %1531 = vmatpush.bf16.msrb.mxu3 %v2500_v2  ;;  %v2565_v2 = vld [vmem:[%s2704_s28 + $0x3d8] sm:$0xff] }
  0x4d   : > { %1493 = vmatpush.bf16.msrb.mxu0 %v2475_v3  ;;  %v2540_v3 = vld [vmem:[%s2704_s28 + $0x310] sm:$0xff] }
  0x4e   : > { %1506 = vmatpush.bf16.msrb.mxu1 %v2483_v4  ;;  %v2548_v4 = vld [vmem:[%s2704_s28 + $0x350] sm:$0xff] }
  0x4f   : > { %1519 = vmatpush.bf16.msrb.mxu2 %v2491_v5  ;;  %v2556_v5 = vld [vmem:[%s2704_s28 + $0x390] sm:$0xff] }
  0x50   : > { %1532 = vmatpush.bf16.msrb.mxu3 %v2499_v6  ;;  %v2564_v6 = vld [vmem:[%s2704_s28 + $0x3d0] sm:$0xff] }
  0x51   : > { %1494 = vmatpush.bf16.msrb.mxu0 %v2474_v7  ;;  %v2539_v7 = vld [vmem:[%s2704_s28 + $0x308] sm:$0xff] }
  0x52   : > { %1507 = vmatpush.bf16.msrb.mxu1 %v2482_v8  ;;  %v2547_v8 = vld [vmem:[%s2704_s28 + $0x348] sm:$0xff] }
  0x53   : > { %1520 = vmatpush.bf16.msrb.mxu2 %v2490_v9  ;;  %v545_v9 = vld [vmem:[#allocation1 + $0x24] sm:$0xff] }
  0x54   : > { %1533 = vmatpush.bf16.msrb.mxu3 %v2498_v13  ;;  %1495 = vmatmul.bf16.vlgmr.msrb.gmra.mxu0 %v2751_v48  ;;  %v543_v48 = vld [vmem:[#allocation1 + $0x12] sm:$0xff]  ;;  %v240_v13 = vld [vmem:[%s2699_s24 + $0x10] sm:$0x3] }
  0x55   : > { %1539 = vmatpush.bf16.msra.mxu0 %v2513_v10  ;;  %1508 = vmatmul.bf16.vlgmr.msrb.gmra.mxu1 %v2756_v51  ;;  %v2552_v51 = vld [vmem:[%s2704_s28 + $0x370] sm:$0xff] }
  0x56   : > { %1552 = vmatpush.bf16.msra.mxu1 %v2521_v11  ;;  %1521 = vmatmul.bf16.vlgmr.msrb.gmra.mxu2 %v2749_v47  ;;  %v2569_v47 = vld [vmem:[%s2704_s28 + $0x3f8] sm:$0xff]  ;;  %v546_v11 = vld [vmem:[#allocation1 + $0x2d] sm:$0xff] }
  0x57   : > { %1565 = vmatpush.bf16.msra.mxu2 %v2529_v12  ;;  %1534 = vmatmul.bf16.vlgmr.msrb.gmra.mxu3 %v2753_v49  ;;  %v2544_v49 = vld [vmem:[%s2704_s28 + $0x330] sm:$0xff]  ;;  %v548_v12 = vld [vmem:[#allocation1 + $0x3f] sm:$0xff] }
  0x58   : > { %1578 = vmatpush.bf16.msra.mxu3 %v2537_v14  ;;  %v547_v10 = vld [vmem:[#allocation1 + $0x36] sm:$0xff]  ;;  %v2555_v14 = vld [vmem:[%s2704_s28 + $0x388] sm:$0xff] }
  0x59   : > { %1540 = vmatpush.bf16.msra.mxu0 %v2512_v15  ;;  %550 = vst [vmem:[#allocation1] ss:$9 sm:$0xff] %v240_v13  ;;  %v2563_v15 = vld [vmem:[%s2704_s28 + $0x3c8] sm:$0xff] }
  0x5a   : > { %1553 = vmatpush.bf16.msra.mxu1 %v2520_v16  ;;  %v2538_v16 = vld [vmem:[%s2704_s28 + $0x300] sm:$0xff] }
  0x5b   : > { %1566 = vmatpush.bf16.msra.mxu2 %v2528_v17  ;;  %v2546_v17 = vld [vmem:[%s2704_s28 + $0x340] sm:$0xff] }
  0x5c   : > { %1579 = vmatpush.bf16.msra.mxu3 %v2536_v18  ;;  %v2577_v18 = vld [vmem:[%s2704_s28 + $0x438] sm:$0xff] }
  0x5d   : > { %1541 = vmatpush.bf16.msra.mxu0 %v2511_v19  ;;  %v2554_v19 = vld [vmem:[%s2704_s28 + $0x380] sm:$0xff] }
  0x5e   : > { %1554 = vmatpush.bf16.msra.mxu1 %v2519_v20  ;;  %v2585_v20 = vld [vmem:[%s2704_s28 + $0x478] sm:$0xff] }
  0x5f   : > { %1567 = vmatpush.bf16.msra.mxu2 %v2527_v21  ;;  %v2562_v21 = vld [vmem:[%s2704_s28 + $0x3c0] sm:$0xff] }
  0x60   : > { %1580 = vmatpush.bf16.msra.mxu3 %v2535_v22  ;;  %v2576_v22 = vld [vmem:[%s2704_s28 + $0x430] sm:$0xff] }
  0x61   : > { %1542 = vmatpush.bf16.msra.mxu0 %v2510_v23  ;;  %v2584_v23 = vld [vmem:[%s2704_s28 + $0x470] sm:$0xff] }
  0x62   : > { %1555 = vmatpush.bf16.msra.mxu1 %v2518_v24  ;;  %v2575_v24 = vld [vmem:[%s2704_s28 + $0x428] sm:$0xff] }
  0x63   : > { %1568 = vmatpush.bf16.msra.mxu2 %v2526_v25  ;;  %v2583_v25 = vld [vmem:[%s2704_s28 + $0x468] sm:$0xff] }
  0x64   : > { %1581 = vmatpush.bf16.msra.mxu3 %v2534_v26  ;;  %v2574_v26 = vld [vmem:[%s2704_s28 + $0x420] sm:$0xff] }
  0x65   : > { %1543 = vmatpush.bf16.msra.mxu0 %v2509_v27  ;;  %v2582_v27 = vld [vmem:[%s2704_s28 + $0x460] sm:$0xff] }
  0x66   : > { %1556 = vmatpush.bf16.msra.mxu1 %v2517_v28  ;;  %v2573_v28 = vld [vmem:[%s2704_s28 + $0x418] sm:$0xff] }
  0x67   : > { %1569 = vmatpush.bf16.msra.mxu2 %v2525_v29  ;;  %v2581_v29 = vld [vmem:[%s2704_s28 + $0x458] sm:$0xff] }
  0x68   : > { %1582 = vmatpush.bf16.msra.mxu3 %v2533_v30  ;;  %v2572_v30 = vld [vmem:[%s2704_s28 + $0x410] sm:$0xff] }
  0x69   : > { %1544 = vmatpush.bf16.msra.mxu0 %v2508_v31  ;;  %v2580_v31 = vld [vmem:[%s2704_s28 + $0x450] sm:$0xff] }
  0x6a   : > { %1557 = vmatpush.bf16.msra.mxu1 %v2516_v32  ;;  %v2571_v32 = vld [vmem:[%s2704_s28 + $0x408] sm:$0xff] }
  0x6b   : > { %1570 = vmatpush.bf16.msra.mxu2 %v2524_v33  ;;  %v2579_v33 = vld [vmem:[%s2704_s28 + $0x448] sm:$0xff] }
  0x6c   : > { %1583 = vmatpush.bf16.msra.mxu3 %v2532_v34  ;;  %v2570_v34 = vld [vmem:[%s2704_s28 + $0x400] sm:$0xff] }
  0x6d   : > { %1545 = vmatpush.bf16.msra.mxu0 %v2507_v35  ;;  %v2578_v35 = vld [vmem:[%s2704_s28 + $0x440] sm:$0xff] }
  0x6e   : > { %1558 = vmatpush.bf16.msra.mxu1 %v2515_v36  ;;  %v551_v36 = vld [vmem:[#allocation1] sm:$0xff] }
  0x6f   : > { %1571 = vmatpush.bf16.msra.mxu2 %v2523_v37  ;;  %v552_v37 = vld [vmem:[#allocation1 + $0x9] sm:$0xff] }
  0x70   : > { %1584 = vmatpush.bf16.msra.mxu3 %v2531_v38 }
  0x71   : > { %1546 = vmatpush.bf16.msra.mxu0 %v2506_v39 }
  0x72   : > { %1559 = vmatpush.bf16.msra.mxu1 %v2514_v40 }
  0x73   : > { %1572 = vmatpush.bf16.msra.mxu2 %v2522_v41 }
  0x74   : > { %1585 = vmatpush.bf16.msra.mxu3 %v2530_v45  ;;  %1547 = vmatmul.bf16.vlgmr.msra.gmra.mxu0 %v541_v46 }
  0x75   : > { %1591 = vmatpush.bf16.msrb.mxu0 %v2545_v42  ;;  %1560 = vmatmul.bf16.vlgmr.msra.gmra.mxu1 %v542_v50 }
  0x76   : > { %1604 = vmatpush.bf16.msrb.mxu1 %v2553_v43  ;;  %1573 = vmatmul.bf16.vlgmr.msra.gmra.mxu2 %v543_v48 }
  0x77   : > { %1617 = vmatpush.bf16.msrb.mxu2 %v2561_v44  ;;  %1586 = vmatmul.bf16.vlgmr.msra.gmra.mxu3 %v544_v52 }
  0x78   : > { %1630 = vmatpush.bf16.msrb.mxu3 %v2569_v47 }
  0x79   : > { %1592 = vmatpush.bf16.msrb.mxu0 %v2544_v49 }
  0x7a   : > { %1605 = vmatpush.bf16.msrb.mxu1 %v2552_v51 }
  0x7b   : > { %1618 = vmatpush.bf16.msrb.mxu2 %v2560_v53 }
  0x7c   : > { %1631 = vmatpush.bf16.msrb.mxu3 %v2568_v54 }
  0x7d   : > { %1593 = vmatpush.bf16.msrb.mxu0 %v2543_v55 }
  0x7e   : > { %1606 = vmatpush.bf16.msrb.mxu1 %v2551_v56 }
  0x7f   : > { %1619 = vmatpush.bf16.msrb.mxu2 %v2559_v57 }
  0x80   : > { %1632 = vmatpush.bf16.msrb.mxu3 %v2567_v58 }
  0x81   : > { %1594 = vmatpush.bf16.msrb.mxu0 %v2542_v59 }
  0x82   : > { %1607 = vmatpush.bf16.msrb.mxu1 %v2550_v60 }
  0x83   : > { %1620 = vmatpush.bf16.msrb.mxu2 %v2558_v61 }
  0x84   : > { %1633 = vmatpush.bf16.msrb.mxu3 %v2566_v62 }
  0x85   : > { %1595 = vmatpush.bf16.msrb.mxu0 %v2541_v63 }
  0x86   : > { %1608 = vmatpush.bf16.msrb.mxu1 %v2549_v0 }
  0x87   : > { %1621 = vmatpush.bf16.msrb.mxu2 %v2557_v1 }
  0x88   : > { %1634 = vmatpush.bf16.msrb.mxu3 %v2565_v2 }
  0x89   : > { %1596 = vmatpush.bf16.msrb.mxu0 %v2540_v3 }
  0x8a   : > { %1609 = vmatpush.bf16.msrb.mxu1 %v2548_v4 }
  0x8b   : > { %1622 = vmatpush.bf16.msrb.mxu2 %v2556_v5 }
  0x8c   : > { %1635 = vmatpush.bf16.msrb.mxu3 %v2564_v6 }
  0x8d   : > { %1597 = vmatpush.bf16.msrb.mxu0 %v2539_v7 }
  0x8e   : > { %1610 = vmatpush.bf16.msrb.mxu1 %v2547_v8 }
  0x8f   : > { %1623 = vmatpush.bf16.msrb.mxu2 %v2555_v14 }
  0x90   : > { %1636 = vmatpush.bf16.msrb.mxu3 %v2563_v15 }
  0x91   : > { %1598 = vmatpush.bf16.msrb.mxu0 %v2538_v16 }
  0x92   : > { %1611 = vmatpush.bf16.msrb.mxu1 %v2546_v17 }
  0x93   : > { %1624 = vmatpush.bf16.msrb.mxu2 %v2554_v19 }
  0x94   : > { %1637 = vmatpush.bf16.msrb.mxu3 %v2562_v21  ;;  %1599 = vmatmul.bf16.vlgmr.msrb.gmra.mxu0 %v545_v9 }
  0x95   : > { %1643 = vmatpush.bf16.msra.mxu0 %v2577_v18  ;;  %1612 = vmatmul.bf16.vlgmr.msrb.gmra.mxu1 %v546_v11 }
  0x96   : > { %1656 = vmatpush.bf16.msra.mxu1 %v2585_v20  ;;  %1625 = vmatmul.bf16.vlgmr.msrb.gmra.mxu2 %v547_v10 }
  0x97   : > { %1638 = vmatmul.bf16.vlgmr.msrb.gmra.mxu3 %v548_v12 }
  0x99   : > { %1644 = vmatpush.bf16.msra.mxu0 %v2576_v22 }
  0x9a   : > { %1657 = vmatpush.bf16.msra.mxu1 %v2584_v23 }
  0x9d   : > { %1645 = vmatpush.bf16.msra.mxu0 %v2575_v24  ;;  %v237_v24 = vld [vmem:[#allocation2] sm:$0x3] }
  0x9e   : > { %1658 = vmatpush.bf16.msra.mxu1 %v2583_v25 }
  0xa1   : > { %1646 = vmatpush.bf16.msra.mxu0 %v2574_v26 }
  0xa2   : > { %1659 = vmatpush.bf16.msra.mxu1 %v2582_v27 }
  0xa5   : > { %1647 = vmatpush.bf16.msra.mxu0 %v2573_v28 }
  0xa6   : > { %1660 = vmatpush.bf16.msra.mxu1 %v2581_v29 }
  0xa9   : > { %1648 = vmatpush.bf16.msra.mxu0 %v2572_v30 }
  0xaa   : > { %1661 = vmatpush.bf16.msra.mxu1 %v2580_v31 }
  0xad   : > { %1649 = vmatpush.bf16.msra.mxu0 %v2571_v32 }
  0xae   : > { %1662 = vmatpush.bf16.msra.mxu1 %v2579_v33 }
  0xb1   : > { %1650 = vmatpush.bf16.msra.mxu0 %v2570_v34  ;;  %v1444_v38 = vpop.f32.mrf.mxu0 }
  0xb2   : > { %1663 = vmatpush.bf16.msra.mxu1 %v2578_v35  ;;  %v1457_v39 = vpop.f32.mrf.mxu1 }
  0xb3   : > { %v1458_v40 = vadd.f32 %v1457_v39, %v1444_v38 }
  0xb4   : > { %1651 = vmatmul.bf16.vlgmr.msra.gmra.mxu0 %v551_v36 }
  0xb5   : > { %1664 = vmatmul.bf16.vlgmr.msra.gmra.mxu1 %v552_v37 }
  0xb9   : > { %v1470_v41 = vpop.f32.mrf.mxu2  ;;  %v1446_v43 = vpop.f32.mrf.mxu0 }
  0xba   : > { %v1471_v42 = vadd.f32 %v1470_v41, %v1458_v40  ;;  %v1483_v44 = vpop.f32.mrf.mxu3  ;;  %v1459_v45 = vpop.f32.mrf.mxu1 }
  0xbc   : > { %v1484_v46 = vadd.f32 %v1483_v44, %v1471_v42 }
  0xc1   : > { %v1472_v47 = vpop.f32.mrf.mxu2 }
  0xc2   : > { %v1485_v48 = vpop.f32.mrf.mxu3 }
  0xd1   : > { %v1496_v49 = vpop.f32.mrf.mxu0 }
  0xd2   : > { %v1509_v50 = vpop.f32.mrf.mxu1  ;;  %v1497_v1 = vadd.f32 %v1496_v49, %v1484_v46 }
  0xd4   : > { %v1510_v2 = vadd.f32 %v1509_v50, %v1497_v1 }
  0xd9   : > { %v1522_v51 = vpop.f32.mrf.mxu2  ;;  %v1498_v53 = vpop.f32.mrf.mxu0 }
  0xda   : > { %v1535_v52 = vpop.f32.mrf.mxu3  ;;  %v1511_v54 = vpop.f32.mrf.mxu1  ;;  %v1523_v3 = vadd.f32 %v1522_v51, %v1510_v2 }
  0xdc   : > { %v1536_v6 = vadd.f32 %v1535_v52, %v1523_v3 }
  0xe1   : > { %v1524_v55 = vpop.f32.mrf.mxu2 }
  0xe2   : > { %v1537_v56 = vpop.f32.mrf.mxu3 }
  0xf1   : > { %v1548_v57 = vpop.f32.mrf.mxu0 }
  0xf2   : > { %v1561_v58 = vpop.f32.mrf.mxu1  ;;  %v1549_v7 = vadd.f32 %v1548_v57, %v1536_v6 }
  0xf4   : > { %v1562_v12 = vadd.f32 %v1561_v58, %v1549_v7 }
  0xf9   : > { %v1574_v59 = vpop.f32.mrf.mxu2  ;;  %v1550_v60 = vpop.f32.mrf.mxu0 }
  0xfa   : > { %v1587_v61 = vpop.f32.mrf.mxu3  ;;  %v1563_v62 = vpop.f32.mrf.mxu1  ;;  %v1575_v13 = vadd.f32 %v1574_v59, %v1562_v12 }
  0xfc   : > { %v1588_v14 = vadd.f32 %v1587_v61, %v1575_v13 }
 0x101   : > { %v1576_v63 = vpop.f32.mrf.mxu2 }
 0x102   : > { %v1589_v0 = vpop.f32.mrf.mxu3 }
 0x111   : > { %v1600_v4 = vpop.f32.mrf.mxu0 }
 0x112   : > { %v1613_v5 = vpop.f32.mrf.mxu1  ;;  %v1601_v17 = vadd.f32 %v1600_v4, %v1588_v14 }
 0x114   : > { %v1614_v18 = vadd.f32 %v1613_v5, %v1601_v17 }
 0x119   : > { %v1626_v8 = vpop.f32.mrf.mxu2  ;;  %v1602_v9 = vpop.f32.mrf.mxu0 }
 0x11a   : > { %v1639_v10 = vpop.f32.mrf.mxu3  ;;  %v1615_v11 = vpop.f32.mrf.mxu1  ;;  %v1627_v19 = vadd.f32 %v1626_v8, %v1614_v18 }
 0x11c   : > { %v1640_v20 = vadd.f32 %v1639_v10, %v1627_v19 }
 0x121   : > { %v1628_v15 = vpop.f32.mrf.mxu2 }
 0x122   : > { %v1641_v16 = vpop.f32.mrf.mxu3 }
 0x131   : > { %v1652_v21 = vpop.f32.mrf.mxu0 }
 0x132   : > { %v1653_v22 = vadd.f32 %v1652_v21, %v1640_v20  ;;  %v1665_v23 = vpop.f32.mrf.mxu1 }
 0x134   : > { %v1666_v25 = vadd.f32 %v1665_v23, %v1653_v22 }
 0x136   : > { %v1669_v26 = vadd.f32 %v1666_v25, %v237_v24  ;;  %1674 = sbr.rel (%p2405_p6) target bundleno = 481 (0x1e1), region = 48 }
 0x138   : > { %1670 = vst [vmem:[#allocation2] sm:$0x3] %v1669_v26 }
 0x139   : > { %v1654_v27 = vpop.f32.mrf.mxu0 }
 0x13a   : > { %v1667_v28 = vpop.f32.mrf.mxu1 }
 0x13b   : > { %v2593_v29 = vld [vmem:[%s2907_s3 + $0x38] sm:$0xff]  ;;  %v2592_v30 = vld [vmem:[%s2907_s3 + $0x30] sm:$0xff]  ;;  %v2591_v31 = vld [vmem:[%s2907_s3 + $0x28] sm:$0xff]  ;;  %vm1764_vm0 = vcmask 74752  }
 0x13c   : > { %1751 = vmatpush.bf16.msra.mxu0 %v2593_v29  ;;  %v2590_v32 = vld [vmem:[%s2907_s3 + $0x20] sm:$0xff]  ;;  %v2589_v33 = vld [vmem:[%s2907_s3 + $0x18] sm:$0xff]  ;;  %v2588_v35 = vld [vmem:[%s2907_s3 + $0x10] sm:$0xff] }
 0x13d   : > { %v2610_v34 = vld [vmem:[%s2906_s2] ss:$0 sm:$0xff]  ;;  %v2587_v38 = vld [vmem:[%s2907_s3 + $0x8] sm:$0xff] }
 0x13e   : > { %v2586_v40 = vld [vmem:[%s2907_s3] sm:$0xff] }
 0x13f   : > { %v1675_v36 = vld [vmem:[#allocation2] sm:$0x3]  ;;  %v2611_v42 = vld [vmem:[%s2908_s4] ss:$0 sm:$0xff] }
 0x140   : > { %1752 = vmatpush.bf16.msra.mxu0 %v2592_v30  ;;  %v1680_v37 = vadd.f32 %v2610_v34, %v1675_v36 }
 0x142   : > { %v1681_v39 = vmax.f32 %v1680_v37, 0.0 }
 0x144   : > { %1753 = vmatpush.bf16.msra.mxu0 %v2591_v31  ;;  %v1682_v41 = vpack.c.bf16 %v1681_v39, %v1681_v39 }
 0x148   : > { %1754 = vmatpush.bf16.msra.mxu0 %v2590_v32 }
 0x14c   : > { %1755 = vmatpush.bf16.msra.mxu0 %v2589_v33 }
 0x150   : > { %1756 = vmatpush.bf16.msra.mxu0 %v2588_v35 }
 0x154   : > { %1757 = vmatpush.bf16.msra.mxu0 %v2587_v38 }
 0x158   : > { %1758 = vmatpush.bf16.msra.mxu0 %v2586_v40 }
 0x15b   : > { %1759 = vmatmul.bf16.vlgmr.msra.gmra.mxu0 %v1682_v41 }
 0x1d8   : > { %v1760_v43 = vpop.f32.mrf.mxu0 }
 0x1d9   : > { %v1761_v44 = vadd.f32 %v2611_v42, %v1760_v43 }
 0x1db   : > { %1765 = vst.msk [vmem:[#allocation3] sm:$0x3] %vm1764_vm0, %v1761_v44 }
 0x1e0   : > { %v1762_v45 = vpop.f32.mrf.mxu0 }
 0x1e1 PF: > { %p2598_p7 = scmp.eq.s32.totalorder %s2690_s19, 3  ;;  %s2653_s26 = smov [#allocation3]  }
 0x1e2   : > { %s1772_s27 = sshll.u32 %s2653_s26, 4  ;;  %s1774_s30 = sshll.u32 %s2909_s5, 4  ;;  %s1773_s27 = int_to_ptr.vmem [resolvable:$true] %s1772_s27  ;;  %s1775_s30 = int_to_ptr.hbm [resolvable:$true] %s1774_s30 }
 0x1e3   : > { %2595 = dma.vmem_to_hbm [thread:$0]  (%p2598_p7), %s1773_s27, 32, %s1775_s30, [#allocation4]  }
 0x1e4   : > { %2645 = dma.done.wait (%p2598_p7), [#allocation4], 32  }
 0x1e5   : > { %2647 = vsyncadd (%p2598_p7), [#allocation4], 4294967264 }
 0x1e6 PF: > { %s16_s18 = sadd.s32 1, %s2650_s18  }
 0x1e7   : > { %p13_p8 = scmp.ge.s32.totalorder %s16_s18, 6  }
 0x1e9   :  { %15 = sbr.rel (!%p13_p8) target bundleno = 1 (0x1), region = 78 }
 0x1ee   :  { %1788 = vsyncpa [#allocation4], 1 }
 0x1ef   :  { %1790 = vsyncpa [#allocation4 + $0x1], 1 }

// kernel: net_forward.4
= control target key start
LH: loop header
LB: loop body
LE: loop exit
PB: predicated region body
PF: predicated region fallthrough
CT: control target
= control target key end

     0   :  { %s6046_s12 = smov 0   ;;  %s7969_s0 = inlined_call_operand.vmem [shape: f32[2,26,26,32], index: 0, kind: input, shape index: {}]   ;;  %s7970_s1 = inlined_call_operand.vmem [shape: bf16[9,32,64], index: 1, kind: input, shape index: {}]   ;;  %s7971_s2 = inlined_call_operand.vmem [shape: f32[1,64], index: 2, kind: input, shape index: {}]   ;;  %s7972_s3 = inlined_call_operand.vmem [shape: bf16[2,12,12,64], index: 3, kind: output, shape index: {}]  }
   0x1 LB: > { %s5112_s13 = sadd.s32 4294967295, %s6024_s12   ;;  %p5116_p0 = scmp.ge.s32.totalorder %s6024_s12, 1  ;;  %s6024_s12 = sphi %s6046_s12, %s13_s12  }
   0x2   : > { %p137_p1 = scmp.lt.s32.totalorder %s6024_s12, 3 }
   0x4   : > { %p138_p2 = pnand %p5116_p0, %p137_p1 }
   0x6   : > { %141 = sbr.rel (%p138_p2) target bundleno = 1467 (0x5bb), region = 32 }
   0xb   : > { %v5984_v0 = vld [vmem:[%s7970_s1 + $0x18] sm:$0xff]  ;;  %p161_p3 = scmp.lt.s32.totalorder %s5112_s13, 1  ;;  %v5983_v1 = vld [vmem:[%s7970_s1 + $0x10] sm:$0xff]  ;;  %v5986_v2 = vld [vmem:[%s7970_s1 + $0x28] sm:$0xff]  ;;  %vm409_vm0 = vcmask 261120   ;;  %vm4624_vm1 = vcmask 523264  }
   0xc   : > { %5999 = vmatpush.bf16.msra.mxu1 %v5984_v0  ;;  %6000 = vmatpush.bf16.msra.mxu2 %v5984_v0  ;;  %v5988_v3 = vld [vmem:[%s7970_s1 + $0x38] sm:$0xff]  ;;  %v5982_v4 = vld [vmem:[%s7970_s1 + $0x8] sm:$0xff]  ;;  %v5985_v42 = vld [vmem:[%s7970_s1 + $0x20] sm:$0xff]  ;;  %vm4984_vm2 = vcmask 519168   ;;  %vm4986_vm3 = vcmask 517120  }
   0xd   : > { %s8128_s13 = smov (!%p161_p3, %s5112_s13), 1  ;;  %6001 = vmatpush.bf16.msra.mxu3 %v5984_v0  ;;  %524 = vmatpush.bf16.msra.mxu0 %v5984_v0  ;;  %v5990_v5 = vld [vmem:[%s7970_s1 + $0x48] sm:$0xff]  ;;  %v5987_v43 = vld [vmem:[%s7970_s1 + $0x30] sm:$0xff]  ;;  %v5981_v44 = vld [vmem:[%s7970_s1] sm:$0xff] }
   0xe   : > { %s6005_s18 = smul.u32 832, %s8128_s13  ;;  %v5989_v57 = vld [vmem:[%s7970_s1 + $0x40] sm:$0xff] }
   0xf   : > { %s6006_s5 = smul.u32 96, %s8128_s13 }
  0x10   : > { %6002 = vmatpush.bf16.msra.mxu1 %v5983_v1  ;;  %6003 = vmatpush.bf16.msra.mxu2 %v5983_v1  ;;  %s6078_s29 = scalar_lea.vmem %s7969_s0, %s6005_s18 }
  0x11   : > { %6004 = vmatpush.bf16.msra.mxu3 %v5983_v1  ;;  %525 = vmatpush.bf16.msra.mxu0 %v5983_v1  ;;  %v6081_v6 = vld [vmem:[%s6078_s29 + $0xc1] sm:$0xff]  ;;  %v6084_v7 = vld [vmem:[%s6078_s29 + $0xc9] sm:$0xff]  ;;  %v6099_v18 = vld [vmem:[%s6078_s29 + $0xd1] sm:$0xff]  ;;  %s7351_s8 = scalar_lea.vmem %s7972_s3, %s6006_s5 }
  0x12   : > { %v320_v8 = vld [vmem:[%s6078_s29 + $0x181] sm:$0xff]  ;;  %v365_v9 = vpack.c.bf16 %v6084_v7, %v6081_v6  ;;  %v321_v10 = vld [vmem:[%s6078_s29 + $0x189] sm:$0xff]  ;;  %v322_v20 = vld [vmem:[%s6078_s29 + $0x191] sm:$0xff] }
  0x13   : > { %v338_v11 = vld [vmem:[%s6078_s29 + $0x241] sm:$0xff]  ;;  %v339_v12 = vld [vmem:[%s6078_s29 + $0x249] sm:$0xff]  ;;  %v374_v13 = vpack.c.bf16 %v321_v10, %v320_v8  ;;  %v340_v22 = vld [vmem:[%s6078_s29 + $0x251] sm:$0xff] }
  0x14   : > { %1255 = vmatpush.bf16.msrb.mxu2 %v5986_v2  ;;  %v383_v14 = vpack.c.bf16 %v339_v12, %v338_v11  ;;  %v284_v15 = vld [vmem:[%s6078_s29 + $0x1] sm:$0xff]  ;;  %v285_v16 = vld [vmem:[%s6078_s29 + $0x9] sm:$0xff]  ;;  %833 = vmatpush.bf16.msrb.mxu1 %v5982_v4  ;;  %v286_v24 = vld [vmem:[%s6078_s29 + $0x11] sm:$0xff] }
  0x15   : > { %1750 = vmatpush.bf16.msrb.mxu3 %v5988_v3  ;;  %2244 = vmatpush.bf16.msrb.mxu0 %v5990_v5  ;;  %v356_v17 = vpack.c.bf16 %v285_v16, %v284_v15  ;;  %v6102_v19 = vld [vmem:[%s6078_s29 + $0xe1] sm:$0xff]  ;;  %v6120_v30 = vld [vmem:[%s6078_s29 + $0xe9] sm:$0xff]  ;;  %v6123_v31 = vld [vmem:[%s6078_s29 + $0xf1] sm:$0xff] }
  0x16   : > { %5140 = vmatmul.msk.bf16.vlgmr.msra.gmra.mxu1 %vm409_vm0, %v365_v9  ;;  %5149 = vmatmul.msk.bf16.vlgmr.msra.gmra.mxu2 %vm409_vm0, %v374_v13  ;;  %v323_v21 = vld [vmem:[%s6078_s29 + $0x1a1] sm:$0xff]  ;;  %v366_v26 = vpack.c.bf16 %v6102_v19, %v6099_v18  ;;  %v324_v32 = vld [vmem:[%s6078_s29 + $0x1a9] sm:$0xff]  ;;  %v325_v33 = vld [vmem:[%s6078_s29 + $0x1b1] sm:$0xff]  ;;  %v367_v38 = vpack.c.bf16 %v6123_v31, %v6120_v30 }
  0x17   : > { %5158 = vmatmul.msk.bf16.vlgmr.msra.gmra.mxu3 %vm409_vm0, %v383_v14  ;;  %5131 = vmatmul.msk.bf16.vlgmr.msra.gmra.mxu0 %vm409_vm0, %v356_v17  ;;  %v341_v23 = vld [vmem:[%s6078_s29 + $0x261] sm:$0xff]  ;;  %v375_v27 = vpack.c.bf16 %v323_v21, %v322_v20  ;;  %v342_v34 = vld [vmem:[%s6078_s29 + $0x269] sm:$0xff]  ;;  %v343_v35 = vld [vmem:[%s6078_s29 + $0x271] sm:$0xff]  ;;  %v376_v39 = vpack.c.bf16 %v325_v33, %v324_v32 }
  0x18   : > { %v6110_v25 = vld [vmem:[%s6078_s29 + $0x21] sm:$0xff]  ;;  %v384_v28 = vpack.c.bf16 %v341_v23, %v340_v22  ;;  %v6130_v36 = vld [vmem:[%s6078_s29 + $0x29] sm:$0xff]  ;;  %v6133_v37 = vld [vmem:[%s6078_s29 + $0x31] sm:$0xff]  ;;  %v385_v40 = vpack.c.bf16 %v343_v35, %v342_v34  ;;  %1256 = vmatpush.bf16.msrb.mxu2 %v5985_v42  ;;  %834 = vmatpush.bf16.msrb.mxu1 %v5981_v44 }
  0x19   : > { %v357_v29 = vpack.c.bf16 %v6110_v25, %v286_v24  ;;  %v358_v41 = vpack.c.bf16 %v6133_v37, %v6130_v36  ;;  %1751 = vmatpush.bf16.msrb.mxu3 %v5987_v43  ;;  %v6153_v45 = vld [vmem:[%s6078_s29 + $0x101] sm:$0xff]  ;;  %v6156_v46 = vld [vmem:[%s6078_s29 + $0x109] sm:$0xff]  ;;  %2245 = vmatpush.bf16.msrb.mxu0 %v5989_v57  ;;  %v6180_v58 = vld [vmem:[%s6078_s29 + $0x111] sm:$0xff] }
  0x1a   : > { %v326_v47 = vld [vmem:[%s6078_s29 + $0x1c1] sm:$0xff]  ;;  %v327_v48 = vld [vmem:[%s6078_s29 + $0x1c9] sm:$0xff]  ;;  %v368_v53 = vpack.c.bf16 %v6156_v46, %v6153_v45  ;;  %v328_v60 = vld [vmem:[%s6078_s29 + $0x1d1] sm:$0xff] }
  0x1b   : > { %v344_v49 = vld [vmem:[%s6078_s29 + $0x281] sm:$0xff]  ;;  %v345_v50 = vld [vmem:[%s6078_s29 + $0x289] sm:$0xff]  ;;  %v377_v54 = vpack.c.bf16 %v327_v48, %v326_v47  ;;  %v346_v62 = vld [vmem:[%s6078_s29 + $0x291] sm:$0xff] }
  0x1c   : > { %v6163_v51 = vld [vmem:[%s6078_s29 + $0x41] sm:$0xff]  ;;  %v6166_v52 = vld [vmem:[%s6078_s29 + $0x49] sm:$0xff]  ;;  %v386_v55 = vpack.c.bf16 %v345_v50, %v344_v49  ;;  %v6190_v0 = vld [vmem:[%s6078_s29 + $0x51] sm:$0xff] }
  0x1d   : > { %v359_v56 = vpack.c.bf16 %v6166_v52, %v6163_v51  ;;  %v6183_v59 = vld [vmem:[%s6078_s29 + $0x121] sm:$0xff]  ;;  %v6204_v8 = vld [vmem:[%s6078_s29 + $0x129] sm:$0xff]  ;;  %v6207_v9 = vld [vmem:[%s6078_s29 + $0x131] sm:$0xff] }
  0x1e   : > { %v329_v61 = vld [vmem:[%s6078_s29 + $0x1e1] sm:$0xff]  ;;  %v369_v2 = vpack.c.bf16 %v6183_v59, %v6180_v58  ;;  %v330_v10 = vld [vmem:[%s6078_s29 + $0x1e9] sm:$0xff]  ;;  %v331_v11 = vld [vmem:[%s6078_s29 + $0x1f1] sm:$0xff]  ;;  %v370_v16 = vpack.c.bf16 %v6207_v9, %v6204_v8 }
  0x1f   : > { %v347_v63 = vld [vmem:[%s6078_s29 + $0x2a1] sm:$0xff]  ;;  %v378_v3 = vpack.c.bf16 %v329_v61, %v328_v60  ;;  %v348_v12 = vld [vmem:[%s6078_s29 + $0x2a9] sm:$0xff]  ;;  %v349_v13 = vld [vmem:[%s6078_s29 + $0x2b1] sm:$0xff]  ;;  %v379_v17 = vpack.c.bf16 %v331_v11, %v330_v10 }
  0x20   : > { %v6193_v1 = vld [vmem:[%s6078_s29 + $0x61] sm:$0xff]  ;;  %v387_v4 = vpack.c.bf16 %v347_v63, %v346_v62  ;;  %v6214_v14 = vld [vmem:[%s6078_s29 + $0x69] sm:$0xff]  ;;  %v6217_v15 = vld [vmem:[%s6078_s29 + $0x71] sm:$0xff]  ;;  %v388_v20 = vpack.c.bf16 %v349_v13, %v348_v12 }
  0x21   : > { %v360_v5 = vpack.c.bf16 %v6193_v1, %v6190_v0  ;;  %v361_v21 = vpack.c.bf16 %v6217_v15, %v6214_v14  ;;  %v6228_v22 = vld [vmem:[%s6078_s29 + $0x141] sm:$0xff]  ;;  %v6231_v23 = vld [vmem:[%s6078_s29 + $0x149] sm:$0xff]  ;;  %v352_v43 = vld [vmem:[%s6078_s29 + $0x2d1] sm:$0xff] }
  0x22   : > { %v332_v24 = vld [vmem:[%s6078_s29 + $0x201] sm:$0xff]  ;;  %v6241_v32 = vld [vmem:[%s6078_s29 + $0x89] sm:$0xff]  ;;  %v371_v33 = vpack.c.bf16 %v6231_v23, %v6228_v22  ;;  %v6262_v47 = vld [vmem:[%s6078_s29 + $0x91] sm:$0xff] }
  0x23   : > { %v335_v42 = vld [vmem:[%s6078_s29 + $0x221] sm:$0xff]  ;;  %v5992_v57 = vld [vmem:[%s7970_s1 + $0x58] sm:$0xff]  ;;  %v6288_v61 = vld [vmem:[%s6078_s29 + $0x169] sm:$0xff] }
  0x24   : > { %v353_v44 = vld [vmem:[%s6078_s29 + $0x2e1] sm:$0xff]  ;;  %2738 = vmatpush.bf16.msra.mxu1 %v5992_v57  ;;  %v6291_v62 = vld [vmem:[%s6078_s29 + $0x171] sm:$0xff]  ;;  %v336_v63 = vld [vmem:[%s6078_s29 + $0x229] sm:$0xff] }
  0x25   : > { %v6265_v48 = vld [vmem:[%s6078_s29 + $0xa1] sm:$0xff]  ;;  %v6301_v10 = vld [vmem:[%s6078_s29 + $0xb1] sm:$0xff]  ;;  %v373_v11 = vpack.c.bf16 %v6291_v62, %v6288_v61 }
  0x26   : > { %5141 = vmatmul.msk.bf16.gmra.mxu1 %vm409_vm0, %v366_v26  ;;  %5150 = vmatmul.msk.bf16.gmra.mxu2 %vm409_vm0, %v375_v27  ;;  %v333_v26 = vld [vmem:[%s6078_s29 + $0x209] sm:$0xff]  ;;  %v350_v27 = vld [vmem:[%s6078_s29 + $0x2c1] sm:$0xff] }
  0x27   : > { %5159 = vmatmul.msk.bf16.gmra.mxu3 %vm409_vm0, %v384_v28  ;;  %5132 = vmatmul.msk.bf16.gmra.mxu0 %vm409_vm0, %v357_v29  ;;  %v351_v28 = vld [vmem:[%s6078_s29 + $0x2c9] sm:$0xff]  ;;  %v6238_v29 = vld [vmem:[%s6078_s29 + $0x81] sm:$0xff]  ;;  %v380_v34 = vpack.c.bf16 %v333_v26, %v332_v24 }
  0x28   : > { %v389_v35 = vpack.c.bf16 %v351_v28, %v350_v27  ;;  %v5998_v60 = vld [vmem:[%s7970_s1 + $0x88] sm:$0xff]  ;;  %v172_v28 = vld [vmem:[%s6078_s29] sm:$0xff] }
  0x29   : > { %4221 = vmatpush.bf16.msra.mxu0 %v5998_v60 }
  0x36   : > { %5142 = vmatmul.msk.bf16.gmra.mxu1 %vm409_vm0, %v367_v38  ;;  %5151 = vmatmul.msk.bf16.gmra.mxu2 %vm409_vm0, %v376_v39  ;;  %v362_v38 = vpack.c.bf16 %v6241_v32, %v6238_v29  ;;  %v6252_v39 = vld [vmem:[%s6078_s29 + $0x151] sm:$0xff] }
  0x37   : > { %5160 = vmatmul.msk.bf16.gmra.mxu3 %vm409_vm0, %v385_v40  ;;  %5133 = vmatmul.msk.bf16.gmra.mxu0 %vm409_vm0, %v358_v41  ;;  %v6255_v40 = vld [vmem:[%s6078_s29 + $0x161] sm:$0xff]  ;;  %v334_v41 = vld [vmem:[%s6078_s29 + $0x211] sm:$0xff] }
  0x38   : > { %v372_v49 = vpack.c.bf16 %v6255_v40, %v6252_v39  ;;  %v381_v50 = vpack.c.bf16 %v335_v42, %v334_v41  ;;  %v5260_v41 = vld [vmem:[%s6078_s29 + $0x28] sm:$0xff] }
  0x46   : > { %5143 = vmatmul.msk.bf16.gmra.mxu1 %vm409_vm0, %v368_v53  ;;  %5152 = vmatmul.msk.bf16.gmra.mxu2 %vm409_vm0, %v377_v54  ;;  %v390_v53 = vpack.c.bf16 %v353_v44, %v352_v43  ;;  %v363_v54 = vpack.c.bf16 %v6265_v48, %v6262_v47 }
  0x47   : > { %5161 = vmatmul.msk.bf16.gmra.mxu3 %vm409_vm0, %v386_v55  ;;  %5134 = vmatmul.msk.bf16.gmra.mxu0 %vm409_vm0, %v359_v56  ;;  %v5994_v55 = vld [vmem:[%s7970_s1 + $0x68] sm:$0xff]  ;;  %v5996_v56 = vld [vmem:[%s7970_s1 + $0x78] sm:$0xff] }
  0x48   : > { %3233 = vmatpush.bf16.msra.mxu2 %v5994_v55  ;;  %3727 = vmatpush.bf16.msra.mxu3 %v5996_v56 }
  0x56   : > { %5144 = vmatmul.msk.bf16.gmra.mxu1 %vm409_vm0, %v369_v2  ;;  %5153 = vmatmul.msk.bf16.gmra.mxu2 %vm409_vm0, %v378_v3  ;;  %v337_v2 = vld [vmem:[%s6078_s29 + $0x231] sm:$0xff]  ;;  %v354_v3 = vld [vmem:[%s6078_s29 + $0x2e9] sm:$0xff] }
  0x57   : > { %5162 = vmatmul.msk.bf16.gmra.mxu3 %vm409_vm0, %v387_v4  ;;  %5135 = vmatmul.msk.bf16.gmra.mxu0 %vm409_vm0, %v360_v5  ;;  %v355_v4 = vld [vmem:[%s6078_s29 + $0x2f1] sm:$0xff]  ;;  %v6298_v5 = vld [vmem:[%s6078_s29 + $0xa9] sm:$0xff]  ;;  %v382_v13 = vpack.c.bf16 %v337_v2, %v336_v63 }
  0x58   : > { %v174_v2 = vld [vmem:[%s6078_s29 + $0x10] sm:$0xff] }
  0x66   : > { %5145 = vmatmul.msk.bf16.gmra.mxu1 %vm409_vm0, %v370_v16  ;;  %5154 = vmatmul.msk.bf16.gmra.mxu2 %vm409_vm0, %v379_v17  ;;  %v391_v16 = vpack.c.bf16 %v355_v4, %v354_v3  ;;  %v364_v17 = vpack.c.bf16 %v6301_v10, %v6298_v5  ;;  %v5261_v3 = vld [vmem:[%s6078_s29 + $0x30] sm:$0xff]  ;;  %v5262_v4 = vld [vmem:[%s6078_s29 + $0x40] sm:$0xff] }
  0x67   : > { %5163 = vmatmul.msk.bf16.gmra.mxu3 %vm409_vm0, %v388_v20  ;;  %5136 = vmatmul.msk.bf16.gmra.mxu0 %vm409_vm0, %v361_v21 }
  0x76   : > { %5146 = vmatmul.msk.bf16.gmra.mxu1 %vm409_vm0, %v371_v33  ;;  %5155 = vmatmul.msk.bf16.gmra.mxu2 %vm409_vm0, %v380_v34  ;;  %v173_v33 = vld [vmem:[%s6078_s29 + $0x8] sm:$0xff] }
  0x77   : > { %5164 = vmatmul.msk.bf16.gmra.mxu3 %vm409_vm0, %v389_v35  ;;  %5137 = vmatmul.msk.bf16.gmra.mxu0 %vm409_vm0, %v362_v38  ;;  %v1016_v34 = vld [vmem:[%s6078_s29 + $0x2] sm:$0xff]  ;;  %v1017_v35 = vld [vmem:[%s6078_s29 + $0xa] sm:$0xff]  ;;  %v244_v44 = vpack.c.bf16 %v173_v33, %v172_v28  ;;  %v1584_v33 = vpack.c.bf16 %v5262_v4, %v5261_v3 }
  0x78   : > { %v5259_v38 = vld [vmem:[%s6078_s29 + $0x20] sm:$0xff] }
  0x86   : > { %5147 = vmatmul.msk.bf16.gmra.mxu1 %vm409_vm0, %v372_v49  ;;  %5156 = vmatmul.msk.bf16.gmra.mxu2 %vm409_vm0, %v381_v50  ;;  %v1088_v50 = vpack.c.bf16 %v1017_v35, %v1016_v34  ;;  %v2078_v34 = vpack.c.bf16 %v6163_v51, %v6133_v37  ;;  %v1021_v37 = vld [vmem:[%s6078_s29 + $0x32] sm:$0xff]  ;;  %v5263_v51 = vld [vmem:[%s6078_s29 + $0x48] sm:$0xff] }
  0x87   : > { %5165 = vmatmul.msk.bf16.gmra.mxu3 %vm409_vm0, %v390_v53  ;;  %5138 = vmatmul.msk.bf16.gmra.mxu0 %vm409_vm0, %v363_v54  ;;  %v1583_v53 = vpack.c.bf16 %v5260_v41, %v5259_v38  ;;  %v2077_v54 = vpack.c.bf16 %v6130_v36, %v6110_v25  ;;  %v1018_v25 = vld [vmem:[%s6078_s29 + $0x12] sm:$0xff]  ;;  %v1019_v36 = vld [vmem:[%s6078_s29 + $0x22] sm:$0xff] }
  0x88   : > { %v1089_v28 = vpack.c.bf16 %v1019_v36, %v1018_v25 }
  0x93   : > { %v6305_v12 = vpop.f32.mrf.mxu1 }
  0x94   : > { %v6309_v20 = vpop.f32.mrf.mxu0 }
  0x96   : > { %5148 = vmatmul.msk.bf16.gmra.mxu1 %vm409_vm0, %v373_v11  ;;  %5157 = vmatmul.msk.bf16.gmra.mxu2 %vm409_vm0, %v382_v13 }
  0x97   : > { %5166 = vmatmul.msk.bf16.gmra.mxu3 %vm409_vm0, %v391_v16  ;;  %5139 = vmatmul.msk.bf16.gmra.mxu0 %vm409_vm0, %v364_v17  ;;  %v245_v16 = vpack.c.bf16 %v5259_v38, %v174_v2  ;;  %v5264_v2 = vld [vmem:[%s6078_s29 + $0x50] sm:$0xff] }
  0x99   : > { %v6315_v21 = vpop.f32.mrf.mxu2 }
  0x9a   : > { %7973 = vst [vmem:[#allocation3_spill] sm:$0xff] %v6315_v21  ;;  %v6317_v24 = vpop.f32.mrf.mxu3 }
  0x9b   : > { %7974 = vst [vmem:[#allocation4_spill] sm:$0xff] %v6317_v24  ;;  %v6319_v26 = vpop.f32.mrf.mxu1  ;;  %v2080_v24 = vpack.c.bf16 %v6214_v14, %v6193_v1  ;;  %v1025_v1 = vld [vmem:[%s6078_s29 + $0x62] sm:$0xff]  ;;  %v5267_v14 = vld [vmem:[%s6078_s29 + $0x70] sm:$0xff] }
  0x9c   : > { %v6321_v27 = vpop.f32.mrf.mxu0 }
  0xa1   : > { %v6329_v42 = vpop.f32.mrf.mxu2 }
  0xa2   : > { %7975 = vst [vmem:[#allocation5_spill] sm:$0xff] %v6329_v42  ;;  %v6331_v43 = vpop.f32.mrf.mxu3 }
  0xa3   : > { %7976 = vst [vmem:[#allocation6_spill] sm:$0xff] %v6331_v43  ;;  %v6333_v49 = vpop.f32.mrf.mxu1 }
  0xa4   : > { %v6337_v55 = vpop.f32.mrf.mxu0 }
  0xa6   : > { %5175 = vmatmul.msk.bf16.vlgmr.msrb.gmra.mxu1 %vm409_vm0, %v244_v44  ;;  %5223 = vmatmul.msk.bf16.vlgmr.msrb.gmra.mxu2 %vm409_vm0, %v1088_v50 }
  0xa7   : > { %5343 = vmatmul.msk.bf16.vlgmr.msrb.gmra.mxu3 %vm409_vm0, %v1583_v53  ;;  %5463 = vmatmul.msk.bf16.vlgmr.msrb.gmra.mxu0 %vm409_vm0, %v2077_v54  ;;  %v1020_v54 = vld [vmem:[%s6078_s29 + $0x2a] sm:$0xff] }
  0xa9   : > { %v6343_v56 = vpop.f32.mrf.mxu2 }
  0xaa   : > { %7977 = vst [vmem:[#allocation7_spill] sm:$0xff] %v6343_v56  ;;  %v6345_v57 = vpop.f32.mrf.mxu3 }
  0xab   : > { %7978 = vst [vmem:[#allocation8_spill] sm:$0xff] %v6345_v57  ;;  %v6347_v60 = vpop.f32.mrf.mxu1  ;;  %v5266_v57 = vld [vmem:[%s6078_s29 + $0x68] sm:$0xff] }
  0xac   : > { %v6349_v63 = vpop.f32.mrf.mxu0 }
  0xb1   : > { %v6356_v11 = vpop.f32.mrf.mxu2 }
  0xb2   : > { %7979 = vst [vmem:[#allocation9_spill] sm:$0xff] %v6356_v11  ;;  %v6358_v13 = vpop.f32.mrf.mxu3 }
  0xb3   : > { %7980 = vst [vmem:[#allocation10_spill] sm:$0xff] %v6358_v13  ;;  %v6360_v17 = vpop.f32.mrf.mxu1 }
  0xb4   : > { %v6364_v35 = vpop.f32.mrf.mxu0 }
  0xb6   : > { %5176 = vmatmul.msk.bf16.gmra.mxu1 %vm409_vm0, %v245_v16  ;;  %5224 = vmatmul.msk.bf16.gmra.mxu2 %vm409_vm0, %v1089_v28  ;;  %v246_v16 = vpack.c.bf16 %v5261_v3, %v5260_v41 }
  0xb7   : > { %5344 = vmatmul.msk.bf16.gmra.mxu3 %vm409_vm0, %v1584_v33  ;;  %5464 = vmatmul.msk.bf16.gmra.mxu0 %vm409_vm0, %v2078_v34  ;;  %v1090_v33 = vpack.c.bf16 %v1021_v37, %v1020_v54  ;;  %v1585_v34 = vpack.c.bf16 %v5264_v2, %v5263_v51  ;;  %v1022_v37 = vld [vmem:[%s6078_s29 + $0x42] sm:$0xff] }
  0xb9   : > { %v6370_v38 = vpop.f32.mrf.mxu2 }
  0xba   : > { %7981 = vst [vmem:[#allocation11_spill] sm:$0xff] %v6370_v38  ;;  %v6372_v44 = vpop.f32.mrf.mxu3 }
  0xbb   : > { %7982 = vst [vmem:[#allocation12_spill] sm:$0xff] %v6372_v44  ;;  %v6374_v50 = vpop.f32.mrf.mxu1  ;;  %v2079_v44 = vpack.c.bf16 %v6190_v0, %v6166_v52  ;;  %v1023_v52 = vld [vmem:[%s6078_s29 + $0x4a] sm:$0xff]  ;;  %v5265_v0 = vld [vmem:[%s6078_s29 + $0x60] sm:$0xff] }
  0xbc   : > { %v6376_v53 = vpop.f32.mrf.mxu0 }
  0xc1   : > { %v6382_v25 = vpop.f32.mrf.mxu2 }
  0xc2   : > { %7983 = vst [vmem:[#allocation13_spill] sm:$0xff] %v6382_v25  ;;  %v6384_v36 = vpop.f32.mrf.mxu3 }
  0xc3   : > { %7984 = vst [vmem:[#allocation14_spill] sm:$0xff] %v6384_v36  ;;  %v6386_v28 = vpop.f32.mrf.mxu1 }
  0xc4   : > { %v6390_v13 = vpop.f32.mrf.mxu0 }
  0xc6   : > { %5177 = vmatmul.msk.bf16.gmra.mxu1 %vm409_vm0, %v246_v16  ;;  %5225 = vmatmul.msk.bf16.gmra.mxu2 %vm409_vm0, %v1090_v33  ;;  %v247_v33 = vpack.c.bf16 %v5263_v51, %v5262_v4 }
  0xc7   : > { %5345 = vmatmul.msk.bf16.gmra.mxu3 %vm409_vm0, %v1585_v34  ;;  %5465 = vmatmul.msk.bf16.gmra.mxu0 %vm409_vm0, %v2079_v44  ;;  %v1091_v34 = vpack.c.bf16 %v1023_v52, %v1022_v37  ;;  %v1024_v52 = vld [vmem:[%s6078_s29 + $0x52] sm:$0xff] }
  0xc9   : > { %v6396_v41 = vpop.f32.mrf.mxu2 }
  0xca   : > { %7985 = vst [vmem:[#allocation15_spill] sm:$0xff] %v6396_v41  ;;  %v6398_v3 = vpop.f32.mrf.mxu3 }
  0xcb   : > { %7986 = vst [vmem:[#allocation16_spill] sm:$0xff] %v6398_v3  ;;  %v6400_v36 = vpop.f32.mrf.mxu1  ;;  %v1586_v3 = vpack.c.bf16 %v5266_v57, %v5265_v0 }
  0xcc   : > { %v6402_v54 = vpop.f32.mrf.mxu0 }
  0xd1   : > { %v6408_v43 = vpop.f32.mrf.mxu2 }
  0xd2   : > { %7987 = vst [vmem:[#allocation17_spill] sm:$0xff] %v6408_v43  ;;  %v6410_v16 = vpop.f32.mrf.mxu3  ;;  %v5268_v43 = vld [vmem:[%s6078_s29 + $0x80] sm:$0xff] }
  0xd3   : > { %7988 = vst [vmem:[#allocation18_spill] sm:$0xff] %v6410_v16  ;;  %v6412_v44 = vpop.f32.mrf.mxu1 }
  0xd4   : > { %v6416_v41 = vpop.f32.mrf.mxu0 }
  0xd6   : > { %5178 = vmatmul.msk.bf16.gmra.mxu1 %vm409_vm0, %v247_v33  ;;  %5226 = vmatmul.msk.bf16.gmra.mxu2 %vm409_vm0, %v1091_v34  ;;  %v1092_v34 = vpack.c.bf16 %v1025_v1, %v1024_v52  ;;  %v1026_v1 = vld [vmem:[%s6078_s29 + $0x6a] sm:$0xff] }
  0xd7   : > { %5346 = vmatmul.msk.bf16.gmra.mxu3 %vm409_vm0, %v1586_v3  ;;  %5466 = vmatmul.msk.bf16.gmra.mxu0 %vm409_vm0, %v2080_v24  ;;  %v248_v3 = vpack.c.bf16 %v5265_v0, %v5264_v2 }
  0xd9   : > { %v6422_v4 = vpop.f32.mrf.mxu2 }
  0xda   : > { %7989 = vst [vmem:[#allocation19_spill] sm:$0xff] %v6422_v4  ;;  %v6424_v51 = vpop.f32.mrf.mxu3  ;;  %v2081_v4 = vpack.c.bf16 %v6238_v29, %v6217_v15  ;;  %v1027_v15 = vld [vmem:[%s6078_s29 + $0x72] sm:$0xff]  ;;  %v5269_v29 = vld [vmem:[%s6078_s29 + $0x88] sm:$0xff] }
  0xdb   : > { %7990 = vst [vmem:[#allocation20_spill] sm:$0xff] %v6424_v51  ;;  %v6426_v16 = vpop.f32.mrf.mxu1  ;;  %v1587_v51 = vpack.c.bf16 %v5268_v43, %v5267_v14 }
  0xdc   : > { %7991 = vst [vmem:[#allocation21_spill] sm:$0xff] %v6426_v16  ;;  %v6428_v37 = vpop.f32.mrf.mxu0 }
  0xe1   : > { %v6434_v25 = vpop.f32.mrf.mxu2 }
  0xe2   : > { %7992 = vst [vmem:[#allocation22_spill] sm:$0xff] %v6434_v25  ;;  %v6436_v33 = vpop.f32.mrf.mxu3  ;;  %v5270_v25 = vld [vmem:[%s6078_s29 + $0x90] sm:$0xff] }
  0xe3   : > { %7993 = vst [vmem:[#allocation23_spill] sm:$0xff] %v6436_v33  ;;  %v6438_v24 = vpop.f32.mrf.mxu1 }
  0xe4   : > { %7994 = vst [vmem:[#allocation24_spill] sm:$0xff] %v6438_v24  ;;  %v6442_v38 = vpop.f32.mrf.mxu0 }
  0xe6   : > { %5179 = vmatmul.msk.bf16.gmra.mxu1 %vm409_vm0, %v248_v3  ;;  %5227 = vmatmul.msk.bf16.gmra.mxu2 %vm409_vm0, %v1092_v34  ;;  %v1093_v34 = vpack.c.bf16 %v1027_v15, %v1026_v1  ;;  %v1028_v15 = vld [vmem:[%s6078_s29 + $0x82] sm:$0xff] }
  0xe7   : > { %5347 = vmatmul.msk.bf16.gmra.mxu3 %vm409_vm0, %v1587_v51  ;;  %5467 = vmatmul.msk.bf16.gmra.mxu0 %vm409_vm0, %v2081_v4  ;;  %v249_v51 = vpack.c.bf16 %v5267_v14, %v5266_v57 }
  0xe9   : > { %v6448_v2 = vpop.f32.mrf.mxu2 }
  0xea   : > { %7995 = vst [vmem:[#allocation25_spill] sm:$0xff] %v6448_v2  ;;  %v6450_v0 = vpop.f32.mrf.mxu3  ;;  %v2082_v2 = vpack.c.bf16 %v6262_v47, %v6241_v32  ;;  %v1029_v32 = vld [vmem:[%s6078_s29 + $0x8a] sm:$0xff]  ;;  %v5271_v47 = vld [vmem:[%s6078_s29 + $0xa0] sm:$0xff] }
  0xeb   : > { %7996 = vst [vmem:[#allocation26_spill] sm:$0xff] %v6450_v0  ;;  %v6452_v33 = vpop.f32.mrf.mxu1  ;;  %v1588_v0 = vpack.c.bf16 %v5270_v25, %v5269_v29 }
  0xec   : > { %7997 = vst [vmem:[#allocation27_spill] sm:$0xff] %v6452_v33  ;;  %v6454_v52 = vpop.f32.mrf.mxu0  ;;  %v5277_v33 = vld [vmem:[%s6078_s29 + $0xe0] sm:$0xff] }
  0xf1   : > { %v6460_v11 = vpop.f32.mrf.mxu2 }
  0xf2   : > { %7998 = vst [vmem:[#allocation28_spill] sm:$0xff] %v6460_v11  ;;  %v6462_v3 = vpop.f32.mrf.mxu3  ;;  %v5272_v11 = vld [vmem:[%s6078_s29 + $0xa8] sm:$0xff] }
  0xf3   : > { %7999 = vst [vmem:[#allocation29_spill] sm:$0xff] %v6462_v3  ;;  %v6464_v4 = vpop.f32.mrf.mxu1 }
  0xf4   : > { %8000 = vst [vmem:[#allocation30_spill] sm:$0xff] %v6464_v4  ;;  %v6468_v56 = vpop.f32.mrf.mxu0  ;;  %v1035_v4 = vld [vmem:[%s6078_s29 + $0xca] sm:$0xff] }
  0xf6   : > { %5180 = vmatmul.msk.bf16.gmra.mxu1 %vm409_vm0, %v249_v51  ;;  %5228 = vmatmul.msk.bf16.gmra.mxu2 %vm409_vm0, %v1093_v34  ;;  %v1094_v34 = vpack.c.bf16 %v1029_v32, %v1028_v15  ;;  %v1030_v32 = vld [vmem:[%s6078_s29 + $0x92] sm:$0xff] }
  0xf7   : > { %5348 = vmatmul.msk.bf16.gmra.mxu3 %vm409_vm0, %v1588_v0  ;;  %5468 = vmatmul.msk.bf16.gmra.mxu0 %vm409_vm0, %v2082_v2  ;;  %v250_v0 = vpack.c.bf16 %v5269_v29, %v5268_v43 }
  0xf9   : > { %v6474_v57 = vpop.f32.mrf.mxu2 }
  0xfa   : > { %8001 = vst [vmem:[#allocation31_spill] sm:$0xff] %v6474_v57  ;;  %v6476_v14 = vpop.f32.mrf.mxu3  ;;  %v2083_v57 = vpack.c.bf16 %v6298_v5, %v6265_v48  ;;  %v1031_v48 = vld [vmem:[%s6078_s29 + $0xa2] sm:$0xff]  ;;  %v5273_v5 = vld [vmem:[%s6078_s29 + $0xb0] sm:$0xff] }
  0xfb   : > { %8002 = vst [vmem:[#allocation32_spill] sm:$0xff] %v6476_v14  ;;  %v6478_v3 = vpop.f32.mrf.mxu1  ;;  %v1589_v14 = vpack.c.bf16 %v5272_v11, %v5271_v47 }
  0xfc   : > { %8003 = vst [vmem:[#allocation33_spill] sm:$0xff] %v6478_v3  ;;  %v6480_v1 = vpop.f32.mrf.mxu0 }
 0x101   : > { %v6486_v42 = vpop.f32.mrf.mxu2 }
 0x102   : > { %8004 = vst [vmem:[#allocation34_spill] sm:$0xff] %v6486_v42  ;;  %v6488_v51 = vpop.f32.mrf.mxu3  ;;  %v5274_v42 = vld [vmem:[%s6078_s29 + $0xc0] sm:$0xff] }
 0x103   : > { %8005 = vst [vmem:[#allocation35_spill] sm:$0xff] %v6488_v51  ;;  %v6490_v2 = vpop.f32.mrf.mxu1 }
 0x104   : > { %8006 = vst [vmem:[#allocation36_spill] sm:$0xff] %v6490_v2  ;;  %v6494_v21 = vpop.f32.mrf.mxu0 }
 0x106   : > { %5181 = vmatmul.msk.bf16.gmra.mxu1 %vm409_vm0, %v250_v0  ;;  %5229 = vmatmul.msk.bf16.gmra.mxu2 %vm409_vm0, %v1094_v34  ;;  %v1095_v34 = vpack.c.bf16 %v1031_v48, %v1030_v32  ;;  %v1032_v48 = vld [vmem:[%s6078_s29 + $0xaa] sm:$0xff] }
 0x107   : > { %5349 = vmatmul.msk.bf16.gmra.mxu3 %vm409_vm0, %v1589_v14  ;;  %5469 = vmatmul.msk.bf16.gmra.mxu0 %vm409_vm0, %v2083_v57  ;;  %v251_v14 = vpack.c.bf16 %v5271_v47, %v5270_v25 }
 0x109   : > { %v6500_v43 = vpop.f32.mrf.mxu2 }
 0x10a   : > { %8007 = vst [vmem:[#allocation37_spill] sm:$0xff] %v6500_v43  ;;  %v6502_v29 = vpop.f32.mrf.mxu3  ;;  %v2084_v43 = vpack.c.bf16 %v6081_v6, %v6301_v10  ;;  %v1033_v6 = vld [vmem:[%s6078_s29 + $0xb2] sm:$0xff]  ;;  %v5275_v10 = vld [vmem:[%s6078_s29 + $0xc8] sm:$0xff] }
 0x10b   : > { %8008 = vst [vmem:[#allocation38_spill] sm:$0xff] %v6502_v29  ;;  %v6504_v51 = vpop.f32.mrf.mxu1  ;;  %v1590_v29 = vpack.c.bf16 %v5274_v42, %v5273_v5 }
 0x10c   : > { %8009 = vst [vmem:[#allocation39_spill] sm:$0xff] %v6504_v51  ;;  %v6506_v15 = vpop.f32.mrf.mxu0 }
 0x111   : > { %v6512_v2 = vpop.f32.mrf.mxu2 }
 0x112   : > { %8010 = vst [vmem:[#allocation40_spill] sm:$0xff] %v6512_v2  ;;  %v6514_v0 = vpop.f32.mrf.mxu3  ;;  %v6538_v2 = vld [vmem:[%s6078_s29 + $0xd0] sm:$0xff] }
 0x113   : > { %8011 = vst [vmem:[#allocation41_spill] sm:$0xff] %v6514_v0  ;;  %v6516_v57 = vpop.f32.mrf.mxu1 }
 0x114   : > { %8012 = vst [vmem:[#allocation42_spill] sm:$0xff] %v6516_v57  ;;  %v6520_v51 = vpop.f32.mrf.mxu0 }
 0x116   : > { %5182 = vmatmul.msk.bf16.gmra.mxu1 %vm409_vm0, %v251_v14  ;;  %5230 = vmatmul.msk.bf16.gmra.mxu2 %vm409_vm0, %v1095_v34 }
 0x117   : > { %5350 = vmatmul.msk.bf16.gmra.mxu3 %vm409_vm0, %v1590_v29  ;;  %5470 = vmatmul.msk.bf16.gmra.mxu0 %vm409_vm0, %v2084_v43  ;;  %v252_v29 = vpack.c.bf16 %v5273_v5, %v5272_v11  ;;  %v1096_v43 = vpack.c.bf16 %v1033_v6, %v1032_v48 }
 0x119   : > { %v6526_v25 = vpop.f32.mrf.mxu2 }
 0x11a   : > { %8013 = vst [vmem:[#allocation43_spill] sm:$0xff] %v6526_v25  ;;  %v6528_v47 = vpop.f32.mrf.mxu3  ;;  %v1591_v25 = vpack.c.bf16 %v6538_v2, %v5275_v10 }
 0x11b   : > { %8014 = vst [vmem:[#allocation44_spill] sm:$0xff] %v6528_v47  ;;  %v6530_v0 = vpop.f32.mrf.mxu1  ;;  %v2085_v47 = vpack.c.bf16 %v6099_v18, %v6084_v7  ;;  %v1034_v7 = vld [vmem:[%s6078_s29 + $0xc2] sm:$0xff] }
 0x11c   : > { %8015 = vst [vmem:[#allocation45_spill] sm:$0xff] %v6530_v0  ;;  %v6532_v32 = vpop.f32.mrf.mxu0 }
 0x121   : > { %v6540_v14 = vpop.f32.mrf.mxu2 }
 0x122   : > { %8016 = vst [vmem:[#allocation46_spill] sm:$0xff] %v6540_v14  ;;  %v6542_v34 = vpop.f32.mrf.mxu3 }
 0x123   : > { %8017 = vst [vmem:[#allocation47_spill] sm:$0xff] %v6542_v34  ;;  %v836_v57 = vpop.f32.mrf.mxu1 }
 0x124   : > { %v2247_v0 = vpop.f32.mrf.mxu0  ;;  %v837_v11 = vadd.f32 %v836_v57, %v6309_v20  ;;  %v1097_v57 = vpack.c.bf16 %v1035_v4, %v1034_v7  ;;  %v5279_v7 = vld [vmem:[%s6078_s29 + $0xf0] sm:$0xff] }
 0x126   : > { %5183 = vmatmul.msk.bf16.gmra.mxu1 %vm409_vm0, %v252_v29  ;;  %5231 = vmatmul.msk.bf16.gmra.mxu2 %vm409_vm0, %v1096_v43  ;;  %v6558_v29 = vld [vmem:[%s6078_s29 + $0xe8] sm:$0xff] }
 0x127   : > { %5351 = vmatmul.msk.bf16.gmra.mxu3 %vm409_vm0, %v1591_v25  ;;  %5471 = vmatmul.msk.bf16.gmra.mxu0 %vm409_vm0, %v2085_v47  ;;  %v253_v47 = vpack.c.bf16 %v5275_v10, %v5274_v42 }
 0x129   : > { %v1258_v5 = vpop.f32.mrf.mxu2 }
 0x12a   : > { %v1753_v48 = vpop.f32.mrf.mxu3  ;;  %v1438_v6 = vadd.f32 %v1258_v5, %v837_v11  ;;  %v1592_v11 = vpack.c.bf16 %v6558_v29, %v5277_v33  ;;  %v2086_v5 = vpack.c.bf16 %v6120_v30, %v6102_v19 }
 0x12b   : > { %v838_v34 = vpop.f32.mrf.mxu1 }
 0x12c   : > { %v1933_v14 = vadd.f32 %v1753_v48, %v1438_v6  ;;  %v2249_v3 = vpop.f32.mrf.mxu0  ;;  %v839_v43 = vadd.f32 %v838_v34, %v6321_v27  ;;  %v1036_v34 = vld [vmem:[%s6078_s29 + $0xd2] sm:$0xff]  ;;  %v1037_v6 = vld [vmem:[%s6078_s29 + $0xe2] sm:$0xff] }
 0x12e   : > { %v6553_v18 = vadd.f32 %v2247_v0, %v1933_v14 }
 0x131   : > { %v1260_v25 = vpop.f32.mrf.mxu2 }
 0x132   : > { %v1755_v24 = vpop.f32.mrf.mxu3  ;;  %v1439_v16 = vadd.f32 %v1260_v25, %v839_v43  ;;  %v6577_v43 = vld [vmem:[%s6078_s29 + $0x100] sm:$0xff] }
 0x133   : > { %v841_v20 = vpop.f32.mrf.mxu1 }
 0x134   : > { %v1934_v0 = vadd.f32 %v1755_v24, %v1439_v16  ;;  %v2252_v14 = vpop.f32.mrf.mxu0  ;;  %v842_v42 = vadd.f32 %v841_v20, %v6337_v55 }
 0x136   : > { %5184 = vmatmul.msk.bf16.gmra.mxu1 %vm409_vm0, %v253_v47  ;;  %5232 = vmatmul.msk.bf16.gmra.mxu2 %vm409_vm0, %v1097_v57  ;;  %v6567_v27 = vadd.f32 %v2249_v3, %v1934_v0  ;;  %v254_v57 = vpack.c.bf16 %v5277_v33, %v6538_v2  ;;  %v2087_v0 = vpack.c.bf16 %v6153_v45, %v6123_v31 }
 0x137   : > { %5352 = vmatmul.msk.bf16.gmra.mxu3 %vm409_vm0, %v1592_v11  ;;  %5472 = vmatmul.msk.bf16.gmra.mxu0 %vm409_vm0, %v2086_v5  ;;  %v1098_v11 = vpack.c.bf16 %v1037_v6, %v1036_v34  ;;  %v1593_v5 = vpack.c.bf16 %v6577_v43, %v5279_v7  ;;  %v1039_v34 = vld [vmem:[%s6078_s29 + $0xf2] sm:$0xff]  ;;  %v5281_v6 = vld [vmem:[%s6078_s29 + $0x108] sm:$0xff] }
 0x139   : > { %v1263_v4 = vpop.f32.mrf.mxu2 }
 0x13a   : > { %v1758_v10 = vpop.f32.mrf.mxu3  ;;  %v1440_v19 = vadd.f32 %v1263_v4, %v842_v42 }
 0x13b   : > { %v843_v30 = vpop.f32.mrf.mxu1 }
 0x13c   : > { %v1935_v16 = vadd.f32 %v1758_v10, %v1440_v19  ;;  %v2254_v24 = vpop.f32.mrf.mxu0  ;;  %v844_v3 = vadd.f32 %v843_v30, %v6349_v63  ;;  %v1038_v30 = vld [vmem:[%s6078_s29 + $0xea] sm:$0xff] }
 0x13e   : > { %v6572_v48 = vadd.f32 %v2252_v14, %v1935_v16 }
 0x141   : > { %v1265_v25 = vpop.f32.mrf.mxu2 }
 0x142   : > { %v1760_v47 = vpop.f32.mrf.mxu3  ;;  %v1441_v55 = vadd.f32 %v1265_v25, %v844_v3  ;;  %v6597_v3 = vld [vmem:[%s6078_s29 + $0x110] sm:$0xff] }
 0x143   : > { %v846_v20 = vpop.f32.mrf.mxu1 }
 0x144   : > { %v1936_v14 = vadd.f32 %v1760_v47, %v1441_v55  ;;  %v2257_v42 = vpop.f32.mrf.mxu0  ;;  %v847_v33 = vadd.f32 %v846_v20, %v6364_v35  ;;  %v1099_v20 = vpack.c.bf16 %v1039_v34, %v1038_v30  ;;  %v6617_v30 = vld [vmem:[%s6078_s29 + $0x128] sm:$0xff] }
 0x146   : > { %5185 = vmatmul.msk.bf16.gmra.mxu1 %vm409_vm0, %v254_v57  ;;  %5233 = vmatmul.msk.bf16.gmra.mxu2 %vm409_vm0, %v1098_v11  ;;  %v6587_v63 = vadd.f32 %v2254_v24, %v1936_v14  ;;  %v255_v57 = vpack.c.bf16 %v5279_v7, %v6558_v29  ;;  %v1594_v11 = vpack.c.bf16 %v6597_v3, %v5281_v6 }
 0x147   : > { %5353 = vmatmul.msk.bf16.gmra.mxu3 %vm409_vm0, %v1593_v5  ;;  %5473 = vmatmul.msk.bf16.gmra.mxu0 %vm409_vm0, %v2087_v0  ;;  %v2088_v5 = vpack.c.bf16 %v6180_v58, %v6156_v46 }
 0x149   : > { %v1268_v2 = vpop.f32.mrf.mxu2 }
 0x14a   : > { %v1763_v4 = vpop.f32.mrf.mxu3  ;;  %v1442_v31 = vadd.f32 %v1268_v2, %v847_v33 }
 0x14b   : > { %v848_v45 = vpop.f32.mrf.mxu1 }
 0x14c   : > { %v1937_v10 = vadd.f32 %v1763_v4, %v1442_v31  ;;  %v2259_v19 = vpop.f32.mrf.mxu0  ;;  %v849_v24 = vadd.f32 %v848_v45, %v6376_v53  ;;  %v1040_v4 = vld [vmem:[%s6078_s29 + $0x102] sm:$0xff]  ;;  %v1041_v45 = vld [vmem:[%s6078_s29 + $0x10a] sm:$0xff] }
 0x14e   : > { %v6592_v16 = vadd.f32 %v2257_v42, %v1937_v10  ;;  %v5283_v10 = vld [vmem:[%s6078_s29 + $0x120] sm:$0xff] }
 0x151   : > { %v1270_v25 = vpop.f32.mrf.mxu2 }
 0x152   : > { %v1765_v47 = vpop.f32.mrf.mxu3  ;;  %v1443_v35 = vadd.f32 %v1270_v25, %v849_v24  ;;  %v256_v25 = vpack.c.bf16 %v5281_v6, %v6577_v43 }
 0x153   : > { %v851_v55 = vpop.f32.mrf.mxu1 }
 0x154   : > { %v1938_v0 = vadd.f32 %v1765_v47, %v1443_v35  ;;  %v2262_v14 = vpop.f32.mrf.mxu0  ;;  %v852_v29 = vadd.f32 %v851_v55, %v6390_v13  ;;  %v1595_v35 = vpack.c.bf16 %v6617_v30, %v5283_v10  ;;  %v2089_v55 = vpack.c.bf16 %v6204_v8, %v6183_v59 }
 0x156   : > { %5186 = vmatmul.msk.bf16.gmra.mxu1 %vm409_vm0, %v255_v57  ;;  %5234 = vmatmul.msk.bf16.gmra.mxu2 %vm409_vm0, %v1099_v20  ;;  %v6607_v53 = vadd.f32 %v2259_v19, %v1938_v0  ;;  %v1100_v57 = vpack.c.bf16 %v1041_v45, %v1040_v4  ;;  %v257_v45 = vpack.c.bf16 %v5283_v10, %v6597_v3 }
 0x157   : > { %5354 = vmatmul.msk.bf16.gmra.mxu3 %vm409_vm0, %v1594_v11  ;;  %5474 = vmatmul.msk.bf16.gmra.mxu0 %vm409_vm0, %v2088_v5 }
 0x159   : > { %v1273_v7 = vpop.f32.mrf.mxu2 }
 0x15a   : > { %v1768_v42 = vpop.f32.mrf.mxu3  ;;  %v1444_v46 = vadd.f32 %v1273_v7, %v852_v29  ;;  %v1042_v29 = vld [vmem:[%s6078_s29 + $0x112] sm:$0xff] }
 0x15b   : > { %v853_v58 = vpop.f32.mrf.mxu1 }
 0x15c   : > { %v1939_v33 = vadd.f32 %v1768_v42, %v1444_v46  ;;  %v2264_v2 = vpop.f32.mrf.mxu0  ;;  %v854_v19 = vadd.f32 %v853_v58, %v6402_v54  ;;  %v1043_v42 = vld [vmem:[%s6078_s29 + $0x122] sm:$0xff]  ;;  %v5285_v46 = vld [vmem:[%s6078_s29 + $0x130] sm:$0xff] }
 0x15d   : > { %v6637_v58 = vld [vmem:[%s6078_s29 + $0x140] sm:$0xff] }
 0x15e   : > { %v6612_v31 = vadd.f32 %v2262_v14, %v1939_v33 }
 0x161   : > { %v1275_v34 = vpop.f32.mrf.mxu2 }
 0x162   : > { %v1770_v24 = vpop.f32.mrf.mxu3  ;;  %v1445_v13 = vadd.f32 %v1275_v34, %v854_v19  ;;  %v1101_v34 = vpack.c.bf16 %v1043_v42, %v1042_v29 }
 0x163   : > { %v856_v47 = vpop.f32.mrf.mxu1 }
 0x164   : > { %v1940_v20 = vadd.f32 %v1770_v24, %v1445_v13  ;;  %v2267_v11 = vpop.f32.mrf.mxu0  ;;  %v857_v43 = vadd.f32 %v856_v47, %v6416_v41  ;;  %v1596_v24 = vpack.c.bf16 %v6637_v58, %v5285_v46 }
 0x166   : > { %5187 = vmatmul.msk.bf16.gmra.mxu1 %vm409_vm0, %v256_v25  ;;  %5235 = vmatmul.msk.bf16.gmra.mxu2 %vm409_vm0, %v1100_v57  ;;  %v6627_v54 = vadd.f32 %v2264_v2, %v1940_v20  ;;  %v2090_v25 = vpack.c.bf16 %v6228_v22, %v6207_v9  ;;  %v1044_v20 = vld [vmem:[%s6078_s29 + $0x12a] sm:$0xff] }
 0x167   : > { %5355 = vmatmul.msk.bf16.gmra.mxu3 %vm409_vm0, %v1595_v35  ;;  %5475 = vmatmul.msk.bf16.gmra.mxu0 %vm409_vm0, %v2089_v55 }
 0x169   : > { %v1278_v6 = vpop.f32.mrf.mxu2 }
 0x16a   : > { %v1773_v5 = vpop.f32.mrf.mxu3  ;;  %v1446_v59 = vadd.f32 %v1278_v6, %v857_v43  ;;  %v1045_v43 = vld [vmem:[%s6078_s29 + $0x132] sm:$0xff]  ;;  %v5287_v6 = vld [vmem:[%s6078_s29 + $0x148] sm:$0xff] }
 0x16b   : > { %v858_v8 = vpop.f32.mrf.mxu1  ;;  %v1102_v42 = vpack.c.bf16 %v1045_v43, %v1044_v20  ;;  %v2092_v43 = vpack.c.bf16 %v6288_v61, %v6255_v40 }
 0x16c   : > { %v1941_v0 = vadd.f32 %v1773_v5, %v1446_v59  ;;  %v2269_v14 = vpop.f32.mrf.mxu0  ;;  %v859_v33 = vadd.f32 %v858_v8, %v6428_v37  ;;  %v6657_v5 = vld [vmem:[%s6078_s29 + $0x150] sm:$0xff] }
 0x16e   : > { %v6632_v7 = vadd.f32 %v2267_v11, %v1941_v0 }
 0x171   : > { %v1280_v2 = vpop.f32.mrf.mxu2 }
 0x172   : > { %v1775_v4 = vpop.f32.mrf.mxu3  ;;  %v1447_v41 = vadd.f32 %v1280_v2, %v859_v33  ;;  %v1597_v33 = vpack.c.bf16 %v6657_v5, %v5287_v6  ;;  %v2091_v2 = vpack.c.bf16 %v6252_v39, %v6231_v23 }
 0x173   : > { %v861_v19 = vpop.f32.mrf.mxu1 }
 0x174   : > { %v1942_v13 = vadd.f32 %v1775_v4, %v1447_v41  ;;  %v2272_v47 = vpop.f32.mrf.mxu0  ;;  %v862_v3 = vadd.f32 %v861_v19, %v6442_v38 }
 0x176   : > { %5188 = vmatmul.msk.bf16.gmra.mxu1 %vm409_vm0, %v257_v45  ;;  %5236 = vmatmul.msk.bf16.gmra.mxu2 %vm409_vm0, %v1101_v34  ;;  %v6647_v37 = vadd.f32 %v2269_v14, %v1942_v13  ;;  %v258_v14 = vpack.c.bf16 %v5285_v46, %v6617_v30  ;;  %v1047_v13 = vld [vmem:[%s6078_s29 + $0x14a] sm:$0xff] }
 0x177   : > { %5356 = vmatmul.msk.bf16.gmra.mxu3 %vm409_vm0, %v1596_v24  ;;  %5476 = vmatmul.msk.bf16.gmra.mxu0 %vm409_vm0, %v2090_v25  ;;  %v1046_v24 = vld [vmem:[%s6078_s29 + $0x142] sm:$0xff] }
 0x179   : > { %v1283_v10 = vpop.f32.mrf.mxu2 }
 0x17a   : > { %v1778_v57 = vpop.f32.mrf.mxu3  ;;  %v1448_v9 = vadd.f32 %v1283_v10, %v862_v3  ;;  %v6677_v3 = vld [vmem:[%s6078_s29 + $0x168] sm:$0xff] }
 0x17b   : > { %v863_v22 = vpop.f32.mrf.mxu1 }
 0x17c   : > { %v1943_v35 = vadd.f32 %v1778_v57, %v1448_v9  ;;  %v2274_v55 = vpop.f32.mrf.mxu0  ;;  %v864_v59 = vadd.f32 %v863_v22, %v6454_v52  ;;  %v259_v22 = vpack.c.bf16 %v5287_v6, %v6637_v58 }
 0x17e   : > { %v6652_v11 = vadd.f32 %v2272_v47, %v1943_v35  ;;  %v5289_v47 = vld [vmem:[%s6078_s29 + $0x160] sm:$0xff] }
 0x17f   : > { %v1598_v20 = vpack.c.bf16 %v6677_v3, %v5289_v47 }
 0x181   : > { %v1285_v8 = vpop.f32.mrf.mxu2 }
 0x182   : > { %v1780_v0 = vpop.f32.mrf.mxu3  ;;  %v1449_v38 = vadd.f32 %v1285_v8, %v864_v59 }
 0x183   : > { %v866_v29 = vpop.f32.mrf.mxu1 }
 0x184   : > { %v1944_v4 = vadd.f32 %v1780_v0, %v1449_v38  ;;  %v2277_v45 = vpop.f32.mrf.mxu0  ;;  %v867_v30 = vadd.f32 %v866_v29, %v6468_v56  ;;  %v1048_v29 = vld [vmem:[%s6078_s29 + $0x152] sm:$0xff] }
 0x186   : > { %5189 = vmatmul.msk.bf16.gmra.mxu1 %vm409_vm0, %v258_v14  ;;  %5237 = vmatmul.msk.bf16.gmra.mxu2 %vm409_vm0, %v1102_v42  ;;  %v6667_v52 = vadd.f32 %v2274_v55, %v1944_v4  ;;  %v1103_v55 = vpack.c.bf16 %v1047_v13, %v1046_v24  ;;  %v6697_v4 = vld [vmem:[%s6078_s29 + $0x180] sm:$0xff] }
 0x187   : > { %5357 = vmatmul.msk.bf16.gmra.mxu3 %vm409_vm0, %v1597_v33  ;;  %5477 = vmatmul.msk.bf16.gmra.mxu0 %vm409_vm0, %v2091_v2  ;;  %v1049_v33 = vld [vmem:[%s6078_s29 + $0x162] sm:$0xff]  ;;  %v5291_v2 = vld [vmem:[%s6078_s29 + $0x170] sm:$0xff] }
 0x189   : > { %v1288_v46 = vpop.f32.mrf.mxu2 }
 0x18a   : > { %v1783_v41 = vpop.f32.mrf.mxu3  ;;  %v1450_v23 = vadd.f32 %v1288_v46, %v867_v30  ;;  %v5412_v30 = vld [vmem:[%s6078_s29 + $0x181] sm:$0xff] }
 0x18b   : > { %v868_v39 = vpop.f32.mrf.mxu1  ;;  %v2093_v24 = vpack.c.bf16 %v5412_v30, %v6291_v62  ;;  %v5995_v62 = vld [vmem:[%s7970_s1 + $0x70] sm:$0xff] }
 0x18c   : > { %v1945_v19 = vadd.f32 %v1783_v41, %v1450_v23  ;;  %v2279_v34 = vpop.f32.mrf.mxu0  ;;  %v869_v10 = vadd.f32 %v868_v39, %v6480_v1  ;;  %3728 = vmatpush.bf16.msra.mxu3 %v5995_v62  ;;  %v1053_v62 = vld [vmem:[%s6078_s29 + $0x18a] sm:$0xff] }
 0x18e   : > { %v6672_v25 = vadd.f32 %v2277_v45, %v1945_v19  ;;  %v1104_v19 = vpack.c.bf16 %v1049_v33, %v1048_v29  ;;  %v261_v29 = vpack.c.bf16 %v5291_v2, %v6677_v3 }
 0x191   : > { %v1290_v57 = vpop.f32.mrf.mxu2 }
 0x192   : > { %v1785_v9 = vpop.f32.mrf.mxu3  ;;  %v1451_v56 = vadd.f32 %v1290_v57, %v869_v10 }
 0x193   : > { %v871_v35 = vpop.f32.mrf.mxu1 }
 0x194   : > { %v1946_v59 = vadd.f32 %v1785_v9, %v1451_v56  ;;  %v2282_v8 = vpop.f32.mrf.mxu0  ;;  %v872_v58 = vadd.f32 %v871_v35, %v6494_v21  ;;  %v260_v21 = vpack.c.bf16 %v5289_v47, %v6657_v5 }
 0x196   : > { %5190 = vmatmul.msk.bf16.gmra.mxu1 %vm409_vm0, %v259_v22  ;;  %5238 = vmatmul.msk.bf16.gmra.mxu2 %vm409_vm0, %v1103_v55  ;;  %v6687_v1 = vadd.f32 %v2279_v34, %v1946_v59  ;;  %v1599_v34 = vpack.c.bf16 %v6697_v4, %v5291_v2 }
 0x197   : > { %5358 = vmatmul.msk.bf16.gmra.mxu3 %vm409_vm0, %v1598_v20  ;;  %5478 = vmatmul.msk.bf16.gmra.mxu0 %vm409_vm0, %v2092_v43  ;;  %v5991_v20 = vld [vmem:[%s7970_s1 + $0x50] sm:$0xff] }
 0x198   : > { %v1050_v43 = vld [vmem:[%s6078_s29 + $0x16a] sm:$0xff]  ;;  %2739 = vmatpush.bf16.msra.mxu1 %v5991_v20 }
 0x199   : > { %v1293_v6 = vpop.f32.mrf.mxu2 }
 0x19a   : > { %v1788_v40 = vpop.f32.mrf.mxu3  ;;  %v1452_v61 = vadd.f32 %v1293_v6, %v872_v58  ;;  %v5293_v58 = vld [vmem:[%s6078_s29 + $0x188] sm:$0xff]  ;;  %v6729_v6 = vld [vmem:[%s6078_s29 + $0x190] sm:$0xff] }
 0x19b   : > { %v873_v0 = vpop.f32.mrf.mxu1 }
 0x19c   : > { %v1947_v14 = vadd.f32 %v1788_v40, %v1452_v61  ;;  %v2284_v38 = vpop.f32.mrf.mxu0  ;;  %v874_v45 = vadd.f32 %v873_v0, %v6506_v15  ;;  %v5993_v15 = vld [vmem:[%s7970_s1 + $0x60] sm:$0xff]  ;;  %v5413_v61 = vld [vmem:[%s6078_s29 + $0x189] sm:$0xff]  ;;  %v5414_v0 = vld [vmem:[%s6078_s29 + $0x191] sm:$0xff] }
 0x19d   : > { %3234 = vmatpush.bf16.msra.mxu2 %v5993_v15 }
 0x19e   : > { %v6692_v42 = vadd.f32 %v2282_v8, %v1947_v14  ;;  %v1051_v8 = vld [vmem:[%s6078_s29 + $0x172] sm:$0xff] }
 0x19f   : > { %v1105_v30 = vpack.c.bf16 %v1051_v8, %v1050_v43 }
 0x1a1   : > { %v1295_v46 = vpop.f32.mrf.mxu2 }
 0x1a2   : > { %v1790_v41 = vpop.f32.mrf.mxu3  ;;  %v1453_v23 = vadd.f32 %v1295_v46, %v874_v45  ;;  %v1600_v46 = vpack.c.bf16 %v6729_v6, %v5293_v58 }
 0x1a3   : > { %v876_v39 = vpop.f32.mrf.mxu1 }
 0x1a4   : > { %v1948_v13 = vadd.f32 %v1790_v41, %v1453_v23  ;;  %v2287_v10 = vpop.f32.mrf.mxu0  ;;  %v877_v47 = vadd.f32 %v876_v39, %v6520_v51  ;;  %v5997_v51 = vld [vmem:[%s7970_s1 + $0x80] sm:$0xff]  ;;  %v2094_v41 = vpack.c.bf16 %v5414_v0, %v5413_v61 }
 0x1a5   : > { %4222 = vmatpush.bf16.msra.mxu0 %v5997_v51 }
 0x1a6   : > { %5191 = vmatmul.msk.bf16.gmra.mxu1 %vm409_vm0, %v260_v21  ;;  %5239 = vmatmul.msk.bf16.gmra.mxu2 %vm409_vm0, %v1104_v19  ;;  %v6710_v5 = vadd.f32 %v2284_v38, %v1948_v13 }
 0x1a7   : > { %5359 = vmatmul.msk.bf16.gmra.mxu3 %vm409_vm0, %v1599_v34  ;;  %5479 = vmatmul.msk.bf16.gmra.mxu0 %vm409_vm0, %v2093_v24 }
 0x1a9   : > { %v1298_v57 = vpop.f32.mrf.mxu2 }
 0x1aa   : > { %v1793_v9 = vpop.f32.mrf.mxu3  ;;  %v1454_v22 = vadd.f32 %v1298_v57, %v877_v47  ;;  %v5295_v47 = vld [vmem:[%s6078_s29 + $0x1a0] sm:$0xff]  ;;  %v6749_v57 = vld [vmem:[%s6078_s29 + $0x1a8] sm:$0xff] }
 0x1ab   : > { %v878_v56 = vpop.f32.mrf.mxu1  ;;  %v1601_v8 = vpack.c.bf16 %v6749_v57, %v5295_v47 }
 0x1ac   : > { %v1949_v35 = vadd.f32 %v1793_v9, %v1454_v22  ;;  %v2289_v55 = vpop.f32.mrf.mxu0  ;;  %v879_v40 = vadd.f32 %v878_v56, %v6532_v32  ;;  %v5415_v22 = vld [vmem:[%s6078_s29 + $0x1a1] sm:$0xff]  ;;  %v5416_v56 = vld [vmem:[%s6078_s29 + $0x1a9] sm:$0xff] }
 0x1ae   : > { %v6724_v59 = vadd.f32 %v2287_v10, %v1949_v35  ;;  %v1052_v10 = vld [vmem:[%s6078_s29 + $0x182] sm:$0xff] }
 0x1af   : > { %v1106_v43 = vpack.c.bf16 %v1053_v62, %v1052_v10 }
 0x1b1   : > { %v1300_v14 = vpop.f32.mrf.mxu2 }
 0x1b2   : > { %v1795_v38 = vpop.f32.mrf.mxu3  ;;  %v1455_v33 = vadd.f32 %v1300_v14, %v879_v40  ;;  %v2095_v40 = vpack.c.bf16 %v5416_v56, %v5415_v22 }
 0x1b3   : > { %v881_v45 = vpop.f32.mrf.mxu1 }
 0x1b4   : > { %v1950_v21 = vadd.f32 %v1795_v38, %v1455_v33  ;;  %v2292_v23 = vpop.f32.mrf.mxu0  ;;  %v882_v3 = vadd.f32 %v881_v45, %v6305_v12  ;;  %v262_v12 = vpack.c.bf16 %v5293_v58, %v6697_v4 }
 0x1b6   : > { %5192 = vmatmul.msk.bf16.gmra.mxu1 %vm409_vm0, %v261_v29  ;;  %5240 = vmatmul.msk.bf16.gmra.mxu2 %vm409_vm0, %v1105_v30  ;;  %v6739_v32 = vadd.f32 %v2289_v55, %v1950_v21  ;;  %v1054_v30 = vld [vmem:[%s6078_s29 + $0x192] sm:$0xff] }
 0x1b7   : > { %5360 = vmatmul.msk.bf16.gmra.mxu3 %vm409_vm0, %v1600_v46  ;;  %5480 = vmatmul.msk.bf16.gmra.mxu0 %vm409_vm0, %v2094_v41  ;;  %v1055_v41 = vld [vmem:[%s6078_s29 + $0x1a2] sm:$0xff]  ;;  %v5297_v21 = vld [vmem:[%s6078_s29 + $0x1b0] sm:$0xff] }
 0x1b8   : > { %v1107_v10 = vpack.c.bf16 %v1055_v41, %v1054_v30 }
 0x1b9   : > { %v1303_v2 = vpop.f32.mrf.mxu2 }
 0x1ba   : > { %v1798_v39 = vpop.f32.mrf.mxu3  ;;  %v1456_v19 = vadd.f32 %v1303_v2, %v882_v3  ;;  %v5417_v2 = vld [vmem:[%s6078_s29 + $0x1b1] sm:$0xff] }
 0x1bb   : > { %v883_v34 = vpop.f32.mrf.mxu1 }
 0x1bc   : > { %v1951_v24 = vadd.f32 %v1798_v39, %v1456_v19  ;;  %v2294_v13 = vpop.f32.mrf.mxu0  ;;  %v884_v9 = vadd.f32 %v883_v34, %v6319_v26  ;;  %v5418_v39 = vld [vmem:[%s6078_s29 + $0x1c1] sm:$0xff] }
 0x1be   : > { %v6744_v15 = vadd.f32 %v2292_v23, %v1951_v24  ;;  %v6769_v23 = vld [vmem:[%s6078_s29 + $0x1c0] sm:$0xff] }
 0x1bf   : > { %v1602_v62 = vpack.c.bf16 %v6769_v23, %v5297_v21 }
 0x1c1   : > { %v1305_v35 = vpop.f32.mrf.mxu2 }
 0x1c2   : > { %v1800_v55 = vpop.f32.mrf.mxu3  ;;  %v1457_v20 = vadd.f32 %v1305_v35, %v884_v9  ;;  %v2096_v9 = vpack.c.bf16 %v5418_v39, %v5417_v2 }
 0x1c3   : > { %v886_v51 = vpop.f32.mrf.mxu1 }
 0x1c4   : > { %v1952_v61 = vadd.f32 %v1800_v55, %v1457_v20  ;;  %v2297_v0 = vpop.f32.mrf.mxu0  ;;  %v887_v4 = vadd.f32 %v886_v51, %v6333_v49  ;;  %v263_v49 = vpack.c.bf16 %v5295_v47, %v6729_v6 }
 0x1c6   : > { %5193 = vmatmul.msk.bf16.gmra.mxu1 %vm409_vm0, %v262_v12  ;;  %5241 = vmatmul.msk.bf16.gmra.mxu2 %vm409_vm0, %v1106_v43  ;;  %v6759_v26 = vadd.f32 %v2294_v13, %v1952_v61  ;;  %v1056_v43 = vld [vmem:[%s6078_s29 + $0x1aa] sm:$0xff] }
 0x1c7   : > { %5361 = vmatmul.msk.bf16.gmra.mxu3 %vm409_vm0, %v1601_v8  ;;  %5481 = vmatmul.msk.bf16.gmra.mxu0 %vm409_vm0, %v2095_v40  ;;  %v1057_v40 = vld [vmem:[%s6078_s29 + $0x1b2] sm:$0xff]  ;;  %v5299_v61 = vld [vmem:[%s6078_s29 + $0x1c8] sm:$0xff] }
 0x1c8   : > { %v1108_v30 = vpack.c.bf16 %v1057_v40, %v1056_v43 }
 0x1c9   : > { %v1308_v58 = vpop.f32.mrf.mxu2 }
 0x1ca   : > { %v1803_v14 = vpop.f32.mrf.mxu3  ;;  %v1458_v38 = vadd.f32 %v1308_v58, %v887_v4  ;;  %v5419_v58 = vld [vmem:[%s6078_s29 + $0x1c9] sm:$0xff] }
 0x1cb   : > { %v888_v29 = vpop.f32.mrf.mxu1 }
 0x1cc   : > { %v1953_v33 = vadd.f32 %v1803_v14, %v1458_v38  ;;  %v2299_v45 = vpop.f32.mrf.mxu0  ;;  %v889_v3 = vadd.f32 %v888_v29, %v6347_v60  ;;  %v5420_v14 = vld [vmem:[%s6078_s29 + $0x1d1] sm:$0xff] }
 0x1ce   : > { %v6764_v46 = vadd.f32 %v2297_v0, %v1953_v33  ;;  %v6789_v0 = vld [vmem:[%s6078_s29 + $0x1d0] sm:$0xff] }
 0x1cf   : > { %v1603_v41 = vpack.c.bf16 %v6789_v0, %v5299_v61 }
 0x1d1   : > { %v1310_v19 = vpop.f32.mrf.mxu2 }
 0x1d2   : > { %v1805_v34 = vpop.f32.mrf.mxu3  ;;  %v1459_v24 = vadd.f32 %v1310_v19, %v889_v3  ;;  %v2097_v3 = vpack.c.bf16 %v5420_v14, %v5419_v58 }
 0x1d3   : > { %v891_v13 = vpop.f32.mrf.mxu1 }
 0x1d4   : > { %v1954_v22 = vadd.f32 %v1805_v34, %v1459_v24  ;;  %v2302_v56 = vpop.f32.mrf.mxu0  ;;  %v892_v6 = vadd.f32 %v891_v13, %v6360_v17  ;;  %v264_v17 = vpack.c.bf16 %v5297_v21, %v6749_v57 }
 0x1d6   : > { %5194 = vmatmul.msk.bf16.gmra.mxu1 %vm409_vm0, %v263_v49  ;;  %5242 = vmatmul.msk.bf16.gmra.mxu2 %vm409_vm0, %v1107_v10  ;;  %v6779_v60 = vadd.f32 %v2299_v45, %v1954_v22  ;;  %v1058_v10 = vld [vmem:[%s6078_s29 + $0x1c2] sm:$0xff] }
 0x1d7   : > { %5362 = vmatmul.msk.bf16.gmra.mxu3 %vm409_vm0, %v1602_v62  ;;  %5482 = vmatmul.msk.bf16.gmra.mxu0 %vm409_vm0, %v2096_v9  ;;  %v1059_v9 = vld [vmem:[%s6078_s29 + $0x1ca] sm:$0xff]  ;;  %v5301_v22 = vld [vmem:[%s6078_s29 + $0x1e0] sm:$0xff] }
 0x1d8   : > { %v1109_v43 = vpack.c.bf16 %v1059_v9, %v1058_v10 }
 0x1d9   : > { %v1313_v47 = vpop.f32.mrf.mxu2 }
 0x1da   : > { %v1808_v35 = vpop.f32.mrf.mxu3  ;;  %v1460_v55 = vadd.f32 %v1313_v47, %v892_v6  ;;  %v5421_v47 = vld [vmem:[%s6078_s29 + $0x1e1] sm:$0xff] }
 0x1db   : > { %v893_v12 = vpop.f32.mrf.mxu1 }
 0x1dc   : > { %v1955_v20 = vadd.f32 %v1808_v35, %v1460_v55  ;;  %v2304_v51 = vpop.f32.mrf.mxu0  ;;  %v894_v4 = vadd.f32 %v893_v12, %v6374_v50  ;;  %v5422_v35 = vld [vmem:[%s6078_s29 + $0x1e9] sm:$0xff] }
 0x1de   : > { %v6784_v8 = vadd.f32 %v2302_v56, %v1955_v20  ;;  %v6809_v56 = vld [vmem:[%s6078_s29 + $0x1e8] sm:$0xff] }
 0x1df   : > { %v1604_v40 = vpack.c.bf16 %v6809_v56, %v5301_v22 }
 0x1e1   : > { %v1315_v38 = vpop.f32.mrf.mxu2 }
 0x1e2   : > { %v1810_v29 = vpop.f32.mrf.mxu3  ;;  %v1461_v33 = vadd.f32 %v1315_v38, %v894_v4  ;;  %v2098_v4 = vpack.c.bf16 %v5422_v35, %v5421_v47 }
 0x1e3   : > { %v896_v45 = vpop.f32.mrf.mxu1 }
 0x1e4   : > { %v1956_v2 = vadd.f32 %v1810_v29, %v1461_v33  ;;  %v2307_v39 = vpop.f32.mrf.mxu0  ;;  %v897_v57 = vadd.f32 %v896_v45, %v6386_v28  ;;  %v265_v28 = vpack.c.bf16 %v5299_v61, %v6769_v23 }
 0x1e6   : > { %5195 = vmatmul.msk.bf16.gmra.mxu1 %vm409_vm0, %v264_v17  ;;  %5243 = vmatmul.msk.bf16.gmra.mxu2 %vm409_vm0, %v1108_v30  ;;  %v6799_v50 = vadd.f32 %v2304_v51, %v1956_v2  ;;  %v1060_v30 = vld [vmem:[%s6078_s29 + $0x1d2] sm:$0xff] }
 0x1e7   : > { %5363 = vmatmul.msk.bf16.gmra.mxu3 %vm409_vm0, %v1603_v41  ;;  %5483 = vmatmul.msk.bf16.gmra.mxu0 %vm409_vm0, %v2097_v3  ;;  %v1061_v3 = vld [vmem:[%s6078_s29 + $0x1e2] sm:$0xff]  ;;  %v5303_v2 = vld [vmem:[%s6078_s29 + $0x1f0] sm:$0xff] }
 0x1e8   : > { %v1110_v9 = vpack.c.bf16 %v1061_v3, %v1060_v30 }
 0x1e9   : > { %v1318_v21 = vpop.f32.mrf.mxu2 }
 0x1ea   : > { %v1813_v19 = vpop.f32.mrf.mxu3  ;;  %v1462_v34 = vadd.f32 %v1318_v21, %v897_v57  ;;  %v8018_v57 = vld [vmem:[#allocation21_spill] sm:$0xff] }
 0x1eb   : > { %v898_v49 = vpop.f32.mrf.mxu1 }
 0x1ec   : > { %v1957_v24 = vadd.f32 %v1813_v19, %v1462_v34  ;;  %v2309_v13 = vpop.f32.mrf.mxu0  ;;  %v899_v6 = vadd.f32 %v898_v49, %v6400_v36  ;;  %v5423_v19 = vld [vmem:[%s6078_s29 + $0x1f1] sm:$0xff]  ;;  %v5424_v34 = vld [vmem:[%s6078_s29 + $0x201] sm:$0xff] }
 0x1ed   : > { %v2099_v47 = vpack.c.bf16 %v5424_v34, %v5423_v19 }
 0x1ee   : > { %v6804_v62 = vadd.f32 %v2307_v39, %v1957_v24  ;;  %v6829_v39 = vld [vmem:[%s6078_s29 + $0x200] sm:$0xff] }
 0x1f1   : > { %v1320_v55 = vpop.f32.mrf.mxu2 }
 0x1f2   : > { %v1815_v12 = vpop.f32.mrf.mxu3  ;;  %v1463_v20 = vadd.f32 %v1320_v55, %v899_v6  ;;  %v1605_v6 = vpack.c.bf16 %v6829_v39, %v5303_v2 }
 0x1f3   : > { %v901_v51 = vpop.f32.mrf.mxu1 }
 0x1f4   : > { %v1958_v58 = vadd.f32 %v1815_v12, %v1463_v20  ;;  %v2312_v14 = vpop.f32.mrf.mxu0  ;;  %v902_v23 = vadd.f32 %v901_v51, %v6412_v44  ;;  %v266_v44 = vpack.c.bf16 %v5301_v22, %v6789_v0  ;;  %v8019_v22 = vld [vmem:[#allocation24_spill] sm:$0xff] }
 0x1f6   : > { %5196 = vmatmul.msk.bf16.gmra.mxu1 %vm409_vm0, %v265_v28  ;;  %5244 = vmatmul.msk.bf16.gmra.mxu2 %vm409_vm0, %v1109_v43  ;;  %v6819_v36 = vadd.f32 %v2309_v13, %v1958_v58  ;;  %v1062_v58 = vld [vmem:[%s6078_s29 + $0x1ea] sm:$0xff] }
 0x1f7   : > { %5364 = vmatmul.msk.bf16.gmra.mxu3 %vm409_vm0, %v1604_v40  ;;  %5484 = vmatmul.msk.bf16.gmra.mxu0 %vm409_vm0, %v2098_v4 }
 0x1f9   : > { %v1323_v61 = vpop.f32.mrf.mxu2 }
 0x1fa   : > { %v1818_v38 = vpop.f32.mrf.mxu3  ;;  %v1464_v29 = vadd.f32 %v1323_v61, %v902_v23  ;;  %v1063_v23 = vld [vmem:[%s6078_s29 + $0x1f2] sm:$0xff]  ;;  %v5305_v61 = vld [vmem:[%s6078_s29 + $0x208] sm:$0xff] }
 0x1fb   : > { %v903_v17 = vpop.f32.mrf.mxu1  ;;  %v1111_v34 = vpack.c.bf16 %v1063_v23, %v1062_v58  ;;  %v5427_v58 = vld [vmem:[%s6078_s29 + $0x221] sm:$0xff]  ;;  %v5428_v23 = vld [vmem:[%s6078_s29 + $0x229] sm:$0xff] }
 0x1fc   : > { %v1959_v33 = vadd.f32 %v1818_v38, %v1464_v29  ;;  %v2314_v45 = vpop.f32.mrf.mxu0  ;;  %v904_v21 = vadd.f32 %v903_v17, %v8018_v57  ;;  %v6849_v38 = vld [vmem:[%s6078_s29 + $0x210] sm:$0xff]  ;;  %v8020_v29 = vld [vmem:[#allocation27_spill] sm:$0xff]  ;;  %v267_v57 = vpack.c.bf16 %v5303_v2, %v6809_v56  ;;  %v8021_v2 = vld [vmem:[#allocation30_spill] sm:$0xff] }
 0x1fe   : > { %v6824_v41 = vadd.f32 %v2312_v14, %v1959_v33  ;;  %v5425_v33 = vld [vmem:[%s6078_s29 + $0x209] sm:$0xff] }
 0x201   : > { %v1325_v49 = vpop.f32.mrf.mxu2 }
 0x202   : > { %v1820_v24 = vpop.f32.mrf.mxu3  ;;  %v1465_v13 = vadd.f32 %v1325_v49, %v904_v21  ;;  %v1606_v49 = vpack.c.bf16 %v6849_v38, %v5305_v61 }
 0x203   : > { %v906_v10 = vpop.f32.mrf.mxu1 }
 0x204   : > { %v1960_v35 = vadd.f32 %v1820_v24, %v1465_v13  ;;  %v2317_v55 = vpop.f32.mrf.mxu0  ;;  %v907_v12 = vadd.f32 %v906_v10, %v8019_v22 }
 0x206   : > { %5197 = vmatmul.msk.bf16.gmra.mxu1 %vm409_vm0, %v266_v44  ;;  %5245 = vmatmul.msk.bf16.gmra.mxu2 %vm409_vm0, %v1110_v9  ;;  %v6839_v0 = vadd.f32 %v2314_v45, %v1960_v35  ;;  %v5426_v45 = vld [vmem:[%s6078_s29 + $0x211] sm:$0xff] }
 0x207   : > { %5365 = vmatmul.msk.bf16.gmra.mxu3 %vm409_vm0, %v1605_v6  ;;  %5485 = vmatmul.msk.bf16.gmra.mxu0 %vm409_vm0, %v2099_v47  ;;  %v2100_v24 = vpack.c.bf16 %v5426_v45, %v5425_v33  ;;  %v268_v33 = vpack.c.bf16 %v5305_v61, %v6829_v39  ;;  %v8023_v61 = vld [vmem:[#allocation36_spill] sm:$0xff] }
 0x209   : > { %v1328_v28 = vpop.f32.mrf.mxu2 }
 0x20a   : > { %v1823_v20 = vpop.f32.mrf.mxu3  ;;  %v1466_v51 = vadd.f32 %v1328_v28, %v907_v12  ;;  %v1064_v12 = vld [vmem:[%s6078_s29 + $0x202] sm:$0xff] }
 0x20b   : > { %v908_v43 = vpop.f32.mrf.mxu1 }
 0x20c   : > { %v1961_v40 = vadd.f32 %v1823_v20, %v1466_v51  ;;  %v2319_v4 = vpop.f32.mrf.mxu0  ;;  %v909_v17 = vadd.f32 %v908_v43, %v8020_v29  ;;  %v1065_v20 = vld [vmem:[%s6078_s29 + $0x20a] sm:$0xff]  ;;  %v5307_v51 = vld [vmem:[%s6078_s29 + $0x220] sm:$0xff] }
 0x20d   : > { %v6869_v43 = vld [vmem:[%s6078_s29 + $0x228] sm:$0xff] }
 0x20e   : > { %v6844_v14 = vadd.f32 %v2317_v55, %v1961_v40  ;;  %v8022_v40 = vld [vmem:[#allocation33_spill] sm:$0xff] }
 0x211   : > { %v1330_v30 = vpop.f32.mrf.mxu2 }
 0x212   : > { %v1825_v3 = vpop.f32.mrf.mxu3  ;;  %v1467_v21 = vadd.f32 %v1330_v30, %v909_v17 }
 0x213   : > { %v911_v19 = vpop.f32.mrf.mxu1 }
 0x214   : > { %v1962_v44 = vadd.f32 %v1825_v3, %v1467_v21  ;;  %v2322_v13 = vpop.f32.mrf.mxu0  ;;  %v912_v10 = vadd.f32 %v911_v19, %v8021_v2  ;;  %v1112_v3 = vpack.c.bf16 %v1065_v20, %v1064_v12  ;;  %v2101_v21 = vpack.c.bf16 %v5428_v23, %v5427_v58  ;;  %v6889_v12 = vld [vmem:[%s6078_s29 + $0x240] sm:$0xff] }
 0x216   : > { %5198 = vmatmul.msk.bf16.gmra.mxu1 %vm409_vm0, %v267_v57  ;;  %5246 = vmatmul.msk.bf16.gmra.mxu2 %vm409_vm0, %v1111_v34  ;;  %v6859_v56 = vadd.f32 %v2319_v4, %v1962_v44  ;;  %v1607_v57 = vpack.c.bf16 %v6869_v43, %v5307_v51 }
 0x217   : > { %5366 = vmatmul.msk.bf16.gmra.mxu3 %vm409_vm0, %v1606_v49  ;;  %5486 = vmatmul.msk.bf16.gmra.mxu0 %vm409_vm0, %v2100_v24 }
 0x219   : > { %v1333_v9 = vpop.f32.mrf.mxu2 }
 0x21a   : > { %v1828_v6 = vpop.f32.mrf.mxu3  ;;  %v1468_v47 = vadd.f32 %v1333_v9, %v912_v10 }
 0x21b   : > { %v913_v35 = vpop.f32.mrf.mxu1 }
 0x21c   : > { %v1963_v55 = vadd.f32 %v1828_v6, %v1468_v47  ;;  %v2324_v22 = vpop.f32.mrf.mxu0  ;;  %v914_v4 = vadd.f32 %v913_v35, %v8022_v40  ;;  %v1066_v6 = vld [vmem:[%s6078_s29 + $0x212] sm:$0xff]  ;;  %v1067_v35 = vld [vmem:[%s6078_s29 + $0x222] sm:$0xff] }
 0x21d   : > { %v5429_v40 = vld [vmem:[%s6078_s29 + $0x231] sm:$0xff] }
 0x21e   : > { %v6864_v28 = vadd.f32 %v2322_v13, %v1963_v55  ;;  %v5309_v55 = vld [vmem:[%s6078_s29 + $0x230] sm:$0xff] }
 0x221   : > { %v1335_v29 = vpop.f32.mrf.mxu2 }
 0x222   : > { %v1830_v17 = vpop.f32.mrf.mxu3  ;;  %v1469_v45 = vadd.f32 %v1335_v29, %v914_v4  ;;  %v5430_v4 = vld [vmem:[%s6078_s29 + $0x241] sm:$0xff]  ;;  %v269_v29 = vpack.c.bf16 %v5307_v51, %v6849_v38  ;;  %v8025_v51 = vld [vmem:[#allocation42_spill] sm:$0xff] }
 0x223   : > { %v916_v30 = vpop.f32.mrf.mxu1 }
 0x224   : > { %v1964_v19 = vadd.f32 %v1830_v17, %v1469_v45  ;;  %v2327_v34 = vpop.f32.mrf.mxu0  ;;  %v917_v49 = vadd.f32 %v916_v30, %v8023_v61  ;;  %v1113_v45 = vpack.c.bf16 %v1067_v35, %v1066_v6  ;;  %v1608_v30 = vpack.c.bf16 %v6889_v12, %v5309_v55  ;;  %v1069_v6 = vld [vmem:[%s6078_s29 + $0x232] sm:$0xff]  ;;  %v5311_v35 = vld [vmem:[%s6078_s29 + $0x248] sm:$0xff] }
 0x226   : > { %5199 = vmatmul.msk.bf16.gmra.mxu1 %vm409_vm0, %v268_v33  ;;  %5247 = vmatmul.msk.bf16.gmra.mxu2 %vm409_vm0, %v1112_v3  ;;  %v6879_v39 = vadd.f32 %v2324_v22, %v1964_v19  ;;  %v8024_v22 = vld [vmem:[#allocation39_spill] sm:$0xff]  ;;  %v2102_v3 = vpack.c.bf16 %v5430_v4, %v5429_v40  ;;  %v5431_v40 = vld [vmem:[%s6078_s29 + $0x249] sm:$0xff]  ;;  %v5432_v4 = vld [vmem:[%s6078_s29 + $0x251] sm:$0xff] }
 0x227   : > { %5367 = vmatmul.msk.bf16.gmra.mxu3 %vm409_vm0, %v1607_v57  ;;  %5487 = vmatmul.msk.bf16.gmra.mxu0 %vm409_vm0, %v2101_v21 }
 0x229   : > { %v1338_v24 = vpop.f32.mrf.mxu2 }
 0x22a   : > { %v1833_v44 = vpop.f32.mrf.mxu3  ;;  %v1470_v13 = vadd.f32 %v1338_v24, %v917_v49 }
 0x22b   : > { %v918_v2 = vpop.f32.mrf.mxu1 }
 0x22c   : > { %v1965_v10 = vadd.f32 %v1833_v44, %v1470_v13  ;;  %v2329_v9 = vpop.f32.mrf.mxu0  ;;  %v919_v20 = vadd.f32 %v918_v2, %v8024_v22  ;;  %v1068_v2 = vld [vmem:[%s6078_s29 + $0x22a] sm:$0xff] }
 0x22d   : > { %v6909_v22 = vld [vmem:[%s6078_s29 + $0x250] sm:$0xff] }
 0x22e   : > { %v6884_v47 = vadd.f32 %v2327_v34, %v1965_v10 }
 0x231   : > { %v1340_v58 = vpop.f32.mrf.mxu2 }
 0x232   : > { %v1835_v23 = vpop.f32.mrf.mxu3  ;;  %v1471_v17 = vadd.f32 %v1340_v58, %v919_v20 }
 0x233   : > { %v921_v33 = vpop.f32.mrf.mxu1 }
 0x234   : > { %v1966_v57 = vadd.f32 %v1835_v23, %v1471_v17  ;;  %v2332_v21 = vpop.f32.mrf.mxu0  ;;  %v922_v19 = vadd.f32 %v921_v33, %v8025_v51 }
 0x236   : > { %5200 = vmatmul.msk.bf16.gmra.mxu1 %vm409_vm0, %v269_v29  ;;  %5248 = vmatmul.msk.bf16.gmra.mxu2 %vm409_vm0, %v1113_v45  ;;  %v6899_v38 = vadd.f32 %v2329_v9, %v1966_v57  ;;  %v8026_v9 = vld [vmem:[#allocation45_spill] sm:$0xff]  ;;  %v270_v29 = vpack.c.bf16 %v5309_v55, %v6869_v43  ;;  %v1114_v45 = vpack.c.bf16 %v1069_v6, %v1068_v2  ;;  %v8027_v55 = vld [vmem:[#allocation3_spill] sm:$0xff] }
 0x237   : > { %5368 = vmatmul.msk.bf16.gmra.mxu3 %vm409_vm0, %v1608_v30  ;;  %5488 = vmatmul.msk.bf16.gmra.mxu0 %vm409_vm0, %v2102_v3  ;;  %v1609_v30 = vpack.c.bf16 %v6909_v22, %v5311_v35  ;;  %v2103_v3 = vpack.c.bf16 %v5432_v4, %v5431_v40  ;;  %v1070_v2 = vld [vmem:[%s6078_s29 + $0x242] sm:$0xff] }
 0x238   : > { %v6929_v40 = vld [vmem:[%s6078_s29 + $0x268] sm:$0xff] }
 0x239   : > { %v1343_v34 = vpop.f32.mrf.mxu2 }
 0x23a   : > { %v1838_v61 = vpop.f32.mrf.mxu3  ;;  %v1472_v49 = vadd.f32 %v1343_v34, %v922_v19 }
 0x23b   : > { %v923_v24 = vpop.f32.mrf.mxu1 }
 0x23c   : > { %v1967_v44 = vadd.f32 %v1838_v61, %v1472_v49  ;;  %v2334_v13 = vpop.f32.mrf.mxu0  ;;  %v924_v20 = vadd.f32 %v923_v24, %v8026_v9  ;;  %v1071_v9 = vld [vmem:[%s6078_s29 + $0x24a] sm:$0xff] }
 0x23e   : > { %v6904_v10 = vadd.f32 %v2332_v21, %v1967_v44 }
 0x241   : > { %v1345_v58 = vpop.f32.mrf.mxu2 }
 0x242   : > { %v1840_v23 = vpop.f32.mrf.mxu3  ;;  %v1473_v17 = vadd.f32 %v1345_v58, %v924_v20  ;;  %v5313_v20 = vld [vmem:[%s6078_s29 + $0x260] sm:$0xff] }
 0x243   : > { %v926_v33 = vpop.f32.mrf.mxu1  ;;  %v5433_v58 = vld [vmem:[%s6078_s29 + $0x261] sm:$0xff] }
 0x244   : > { %v1968_v57 = vadd.f32 %v1840_v23, %v1473_v17  ;;  %v2337_v21 = vpop.f32.mrf.mxu0  ;;  %v927_v51 = vadd.f32 %v926_v33, %v8027_v55  ;;  %v5434_v23 = vld [vmem:[%s6078_s29 + $0x269] sm:$0xff]  ;;  %v271_v33 = vpack.c.bf16 %v5311_v35, %v6889_v12  ;;  %v8029_v35 = vld [vmem:[#allocation7_spill] sm:$0xff] }
 0x246   : > { %5201 = vmatmul.msk.bf16.gmra.mxu1 %vm409_vm0, %v270_v29  ;;  %5249 = vmatmul.msk.bf16.gmra.mxu2 %vm409_vm0, %v1114_v45  ;;  %v6919_v43 = vadd.f32 %v2334_v13, %v1968_v57  ;;  %v8028_v13 = vld [vmem:[#allocation5_spill] sm:$0xff]  ;;  %v1610_v57 = vpack.c.bf16 %v6929_v40, %v5313_v20 }
 0x247   : > { %5369 = vmatmul.msk.bf16.gmra.mxu3 %vm409_vm0, %v1609_v30  ;;  %5489 = vmatmul.msk.bf16.gmra.mxu0 %vm409_vm0, %v2103_v3  ;;  %v1115_v3 = vpack.c.bf16 %v1071_v9, %v1070_v2 }
 0x249   : > { %v1348_v19 = vpop.f32.mrf.mxu2 }
 0x24a   : > { %v1843_v34 = vpop.f32.mrf.mxu3  ;;  %v1474_v61 = vadd.f32 %v1348_v19, %v927_v51 }
 0x24b   : > { %v928_v49 = vpop.f32.mrf.mxu1 }
 0x24c   : > { %v1969_v24 = vadd.f32 %v1843_v34, %v1474_v61  ;;  %v2339_v44 = vpop.f32.mrf.mxu0  ;;  %v929_v4 = vadd.f32 %v928_v49, %v8028_v13  ;;  %v1072_v13 = vld [vmem:[%s6078_s29 + $0x252] sm:$0xff] }
 0x24e   : > { %v6924_v6 = vadd.f32 %v2337_v21, %v1969_v24  ;;  %v2104_v21 = vpack.c.bf16 %v5434_v23, %v5433_v58  ;;  %v1073_v58 = vld [vmem:[%s6078_s29 + $0x262] sm:$0xff]  ;;  %v5315_v23 = vld [vmem:[%s6078_s29 + $0x270] sm:$0xff] }
 0x251   : > { %v1350_v29 = vpop.f32.mrf.mxu2 }
 0x252   : > { %v1845_v17 = vpop.f32.mrf.mxu3  ;;  %v1475_v45 = vadd.f32 %v1350_v29, %v929_v4  ;;  %v6949_v29 = vld [vmem:[%s6078_s29 + $0x280] sm:$0xff] }
 0x253   : > { %v931_v30 = vpop.f32.mrf.mxu1 }
 0x254   : > { %v1970_v55 = vadd.f32 %v1845_v17, %v1475_v45  ;;  %v2342_v51 = vpop.f32.mrf.mxu0  ;;  %v932_v19 = vadd.f32 %v931_v30, %v8029_v35  ;;  %v5436_v45 = vld [vmem:[%s6078_s29 + $0x281] sm:$0xff]  ;;  %v272_v30 = vpack.c.bf16 %v5313_v20, %v6909_v22  ;;  %v1116_v35 = vpack.c.bf16 %v1073_v58, %v1072_v13 }
 0x255   : > { %v8032_v20 = vld [vmem:[#allocation11_spill] sm:$0xff] }
 0x256   : > { %5202 = vmatmul.msk.bf16.gmra.mxu1 %vm409_vm0, %v271_v33  ;;  %5250 = vmatmul.msk.bf16.gmra.mxu2 %vm409_vm0, %v1115_v3  ;;  %v6939_v12 = vadd.f32 %v2339_v44, %v1970_v55  ;;  %v8030_v44 = vld [vmem:[#allocation9_spill] sm:$0xff] }
 0x257   : > { %5370 = vmatmul.msk.bf16.gmra.mxu3 %vm409_vm0, %v1610_v57  ;;  %5490 = vmatmul.msk.bf16.gmra.mxu0 %vm409_vm0, %v2104_v21  ;;  %v5435_v33 = vld [vmem:[%s6078_s29 + $0x271] sm:$0xff] }
 0x259   : > { %v1353_v34 = vpop.f32.mrf.mxu2 }
 0x25a   : > { %v1848_v61 = vpop.f32.mrf.mxu3  ;;  %v1476_v49 = vadd.f32 %v1353_v34, %v932_v19  ;;  %v1611_v19 = vpack.c.bf16 %v6949_v29, %v5315_v23 }
 0x25b   : > { %v933_v24 = vpop.f32.mrf.mxu1 }
 0x25c   : > { %v1971_v2 = vadd.f32 %v1848_v61, %v1476_v49  ;;  %v2344_v9 = vpop.f32.mrf.mxu0  ;;  %v934_v17 = vadd.f32 %v933_v24, %v8030_v44 }
 0x25e   : > { %v6944_v4 = vadd.f32 %v2342_v51, %v1971_v2  ;;  %v2105_v51 = vpack.c.bf16 %v5436_v45, %v5435_v33  ;;  %v1074_v33 = vld [vmem:[%s6078_s29 + $0x26a] sm:$0xff] }
 0x261   : > { %v1355_v3 = vpop.f32.mrf.mxu2 }
 0x262   : > { %v1850_v57 = vpop.f32.mrf.mxu3  ;;  %v1477_v21 = vadd.f32 %v1355_v3, %v934_v17  ;;  %v1075_v3 = vld [vmem:[%s6078_s29 + $0x272] sm:$0xff] }
 0x263   : > { %v936_v55 = vpop.f32.mrf.mxu1 }
 0x264   : > { %v1972_v34 = vadd.f32 %v1850_v57, %v1477_v21  ;;  %v2347_v61 = vpop.f32.mrf.mxu0  ;;  %v937_v49 = vadd.f32 %v936_v55, %v8032_v20  ;;  %v5317_v57 = vld [vmem:[%s6078_s29 + $0x288] sm:$0xff]  ;;  %v273_v55 = vpack.c.bf16 %v5315_v23, %v6929_v40  ;;  %v8036_v23 = vld [vmem:[#allocation15_spill] sm:$0xff] }
 0x266   : > { %5203 = vmatmul.msk.bf16.gmra.mxu1 %vm409_vm0, %v272_v30  ;;  %5251 = vmatmul.msk.bf16.gmra.mxu2 %vm409_vm0, %v1116_v35  ;;  %v6959_v22 = vadd.f32 %v2344_v9, %v1972_v34  ;;  %v6969_v30 = vld [vmem:[%s6078_s29 + $0x290] sm:$0xff] }
 0x267   : > { %5371 = vmatmul.msk.bf16.gmra.mxu3 %vm409_vm0, %v1611_v19  ;;  %5491 = vmatmul.msk.bf16.gmra.mxu0 %vm409_vm0, %v2105_v51  ;;  %v8034_v9 = vld [vmem:[#allocation13_spill] sm:$0xff] }
 0x268   : > { %8031 = vst [vmem:[#allocation21_spill] sm:$0xff] %v6959_v22  ;;  %v5437_v35 = vld [vmem:[%s6078_s29 + $0x289] sm:$0xff]  ;;  %v5438_v19 = vld [vmem:[%s6078_s29 + $0x291] sm:$0xff] }
 0x269   : > { %v1358_v24 = vpop.f32.mrf.mxu2 }
 0x26a   : > { %v1853_v2 = vpop.f32.mrf.mxu3  ;;  %v1478_v13 = vadd.f32 %v1358_v24, %v937_v49  ;;  %v1117_v24 = vpack.c.bf16 %v1075_v3, %v1074_v33 }
 0x26b   : > { %v938_v58 = vpop.f32.mrf.mxu1 }
 0x26c   : > { %v1973_v44 = vadd.f32 %v1853_v2, %v1478_v13  ;;  %v2349_v17 = vpop.f32.mrf.mxu0  ;;  %v939_v21 = vadd.f32 %v938_v58, %v8034_v9  ;;  %v1612_v2 = vpack.c.bf16 %v6969_v30, %v5317_v57 }
 0x26e   : > { %v6964_v45 = vadd.f32 %v2347_v61, %v1973_v44  ;;  %v2106_v61 = vpack.c.bf16 %v5438_v19, %v5437_v35 }
 0x270   : > { %8033 = vst [vmem:[#allocation24_spill] sm:$0xff] %v6964_v45 }
 0x271   : > { %v1360_v51 = vpop.f32.mrf.mxu2 }
 0x272   : > { %v1855_v34 = vpop.f32.mrf.mxu3  ;;  %v1479_v20 = vadd.f32 %v1360_v51, %v939_v21  ;;  %v1076_v51 = vld [vmem:[%s6078_s29 + $0x282] sm:$0xff] }
 0x273   : > { %v941_v49 = vpop.f32.mrf.mxu1 }
 0x274   : > { %v1974_v13 = vadd.f32 %v1855_v34, %v1479_v20  ;;  %v2352_v44 = vpop.f32.mrf.mxu0  ;;  %v942_v58 = vadd.f32 %v941_v49, %v8036_v23  ;;  %v5319_v20 = vld [vmem:[%s6078_s29 + $0x2a0] sm:$0xff]  ;;  %v274_v49 = vpack.c.bf16 %v5317_v57, %v6949_v29 }
 0x275   : > { %v8040_v57 = vld [vmem:[#allocation19_spill] sm:$0xff] }
 0x276   : > { %5204 = vmatmul.msk.bf16.gmra.mxu1 %vm409_vm0, %v273_v55  ;;  %5252 = vmatmul.msk.bf16.gmra.mxu2 %vm409_vm0, %v1117_v24  ;;  %v6979_v40 = vadd.f32 %v2349_v17, %v1974_v13  ;;  %v1077_v55 = vld [vmem:[%s6078_s29 + $0x28a] sm:$0xff]  ;;  %v5439_v13 = vld [vmem:[%s6078_s29 + $0x2a1] sm:$0xff] }
 0x277   : > { %5372 = vmatmul.msk.bf16.gmra.mxu3 %vm409_vm0, %v1612_v2  ;;  %5492 = vmatmul.msk.bf16.gmra.mxu0 %vm409_vm0, %v2106_v61  ;;  %v6989_v24 = vld [vmem:[%s6078_s29 + $0x2a8] sm:$0xff]  ;;  %v8038_v17 = vld [vmem:[#allocation17_spill] sm:$0xff] }
 0x278   : > { %8035 = vst [vmem:[#allocation27_spill] sm:$0xff] %v6979_v40  ;;  %v5440_v40 = vld [vmem:[%s6078_s29 + $0x2a9] sm:$0xff] }
 0x279   : > { %v1363_v33 = vpop.f32.mrf.mxu2 }
 0x27a   : > { %v1858_v3 = vpop.f32.mrf.mxu3  ;;  %v1480_v9 = vadd.f32 %v1363_v33, %v942_v58  ;;  %v1118_v33 = vpack.c.bf16 %v1077_v55, %v1076_v51 }
 0x27b   : > { %v943_v21 = vpop.f32.mrf.mxu1 }
 0x27c   : > { %v1975_v35 = vadd.f32 %v1858_v3, %v1480_v9  ;;  %v2354_v19 = vpop.f32.mrf.mxu0  ;;  %v944_v2 = vadd.f32 %v943_v21, %v8038_v17  ;;  %v1613_v3 = vpack.c.bf16 %v6989_v24, %v5319_v20 }
 0x27e   : > { %v6984_v34 = vadd.f32 %v2352_v44, %v1975_v35  ;;  %v2107_v44 = vpack.c.bf16 %v5440_v40, %v5439_v13  ;;  %v1078_v13 = vld [vmem:[%s6078_s29 + $0x292] sm:$0xff] }
 0x280   : > { %8037 = vst [vmem:[#allocation30_spill] sm:$0xff] %v6984_v34 }
 0x281   : > { %v1365_v61 = vpop.f32.mrf.mxu2 }
 0x282   : > { %v1860_v45 = vpop.f32.mrf.mxu3  ;;  %v1481_v23 = vadd.f32 %v1365_v61, %v944_v2 }
 0x283   : > { %v946_v58 = vpop.f32.mrf.mxu1 }
 0x284   : > { %v1976_v9 = vadd.f32 %v1860_v45, %v1481_v23  ;;  %v2357_v35 = vpop.f32.mrf.mxu0  ;;  %v947_v21 = vadd.f32 %v946_v58, %v8040_v57  ;;  %v5321_v23 = vld [vmem:[%s6078_s29 + $0x2b0] sm:$0xff]  ;;  %v275_v58 = vpack.c.bf16 %v5319_v20, %v6969_v30 }
 0x285   : > { %v8044_v20 = vld [vmem:[#allocation25_spill] sm:$0xff] }
 0x286   : > { %5205 = vmatmul.msk.bf16.gmra.mxu1 %vm409_vm0, %v274_v49  ;;  %5253 = vmatmul.msk.bf16.gmra.mxu2 %vm409_vm0, %v1118_v33  ;;  %v6999_v29 = vadd.f32 %v2354_v19, %v1976_v9  ;;  %v1079_v49 = vld [vmem:[%s6078_s29 + $0x2a2] sm:$0xff]  ;;  %v8042_v19 = vld [vmem:[#allocation22_spill] sm:$0xff] }
 0x287   : > { %5373 = vmatmul.msk.bf16.gmra.mxu3 %vm409_vm0, %v1613_v3  ;;  %5493 = vmatmul.msk.bf16.gmra.mxu0 %vm409_vm0, %v2107_v44  ;;  %v7009_v33 = vld [vmem:[%s6078_s29 + $0x2c0] sm:$0xff]  ;;  %v5441_v9 = vld [vmem:[%s6078_s29 + $0x2b1] sm:$0xff] }
 0x288   : > { %8039 = vst [vmem:[#allocation33_spill] sm:$0xff] %v6999_v29  ;;  %v5442_v29 = vld [vmem:[%s6078_s29 + $0x2c1] sm:$0xff] }
 0x289   : > { %v1368_v40 = vpop.f32.mrf.mxu2 }
 0x28a   : > { %v1863_v45 = vpop.f32.mrf.mxu3  ;;  %v1482_v51 = vadd.f32 %v1368_v40, %v947_v21  ;;  %v1119_v40 = vpack.c.bf16 %v1079_v49, %v1078_v13 }
 0x28b   : > { %v948_v55 = vpop.f32.mrf.mxu1 }
 0x28c   : > { %v1977_v17 = vadd.f32 %v1863_v45, %v1482_v51  ;;  %v2359_v2 = vpop.f32.mrf.mxu0  ;;  %v949_v3 = vadd.f32 %v948_v55, %v8042_v19  ;;  %v1614_v45 = vpack.c.bf16 %v7009_v33, %v5321_v23 }
 0x28e   : > { %v7004_v61 = vadd.f32 %v2357_v35, %v1977_v17  ;;  %v2108_v35 = vpack.c.bf16 %v5442_v29, %v5441_v9  ;;  %v1080_v9 = vld [vmem:[%s6078_s29 + $0x2aa] sm:$0xff] }
 0x290   : > { %8041 = vst [vmem:[#allocation36_spill] sm:$0xff] %v7004_v61 }
 0x291   : > { %v1370_v44 = vpop.f32.mrf.mxu2 }
 0x292   : > { %v1865_v34 = vpop.f32.mrf.mxu3  ;;  %v1483_v57 = vadd.f32 %v1370_v44, %v949_v3 }
 0x293   : > { %v951_v21 = vpop.f32.mrf.mxu1 }
 0x294   : > { %v1978_v51 = vadd.f32 %v1865_v34, %v1483_v57  ;;  %v2362_v17 = vpop.f32.mrf.mxu0  ;;  %v952_v55 = vadd.f32 %v951_v21, %v8044_v20  ;;  %v5323_v57 = vld [vmem:[%s6078_s29 + $0x2c8] sm:$0xff]  ;;  %v276_v21 = vpack.c.bf16 %v5321_v23, %v6989_v24  ;;  %v8048_v23 = vld [vmem:[#allocation31_spill] sm:$0xff] }
 0x296   : > { %5206 = vmatmul.msk.bf16.gmra.mxu1 %vm409_vm0, %v275_v58  ;;  %5254 = vmatmul.msk.bf16.gmra.mxu2 %vm409_vm0, %v1119_v40  ;;  %v7019_v30 = vadd.f32 %v2359_v2, %v1978_v51  ;;  %v1081_v58 = vld [vmem:[%s6078_s29 + $0x2b2] sm:$0xff]  ;;  %v8046_v2 = vld [vmem:[#allocation28_spill] sm:$0xff] }
 0x297   : > { %5374 = vmatmul.msk.bf16.gmra.mxu3 %vm409_vm0, %v1614_v45  ;;  %5494 = vmatmul.msk.bf16.gmra.mxu0 %vm409_vm0, %v2108_v35  ;;  %v7029_v40 = vld [vmem:[%s6078_s29 + $0x2d0] sm:$0xff] }
 0x298   : > { %8043 = vst [vmem:[#allocation39_spill] sm:$0xff] %v7019_v30  ;;  %v5443_v51 = vld [vmem:[%s6078_s29 + $0x2c9] sm:$0xff]  ;;  %v5444_v30 = vld [vmem:[%s6078_s29 + $0x2d1] sm:$0xff] }
 0x299   : > { %v1373_v29 = vpop.f32.mrf.mxu2 }
 0x29a   : > { %v1868_v34 = vpop.f32.mrf.mxu3  ;;  %v1484_v13 = vadd.f32 %v1373_v29, %v952_v55  ;;  %v1120_v29 = vpack.c.bf16 %v1081_v58, %v1080_v9 }
 0x29b   : > { %v953_v49 = vpop.f32.mrf.mxu1 }
 0x29c   : > { %v1979_v19 = vadd.f32 %v1868_v34, %v1484_v13  ;;  %v2364_v3 = vpop.f32.mrf.mxu0  ;;  %v954_v45 = vadd.f32 %v953_v49, %v8046_v2  ;;  %v1615_v34 = vpack.c.bf16 %v7029_v40, %v5323_v57 }
 0x29e   : > { %v7024_v44 = vadd.f32 %v2362_v17, %v1979_v19  ;;  %v2109_v17 = vpack.c.bf16 %v5444_v30, %v5443_v51  ;;  %v1082_v51 = vld [vmem:[%s6078_s29 + $0x2c2] sm:$0xff] }
 0x2a0   : > { %8045 = vst [vmem:[#allocation42_spill] sm:$0xff] %v7024_v44 }
 0x2a1   : > { %v1375_v35 = vpop.f32.mrf.mxu2 }
 0x2a2   : > { %v1870_v61 = vpop.f32.mrf.mxu3  ;;  %v1485_v20 = vadd.f32 %v1375_v35, %v954_v45 }
 0x2a3   : > { %v956_v55 = vpop.f32.mrf.mxu1 }
 0x2a4   : > { %v1980_v13 = vadd.f32 %v1870_v61, %v1485_v20  ;;  %v2367_v19 = vpop.f32.mrf.mxu0  ;;  %v957_v49 = vadd.f32 %v956_v55, %v8048_v23  ;;  %v5325_v20 = vld [vmem:[%s6078_s29 + $0x2e0] sm:$0xff]  ;;  %v277_v55 = vpack.c.bf16 %v5323_v57, %v7009_v33  ;;  %v8052_v57 = vld [vmem:[#allocation37_spill] sm:$0xff] }
 0x2a6   : > { %5207 = vmatmul.msk.bf16.gmra.mxu1 %vm409_vm0, %v276_v21  ;;  %5255 = vmatmul.msk.bf16.gmra.mxu2 %vm409_vm0, %v1120_v29  ;;  %v7039_v24 = vadd.f32 %v2364_v3, %v1980_v13  ;;  %v1083_v21 = vld [vmem:[%s6078_s29 + $0x2ca] sm:$0xff]  ;;  %v8050_v3 = vld [vmem:[#allocation34_spill] sm:$0xff]  ;;  %v5445_v13 = vld [vmem:[%s6078_s29 + $0x2e1] sm:$0xff] }
 0x2a7   : > { %5375 = vmatmul.msk.bf16.gmra.mxu3 %vm409_vm0, %v1615_v34  ;;  %5495 = vmatmul.msk.bf16.gmra.mxu0 %vm409_vm0, %v2109_v17  ;;  %v7049_v29 = vld [vmem:[%s6078_s29 + $0x2e8] sm:$0xff] }
 0x2a8   : > { %8047 = vst [vmem:[#allocation45_spill] sm:$0xff] %v7039_v24  ;;  %v5446_v24 = vld [vmem:[%s6078_s29 + $0x2e9] sm:$0xff] }
 0x2a9   : > { %v1378_v30 = vpop.f32.mrf.mxu2 }
 0x2aa   : > { %v1873_v61 = vpop.f32.mrf.mxu3  ;;  %v1486_v9 = vadd.f32 %v1378_v30, %v957_v49  ;;  %v1121_v30 = vpack.c.bf16 %v1083_v21, %v1082_v51 }
 0x2ab   : > { %v958_v58 = vpop.f32.mrf.mxu1 }
 0x2ac   : > { %v1981_v2 = vadd.f32 %v1873_v61, %v1486_v9  ;;  %v2369_v45 = vpop.f32.mrf.mxu0  ;;  %v959_v34 = vadd.f32 %v958_v58, %v8050_v3  ;;  %v1616_v61 = vpack.c.bf16 %v7049_v29, %v5325_v20 }
 0x2ae   : > { %v7044_v35 = vadd.f32 %v2367_v19, %v1981_v2  ;;  %v2110_v19 = vpack.c.bf16 %v5446_v24, %v5445_v13  ;;  %v1084_v13 = vld [vmem:[%s6078_s29 + $0x2d2] sm:$0xff] }
 0x2b0   : > { %8049 = vst [vmem:[#allocation3_spill] sm:$0xff] %v7044_v35 }
 0x2b1   : > { %v1380_v17 = vpop.f32.mrf.mxu2 }
 0x2b2   : > { %v1875_v44 = vpop.f32.mrf.mxu3  ;;  %v1487_v23 = vadd.f32 %v1380_v17, %v959_v34 }
 0x2b3   : > { %v961_v49 = vpop.f32.mrf.mxu1 }
 0x2b4   : > { %v1982_v9 = vadd.f32 %v1875_v44, %v1487_v23  ;;  %v2372_v2 = vpop.f32.mrf.mxu0  ;;  %v962_v58 = vadd.f32 %v961_v49, %v8052_v57  ;;  %v5327_v23 = vld [vmem:[%s6078_s29 + $0x2f0] sm:$0xff]  ;;  %v278_v49 = vpack.c.bf16 %v5325_v20, %v7029_v40  ;;  %v8055_v40 = vld [vmem:[#allocation43_spill] sm:$0xff] }
 0x2b6   : > { %5208 = vmatmul.msk.bf16.gmra.mxu1 %vm409_vm0, %v277_v55  ;;  %5256 = vmatmul.msk.bf16.gmra.mxu2 %vm409_vm0, %v1121_v30  ;;  %v7059_v33 = vadd.f32 %v2369_v45, %v1982_v9  ;;  %v1085_v55 = vld [vmem:[%s6078_s29 + $0x2e2] sm:$0xff]  ;;  %v5447_v9 = vld [vmem:[%s6078_s29 + $0x2f1] sm:$0xff] }
 0x2b7   : > { %5376 = vmatmul.msk.bf16.gmra.mxu3 %vm409_vm0, %v1616_v61  ;;  %5496 = vmatmul.msk.bf16.gmra.mxu0 %vm409_vm0, %v2110_v19  ;;  %v5328_v30 = vld [vmem:[%s6078_s29 + $0x300] sm:$0xff]  ;;  %v8053_v61 = vld [vmem:[#allocation40_spill] sm:$0xff] }
 0x2b8   : > { %8051 = vst [vmem:[#allocation5_spill] sm:$0xff] %v7059_v33  ;;  %v5448_v33 = vld [vmem:[%s6078_s29 + $0x301] sm:$0xff] }
 0x2b9   : > { %v1383_v24 = vpop.f32.mrf.mxu2 }
 0x2ba   : > { %v1878_v44 = vpop.f32.mrf.mxu3  ;;  %v1488_v51 = vadd.f32 %v1383_v24, %v962_v58  ;;  %v1122_v58 = vpack.c.bf16 %v1085_v55, %v1084_v13  ;;  %v1617_v24 = vpack.c.bf16 %v5328_v30, %v5327_v23 }
 0x2bb   : > { %v963_v21 = vpop.f32.mrf.mxu1 }
 0x2bc   : > { %v1983_v3 = vadd.f32 %v1878_v44, %v1488_v51  ;;  %v2374_v34 = vpop.f32.mrf.mxu0  ;;  %v964_v45 = vadd.f32 %v963_v21, %v8053_v61  ;;  %v2111_v44 = vpack.c.bf16 %v5448_v33, %v5447_v9  ;;  %v1086_v61 = vld [vmem:[%s6078_s29 + $0x2ea] sm:$0xff]  ;;  %v1087_v9 = vld [vmem:[%s6078_s29 + $0x2f2] sm:$0xff] }
 0x2be   : > { %v7064_v17 = vadd.f32 %v2372_v2, %v1983_v3 }
 0x2c1   : > { %v1385_v35 = vpop.f32.mrf.mxu2 }
 0x2c2   : > { %v1880_v19 = vpop.f32.mrf.mxu3  ;;  %v1489_v57 = vadd.f32 %v1385_v35, %v964_v45 }
 0x2c3   : > { %v966_v22 = vpop.f32.mrf.mxu1 }
 0x2c4   : > { %v1984_v51 = vadd.f32 %v1880_v19, %v1489_v57  ;;  %v2377_v2 = vpop.f32.mrf.mxu0  ;;  %v967_v35 = vadd.f32 %v966_v22, %v8055_v40  ;;  %v5329_v19 = vld [vmem:[%s6078_s29 + $0x308] sm:$0xff]  ;;  %v8057_v57 = vld [vmem:[#allocation46_spill] sm:$0xff]  ;;  %v279_v22 = vpack.c.bf16 %v5327_v23, %v7049_v29 }
 0x2c5   : > { %v8059_v23 = vld [vmem:[#allocation4_spill] sm:$0xff] }
 0x2c6   : > { %5209 = vmatmul.msk.bf16.gmra.mxu1 %vm409_vm0, %v278_v49  ;;  %5257 = vmatmul.msk.bf16.gmra.mxu2 %vm409_vm0, %v1122_v58  ;;  %v7076_v21 = vadd.f32 %v2374_v34, %v1984_v51  ;;  %v5330_v49 = vld [vmem:[%s6078_s29 + $0x310] sm:$0xff] }
 0x2c7   : > { %5377 = vmatmul.msk.bf16.gmra.mxu3 %vm409_vm0, %v1617_v24  ;;  %5497 = vmatmul.msk.bf16.gmra.mxu0 %vm409_vm0, %v2111_v44  ;;  %v5449_v58 = vld [vmem:[%s6078_s29 + $0x309] sm:$0xff]  ;;  %v5450_v24 = vld [vmem:[%s6078_s29 + $0x311] sm:$0xff] }
 0x2c8   : > { %8054 = vst [vmem:[#allocation7_spill] sm:$0xff] %v7076_v21 }
 0x2c9   : > { %v1388_v20 = vpop.f32.mrf.mxu2 }
 0x2ca   : > { %v1883_v33 = vpop.f32.mrf.mxu3  ;;  %v1490_v3 = vadd.f32 %v1388_v20, %v967_v35  ;;  %v1123_v35 = vpack.c.bf16 %v1087_v9, %v1086_v61  ;;  %v1618_v20 = vpack.c.bf16 %v5330_v49, %v5329_v19 }
 0x2cb   : > { %v968_v13 = vpop.f32.mrf.mxu1 }
 0x2cc   : > { %v1985_v55 = vadd.f32 %v1883_v33, %v1490_v3  ;;  %v2379_v30 = vpop.f32.mrf.mxu0  ;;  %v969_v34 = vadd.f32 %v968_v13, %v8057_v57  ;;  %v2112_v33 = vpack.c.bf16 %v5450_v24, %v5449_v58  ;;  %v5500_v58 = vld [vmem:[%s6078_s29 + $0x2a] sm:$0xff]  ;;  %v5619_v24 = vld [vmem:[%s6078_s29 + $0x40] sm:$0xff] }
 0x2ce   : > { %v7081_v45 = vadd.f32 %v2377_v2, %v1985_v55 }
 0x2d0   : > { %8056 = vst [vmem:[#allocation9_spill] sm:$0xff] %v7081_v45 }
 0x2d1   : > { %v1390_v51 = vpop.f32.mrf.mxu2 }
 0x2d2   : > { %v1885_v44 = vpop.f32.mrf.mxu3  ;;  %v1491_v40 = vadd.f32 %v1390_v51, %v969_v34  ;;  %v5499_v34 = vld [vmem:[%s6078_s29 + $0x22] sm:$0xff] }
 0x2d3   : > { %v971_v21 = vpop.f32.mrf.mxu1 }
 0x2d4   : > { %v1986_v2 = vadd.f32 %v1885_v44, %v1491_v40  ;;  %v2382_v3 = vpop.f32.mrf.mxu0  ;;  %v972_v13 = vadd.f32 %v971_v21, %v8059_v23  ;;  %v5620_v44 = vld [vmem:[%s6078_s29 + $0x48] sm:$0xff]  ;;  %v8061_v40 = vld [vmem:[#allocation6_spill] sm:$0xff]  ;;  %v2571_v23 = vpack.c.bf16 %v5500_v58, %v5499_v34 }
 0x2d5   : > { %v8063_v34 = vld [vmem:[#allocation8_spill] sm:$0xff] }
 0x2d6   : > { %5210 = vmatmul.msk.bf16.gmra.mxu1 %vm409_vm0, %v279_v22  ;;  %5258 = vmatmul.msk.bf16.gmra.mxu2 %vm409_vm0, %v1123_v35  ;;  %v7093_v29 = vadd.f32 %v2379_v30, %v1986_v2  ;;  %v5739_v30 = vld [vmem:[%s6078_s29 + $0x41] sm:$0xff]  ;;  %v5740_v22 = vld [vmem:[%s6078_s29 + $0x49] sm:$0xff] }
 0x2d7   : > { %5378 = vmatmul.msk.bf16.gmra.mxu3 %vm409_vm0, %v1618_v20  ;;  %5498 = vmatmul.msk.bf16.gmra.mxu0 %vm409_vm0, %v2112_v33  ;;  %v5859_v20 = vld [vmem:[%s6078_s29 + $0x42] sm:$0xff]  ;;  %v7108_v33 = vld [vmem:[%s6078_s29 + $0x4a] sm:$0xff] }
 0x2d8   : > { %8058 = vst [vmem:[#allocation11_spill] sm:$0xff] %v7093_v29  ;;  %v4054_v29 = vpack.c.bf16 %v7108_v33, %v5859_v20 }
 0x2d9   : > { %v1393_v55 = vpop.f32.mrf.mxu2 }
 0x2da   : > { %v1888_v61 = vpop.f32.mrf.mxu3  ;;  %v1492_v9 = vadd.f32 %v1393_v55, %v972_v13 }
 0x2db   : > { %v973_v19 = vpop.f32.mrf.mxu1 }
 0x2dc   : > { %v1987_v49 = vadd.f32 %v1888_v61, %v1492_v9  ;;  %v2384_v57 = vpop.f32.mrf.mxu0  ;;  %v974_v35 = vadd.f32 %v973_v19, %v8061_v40  ;;  %v3066_v61 = vpack.c.bf16 %v5620_v44, %v5619_v24  ;;  %v3560_v9 = vpack.c.bf16 %v5740_v22, %v5739_v30 }
 0x2de   : > { %v7100_v51 = vadd.f32 %v2382_v3, %v1987_v49 }
 0x2e0   : > { %8060 = vst [vmem:[#allocation13_spill] sm:$0xff] %v7100_v51 }
 0x2e1   : > { %v1395_v21 = vpop.f32.mrf.mxu2 }
 0x2e2   : > { %v1890_v2 = vpop.f32.mrf.mxu3  ;;  %v1493_v13 = vadd.f32 %v1395_v21, %v974_v35  ;;  %v5501_v21 = vld [vmem:[%s6078_s29 + $0x32] sm:$0xff] }
 0x2e3   : > { %v976_v55 = vpop.f32.mrf.mxu1 }
 0x2e4   : > { %v1988_v3 = vadd.f32 %v1890_v2, %v1493_v13  ;;  %v2387_v49 = vpop.f32.mrf.mxu0  ;;  %v977_v58 = vadd.f32 %v976_v55, %v8063_v34  ;;  %v5621_v2 = vld [vmem:[%s6078_s29 + $0x50] sm:$0xff]  ;;  %v5622_v13 = vld [vmem:[%s6078_s29 + $0x60] sm:$0xff]  ;;  %v2572_v34 = vpack.c.bf16 %v5859_v20, %v5501_v21 }
 0x2e6   : > { %5583 = vmatmul.msk.bf16.vlgmr.msra.gmra.mxu1 %vm409_vm0, %v2571_v23  ;;  %5703 = vmatmul.msk.bf16.vlgmr.msra.gmra.mxu2 %vm409_vm0, %v3066_v61  ;;  %v7114_v19 = vadd.f32 %v2384_v57, %v1988_v3  ;;  %v5741_v61 = vld [vmem:[%s6078_s29 + $0x51] sm:$0xff]  ;;  %v5742_v57 = vld [vmem:[%s6078_s29 + $0x61] sm:$0xff] }
 0x2e7   : > { %5823 = vmatmul.msk.bf16.vlgmr.msra.gmra.mxu3 %vm409_vm0, %v3560_v9  ;;  %5943 = vmatmul.msk.bf16.vlgmr.msra.gmra.mxu0 %vm409_vm0, %v4054_v29  ;;  %v8065_v9 = vld [vmem:[#allocation10_spill] sm:$0xff]  ;;  %v7128_v29 = vld [vmem:[%s6078_s29 + $0x62] sm:$0xff] }
 0x2e8   : > { %8062 = vst [vmem:[#allocation15_spill] sm:$0xff] %v7114_v19  ;;  %v5861_v19 = vld [vmem:[%s6078_s29 + $0x52] sm:$0xff] }
 0x2e9   : > { %v1398_v24 = vpop.f32.mrf.mxu2 }
 0x2ea   : > { %v1893_v44 = vpop.f32.mrf.mxu3  ;;  %v1494_v30 = vadd.f32 %v1398_v24, %v977_v58  ;;  %v3067_v24 = vpack.c.bf16 %v5622_v13, %v5621_v2 }
 0x2eb   : > { %v978_v22 = vpop.f32.mrf.mxu1 }
 0x2ec   : > { %v1989_v40 = vadd.f32 %v1893_v44, %v1494_v30  ;;  %v2389_v35 = vpop.f32.mrf.mxu0  ;;  %v979_v3 = vadd.f32 %v978_v22, %v8065_v9  ;;  %v3561_v44 = vpack.c.bf16 %v5742_v57, %v5741_v61  ;;  %v4055_v30 = vpack.c.bf16 %v7128_v29, %v5861_v19  ;;  %v5623_v9 = vld [vmem:[%s6078_s29 + $0x68] sm:$0xff] }
 0x2ee   : > { %v7120_v23 = vadd.f32 %v2387_v49, %v1989_v40 }
 0x2f0   : > { %8064 = vst [vmem:[#allocation17_spill] sm:$0xff] %v7120_v23 }
 0x2f1   : > { %v1400_v51 = vpop.f32.mrf.mxu2 }
 0x2f2   : > { %v1895_v55 = vpop.f32.mrf.mxu3  ;;  %v1495_v45 = vadd.f32 %v1400_v51, %v979_v3  ;;  %v8067_v51 = vld [vmem:[#allocation12_spill] sm:$0xff] }
 0x2f3   : > { %v981_v58 = vpop.f32.mrf.mxu1 }
 0x2f4   : > { %v1990_v49 = vadd.f32 %v1895_v55, %v1495_v45  ;;  %v2392_v40 = vpop.f32.mrf.mxu0  ;;  %v982_v22 = vadd.f32 %v981_v58, %v8067_v51  ;;  %v5624_v55 = vld [vmem:[%s6078_s29 + $0x70] sm:$0xff]  ;;  %v2573_v58 = vpack.c.bf16 %v5861_v19, %v7108_v33  ;;  %v8071_v19 = vld [vmem:[#allocation16_spill] sm:$0xff] }
 0x2f6   : > { %5584 = vmatmul.msk.bf16.gmra.mxu1 %vm409_vm0, %v2572_v34  ;;  %5704 = vmatmul.msk.bf16.gmra.mxu2 %vm409_vm0, %v3067_v24  ;;  %v7134_v20 = vadd.f32 %v2389_v35, %v1990_v49  ;;  %v5743_v34 = vld [vmem:[%s6078_s29 + $0x69] sm:$0xff]  ;;  %v5744_v24 = vld [vmem:[%s6078_s29 + $0x71] sm:$0xff] }
 0x2f7   : > { %5824 = vmatmul.msk.bf16.gmra.mxu3 %vm409_vm0, %v3561_v44  ;;  %5944 = vmatmul.msk.bf16.gmra.mxu0 %vm409_vm0, %v4055_v30  ;;  %v8069_v44 = vld [vmem:[#allocation14_spill] sm:$0xff]  ;;  %v5863_v49 = vld [vmem:[%s6078_s29 + $0x6a] sm:$0xff] }
 0x2f8   : > { %8066 = vst [vmem:[#allocation19_spill] sm:$0xff] %v7134_v20  ;;  %v7147_v20 = vld [vmem:[%s6078_s29 + $0x72] sm:$0xff] }
 0x2f9   : > { %v1403_v21 = vpop.f32.mrf.mxu2 }
 0x2fa   : > { %v1898_v45 = vpop.f32.mrf.mxu3  ;;  %v1496_v2 = vadd.f32 %v1403_v21, %v982_v22  ;;  %v3068_v21 = vpack.c.bf16 %v5624_v55, %v5623_v9 }
 0x2fb   : > { %v983_v13 = vpop.f32.mrf.mxu1 }
 0x2fc   : > { %v1991_v61 = vadd.f32 %v1898_v45, %v1496_v2  ;;  %v2394_v57 = vpop.f32.mrf.mxu0  ;;  %v984_v35 = vadd.f32 %v983_v13, %v8069_v44  ;;  %v3562_v45 = vpack.c.bf16 %v5744_v24, %v5743_v34 }
 0x2fe   : > { %v7139_v3 = vadd.f32 %v2392_v40, %v1991_v61  ;;  %v4056_v40 = vpack.c.bf16 %v7147_v20, %v5863_v49 }
 0x300   : > { %8068 = vst [vmem:[#allocation22_spill] sm:$0xff] %v7139_v3 }
 0x301   : > { %v1405_v30 = vpop.f32.mrf.mxu2 }
 0x302   : > { %v1900_v23 = vpop.f32.mrf.mxu3  ;;  %v1497_v51 = vadd.f32 %v1405_v30, %v984_v35  ;;  %v5625_v35 = vld [vmem:[%s6078_s29 + $0x80] sm:$0xff] }
 0x303   : > { %v986_v22 = vpop.f32.mrf.mxu1 }
 0x304   : > { %v1992_v2 = vadd.f32 %v1900_v23, %v1497_v51  ;;  %v2397_v61 = vpop.f32.mrf.mxu0  ;;  %v987_v13 = vadd.f32 %v986_v22, %v8071_v19  ;;  %v5745_v51 = vld [vmem:[%s6078_s29 + $0x81] sm:$0xff]  ;;  %v2574_v22 = vpack.c.bf16 %v5863_v49, %v7128_v29 }
 0x305   : > { %v8075_v49 = vld [vmem:[#allocation20_spill] sm:$0xff] }
 0x306   : > { %5585 = vmatmul.msk.bf16.gmra.mxu1 %vm409_vm0, %v2573_v58  ;;  %5705 = vmatmul.msk.bf16.gmra.mxu2 %vm409_vm0, %v3068_v21  ;;  %v7154_v33 = vadd.f32 %v2394_v57, %v1992_v2  ;;  %v5626_v58 = vld [vmem:[%s6078_s29 + $0x88] sm:$0xff] }
 0x307   : > { %5825 = vmatmul.msk.bf16.gmra.mxu3 %vm409_vm0, %v3562_v45  ;;  %5945 = vmatmul.msk.bf16.gmra.mxu0 %vm409_vm0, %v4056_v40  ;;  %v5746_v21 = vld [vmem:[%s6078_s29 + $0x89] sm:$0xff]  ;;  %v8073_v45 = vld [vmem:[#allocation18_spill] sm:$0xff] }
 0x308   : > { %8070 = vst [vmem:[#allocation25_spill] sm:$0xff] %v7154_v33  ;;  %v5865_v2 = vld [vmem:[%s6078_s29 + $0x82] sm:$0xff]  ;;  %v7167_v33 = vld [vmem:[%s6078_s29 + $0x8a] sm:$0xff] }
 0x309   : > { %v1408_v9 = vpop.f32.mrf.mxu2 }
 0x30a   : > { %v1903_v23 = vpop.f32.mrf.mxu3  ;;  %v1498_v55 = vadd.f32 %v1408_v9, %v987_v13  ;;  %v3069_v9 = vpack.c.bf16 %v5626_v58, %v5625_v35 }
 0x30b   : > { %v988_v34 = vpop.f32.mrf.mxu1 }
 0x30c   : > { %v1993_v24 = vadd.f32 %v1903_v23, %v1498_v55  ;;  %v2399_v44 = vpop.f32.mrf.mxu0  ;;  %v989_v57 = vadd.f32 %v988_v34, %v8073_v45  ;;  %v3563_v23 = vpack.c.bf16 %v5746_v21, %v5745_v51 }
 0x30e   : > { %v7159_v30 = vadd.f32 %v2397_v61, %v1993_v24  ;;  %v4057_v61 = vpack.c.bf16 %v7167_v33, %v5865_v2 }
 0x310   : > { %8072 = vst [vmem:[#allocation28_spill] sm:$0xff] %v7159_v30 }
 0x311   : > { %v1410_v40 = vpop.f32.mrf.mxu2 }
 0x312   : > { %v1905_v3 = vpop.f32.mrf.mxu3  ;;  %v1499_v19 = vadd.f32 %v1410_v40, %v989_v57  ;;  %v5627_v57 = vld [vmem:[%s6078_s29 + $0x90] sm:$0xff] }
 0x313   : > { %v991_v13 = vpop.f32.mrf.mxu1 }
 0x314   : > { %v1994_v55 = vadd.f32 %v1905_v3, %v1499_v19  ;;  %v2402_v24 = vpop.f32.mrf.mxu0  ;;  %v992_v34 = vadd.f32 %v991_v13, %v8075_v49  ;;  %v5747_v19 = vld [vmem:[%s6078_s29 + $0x91] sm:$0xff]  ;;  %v2575_v13 = vpack.c.bf16 %v5865_v2, %v7147_v20 }
 0x315   : > { %v8079_v2 = vld [vmem:[#allocation26_spill] sm:$0xff] }
 0x316   : > { %5586 = vmatmul.msk.bf16.gmra.mxu1 %vm409_vm0, %v2574_v22  ;;  %5706 = vmatmul.msk.bf16.gmra.mxu2 %vm409_vm0, %v3069_v9  ;;  %v7174_v29 = vadd.f32 %v2399_v44, %v1994_v55  ;;  %v5628_v22 = vld [vmem:[%s6078_s29 + $0xa0] sm:$0xff]  ;;  %v5867_v55 = vld [vmem:[%s6078_s29 + $0x92] sm:$0xff] }
 0x317   : > { %5826 = vmatmul.msk.bf16.gmra.mxu3 %vm409_vm0, %v3563_v23  ;;  %5946 = vmatmul.msk.bf16.gmra.mxu0 %vm409_vm0, %v4057_v61  ;;  %v5748_v9 = vld [vmem:[%s6078_s29 + $0xa1] sm:$0xff] }
 0x318   : > { %8074 = vst [vmem:[#allocation31_spill] sm:$0xff] %v7174_v29  ;;  %v8077_v23 = vld [vmem:[#allocation23_spill] sm:$0xff] }
 0x319   : > { %v1413_v35 = vpop.f32.mrf.mxu2  ;;  %v7187_v29 = vld [vmem:[%s6078_s29 + $0xa2] sm:$0xff] }
 0x31a   : > { %v1908_v3 = vpop.f32.mrf.mxu3  ;;  %v1500_v58 = vadd.f32 %v1413_v35, %v992_v34  ;;  %v3070_v35 = vpack.c.bf16 %v5628_v22, %v5627_v57 }
 0x31b   : > { %v993_v51 = vpop.f32.mrf.mxu1 }
 0x31c   : > { %v1995_v21 = vadd.f32 %v1908_v3, %v1500_v58  ;;  %v2404_v45 = vpop.f32.mrf.mxu0  ;;  %v994_v44 = vadd.f32 %v993_v51, %v8077_v23  ;;  %v3564_v3 = vpack.c.bf16 %v5748_v9, %v5747_v19 }
 0x31e   : > { %v7179_v40 = vadd.f32 %v2402_v24, %v1995_v21  ;;  %v4058_v24 = vpack.c.bf16 %v7187_v29, %v5867_v55 }
 0x320   : > { %8076 = vst [vmem:[#allocation34_spill] sm:$0xff] %v7179_v40 }
 0x321   : > { %v1415_v61 = vpop.f32.mrf.mxu2 }
 0x322   : > { %v1910_v30 = vpop.f32.mrf.mxu3  ;;  %v1501_v49 = vadd.f32 %v1415_v61, %v994_v44  ;;  %v5629_v44 = vld [vmem:[%s6078_s29 + $0xa8] sm:$0xff] }
 0x323   : > { %v996_v34 = vpop.f32.mrf.mxu1 }
 0x324   : > { %v1996_v58 = vadd.f32 %v1910_v30, %v1501_v49  ;;  %v2407_v21 = vpop.f32.mrf.mxu0  ;;  %v997_v51 = vadd.f32 %v996_v34, %v8079_v2  ;;  %v5749_v49 = vld [vmem:[%s6078_s29 + $0xa9] sm:$0xff]  ;;  %v2576_v34 = vpack.c.bf16 %v5867_v55, %v7167_v33 }
 0x325   : > { %v8083_v55 = vld [vmem:[#allocation32_spill] sm:$0xff] }
 0x326   : > { %5587 = vmatmul.msk.bf16.gmra.mxu1 %vm409_vm0, %v2575_v13  ;;  %5707 = vmatmul.msk.bf16.gmra.mxu2 %vm409_vm0, %v3070_v35  ;;  %v7194_v20 = vadd.f32 %v2404_v45, %v1996_v58  ;;  %v5630_v13 = vld [vmem:[%s6078_s29 + $0xb0] sm:$0xff] }
 0x327   : > { %5827 = vmatmul.msk.bf16.gmra.mxu3 %vm409_vm0, %v3564_v3  ;;  %5947 = vmatmul.msk.bf16.gmra.mxu0 %vm409_vm0, %v4058_v24  ;;  %v5750_v35 = vld [vmem:[%s6078_s29 + $0xb1] sm:$0xff] }
 0x328   : > { %8078 = vst [vmem:[#allocation37_spill] sm:$0xff] %v7194_v20  ;;  %v8081_v3 = vld [vmem:[#allocation29_spill] sm:$0xff] }
 0x329   : > { %v1418_v57 = vpop.f32.mrf.mxu2  ;;  %v5869_v58 = vld [vmem:[%s6078_s29 + $0xaa] sm:$0xff]  ;;  %v7207_v20 = vld [vmem:[%s6078_s29 + $0xb2] sm:$0xff] }
 0x32a   : > { %v1913_v30 = vpop.f32.mrf.mxu3  ;;  %v1502_v22 = vadd.f32 %v1418_v57, %v997_v51  ;;  %v3071_v57 = vpack.c.bf16 %v5630_v13, %v5629_v44 }
 0x32b   : > { %v998_v19 = vpop.f32.mrf.mxu1 }
 0x32c   : > { %v1997_v9 = vadd.f32 %v1913_v30, %v1502_v22  ;;  %v2409_v23 = vpop.f32.mrf.mxu0  ;;  %v999_v45 = vadd.f32 %v998_v19, %v8081_v3  ;;  %v3565_v30 = vpack.c.bf16 %v5750_v35, %v5749_v49 }
 0x32e   : > { %v7199_v61 = vadd.f32 %v2407_v21, %v1997_v9  ;;  %v4059_v21 = vpack.c.bf16 %v7207_v20, %v5869_v58 }
 0x330   : > { %8080 = vst [vmem:[#allocation40_spill] sm:$0xff] %v7199_v61 }
 0x331   : > { %v1420_v24 = vpop.f32.mrf.mxu2 }
 0x332   : > { %v1915_v40 = vpop.f32.mrf.mxu3  ;;  %v1503_v2 = vadd.f32 %v1420_v24, %v999_v45  ;;  %v5631_v45 = vld [vmem:[%s6078_s29 + $0xc0] sm:$0xff] }
 0x333   : > { %v1001_v51 = vpop.f32.mrf.mxu1 }
 0x334   : > { %v1998_v22 = vadd.f32 %v1915_v40, %v1503_v2  ;;  %v2412_v9 = vpop.f32.mrf.mxu0  ;;  %v1002_v19 = vadd.f32 %v1001_v51, %v8083_v55  ;;  %v5751_v2 = vld [vmem:[%s6078_s29 + $0xc1] sm:$0xff]  ;;  %v2577_v51 = vpack.c.bf16 %v5869_v58, %v7187_v29  ;;  %v8087_v58 = vld [vmem:[#allocation38_spill] sm:$0xff] }
 0x336   : > { %5588 = vmatmul.msk.bf16.gmra.mxu1 %vm409_vm0, %v2576_v34  ;;  %5708 = vmatmul.msk.bf16.gmra.mxu2 %vm409_vm0, %v3071_v57  ;;  %v7214_v33 = vadd.f32 %v2409_v23, %v1998_v22  ;;  %v5632_v34 = vld [vmem:[%s6078_s29 + $0xc8] sm:$0xff] }
 0x337   : > { %5828 = vmatmul.msk.bf16.gmra.mxu3 %vm409_vm0, %v3565_v30  ;;  %5948 = vmatmul.msk.bf16.gmra.mxu0 %vm409_vm0, %v4059_v21  ;;  %v5752_v57 = vld [vmem:[%s6078_s29 + $0xc9] sm:$0xff]  ;;  %v8085_v30 = vld [vmem:[#allocation35_spill] sm:$0xff] }
 0x338   : > { %8082 = vst [vmem:[#allocation43_spill] sm:$0xff] %v7214_v33  ;;  %v5871_v22 = vld [vmem:[%s6078_s29 + $0xc2] sm:$0xff]  ;;  %v7227_v33 = vld [vmem:[%s6078_s29 + $0xca] sm:$0xff] }
 0x339   : > { %v1423_v44 = vpop.f32.mrf.mxu2 }
 0x33a   : > { %v1918_v40 = vpop.f32.mrf.mxu3  ;;  %v1504_v13 = vadd.f32 %v1423_v44, %v1002_v19  ;;  %v3072_v44 = vpack.c.bf16 %v5632_v34, %v5631_v45 }
 0x33b   : > { %v1003_v49 = vpop.f32.mrf.mxu1 }
 0x33c   : > { %v1999_v35 = vadd.f32 %v1918_v40, %v1504_v13  ;;  %v2414_v3 = vpop.f32.mrf.mxu0  ;;  %v1004_v23 = vadd.f32 %v1003_v49, %v8085_v30  ;;  %v3566_v40 = vpack.c.bf16 %v5752_v57, %v5751_v2 }
 0x33e   : > { %v7219_v24 = vadd.f32 %v2412_v9, %v1999_v35  ;;  %v4060_v9 = vpack.c.bf16 %v7227_v33, %v5871_v22 }
 0x340   : > { %8084 = vst [vmem:[#allocation46_spill] sm:$0xff] %v7219_v24 }
 0x341   : > { %v1425_v21 = vpop.f32.mrf.mxu2 }
 0x342   : > { %v1920_v61 = vpop.f32.mrf.mxu3  ;;  %v1505_v55 = vadd.f32 %v1425_v21, %v1004_v23  ;;  %v5633_v23 = vld [vmem:[%s6078_s29 + $0xd0] sm:$0xff] }
 0x343   : > { %v1006_v19 = vpop.f32.mrf.mxu1 }
 0x344   : > { %v2000_v13 = vadd.f32 %v1920_v61, %v1505_v55  ;;  %v2417_v35 = vpop.f32.mrf.mxu0  ;;  %v1007_v49 = vadd.f32 %v1006_v19, %v8087_v58  ;;  %v5753_v55 = vld [vmem:[%s6078_s29 + $0xd1] sm:$0xff]  ;;  %v2578_v19 = vpack.c.bf16 %v5871_v22, %v7207_v20  ;;  %v8091_v22 = vld [vmem:[#allocation44_spill] sm:$0xff] }
 0x346   : > { %5589 = vmatmul.msk.bf16.gmra.mxu1 %vm409_vm0, %v2577_v51  ;;  %5709 = vmatmul.msk.bf16.gmra.mxu2 %vm409_vm0, %v3072_v44  ;;  %v7234_v29 = vadd.f32 %v2414_v3, %v2000_v13  ;;  %v5634_v51 = vld [vmem:[%s6078_s29 + $0xe0] sm:$0xff]  ;;  %v5873_v13 = vld [vmem:[%s6078_s29 + $0xd2] sm:$0xff] }
 0x347   : > { %5829 = vmatmul.msk.bf16.gmra.mxu3 %vm409_vm0, %v3566_v40  ;;  %5949 = vmatmul.msk.bf16.gmra.mxu0 %vm409_vm0, %v4060_v9  ;;  %v5754_v44 = vld [vmem:[%s6078_s29 + $0xe1] sm:$0xff]  ;;  %v8089_v40 = vld [vmem:[#allocation41_spill] sm:$0xff] }
 0x348   : > { %8086 = vst [vmem:[#allocation4_spill] sm:$0xff] %v7234_v29  ;;  %v7247_v29 = vld [vmem:[%s6078_s29 + $0xe2] sm:$0xff] }
 0x349   : > { %v1428_v45 = vpop.f32.mrf.mxu2 }
 0x34a   : > { %v1923_v61 = vpop.f32.mrf.mxu3  ;;  %v1506_v34 = vadd.f32 %v1428_v45, %v1007_v49  ;;  %v3073_v45 = vpack.c.bf16 %v5634_v51, %v5633_v23 }
 0x34b   : > { %v1008_v2 = vpop.f32.mrf.mxu1 }
 0x34c   : > { %v2001_v57 = vadd.f32 %v1923_v61, %v1506_v34  ;;  %v2419_v30 = vpop.f32.mrf.mxu0  ;;  %v1009_v3 = vadd.f32 %v1008_v2, %v8089_v40  ;;  %v3567_v61 = vpack.c.bf16 %v5754_v44, %v5753_v55 }
 0x34e   : > { %v7239_v21 = vadd.f32 %v2417_v35, %v2001_v57  ;;  %v4061_v35 = vpack.c.bf16 %v7247_v29, %v5873_v13 }
 0x350   : > { %8088 = vst [vmem:[#allocation6_spill] sm:$0xff] %v7239_v21 }
 0x351   : > { %v1430_v9 = vpop.f32.mrf.mxu2 }
 0x352   : > { %v1925_v24 = vpop.f32.mrf.mxu3  ;;  %v1507_v58 = vadd.f32 %v1430_v9, %v1009_v3  ;;  %v5635_v3 = vld [vmem:[%s6078_s29 + $0xe8] sm:$0xff] }
 0x353   : > { %v1011_v49 = vpop.f32.mrf.mxu1 }
 0x354   : > { %v2002_v34 = vadd.f32 %v1925_v24, %v1507_v58  ;;  %v2422_v57 = vpop.f32.mrf.mxu0  ;;  %v1012_v2 = vadd.f32 %v1011_v49, %v8091_v22  ;;  %v5755_v58 = vld [vmem:[%s6078_s29 + $0xe9] sm:$0xff]  ;;  %v2579_v49 = vpack.c.bf16 %v5873_v13, %v7227_v33 }
 0x356   : > { %5590 = vmatmul.msk.bf16.gmra.mxu1 %vm409_vm0, %v2578_v19  ;;  %5710 = vmatmul.msk.bf16.gmra.mxu2 %vm409_vm0, %v3073_v45  ;;  %v7254_v20 = vadd.f32 %v2419_v30, %v2002_v34  ;;  %v5636_v19 = vld [vmem:[%s6078_s29 + $0xf0] sm:$0xff] }
 0x357   : > { %5830 = vmatmul.msk.bf16.gmra.mxu3 %vm409_vm0, %v3567_v61  ;;  %5950 = vmatmul.msk.bf16.gmra.mxu0 %vm409_vm0, %v4061_v35  ;;  %v5756_v45 = vld [vmem:[%s6078_s29 + $0xf1] sm:$0xff]  ;;  %v8093_v61 = vld [vmem:[#allocation47_spill] sm:$0xff] }
 0x358   : > { %8090 = vst [vmem:[#allocation8_spill] sm:$0xff] %v7254_v20  ;;  %v5875_v34 = vld [vmem:[%s6078_s29 + $0xea] sm:$0xff]  ;;  %v7267_v20 = vld [vmem:[%s6078_s29 + $0xf2] sm:$0xff] }
 0x359   : > { %v1433_v23 = vpop.f32.mrf.mxu2 }
 0x35a   : > { %v1928_v24 = vpop.f32.mrf.mxu3  ;;  %v1508_v51 = vadd.f32 %v1433_v23, %v1012_v2  ;;  %v3074_v23 = vpack.c.bf16 %v5636_v19, %v5635_v3 }
 0x35b   : > { %v1013_v55 = vpop.f32.mrf.mxu1 }
 0x35c   : > { %v2003_v44 = vadd.f32 %v1928_v24, %v1508_v51  ;;  %v2424_v40 = vpop.f32.mrf.mxu0  ;;  %v1014_v30 = vadd.f32 %v1013_v55, %v8093_v61  ;;  %v3568_v24 = vpack.c.bf16 %v5756_v45, %v5755_v58  ;;  %v4062_v51 = vpack.c.bf16 %v7267_v20, %v5875_v34  ;;  %v7281_v45 = vld [vmem:[%s7971_s2] ss:$0 sm:$0xff] }
 0x35e   : > { %v7259_v9 = vadd.f32 %v2422_v57, %v2003_v44 }
 0x360   : > { %8092 = vst [vmem:[#allocation10_spill] sm:$0xff] %v7259_v9 }
 0x361   : > { %v1435_v35 = vpop.f32.mrf.mxu2 }
 0x362   : > { %v1930_v21 = vpop.f32.mrf.mxu3  ;;  %v1509_v22 = vadd.f32 %v1435_v35, %v1014_v30  ;;  %v5638_v35 = vld [vmem:[%s6078_s29 + $0x108] sm:$0xff] }
 0x363   : > { %v2741_v2 = vpop.f32.mrf.mxu1 }
 0x364   : > { %v2004_v57 = vadd.f32 %v1930_v21, %v1509_v22  ;;  %v4224_v44 = vpop.f32.mrf.mxu0  ;;  %v2921_v33 = vadd.f32 %v2741_v2, %v6553_v18  ;;  %v5758_v22 = vld [vmem:[%s6078_s29 + $0x109] sm:$0xff] }
 0x365   : > { %v5877_v2 = vld [vmem:[%s6078_s29 + $0x102] sm:$0xff] }
 0x366   : > { %5591 = vmatmul.msk.bf16.gmra.mxu1 %vm409_vm0, %v2579_v49  ;;  %5711 = vmatmul.msk.bf16.gmra.mxu2 %vm409_vm0, %v3074_v23  ;;  %v7274_v55 = vadd.f32 %v2424_v40, %v2004_v57  ;;  %v5637_v40 = vld [vmem:[%s6078_s29 + $0x100] sm:$0xff] }
 0x367   : > { %5831 = vmatmul.msk.bf16.gmra.mxu3 %vm409_vm0, %v3568_v24  ;;  %5951 = vmatmul.msk.bf16.gmra.mxu0 %vm409_vm0, %v4062_v51  ;;  %v5757_v49 = vld [vmem:[%s6078_s29 + $0x101] sm:$0xff]  ;;  %v7291_v24 = vld [vmem:[%s6078_s29 + $0x10a] sm:$0xff] }
 0x368   : > { %8094 = vst [vmem:[#allocation12_spill] sm:$0xff] %v7274_v55  ;;  %v4063_v55 = vpack.c.bf16 %v7291_v24, %v5877_v2 }
 0x369   : > { %v3236_v21 = vpop.f32.mrf.mxu2 }
 0x36a   : > { %v3730_v13 = vpop.f32.mrf.mxu3  ;;  %v3416_v3 = vadd.f32 %v3236_v21, %v2921_v33  ;;  %v2580_v33 = vpack.c.bf16 %v5875_v34, %v7247_v29 }
 0x36b   : > { %v2743_v19 = vpop.f32.mrf.mxu1 }
 0x36c   : > { %v3910_v58 = vadd.f32 %v3730_v13, %v3416_v3  ;;  %v4226_v61 = vpop.f32.mrf.mxu0  ;;  %v2922_v18 = vadd.f32 %v2743_v19, %v6567_v27 }
 0x36e   : > { %v4404_v30 = vadd.f32 %v4224_v44, %v3910_v58  ;;  %v3075_v44 = vpack.c.bf16 %v5638_v35, %v5637_v40  ;;  %v3569_v58 = vpack.c.bf16 %v5758_v22, %v5757_v49 }
 0x370   : > { %v4480_v23 = vadd.f32 %v7281_v45, %v4404_v30 }
 0x371   : > { %v3238_v51 = vpop.f32.mrf.mxu2 }
 0x372   : > { %v3732_v57 = vpop.f32.mrf.mxu3  ;;  %v4552_v21 = vmax.f32 %v4480_v23, 0.0  ;;  %v3417_v13 = vadd.f32 %v3238_v51, %v2922_v18  ;;  %v5639_v51 = vld [vmem:[%s6078_s29 + $0x110] sm:$0xff] }
 0x373   : > { %v2746_v3 = vpop.f32.mrf.mxu1 }
 0x374   : > { %4625 = vst.msk [vmem:[#allocation2] sm:$0xff] %vm4624_vm1, %v4552_v21  ;;  %v3911_v30 = vadd.f32 %v3732_v57, %v3417_v13  ;;  %v4229_v9 = vpop.f32.mrf.mxu0  ;;  %v2923_v34 = vadd.f32 %v2746_v3, %v6572_v48  ;;  %v5640_v57 = vld [vmem:[%s6078_s29 + $0x120] sm:$0xff]  ;;  %v5879_v13 = vld [vmem:[%s6078_s29 + $0x112] sm:$0xff] }
 0x375   : > { %v7311_v3 = vld [vmem:[%s6078_s29 + $0x122] sm:$0xff] }
 0x376   : > { %5592 = vmatmul.msk.bf16.gmra.mxu1 %vm409_vm0, %v2580_v33  ;;  %v4405_v27 = vadd.f32 %v4226_v61, %v3911_v30  ;;  %5712 = vmatmul.msk.bf16.gmra.mxu2 %vm409_vm0, %v3075_v44  ;;  %v5759_v33 = vld [vmem:[%s6078_s29 + $0x111] sm:$0xff]  ;;  %v2581_v30 = vpack.c.bf16 %v5877_v2, %v7267_v20 }
 0x377   : > { %5832 = vmatmul.msk.bf16.gmra.mxu3 %vm409_vm0, %v3569_v58  ;;  %5952 = vmatmul.msk.bf16.gmra.mxu0 %vm409_vm0, %v4063_v55  ;;  %v5760_v55 = vld [vmem:[%s6078_s29 + $0x121] sm:$0xff] }
 0x378   : > { %v4481_v29 = vadd.f32 %v7281_v45, %v4405_v27 }
 0x379   : > { %v3241_v19 = vpop.f32.mrf.mxu2 }
 0x37a   : > { %v3735_v40 = vpop.f32.mrf.mxu3  ;;  %v4553_v35 = vmax.f32 %v4481_v29, 0.0  ;;  %v3418_v49 = vadd.f32 %v3241_v19, %v2923_v34  ;;  %v3076_v19 = vpack.c.bf16 %v5640_v57, %v5639_v51 }
 0x37b   : > { %v2748_v61 = vpop.f32.mrf.mxu1 }
 0x37c   : > { %4626 = vst.msk [vmem:[#allocation2 + $0x8] sm:$0xff] %vm4624_vm1, %v4553_v35  ;;  %v3912_v22 = vadd.f32 %v3735_v40, %v3418_v49  ;;  %v4231_v23 = vpop.f32.mrf.mxu0  ;;  %v2924_v48 = vadd.f32 %v2748_v61, %v6587_v63  ;;  %v4064_v40 = vpack.c.bf16 %v7311_v3, %v5879_v13 }
 0x37e   : > { %v4406_v18 = vadd.f32 %v4229_v9, %v3912_v22  ;;  %v3570_v9 = vpack.c.bf16 %v5760_v55, %v5759_v33 }
 0x380   : > { %v4482_v21 = vadd.f32 %v7281_v45, %v4406_v18 }
 0x381   : > { %v3243_v44 = vpop.f32.mrf.mxu2 }
 0x382   : > { %v3737_v58 = vpop.f32.mrf.mxu3  ;;  %v4554_v27 = vmax.f32 %v4482_v21, 0.0  ;;  %v3419_v29 = vadd.f32 %v3243_v44, %v2924_v48  ;;  %v5641_v21 = vld [vmem:[%s6078_s29 + $0x128] sm:$0xff]  ;;  %v5642_v48 = vld [vmem:[%s6078_s29 + $0x130] sm:$0xff] }
 0x383   : > { %v2751_v34 = vpop.f32.mrf.mxu1  ;;  %v5761_v44 = vld [vmem:[%s6078_s29 + $0x129] sm:$0xff] }
 0x384   : > { %4627 = vst.msk [vmem:[#allocation2 + $0x10] sm:$0xff] %vm4624_vm1, %v4554_v27  ;;  %v3913_v35 = vadd.f32 %v3737_v58, %v3419_v29  ;;  %v4234_v49 = vpop.f32.mrf.mxu0  ;;  %v2925_v2 = vadd.f32 %v2751_v34, %v6592_v16  ;;  %v5762_v58 = vld [vmem:[%s6078_s29 + $0x131] sm:$0xff] }
 0x385   : > { %v7330_v27 = vld [vmem:[%s6078_s29 + $0x12a] sm:$0xff]  ;;  %v7333_v29 = vld [vmem:[%s6078_s29 + $0x132] sm:$0xff] }
 0x386   : > { %5593 = vmatmul.msk.bf16.gmra.mxu1 %vm409_vm0, %v2581_v30  ;;  %v4407_v63 = vadd.f32 %v4231_v23, %v3913_v35  ;;  %5713 = vmatmul.msk.bf16.gmra.mxu2 %vm409_vm0, %v3076_v19 }
 0x387   : > { %5833 = vmatmul.msk.bf16.gmra.mxu3 %vm409_vm0, %v3570_v9  ;;  %5953 = vmatmul.msk.bf16.gmra.mxu0 %vm409_vm0, %v4064_v40  ;;  %v2582_v9 = vpack.c.bf16 %v5879_v13, %v7291_v24 }
 0x388   : > { %v4483_v20 = vadd.f32 %v7281_v45, %v4407_v63 }
 0x389   : > { %v3246_v61 = vpop.f32.mrf.mxu2 }
 0x38a   : > { %v3740_v22 = vpop.f32.mrf.mxu3  ;;  %v4555_v18 = vmax.f32 %v4483_v20, 0.0  ;;  %v3420_v51 = vadd.f32 %v3246_v61, %v2925_v2  ;;  %v3571_v20 = vpack.c.bf16 %v5762_v58, %v5761_v44  ;;  %v4065_v2 = vpack.c.bf16 %v7333_v29, %v7330_v27 }
 0x38b   : > { %v2753_v23 = vpop.f32.mrf.mxu1 }
 0x38c   : > { %4628 = vst.msk [vmem:[#allocation2 + $0x18] sm:$0xff] %vm4624_vm1, %v4555_v18  ;;  %v3914_v57 = vadd.f32 %v3740_v22, %v3420_v51  ;;  %v4236_v33 = vpop.f32.mrf.mxu0  ;;  %v2926_v16 = vadd.f32 %v2753_v23, %v6607_v53  ;;  %v4697_v18 = vld [vmem:[#allocation2] ss:$2 sm:$0xff]  ;;  %v4745_v51 = vld [vmem:[#allocation2 + $0x1] ss:$2 sm:$0xff] }
 0x38d   : > { %v4792_v58 = vmax.f32 %v4697_v18, %v4745_v51  ;;  %v2583_v51 = vpack.c.bf16 %v7330_v27, %v7311_v3 }
 0x38e   : > { %v4408_v55 = vadd.f32 %v4234_v49, %v3914_v57  ;;  %v3077_v49 = vpack.c.bf16 %v5642_v48, %v5641_v21 }
 0x390   : > { %v4484_v30 = vadd.f32 %v7281_v45, %v4408_v55 }
 0x391   : > { %v3248_v34 = vpop.f32.mrf.mxu2 }
 0x392   : > { %v3742_v19 = vpop.f32.mrf.mxu3  ;;  %v4556_v40 = vmax.f32 %v4484_v30, 0.0  ;;  %v3421_v35 = vadd.f32 %v3248_v34, %v2926_v16 }
 0x393   : > { %v2756_v63 = vpop.f32.mrf.mxu1 }
 0x394   : > { %4629 = vst.msk [vmem:[#allocation2 + $0x20] sm:$0xff] %vm4624_vm1, %v4556_v40  ;;  %v3915_v61 = vadd.f32 %v3742_v19, %v3421_v35  ;;  %v4239_v53 = vpop.f32.mrf.mxu0  ;;  %v2927_v13 = vadd.f32 %v2756_v63, %v6612_v31  ;;  %v5644_v40 = vld [vmem:[%s6078_s29 + $0x148] sm:$0xff] }
 0x395   : > { %v5763_v35 = vld [vmem:[%s6078_s29 + $0x141] sm:$0xff]  ;;  %v5764_v63 = vld [vmem:[%s6078_s29 + $0x149] sm:$0xff] }
 0x396   : > { %5594 = vmatmul.msk.bf16.gmra.mxu1 %vm409_vm0, %v2582_v9  ;;  %v4409_v22 = vadd.f32 %v4236_v33, %v3915_v61  ;;  %5714 = vmatmul.msk.bf16.gmra.mxu2 %vm409_vm0, %v3077_v49  ;;  %v5643_v9 = vld [vmem:[%s6078_s29 + $0x140] sm:$0xff] }
 0x397   : > { %5834 = vmatmul.msk.bf16.gmra.mxu3 %vm409_vm0, %v3571_v20  ;;  %5954 = vmatmul.msk.bf16.gmra.mxu0 %vm409_vm0, %v4065_v2  ;;  %v5883_v61 = vld [vmem:[%s6078_s29 + $0x142] sm:$0xff] }
 0x398   : > { %v4485_v24 = vadd.f32 %v7281_v45, %v4409_v22  ;;  %v7360_v22 = vld [vmem:[%s6078_s29 + $0x14a] sm:$0xff] }
 0x399   : > { %v3251_v23 = vpop.f32.mrf.mxu2 }
 0x39a   : > { %v3745_v57 = vpop.f32.mrf.mxu3  ;;  %v4557_v55 = vmax.f32 %v4485_v24, 0.0  ;;  %v3422_v21 = vadd.f32 %v3251_v23, %v2927_v13  ;;  %v4747_v24 = vld [vmem:[#allocation2 + $0x11] ss:$2 sm:$0xf] }
 0x39b   : > { %v2758_v33 = vpop.f32.mrf.mxu1  ;;  %v4817_v48 = vld [vmem:[#allocation2 + $0x18] ss:$2 sm:$0xff]  ;;  %v4865_v44 = vld [vmem:[#allocation2 + $0x19] ss:$2 sm:$0xff] }
 0x39c   : > { %v4912_v30 = vmax.f32 %v4817_v48, %v4865_v44  ;;  %4630 = vst.msk [vmem:[#allocation2 + $0x28] sm:$0xff] %vm4624_vm1, %v4557_v55  ;;  %v3916_v31 = vadd.f32 %v3745_v57, %v3422_v21  ;;  %v4241_v16 = vpop.f32.mrf.mxu0  ;;  %v2928_v2 = vadd.f32 %v2758_v33, %v6627_v54  ;;  %v3078_v21 = vpack.c.bf16 %v5644_v40, %v5643_v9 }
 0x39d   : > { %v3572_v48 = vpack.c.bf16 %v5764_v63, %v5763_v35  ;;  %v4066_v54 = vpack.c.bf16 %v7360_v22, %v5883_v61 }
 0x39e   : > { %v4936_v34 = vmax.f32 %v4792_v58, %v4912_v30  ;;  %v4410_v19 = vadd.f32 %v4239_v53, %v3916_v31  ;;  %v4699_v53 = vld [vmem:[#allocation2 + $0x10] ss:$2 sm:$0xf] }
 0x39f   : > { %v4793_v33 = vmax.f32 %v4699_v53, %v4747_v24 }
 0x3a0   : > { %v4960_v49 = vpack.c.bf16 %v4936_v34, %v4936_v34  ;;  %v4486_v20 = vadd.f32 %v7281_v45, %v4410_v19 }
 0x3a1   : > { %v3253_v13 = vpop.f32.mrf.mxu2 }
 0x3a2   : > { %v3747_v18 = vpop.f32.mrf.mxu3  ;;  %4985 = vst.msk [vmem:[%s7351_s8] sm:$0xf] %vm4984_vm2, %v4960_v49  ;;  %v4558_v23 = vmax.f32 %v4486_v20, 0.0  ;;  %v3423_v57 = vadd.f32 %v3253_v13, %v2928_v2  ;;  %v5645_v13 = vld [vmem:[%s6078_s29 + $0x150] sm:$0xff] }
 0x3a3   : > { %v2761_v55 = vpop.f32.mrf.mxu1  ;;  %v4819_v44 = vld [vmem:[#allocation2 + $0x28] ss:$2 sm:$0xf]  ;;  %v4867_v58 = vld [vmem:[#allocation2 + $0x29] ss:$2 sm:$0xf] }
 0x3a4   : > { %v4913_v30 = vmax.f32 %v4819_v44, %v4867_v58  ;;  %4631 = vst.msk [vmem:[#allocation2 + $0x30] sm:$0xff] %vm4624_vm1, %v4558_v23  ;;  %v3917_v31 = vadd.f32 %v3747_v18, %v3423_v57  ;;  %v4244_v34 = vpop.f32.mrf.mxu0  ;;  %v2929_v40 = vadd.f32 %v2761_v55, %v6632_v7  ;;  %v5646_v18 = vld [vmem:[%s6078_s29 + $0x160] sm:$0xff]  ;;  %v5885_v55 = vld [vmem:[%s6078_s29 + $0x152] sm:$0xff]  ;;  %v2584_v58 = vpack.c.bf16 %v5883_v61, %v7333_v29 }
 0x3a5   : > { %v5766_v23 = vld [vmem:[%s6078_s29 + $0x161] sm:$0xff] }
 0x3a6   : > { %5595 = vmatmul.msk.bf16.gmra.mxu1 %vm409_vm0, %v2583_v51  ;;  %v4937_v3 = vmax.f32 %v4793_v33, %v4913_v30  ;;  %v4411_v27 = vadd.f32 %v4241_v16, %v3917_v31  ;;  %5715 = vmatmul.msk.bf16.gmra.mxu2 %vm409_vm0, %v3078_v21  ;;  %v5765_v51 = vld [vmem:[%s6078_s29 + $0x151] sm:$0xff]  ;;  %v7385_v21 = vld [vmem:[%s6078_s29 + $0x162] sm:$0xff]  ;;  %v3079_v31 = vpack.c.bf16 %v5646_v18, %v5645_v13 }
 0x3a7   : > { %5835 = vmatmul.msk.bf16.gmra.mxu3 %vm409_vm0, %v3572_v48  ;;  %5955 = vmatmul.msk.bf16.gmra.mxu0 %vm409_vm0, %v4066_v54  ;;  %v5767_v13 = vld [vmem:[%s6078_s29 + $0x169] sm:$0xff]  ;;  %v5768_v18 = vld [vmem:[%s6078_s29 + $0x171] sm:$0xff] }
 0x3a8   : > { %v4961_v19 = vpack.c.bf16 %v4937_v3, %v4937_v3  ;;  %v4487_v9 = vadd.f32 %v7281_v45, %v4411_v27  ;;  %v4067_v3 = vpack.c.bf16 %v7385_v21, %v5885_v55 }
 0x3a9   : > { %v3256_v35 = vpop.f32.mrf.mxu2 }
 0x3aa   : > { %v3750_v63 = vpop.f32.mrf.mxu3  ;;  %4987 = vst.msk [vmem:[%s7351_s8 + $0x4] sm:$0x3] %vm4986_vm3, %v4961_v19  ;;  %v4559_v16 = vmax.f32 %v4487_v9, 0.0  ;;  %v3424_v49 = vadd.f32 %v3256_v35, %v2929_v40 }
 0x3ab   : > { %v2763_v20 = vpop.f32.mrf.mxu1 }
 0x3ac   : > { %4632 = vst.msk [vmem:[#allocation2 + $0x38] sm:$0xff] %vm4624_vm1, %v4559_v16  ;;  %v3918_v2 = vadd.f32 %v3750_v63, %v3424_v49  ;;  %v4246_v53 = vpop.f32.mrf.mxu0  ;;  %v2930_v57 = vadd.f32 %v2763_v20, %v6647_v37 }
 0x3ae   : > { %v4412_v24 = vadd.f32 %v4244_v34, %v3918_v2  ;;  %v3573_v34 = vpack.c.bf16 %v5766_v23, %v5765_v51  ;;  %v7404_v23 = vld [vmem:[%s6078_s29 + $0x16a] sm:$0xff] }
 0x3b0   : > { %v4488_v7 = vadd.f32 %v7281_v45, %v4412_v24  ;;  %v5648_v24 = vld [vmem:[%s6078_s29 + $0x170] sm:$0xff] }
 0x3b1   : > { %v3258_v48 = vpop.f32.mrf.mxu2 }
 0x3b2   : > { %v3752_v44 = vpop.f32.mrf.mxu3  ;;  %v4560_v54 = vmax.f32 %v4488_v7, 0.0  ;;  %v3425_v33 = vadd.f32 %v3258_v48, %v2930_v57  ;;  %v7407_v7 = vld [vmem:[%s6078_s29 + $0x172] sm:$0xff] }
 0x3b3   : > { %v2766_v30 = vpop.f32.mrf.mxu1 }
 0x3b4   : > { %4633 = vst.msk [vmem:[#allocation2 + $0x40] sm:$0xff] %vm4624_vm1, %v4560_v54  ;;  %v3919_v27 = vadd.f32 %v3752_v44, %v3425_v33  ;;  %v4249_v19 = vpop.f32.mrf.mxu0  ;;  %v2931_v61 = vadd.f32 %v2766_v30, %v6652_v11  ;;  %v2585_v44 = vpack.c.bf16 %v5885_v55, %v7360_v22 }
 0x3b6   : > { %5596 = vmatmul.msk.bf16.gmra.mxu1 %vm409_vm0, %v2584_v58  ;;  %v4413_v37 = vadd.f32 %v4246_v53, %v3919_v27  ;;  %5716 = vmatmul.msk.bf16.gmra.mxu2 %vm409_vm0, %v3079_v31  ;;  %v5647_v53 = vld [vmem:[%s6078_s29 + $0x168] sm:$0xff]  ;;  %v3574_v31 = vpack.c.bf16 %v5768_v18, %v5767_v13  ;;  %v5649_v13 = vld [vmem:[%s6078_s29 + $0x180] sm:$0xff] }
 0x3b7   : > { %5836 = vmatmul.msk.bf16.gmra.mxu3 %vm409_vm0, %v3573_v34  ;;  %5956 = vmatmul.msk.bf16.gmra.mxu0 %vm409_vm0, %v4067_v3  ;;  %v3080_v30 = vpack.c.bf16 %v5648_v24, %v5647_v53  ;;  %v4068_v34 = vpack.c.bf16 %v7407_v7, %v7404_v23  ;;  %v5650_v18 = vld [vmem:[%s6078_s29 + $0x188] sm:$0xff] }
 0x3b8   : > { %v4489_v29 = vadd.f32 %v7281_v45, %v4413_v37  ;;  %v4749_v37 = vld [vmem:[#allocation2 + $0x31] ss:$2 sm:$0xff] }
 0x3b9   : > { %v3261_v9 = vpop.f32.mrf.mxu2 }
 0x3ba   : > { %v3755_v40 = vpop.f32.mrf.mxu3  ;;  %v4561_v35 = vmax.f32 %v4489_v29, 0.0  ;;  %v3426_v63 = vadd.f32 %v3261_v9, %v2931_v61 }
 0x3bb   : > { %v2768_v16 = vpop.f32.mrf.mxu1 }
 0x3bc   : > { %4634 = vst.msk [vmem:[#allocation2 + $0x48] sm:$0xff] %vm4624_vm1, %v4561_v35  ;;  %v3920_v49 = vadd.f32 %v3755_v40, %v3426_v63  ;;  %v4251_v20 = vpop.f32.mrf.mxu0  ;;  %v2932_v11 = vadd.f32 %v2768_v16, %v6667_v52 }
 0x3be   : > { %v4414_v2 = vadd.f32 %v4249_v19, %v3920_v49  ;;  %v4701_v19 = vld [vmem:[#allocation2 + $0x30] ss:$2 sm:$0xff] }
 0x3bf   : > { %v4794_v49 = vmax.f32 %v4701_v19, %v4749_v37 }
 0x3c0   : > { %v4490_v51 = vadd.f32 %v7281_v45, %v4414_v2 }
 0x3c1   : > { %v3263_v57 = vpop.f32.mrf.mxu2 }
 0x3c2   : > { %v3757_v48 = vpop.f32.mrf.mxu3  ;;  %v4562_v58 = vmax.f32 %v4490_v51, 0.0  ;;  %v3427_v54 = vadd.f32 %v3263_v57, %v2932_v11  ;;  %v5769_v51 = vld [vmem:[%s6078_s29 + $0x181] sm:$0xff]  ;;  %v5770_v11 = vld [vmem:[%s6078_s29 + $0x189] sm:$0xff] }
 0x3c3   : > { %v2771_v33 = vpop.f32.mrf.mxu1  ;;  %v3575_v19 = vpack.c.bf16 %v5770_v11, %v5769_v51  ;;  %v5651_v11 = vld [vmem:[%s6078_s29 + $0x190] sm:$0xff] }
 0x3c4   : > { %4635 = vst.msk [vmem:[#allocation2 + $0x50] sm:$0xff] %vm4624_vm1, %v4562_v58  ;;  %v3921_v3 = vadd.f32 %v3757_v48, %v3427_v54  ;;  %v4254_v52 = vpop.f32.mrf.mxu0  ;;  %v2933_v55 = vadd.f32 %v2771_v33, %v6672_v25  ;;  %v5889_v58 = vld [vmem:[%s6078_s29 + $0x182] sm:$0xff]  ;;  %v7428_v54 = vld [vmem:[%s6078_s29 + $0x18a] sm:$0xff] }
 0x3c5   : > { %v4703_v33 = vld [vmem:[#allocation2 + $0x40] ss:$2 sm:$0xf] }
 0x3c6   : > { %5597 = vmatmul.msk.bf16.gmra.mxu1 %vm409_vm0, %v2585_v44  ;;  %v4415_v27 = vadd.f32 %v4251_v20, %v3921_v3  ;;  %5717 = vmatmul.msk.bf16.gmra.mxu2 %vm409_vm0, %v3080_v30  ;;  %v4751_v30 = vld [vmem:[#allocation2 + $0x41] ss:$2 sm:$0xf]  ;;  %v2586_v3 = vpack.c.bf16 %v7404_v23, %v7385_v21 }
 0x3c7   : > { %5837 = vmatmul.msk.bf16.gmra.mxu3 %vm409_vm0, %v3574_v31  ;;  %5957 = vmatmul.msk.bf16.gmra.mxu0 %vm409_vm0, %v4068_v34 }
 0x3c8   : > { %v4491_v22 = vadd.f32 %v7281_v45, %v4415_v27 }
 0x3c9   : > { %v3266_v29 = vpop.f32.mrf.mxu2 }
 0x3ca   : > { %v3760_v61 = vpop.f32.mrf.mxu3  ;;  %v4563_v9 = vmax.f32 %v4491_v22, 0.0  ;;  %v3428_v40 = vadd.f32 %v3266_v29, %v2933_v55  ;;  %v3081_v55 = vpack.c.bf16 %v5650_v18, %v5649_v13 }
 0x3cb   : > { %v2773_v35 = vpop.f32.mrf.mxu1  ;;  %v4821_v63 = vld [vmem:[#allocation2 + $0x48] ss:$2 sm:$0xff]  ;;  %v4869_v16 = vld [vmem:[#allocation2 + $0x49] ss:$2 sm:$0xff] }
 0x3cc   : > { %v4914_v20 = vmax.f32 %v4821_v63, %v4869_v16  ;;  %4636 = vst.msk [vmem:[#allocation2 + $0x58] sm:$0xff] %vm4624_vm1, %v4563_v9  ;;  %v3922_v25 = vadd.f32 %v3760_v61, %v3428_v40  ;;  %v4256_v2 = vpop.f32.mrf.mxu0  ;;  %v2934_v44 = vadd.f32 %v2773_v35, %v6687_v1  ;;  %v4069_v1 = vpack.c.bf16 %v7428_v54, %v5889_v58 }
 0x3cd   : > { %v4795_v61 = vmax.f32 %v4703_v33, %v4751_v30  ;;  %v5891_v30 = vld [vmem:[%s6078_s29 + $0x192] sm:$0xff] }
 0x3ce   : > { %v4938_v53 = vmax.f32 %v4794_v49, %v4914_v20  ;;  %v4416_v24 = vadd.f32 %v4254_v52, %v3922_v25 }
 0x3d0   : > { %v4962_v57 = vpack.c.bf16 %v4938_v53, %v4938_v53  ;;  %v4492_v48 = vadd.f32 %v7281_v45, %v4416_v24 }
 0x3d1   : > { %v3268_v31 = vpop.f32.mrf.mxu2 }
 0x3d2   : > { %v3762_v34 = vpop.f32.mrf.mxu3  ;;  %4988 = vst.msk [vmem:[%s7351_s8 + $0x8] sm:$0xf] %vm4984_vm2, %v4962_v57  ;;  %v4564_v52 = vmax.f32 %v4492_v48, 0.0  ;;  %v3429_v27 = vadd.f32 %v3268_v31, %v2934_v44  ;;  %v5652_v57 = vld [vmem:[%s6078_s29 + $0x1a0] sm:$0xff]  ;;  %v5771_v48 = vld [vmem:[%s6078_s29 + $0x191] sm:$0xff] }
 0x3d3   : > { %v2776_v22 = vpop.f32.mrf.mxu1  ;;  %v4823_v37 = vld [vmem:[#allocation2 + $0x58] ss:$2 sm:$0xf]  ;;  %v4871_v29 = vld [vmem:[#allocation2 + $0x59] ss:$2 sm:$0xf] }
 0x3d4   : > { %v4915_v9 = vmax.f32 %v4823_v37, %v4871_v29  ;;  %4637 = vst.msk [vmem:[#allocation2 + $0x60] sm:$0xff] %vm4624_vm1, %v4564_v52  ;;  %v3923_v40 = vadd.f32 %v3762_v34, %v3429_v27  ;;  %v4259_v35 = vpop.f32.mrf.mxu0  ;;  %v2935_v49 = vadd.f32 %v2776_v22, %v6692_v42  ;;  %v5772_v44 = vld [vmem:[%s6078_s29 + $0x1a1] sm:$0xff]  ;;  %v2587_v52 = vpack.c.bf16 %v5889_v58, %v7407_v7 }
 0x3d5   : > { %v7453_v31 = vld [vmem:[%s6078_s29 + $0x1a2] sm:$0xff]  ;;  %v3576_v37 = vpack.c.bf16 %v5772_v44, %v5771_v48 }
 0x3d6   : > { %5598 = vmatmul.msk.bf16.gmra.mxu1 %vm409_vm0, %v2586_v3  ;;  %v4939_v21 = vmax.f32 %v4795_v61, %v4915_v9  ;;  %v4417_v23 = vadd.f32 %v4256_v2, %v3923_v40  ;;  %5718 = vmatmul.msk.bf16.gmra.mxu2 %vm409_vm0, %v3081_v55  ;;  %v4070_v29 = vpack.c.bf16 %v7453_v31, %v5891_v30 }
 0x3d7   : > { %5838 = vmatmul.msk.bf16.gmra.mxu3 %vm409_vm0, %v3575_v19  ;;  %5958 = vmatmul.msk.bf16.gmra.mxu0 %vm409_vm0, %v4069_v1  ;;  %v3082_v19 = vpack.c.bf16 %v5652_v57, %v5651_v11  ;;  %v2588_v57 = vpack.c.bf16 %v5891_v30, %v7428_v54 }
 0x3d8   : > { %v4963_v63 = vpack.c.bf16 %v4939_v21, %v4939_v21  ;;  %v4493_v16 = vadd.f32 %v7281_v45, %v4417_v23 }
 0x3d9   : > { %v3271_v20 = vpop.f32.mrf.mxu2 }
 0x3da   : > { %v3765_v25 = vpop.f32.mrf.mxu3  ;;  %4989 = vst.msk [vmem:[%s7351_s8 + $0xc] sm:$0x3] %vm4986_vm3, %v4963_v63  ;;  %v4565_v2 = vmax.f32 %v4493_v16, 0.0  ;;  %v3430_v53 = vadd.f32 %v3271_v20, %v2935_v49  ;;  %v5653_v20 = vld [vmem:[%s6078_s29 + $0x1a8] sm:$0xff] }
 0x3db   : > { %v2778_v24 = vpop.f32.mrf.mxu1 }
 0x3dc   : > { %4638 = vst.msk [vmem:[#allocation2 + $0x68] sm:$0xff] %vm4624_vm1, %v4565_v2  ;;  %v3924_v13 = vadd.f32 %v3765_v25, %v3430_v53  ;;  %v4261_v18 = vpop.f32.mrf.mxu0  ;;  %v2936_v33 = vadd.f32 %v2778_v24, %v6710_v5  ;;  %v5654_v25 = vld [vmem:[%s6078_s29 + $0x1b0] sm:$0xff] }
 0x3dd   : > { %v5773_v2 = vld [vmem:[%s6078_s29 + $0x1a9] sm:$0xff]  ;;  %v5774_v53 = vld [vmem:[%s6078_s29 + $0x1b1] sm:$0xff] }
 0x3de   : > { %v4418_v51 = vadd.f32 %v4259_v35, %v3924_v13  ;;  %v7472_v13 = vld [vmem:[%s6078_s29 + $0x1aa] sm:$0xff] }
 0x3e0   : > { %v4494_v42 = vadd.f32 %v7281_v45, %v4418_v51 }
 0x3e1   : > { %v3273_v34 = vpop.f32.mrf.mxu2 }
 0x3e2   : > { %v3767_v3 = vpop.f32.mrf.mxu3  ;;  %v4566_v27 = vmax.f32 %v4494_v42, 0.0  ;;  %v3431_v22 = vadd.f32 %v3273_v34, %v2936_v33  ;;  %v3083_v33 = vpack.c.bf16 %v5654_v25, %v5653_v20  ;;  %v3577_v34 = vpack.c.bf16 %v5774_v53, %v5773_v2  ;;  %v5895_v53 = vld [vmem:[%s6078_s29 + $0x1c2] sm:$0xff] }
 0x3e3   : > { %v2781_v55 = vpop.f32.mrf.mxu1 }
 0x3e4   : > { %4639 = vst.msk [vmem:[#allocation2 + $0x70] sm:$0xff] %vm4624_vm1, %v4566_v27  ;;  %v3925_v1 = vadd.f32 %v3767_v3, %v3431_v22  ;;  %v4264_v61 = vpop.f32.mrf.mxu0  ;;  %v2937_v58 = vadd.f32 %v2781_v55, %v6724_v59  ;;  %v4705_v22 = vld [vmem:[#allocation2 + $0x60] ss:$2 sm:$0xff]  ;;  %v4753_v55 = vld [vmem:[#allocation2 + $0x61] ss:$2 sm:$0xff] }
 0x3e6   : > { %5599 = vmatmul.msk.bf16.gmra.mxu1 %vm409_vm0, %v2587_v52  ;;  %v4419_v5 = vadd.f32 %v4261_v18, %v3925_v1  ;;  %5719 = vmatmul.msk.bf16.gmra.mxu2 %vm409_vm0, %v3082_v19  ;;  %v7475_v18 = vld [vmem:[%s6078_s29 + $0x1b2] sm:$0xff] }
 0x3e7   : > { %5839 = vmatmul.msk.bf16.gmra.mxu3 %vm409_vm0, %v3576_v37  ;;  %5959 = vmatmul.msk.bf16.gmra.mxu0 %vm409_vm0, %v4070_v29  ;;  %v4071_v3 = vpack.c.bf16 %v7475_v18, %v7472_v13 }
 0x3e8   : > { %v4495_v7 = vadd.f32 %v7281_v45, %v4419_v5 }
 0x3e9   : > { %v3276_v9 = vpop.f32.mrf.mxu2 }
 0x3ea   : > { %v3770_v40 = vpop.f32.mrf.mxu3  ;;  %v4567_v35 = vmax.f32 %v4495_v7, 0.0  ;;  %v3432_v21 = vadd.f32 %v3276_v9, %v2937_v58  ;;  %v4796_v58 = vmax.f32 %v4705_v22, %v4753_v55 }
 0x3eb   : > { %v2783_v23 = vpop.f32.mrf.mxu1 }
 0x3ec   : > { %4640 = vst.msk [vmem:[#allocation2 + $0x78] sm:$0xff] %vm4624_vm1, %v4567_v35  ;;  %v3926_v63 = vadd.f32 %v3770_v40, %v3432_v21  ;;  %v4266_v16 = vpop.f32.mrf.mxu0  ;;  %v2938_v59 = vadd.f32 %v2783_v23, %v6739_v32  ;;  %v5655_v23 = vld [vmem:[%s6078_s29 + $0x1c0] sm:$0xff] }
 0x3ee   : > { %v4420_v49 = vadd.f32 %v4264_v61, %v3926_v63  ;;  %v5656_v63 = vld [vmem:[%s6078_s29 + $0x1c8] sm:$0xff] }
 0x3f0   : > { %v4496_v24 = vadd.f32 %v7281_v45, %v4420_v49  ;;  %v5776_v49 = vld [vmem:[%s6078_s29 + $0x1c9] sm:$0xff] }
 0x3f1   : > { %v3278_v51 = vpop.f32.mrf.mxu2 }
 0x3f2   : > { %v3772_v11 = vpop.f32.mrf.mxu3  ;;  %v4568_v48 = vmax.f32 %v4496_v24, 0.0  ;;  %v3433_v44 = vadd.f32 %v3278_v51, %v2938_v59  ;;  %v7496_v24 = vld [vmem:[%s6078_s29 + $0x1ca] sm:$0xff] }
 0x3f3   : > { %v2786_v42 = vpop.f32.mrf.mxu1  ;;  %v4707_v59 = vld [vmem:[#allocation2 + $0x70] ss:$2 sm:$0xf]  ;;  %v4755_v51 = vld [vmem:[#allocation2 + $0x71] ss:$2 sm:$0xf] }
 0x3f4   : > { %4641 = vst.msk [vmem:[#allocation2 + $0x80] sm:$0xff] %vm4624_vm1, %v4568_v48  ;;  %v3927_v52 = vadd.f32 %v3772_v11, %v3433_v44  ;;  %v4269_v32 = vpop.f32.mrf.mxu0  ;;  %v2939_v30 = vadd.f32 %v2786_v42, %v6744_v15  ;;  %v2589_v48 = vpack.c.bf16 %v7472_v13, %v7453_v31 }
 0x3f6   : > { %5600 = vmatmul.msk.bf16.gmra.mxu1 %vm409_vm0, %v2588_v57  ;;  %v4421_v27 = vadd.f32 %v4266_v16, %v3927_v52  ;;  %5720 = vmatmul.msk.bf16.gmra.mxu2 %vm409_vm0, %v3083_v33  ;;  %v5775_v16 = vld [vmem:[%s6078_s29 + $0x1c1] sm:$0xff] }
 0x3f7   : > { %5840 = vmatmul.msk.bf16.gmra.mxu3 %vm409_vm0, %v3577_v34  ;;  %5960 = vmatmul.msk.bf16.gmra.mxu0 %vm409_vm0, %v4071_v3  ;;  %v3084_v34 = vpack.c.bf16 %v5656_v63, %v5655_v23  ;;  %v3578_v3 = vpack.c.bf16 %v5776_v49, %v5775_v16  ;;  %v5778_v23 = vld [vmem:[%s6078_s29 + $0x1e1] sm:$0xff]  ;;  %v5897_v16 = vld [vmem:[%s6078_s29 + $0x1d2] sm:$0xff] }
 0x3f8   : > { %v4497_v54 = vadd.f32 %v7281_v45, %v4421_v27  ;;  %v4797_v27 = vmax.f32 %v4707_v59, %v4755_v51  ;;  %v7521_v49 = vld [vmem:[%s6078_s29 + $0x1e2] sm:$0xff] }
 0x3f9   : > { %v3281_v19 = vpop.f32.mrf.mxu2 }
 0x3fa   : > { %v3775_v37 = vpop.f32.mrf.mxu3  ;;  %v4569_v29 = vmax.f32 %v4497_v54, 0.0  ;;  %v3434_v1 = vadd.f32 %v3281_v19, %v2939_v30 }
 0x3fb   : > { %v2788_v61 = vpop.f32.mrf.mxu1  ;;  %v4825_v5 = vld [vmem:[#allocation2 + $0x78] ss:$2 sm:$0xff]  ;;  %v4873_v7 = vld [vmem:[#allocation2 + $0x79] ss:$2 sm:$0xff] }
 0x3fc   : > { %v4916_v9 = vmax.f32 %v4825_v5, %v4873_v7  ;;  %4642 = vst.msk [vmem:[#allocation2 + $0x88] sm:$0xff] %vm4624_vm1, %v4569_v29  ;;  %v3928_v15 = vadd.f32 %v3775_v37, %v3434_v1  ;;  %v4271_v40 = vpop.f32.mrf.mxu0  ;;  %v2940_v2 = vadd.f32 %v2788_v61, %v6759_v26  ;;  %v4072_v26 = vpack.c.bf16 %v7496_v24, %v5895_v53 }
 0x3fe   : > { %v4940_v35 = vmax.f32 %v4796_v58, %v4916_v9  ;;  %v4422_v21 = vadd.f32 %v4269_v32, %v3928_v15 }
 0x400   : > { %v4964_v20 = vpack.c.bf16 %v4940_v35, %v4940_v35  ;;  %v4498_v25 = vadd.f32 %v7281_v45, %v4422_v21  ;;  %v5658_v35 = vld [vmem:[%s6078_s29 + $0x1e0] sm:$0xff]  ;;  %v5777_v21 = vld [vmem:[%s6078_s29 + $0x1d1] sm:$0xff] }
 0x401   : > { %v3283_v11 = vpop.f32.mrf.mxu2 }
 0x402   : > { %v3777_v57 = vpop.f32.mrf.mxu3  ;;  %4990 = vst.msk [vmem:[%s7351_s8 + $0x10] sm:$0xf] %vm4984_vm2, %v4964_v20  ;;  %v4570_v44 = vmax.f32 %v4498_v25, 0.0  ;;  %v3435_v42 = vadd.f32 %v3283_v11, %v2940_v2  ;;  %v2590_v2 = vpack.c.bf16 %v5895_v53, %v7475_v18 }
 0x403   : > { %v2791_v33 = vpop.f32.mrf.mxu1  ;;  %v4827_v52 = vld [vmem:[#allocation2 + $0x88] ss:$2 sm:$0xf]  ;;  %v4875_v32 = vld [vmem:[#allocation2 + $0x89] ss:$2 sm:$0xf] }
 0x404   : > { %v4917_v54 = vmax.f32 %v4827_v52, %v4875_v32  ;;  %4643 = vst.msk [vmem:[#allocation2 + $0x90] sm:$0xff] %vm4624_vm1, %v4570_v44  ;;  %v3929_v30 = vadd.f32 %v3777_v57, %v3435_v42  ;;  %v4274_v22 = vpop.f32.mrf.mxu0  ;;  %v2941_v37 = vadd.f32 %v2791_v33, %v6764_v46  ;;  %v4073_v44 = vpack.c.bf16 %v7521_v49, %v5897_v16 }
 0x406   : > { %5601 = vmatmul.msk.bf16.gmra.mxu1 %vm409_vm0, %v2589_v48  ;;  %v4941_v31 = vmax.f32 %v4797_v27, %v4917_v54  ;;  %v4423_v13 = vadd.f32 %v4271_v40, %v3929_v30  ;;  %5721 = vmatmul.msk.bf16.gmra.mxu2 %vm409_vm0, %v3084_v34  ;;  %v5657_v40 = vld [vmem:[%s6078_s29 + $0x1d0] sm:$0xff]  ;;  %v3579_v48 = vpack.c.bf16 %v5778_v23, %v5777_v21 }
 0x407   : > { %5841 = vmatmul.msk.bf16.gmra.mxu3 %vm409_vm0, %v3578_v3  ;;  %5961 = vmatmul.msk.bf16.gmra.mxu0 %vm409_vm0, %v4072_v26  ;;  %v3085_v57 = vpack.c.bf16 %v5658_v35, %v5657_v40 }
 0x408   : > { %v4965_v55 = vpack.c.bf16 %v4941_v31, %v4941_v31  ;;  %v4499_v19 = vadd.f32 %v7281_v45, %v4423_v13  ;;  %v5660_v31 = vld [vmem:[%s6078_s29 + $0x1f0] sm:$0xff] }
 0x409   : > { %v3286_v29 = vpop.f32.mrf.mxu2  ;;  %v5779_v13 = vld [vmem:[%s6078_s29 + $0x1e9] sm:$0xff] }
 0x40a   : > { %v3780_v1 = vpop.f32.mrf.mxu3  ;;  %4991 = vst.msk [vmem:[%s7351_s8 + $0x14] sm:$0x3] %vm4986_vm3, %v4965_v55  ;;  %v4571_v61 = vmax.f32 %v4499_v19, 0.0  ;;  %v3436_v5 = vadd.f32 %v3286_v29, %v2941_v37  ;;  %v5780_v55 = vld [vmem:[%s6078_s29 + $0x1f1] sm:$0xff] }
 0x40b   : > { %v2793_v7 = vpop.f32.mrf.mxu1  ;;  %v7540_v37 = vld [vmem:[%s6078_s29 + $0x1ea] sm:$0xff]  ;;  %v7543_v29 = vld [vmem:[%s6078_s29 + $0x1f2] sm:$0xff]  ;;  %v3580_v40 = vpack.c.bf16 %v5780_v55, %v5779_v13 }
 0x40c   : > { %4644 = vst.msk [vmem:[#allocation2 + $0x98] sm:$0xff] %vm4624_vm1, %v4571_v61  ;;  %v3930_v58 = vadd.f32 %v3780_v1, %v3436_v5  ;;  %v4276_v9 = vpop.f32.mrf.mxu0  ;;  %v2942_v63 = vadd.f32 %v2793_v7, %v6779_v60  ;;  %v2591_v5 = vpack.c.bf16 %v5897_v16, %v7496_v24  ;;  %v4074_v35 = vpack.c.bf16 %v7543_v29, %v7540_v37 }
 0x40d   : > { %v2592_v55 = vpack.c.bf16 %v7540_v37, %v7521_v49 }
 0x40e   : > { %v4424_v15 = vadd.f32 %v4274_v22, %v3930_v58  ;;  %v5659_v22 = vld [vmem:[%s6078_s29 + $0x1e8] sm:$0xff] }
 0x410   : > { %v4500_v46 = vadd.f32 %v7281_v45, %v4424_v15  ;;  %v3086_v15 = vpack.c.bf16 %v5660_v31, %v5659_v22 }
 0x411   : > { %v3288_v20 = vpop.f32.mrf.mxu2 }
 0x412   : > { %v3782_v25 = vpop.f32.mrf.mxu3  ;;  %v4572_v59 = vmax.f32 %v4500_v46, 0.0  ;;  %v3437_v51 = vadd.f32 %v3288_v20, %v2942_v63 }
 0x413   : > { %v2796_v11 = vpop.f32.mrf.mxu1  ;;  %v4709_v63 = vld [vmem:[#allocation2 + $0x90] ss:$2 sm:$0xff]  ;;  %v4757_v16 = vld [vmem:[#allocation2 + $0x91] ss:$2 sm:$0xff] }
 0x414   : > { %4645 = vst.msk [vmem:[#allocation2 + $0xa0] sm:$0xff] %vm4624_vm1, %v4572_v59  ;;  %v3931_v42 = vadd.f32 %v3782_v25, %v3437_v51  ;;  %v4279_v33 = vpop.f32.mrf.mxu0  ;;  %v2943_v53 = vadd.f32 %v2796_v11, %v6784_v8 }
 0x416   : > { %5602 = vmatmul.msk.bf16.gmra.mxu1 %vm409_vm0, %v2590_v2  ;;  %v4425_v60 = vadd.f32 %v4276_v9, %v3931_v42  ;;  %5722 = vmatmul.msk.bf16.gmra.mxu2 %vm409_vm0, %v3085_v57 }
 0x417   : > { %5842 = vmatmul.msk.bf16.gmra.mxu3 %vm409_vm0, %v3579_v48  ;;  %5962 = vmatmul.msk.bf16.gmra.mxu0 %vm409_vm0, %v4073_v44  ;;  %v4798_v48 = vmax.f32 %v4709_v63, %v4757_v16 }
 0x418   : > { %v4501_v18 = vadd.f32 %v7281_v45, %v4425_v60 }
 0x419   : > { %v3291_v34 = vpop.f32.mrf.mxu2 }
 0x41a   : > { %v3785_v3 = vpop.f32.mrf.mxu3  ;;  %v4573_v52 = vmax.f32 %v4501_v18, 0.0  ;;  %v3438_v32 = vadd.f32 %v3291_v34, %v2943_v53  ;;  %v5661_v18 = vld [vmem:[%s6078_s29 + $0x200] sm:$0xff]  ;;  %v5662_v53 = vld [vmem:[%s6078_s29 + $0x208] sm:$0xff] }
 0x41b   : > { %v2798_v26 = vpop.f32.mrf.mxu1  ;;  %v5781_v34 = vld [vmem:[%s6078_s29 + $0x201] sm:$0xff] }
 0x41c   : > { %4646 = vst.msk [vmem:[#allocation2 + $0xa8] sm:$0xff] %vm4624_vm1, %v4573_v52  ;;  %v3932_v27 = vadd.f32 %v3785_v3, %v3438_v32  ;;  %v4281_v54 = vpop.f32.mrf.mxu0  ;;  %v2944_v8 = vadd.f32 %v2798_v26, %v6799_v50  ;;  %v5782_v3 = vld [vmem:[%s6078_s29 + $0x209] sm:$0xff]  ;;  %v4759_v22 = vld [vmem:[#allocation2 + $0xa1] ss:$2 sm:$0xf] }
 0x41e   : > { %v4426_v30 = vadd.f32 %v4279_v33, %v3932_v27  ;;  %v5901_v27 = vld [vmem:[%s6078_s29 + $0x202] sm:$0xff] }
 0x420   : > { %v4502_v19 = vadd.f32 %v7281_v45, %v4426_v30  ;;  %v4711_v30 = vld [vmem:[#allocation2 + $0xa0] ss:$2 sm:$0xf] }
 0x421   : > { %v3293_v1 = vpop.f32.mrf.mxu2 }
 0x422   : > { %v3787_v61 = vpop.f32.mrf.mxu3  ;;  %v4574_v7 = vmax.f32 %v4502_v19, 0.0  ;;  %v3439_v58 = vadd.f32 %v3293_v1, %v2944_v8 }
 0x423   : > { %v2801_v9 = vpop.f32.mrf.mxu1 }
 0x424   : > { %4647 = vst.msk [vmem:[#allocation2 + $0xb0] sm:$0xff] %vm4624_vm1, %v4574_v7  ;;  %v3933_v21 = vadd.f32 %v3787_v61, %v3439_v58  ;;  %v4284_v50 = vpop.f32.mrf.mxu0  ;;  %v2945_v46 = vadd.f32 %v2801_v9, %v6804_v62  ;;  %v3087_v61 = vpack.c.bf16 %v5662_v53, %v5661_v18  ;;  %v4799_v58 = vmax.f32 %v4711_v30, %v4759_v22 }
 0x425   : > { %v2593_v18 = vpack.c.bf16 %v5901_v27, %v7543_v29 }
 0x426   : > { %5603 = vmatmul.msk.bf16.gmra.mxu1 %vm409_vm0, %v2591_v5  ;;  %v4427_v23 = vadd.f32 %v4281_v54, %v3933_v21  ;;  %5723 = vmatmul.msk.bf16.gmra.mxu2 %vm409_vm0, %v3086_v15  ;;  %v7564_v54 = vld [vmem:[%s6078_s29 + $0x20a] sm:$0xff]  ;;  %v3581_v5 = vpack.c.bf16 %v5782_v3, %v5781_v34  ;;  %v7579_v21 = vld [vmem:[%s7971_s2] ss:$0 sm:$0xff] }
 0x427   : > { %5843 = vmatmul.msk.bf16.gmra.mxu3 %vm409_vm0, %v3580_v40  ;;  %5963 = vmatmul.msk.bf16.gmra.mxu0 %vm409_vm0, %v4074_v35 }
 0x428   : > { %v4503_v24 = vadd.f32 %v7281_v45, %v4427_v23 }
 0x429   : > { %v3296_v20 = vpop.f32.mrf.mxu2 }
 0x42a   : > { %v3790_v25 = vpop.f32.mrf.mxu3  ;;  %v4575_v2 = vmax.f32 %v4503_v24, 0.0  ;;  %v3440_v59 = vadd.f32 %v3296_v20, %v2945_v46 }
 0x42b   : > { %v2803_v51 = vpop.f32.mrf.mxu1  ;;  %v4829_v11 = vld [vmem:[#allocation2 + $0xa8] ss:$2 sm:$0xff]  ;;  %v4877_v57 = vld [vmem:[#allocation2 + $0xa9] ss:$2 sm:$0xff] }
 0x42c   : > { %v4918_v44 = vmax.f32 %v4829_v11, %v4877_v57  ;;  %4648 = vst.msk [vmem:[#allocation2 + $0xb8] sm:$0xff] %vm4624_vm1, %v4575_v2  ;;  %v3934_v62 = vadd.f32 %v3790_v25, %v3440_v59  ;;  %v4286_v42 = vpop.f32.mrf.mxu0  ;;  %v2946_v26 = vadd.f32 %v2803_v51, %v6819_v36  ;;  %v4075_v36 = vpack.c.bf16 %v7564_v54, %v5901_v27  ;;  %v5663_v51 = vld [vmem:[%s6078_s29 + $0x210] sm:$0xff]  ;;  %v5664_v11 = vld [vmem:[%s6078_s29 + $0x220] sm:$0xff] }
 0x42d   : > { %v5783_v57 = vld [vmem:[%s6078_s29 + $0x211] sm:$0xff] }
 0x42e   : > { %v4942_v33 = vmax.f32 %v4798_v48, %v4918_v44  ;;  %v4428_v60 = vadd.f32 %v4284_v50, %v3934_v62  ;;  %v5784_v48 = vld [vmem:[%s6078_s29 + $0x221] sm:$0xff]  ;;  %v5903_v62 = vld [vmem:[%s6078_s29 + $0x212] sm:$0xff] }
 0x430   : > { %v4966_v52 = vpack.c.bf16 %v4942_v33, %v4942_v33  ;;  %v4504_v32 = vadd.f32 %v7281_v45, %v4428_v60 }
 0x431   : > { %v3298_v31 = vpop.f32.mrf.mxu2 }
 0x432   : > { %v3792_v13 = vpop.f32.mrf.mxu3  ;;  %4992 = vst.msk [vmem:[%s7351_s8 + $0x18] sm:$0xf] %vm4984_vm2, %v4966_v52  ;;  %v4576_v19 = vmax.f32 %v4504_v32, 0.0  ;;  %v3441_v8 = vadd.f32 %v3298_v31, %v2946_v26  ;;  %v3088_v52 = vpack.c.bf16 %v5664_v11, %v5663_v51  ;;  %v3582_v32 = vpack.c.bf16 %v5784_v48, %v5783_v57 }
 0x433   : > { %v2806_v1 = vpop.f32.mrf.mxu1  ;;  %v4831_v45 = vld [vmem:[#allocation2 + $0xb8] ss:$2 sm:$0xf]  ;;  %v4879_v7 = vld [vmem:[#allocation2 + $0xb9] ss:$2 sm:$0xf] }
 0x434   : > { %v4919_v9 = vmax.f32 %v4831_v45, %v4879_v7  ;;  %4649 = vst.msk [vmem:[#allocation2 + $0xc0] sm:$0xff] %vm4624_vm1, %v4576_v19  ;;  %v3935_v15 = vadd.f32 %v3792_v13, %v3441_v8  ;;  %v4289_v40 = vpop.f32.mrf.mxu0  ;;  %v2947_v23 = vadd.f32 %v2806_v1, %v6824_v41  ;;  %v5665_v45 = vld [vmem:[%s6078_s29 + $0x228] sm:$0xff]  ;;  %v5666_v7 = vld [vmem:[%s6078_s29 + $0x230] sm:$0xff] }
 0x436   : > { %5604 = vmatmul.msk.bf16.gmra.mxu1 %vm409_vm0, %v2592_v55  ;;  %v4943_v49 = vmax.f32 %v4799_v58, %v4919_v9  ;;  %v4429_v37 = vadd.f32 %v4286_v42, %v3935_v15  ;;  %5724 = vmatmul.msk.bf16.gmra.mxu2 %vm409_vm0, %v3087_v61  ;;  %v7594_v42 = vld [vmem:[%s6078_s29 + $0x222] sm:$0xff]  ;;  %v5786_v58 = vld [vmem:[%s6078_s29 + $0x231] sm:$0xff] }
 0x437   : > { %5844 = vmatmul.msk.bf16.gmra.mxu3 %vm409_vm0, %v3581_v5  ;;  %5964 = vmatmul.msk.bf16.gmra.mxu0 %vm409_vm0, %v4075_v36  ;;  %v4076_v26 = vpack.c.bf16 %v7594_v42, %v5903_v62  ;;  %v5785_v36 = vld [vmem:[%s6078_s29 + $0x229] sm:$0xff] }
 0x438   : > { %v4967_v35 = vpack.c.bf16 %v4943_v49, %v4943_v49  ;;  %v4505_v50 = vadd.f32 %v7579_v21, %v4429_v37  ;;  %v7613_v15 = vld [vmem:[%s6078_s29 + $0x22a] sm:$0xff] }
 0x439   : > { %v3301_v24 = vpop.f32.mrf.mxu2 }
 0x43a   : > { %v3795_v46 = vpop.f32.mrf.mxu3  ;;  %4993 = vst.msk [vmem:[%s7351_s8 + $0x1c] sm:$0x3] %vm4986_vm3, %v4967_v35  ;;  %v4577_v63 = vmax.f32 %v4505_v50, 0.0  ;;  %v3442_v16 = vadd.f32 %v3301_v24, %v2947_v23  ;;  %v2594_v35 = vpack.c.bf16 %v5903_v62, %v7564_v54 }
 0x43b   : > { %v2808_v20 = vpop.f32.mrf.mxu1 }
 0x43c   : > { %4650 = vst.msk [vmem:[#allocation2 + $0xc8] sm:$0xff] %vm4624_vm1, %v4577_v63  ;;  %v3936_v25 = vadd.f32 %v3795_v46, %v3442_v16  ;;  %v4291_v2 = vpop.f32.mrf.mxu0  ;;  %v2948_v44 = vadd.f32 %v2808_v20, %v6839_v0  ;;  %v3089_v46 = vpack.c.bf16 %v5666_v7, %v5665_v45  ;;  %v3583_v63 = vpack.c.bf16 %v5786_v58, %v5785_v36 }
 0x43e   : > { %v4430_v59 = vadd.f32 %v4289_v40, %v3936_v25  ;;  %v7616_v40 = vld [vmem:[%s6078_s29 + $0x232] sm:$0xff] }
 0x43f   : > { %v4077_v16 = vpack.c.bf16 %v7616_v40, %v7613_v15 }
 0x440   : > { %v4506_v41 = vadd.f32 %v7579_v21, %v4430_v59 }
 0x441   : > { %v3303_v33 = vpop.f32.mrf.mxu2 }
 0x442   : > { %v3797_v60 = vpop.f32.mrf.mxu3  ;;  %v4578_v53 = vmax.f32 %v4506_v41, 0.0  ;;  %v3443_v34 = vadd.f32 %v3303_v33, %v2948_v44 }
 0x443   : > { %v2811_v3 = vpop.f32.mrf.mxu1  ;;  %v4713_v59 = vld [vmem:[#allocation2 + $0xc0] ss:$2 sm:$0xff]  ;;  %v4761_v51 = vld [vmem:[#allocation2 + $0xc1] ss:$2 sm:$0xff] }
 0x444   : > { %4651 = vst.msk [vmem:[#allocation2 + $0xd0] sm:$0xff] %vm4624_vm1, %v4578_v53  ;;  %v3937_v30 = vadd.f32 %v3797_v60, %v3443_v34  ;;  %v4294_v22 = vpop.f32.mrf.mxu0  ;;  %v2949_v27 = vadd.f32 %v2811_v3, %v6844_v14  ;;  %v4800_v60 = vmax.f32 %v4713_v59, %v4761_v51  ;;  %v5669_v59 = vld [vmem:[%s6078_s29 + $0x250] sm:$0xff]  ;;  %v5670_v51 = vld [vmem:[%s6078_s29 + $0x260] sm:$0xff] }
 0x446   : > { %5605 = vmatmul.msk.bf16.gmra.mxu1 %vm409_vm0, %v2593_v18  ;;  %v4431_v0 = vadd.f32 %v4291_v2, %v3937_v30  ;;  %5725 = vmatmul.msk.bf16.gmra.mxu2 %vm409_vm0, %v3088_v52  ;;  %v5667_v52 = vld [vmem:[%s6078_s29 + $0x240] sm:$0xff]  ;;  %v5788_v30 = vld [vmem:[%s6078_s29 + $0x249] sm:$0xff] }
 0x447   : > { %5845 = vmatmul.msk.bf16.gmra.mxu3 %vm409_vm0, %v3582_v32  ;;  %5965 = vmatmul.msk.bf16.gmra.mxu0 %vm409_vm0, %v4076_v26  ;;  %v5668_v32 = vld [vmem:[%s6078_s29 + $0x248] sm:$0xff] }
 0x448   : > { %v4507_v29 = vadd.f32 %v7579_v21, %v4431_v0  ;;  %v5787_v26 = vld [vmem:[%s6078_s29 + $0x241] sm:$0xff]  ;;  %v3090_v7 = vpack.c.bf16 %v5668_v32, %v5667_v52 }
 0x449   : > { %v3306_v31 = vpop.f32.mrf.mxu2  ;;  %v3584_v36 = vpack.c.bf16 %v5788_v30, %v5787_v26 }
 0x44a   : > { %v3800_v13 = vpop.f32.mrf.mxu3  ;;  %v4579_v55 = vmax.f32 %v4507_v29, 0.0  ;;  %v3444_v19 = vadd.f32 %v3306_v31, %v2949_v27  ;;  %v5907_v27 = vld [vmem:[%s6078_s29 + $0x242] sm:$0xff]  ;;  %v7637_v31 = vld [vmem:[%s6078_s29 + $0x24a] sm:$0xff] }
 0x44b   : > { %v2813_v8 = vpop.f32.mrf.mxu1 }
 0x44c   : > { %4652 = vst.msk [vmem:[#allocation2 + $0xd8] sm:$0xff] %vm4624_vm1, %v4579_v55  ;;  %v3938_v1 = vadd.f32 %v3800_v13, %v3444_v19  ;;  %v4296_v61 = vpop.f32.mrf.mxu0  ;;  %v2950_v14 = vadd.f32 %v2813_v8, %v6859_v56  ;;  %v4715_v13 = vld [vmem:[#allocation2 + $0xd0] ss:$2 sm:$0xf] }
 0x44d   : > { %v4763_v55 = vld [vmem:[#allocation2 + $0xd1] ss:$2 sm:$0xf] }
 0x44e   : > { %v4432_v5 = vadd.f32 %v4294_v22, %v3938_v1  ;;  %v2595_v1 = vpack.c.bf16 %v7613_v15, %v7594_v42 }
 0x450   : > { %v4508_v9 = vadd.f32 %v7579_v21, %v4432_v5 }
 0x451   : > { %v3308_v49 = vpop.f32.mrf.mxu2 }
 0x452   : > { %v3802_v37 = vpop.f32.mrf.mxu3  ;;  %v4580_v50 = vmax.f32 %v4508_v9, 0.0  ;;  %v3445_v23 = vadd.f32 %v3308_v49, %v2950_v14  ;;  %v4801_v14 = vmax.f32 %v4715_v13, %v4763_v55 }
 0x453   : > { %v2816_v24 = vpop.f32.mrf.mxu1 }
 0x454   : > { %4653 = vst.msk [vmem:[#allocation2 + $0xe0] sm:$0xff] %vm4624_vm1, %v4580_v50  ;;  %v3939_v20 = vadd.f32 %v3802_v37, %v3445_v23  ;;  %v4299_v56 = vpop.f32.mrf.mxu0  ;;  %v2951_v2 = vadd.f32 %v2816_v24, %v6864_v28 }
 0x456   : > { %5606 = vmatmul.msk.bf16.gmra.mxu1 %vm409_vm0, %v2594_v35  ;;  %v4433_v25 = vadd.f32 %v4296_v61, %v3939_v20  ;;  %5726 = vmatmul.msk.bf16.gmra.mxu2 %vm409_vm0, %v3089_v46 }
 0x457   : > { %5846 = vmatmul.msk.bf16.gmra.mxu3 %vm409_vm0, %v3583_v63  ;;  %5966 = vmatmul.msk.bf16.gmra.mxu0 %vm409_vm0, %v4077_v16 }
 0x458   : > { %v4509_v54 = vadd.f32 %v7579_v21, %v4433_v25 }
 0x459   : > { %v3311_v11 = vpop.f32.mrf.mxu2 }
 0x45a   : > { %v3805_v57 = vpop.f32.mrf.mxu3  ;;  %v4581_v48 = vmax.f32 %v4509_v54, 0.0  ;;  %v3446_v41 = vadd.f32 %v3311_v11, %v2951_v2  ;;  %v5789_v11 = vld [vmem:[%s6078_s29 + $0x251] sm:$0xff] }
 0x45b   : > { %v2818_v44 = vpop.f32.mrf.mxu1  ;;  %v4833_v62 = vld [vmem:[#allocation2 + $0xd8] ss:$2 sm:$0xff]  ;;  %v4881_v33 = vld [vmem:[#allocation2 + $0xd9] ss:$2 sm:$0xff] }
 0x45c   : > { %v4920_v18 = vmax.f32 %v4833_v62, %v4881_v33  ;;  %4654 = vst.msk [vmem:[#allocation2 + $0xe8] sm:$0xff] %vm4624_vm1, %v4581_v48  ;;  %v3940_v28 = vadd.f32 %v3805_v57, %v3446_v41  ;;  %v4301_v53 = vpop.f32.mrf.mxu0  ;;  %v2952_v29 = vadd.f32 %v2818_v44, %v6879_v39  ;;  %v4078_v39 = vpack.c.bf16 %v7637_v31, %v5907_v27  ;;  %v5790_v57 = vld [vmem:[%s6078_s29 + $0x261] sm:$0xff]  ;;  %v5909_v41 = vld [vmem:[%s6078_s29 + $0x252] sm:$0xff] }
 0x45d   : > { %v7662_v44 = vld [vmem:[%s6078_s29 + $0x262] sm:$0xff] }
 0x45e   : > { %v4944_v34 = vmax.f32 %v4800_v60, %v4920_v18  ;;  %v4434_v3 = vadd.f32 %v4299_v56, %v3940_v28  ;;  %v2596_v60 = vpack.c.bf16 %v5907_v27, %v7616_v40  ;;  %v4079_v52 = vpack.c.bf16 %v7662_v44, %v5909_v41 }
 0x460   : > { %v4968_v22 = vpack.c.bf16 %v4944_v34, %v4944_v34  ;;  %v4510_v0 = vadd.f32 %v7579_v21, %v4434_v3  ;;  %v3091_v34 = vpack.c.bf16 %v5670_v51, %v5669_v59  ;;  %v3585_v3 = vpack.c.bf16 %v5790_v57, %v5789_v11 }
 0x461   : > { %v3313_v19 = vpop.f32.mrf.mxu2 }
 0x462   : > { %v3807_v8 = vpop.f32.mrf.mxu3  ;;  %4994 = vst.msk [vmem:[%s7351_s8 + $0x20] sm:$0xf] %vm4984_vm2, %v4968_v22  ;;  %v4582_v61 = vmax.f32 %v4510_v0, 0.0  ;;  %v3447_v5 = vadd.f32 %v3313_v19, %v2952_v29 }
 0x463   : > { %v2821_v45 = vpop.f32.mrf.mxu1  ;;  %v4835_v58 = vld [vmem:[#allocation2 + $0xe8] ss:$2 sm:$0xf]  ;;  %v4883_v9 = vld [vmem:[#allocation2 + $0xe9] ss:$2 sm:$0xf] }
 0x464   : > { %v4921_v49 = vmax.f32 %v4835_v58, %v4883_v9  ;;  %4655 = vst.msk [vmem:[#allocation2 + $0xf0] sm:$0xff] %vm4624_vm1, %v4582_v61  ;;  %v3941_v37 = vadd.f32 %v3807_v8, %v3447_v5  ;;  %v4304_v35 = vpop.f32.mrf.mxu0  ;;  %v2953_v24 = vadd.f32 %v2821_v45, %v6884_v47  ;;  %v5672_v61 = vld [vmem:[%s6078_s29 + $0x270] sm:$0xff] }
 0x465   : > { %v5791_v5 = vld [vmem:[%s6078_s29 + $0x269] sm:$0xff]  ;;  %v5792_v45 = vld [vmem:[%s6078_s29 + $0x271] sm:$0xff] }
 0x466   : > { %5607 = vmatmul.msk.bf16.gmra.mxu1 %vm409_vm0, %v2595_v1  ;;  %v4945_v42 = vmax.f32 %v4801_v14, %v4921_v49  ;;  %v4435_v15 = vadd.f32 %v4301_v53, %v3941_v37  ;;  %5727 = vmatmul.msk.bf16.gmra.mxu2 %vm409_vm0, %v3090_v7  ;;  %v5671_v1 = vld [vmem:[%s6078_s29 + $0x268] sm:$0xff]  ;;  %v7684_v58 = vld [vmem:[%s6078_s29 + $0x272] sm:$0xff]  ;;  %v2597_v14 = vpack.c.bf16 %v5909_v41, %v7637_v31 }
 0x467   : > { %5847 = vmatmul.msk.bf16.gmra.mxu3 %vm409_vm0, %v3584_v36  ;;  %5967 = vmatmul.msk.bf16.gmra.mxu0 %vm409_vm0, %v4078_v39  ;;  %v7681_v36 = vld [vmem:[%s6078_s29 + $0x26a] sm:$0xff] }
 0x468   : > { %v4969_v50 = vpack.c.bf16 %v4945_v42, %v4945_v42  ;;  %v4511_v23 = vadd.f32 %v7579_v21, %v4435_v15  ;;  %v3092_v42 = vpack.c.bf16 %v5672_v61, %v5671_v1  ;;  %v3586_v15 = vpack.c.bf16 %v5792_v45, %v5791_v5 }
 0x469   : > { %v3316_v46 = vpop.f32.mrf.mxu2 }
 0x46a   : > { %v3810_v63 = vpop.f32.mrf.mxu3  ;;  %4995 = vst.msk [vmem:[%s7351_s8 + $0x24] sm:$0x3] %vm4986_vm3, %v4969_v50  ;;  %v4583_v16 = vmax.f32 %v4511_v23, 0.0  ;;  %v3448_v20 = vadd.f32 %v3316_v46, %v2953_v24  ;;  %v4080_v50 = vpack.c.bf16 %v7684_v58, %v7681_v36 }
 0x46b   : > { %v2823_v56 = vpop.f32.mrf.mxu1 }
 0x46c   : > { %4656 = vst.msk [vmem:[#allocation2 + $0xf8] sm:$0xff] %vm4624_vm1, %v4583_v16  ;;  %v3942_v25 = vadd.f32 %v3810_v63, %v3448_v20  ;;  %v4306_v54 = vpop.f32.mrf.mxu0  ;;  %v2954_v48 = vadd.f32 %v2823_v56, %v6899_v38 }
 0x46e   : > { %v4436_v2 = vadd.f32 %v4304_v35, %v3942_v25 }
 0x470   : > { %v4512_v47 = vadd.f32 %v7579_v21, %v4436_v2 }
 0x471   : > { %v3318_v62 = vpop.f32.mrf.mxu2 }
 0x472   : > { %v3812_v33 = vpop.f32.mrf.mxu3  ;;  %v4584_v18 = vmax.f32 %v4512_v47, 0.0  ;;  %v3449_v28 = vadd.f32 %v3318_v62, %v2954_v48  ;;  %v5673_v62 = vld [vmem:[%s6078_s29 + $0x280] sm:$0xff] }
 0x473   : > { %v2826_v53 = vpop.f32.mrf.mxu1  ;;  %v4717_v63 = vld [vmem:[#allocation2 + $0xf0] ss:$2 sm:$0xff]  ;;  %v4765_v16 = vld [vmem:[#allocation2 + $0xf1] ss:$2 sm:$0xff] }
 0x474   : > { %4657 = vst.msk [vmem:[#allocation2 + $0x100] sm:$0xff] %vm4624_vm1, %v4584_v18  ;;  %v3943_v32 = vadd.f32 %v3812_v33, %v3449_v28  ;;  %v4309_v26 = vpop.f32.mrf.mxu0  ;;  %v2955_v30 = vadd.f32 %v2826_v53, %v6904_v10  ;;  %v4802_v11 = vmax.f32 %v4717_v63, %v4765_v16  ;;  %v5674_v33 = vld [vmem:[%s6078_s29 + $0x288] sm:$0xff]  ;;  %v5915_v63 = vld [vmem:[%s6078_s29 + $0x292] sm:$0xff] }
 0x475   : > { %v5794_v18 = vld [vmem:[%s6078_s29 + $0x289] sm:$0xff] }
 0x476   : > { %5608 = vmatmul.msk.bf16.gmra.mxu1 %vm409_vm0, %v2596_v60  ;;  %v4437_v38 = vadd.f32 %v4306_v54, %v3943_v32  ;;  %5728 = vmatmul.msk.bf16.gmra.mxu2 %vm409_vm0, %v3091_v34  ;;  %v5793_v60 = vld [vmem:[%s6078_s29 + $0x281] sm:$0xff] }
 0x477   : > { %5848 = vmatmul.msk.bf16.gmra.mxu3 %vm409_vm0, %v3585_v3  ;;  %5968 = vmatmul.msk.bf16.gmra.mxu0 %vm409_vm0, %v4079_v52  ;;  %v5913_v3 = vld [vmem:[%s6078_s29 + $0x282] sm:$0xff]  ;;  %v7705_v52 = vld [vmem:[%s6078_s29 + $0x28a] sm:$0xff] }
 0x478   : > { %v4513_v40 = vadd.f32 %v7579_v21, %v4437_v38  ;;  %v7730_v16 = vld [vmem:[%s6078_s29 + $0x2a2] sm:$0xff] }
 0x479   : > { %v3321_v22 = vpop.f32.mrf.mxu2 }
 0x47a   : > { %v3815_v0 = vpop.f32.mrf.mxu3  ;;  %v4585_v29 = vmax.f32 %v4513_v40, 0.0  ;;  %v3450_v27 = vadd.f32 %v3321_v22, %v2955_v30  ;;  %v2598_v30 = vpack.c.bf16 %v7681_v36, %v7662_v44 }
 0x47b   : > { %v2828_v13 = vpop.f32.mrf.mxu1  ;;  %v4719_v32 = vld [vmem:[#allocation2 + $0x100] ss:$2 sm:$0xf] }
 0x47c   : > { %4658 = vst.msk [vmem:[#allocation2 + $0x108] sm:$0xff] %vm4624_vm1, %v4585_v29  ;;  %v3944_v55 = vadd.f32 %v3815_v0, %v3450_v27  ;;  %v4311_v19 = vpop.f32.mrf.mxu0  ;;  %v2956_v10 = vadd.f32 %v2828_v13, %v6919_v43  ;;  %v3093_v27 = vpack.c.bf16 %v5674_v33, %v5673_v62  ;;  %v3587_v13 = vpack.c.bf16 %v5794_v18, %v5793_v60 }
 0x47e   : > { %v4438_v8 = vadd.f32 %v4309_v26, %v3944_v55  ;;  %v4767_v26 = vld [vmem:[#allocation2 + $0x101] ss:$2 sm:$0xf] }
 0x480   : > { %v4514_v7 = vadd.f32 %v7579_v21, %v4438_v8  ;;  %v4803_v8 = vmax.f32 %v4719_v32, %v4767_v26  ;;  %v5677_v26 = vld [vmem:[%s6078_s29 + $0x2a8] sm:$0xff] }
 0x481   : > { %v3323_v9 = vpop.f32.mrf.mxu2 }
 0x482   : > { %v3817_v39 = vpop.f32.mrf.mxu3  ;;  %v4586_v49 = vmax.f32 %v4514_v7, 0.0  ;;  %v3451_v37 = vadd.f32 %v3323_v9, %v2956_v10 }
 0x483   : > { %v2831_v35 = vpop.f32.mrf.mxu1 }
 0x484   : > { %4659 = vst.msk [vmem:[#allocation2 + $0x110] sm:$0xff] %vm4624_vm1, %v4586_v49  ;;  %v3945_v23 = vadd.f32 %v3817_v39, %v3451_v37  ;;  %v4314_v43 = vpop.f32.mrf.mxu0  ;;  %v2957_v46 = vadd.f32 %v2831_v35, %v6924_v6 }
 0x486   : > { %5609 = vmatmul.msk.bf16.gmra.mxu1 %vm409_vm0, %v2597_v14  ;;  %v4439_v24 = vadd.f32 %v4311_v19, %v3945_v23  ;;  %5729 = vmatmul.msk.bf16.gmra.mxu2 %vm409_vm0, %v3092_v42  ;;  %v5676_v23 = vld [vmem:[%s6078_s29 + $0x2a0] sm:$0xff] }
 0x487   : > { %5849 = vmatmul.msk.bf16.gmra.mxu3 %vm409_vm0, %v3586_v15  ;;  %5969 = vmatmul.msk.bf16.gmra.mxu0 %vm409_vm0, %v4080_v50  ;;  %v5675_v50 = vld [vmem:[%s6078_s29 + $0x290] sm:$0xff] }
 0x488   : > { %v4515_v31 = vadd.f32 %v7579_v21, %v4439_v24  ;;  %v5796_v24 = vld [vmem:[%s6078_s29 + $0x2a1] sm:$0xff] }
 0x489   : > { %v3326_v20 = vpop.f32.mrf.mxu2 }
 0x48a   : > { %v3820_v56 = vpop.f32.mrf.mxu3  ;;  %v4587_v25 = vmax.f32 %v4515_v31, 0.0  ;;  %v3452_v54 = vadd.f32 %v3326_v20, %v2957_v46  ;;  %v8095_v31 = vld [vmem:[#allocation21_spill] sm:$0xff] }
 0x48b   : > { %v2833_v2 = vpop.f32.mrf.mxu1  ;;  %v4837_v59 = vld [vmem:[#allocation2 + $0x108] ss:$2 sm:$0xff]  ;;  %v4885_v51 = vld [vmem:[#allocation2 + $0x109] ss:$2 sm:$0xff] }
 0x48c   : > { %v4922_v57 = vmax.f32 %v4837_v59, %v4885_v51  ;;  %4660 = vst.msk [vmem:[#allocation2 + $0x118] sm:$0xff] %vm4624_vm1, %v4587_v25  ;;  %v3946_v6 = vadd.f32 %v3820_v56, %v3452_v54  ;;  %v4316_v47 = vpop.f32.mrf.mxu0  ;;  %v2958_v34 = vadd.f32 %v2833_v2, %v6939_v12  ;;  %v4081_v12 = vpack.c.bf16 %v7705_v52, %v5913_v3 }
 0x48d   : > { %v2599_v25 = vpack.c.bf16 %v5913_v3, %v7684_v58  ;;  %v3094_v51 = vpack.c.bf16 %v5676_v23, %v5675_v50 }
 0x48e   : > { %v4946_v48 = vmax.f32 %v4802_v11, %v4922_v57  ;;  %v4440_v41 = vadd.f32 %v4314_v43, %v3946_v6  ;;  %v5795_v43 = vld [vmem:[%s6078_s29 + $0x291] sm:$0xff]  ;;  %v4082_v57 = vpack.c.bf16 %v7730_v16, %v5915_v63 }
 0x48f   : > { %v3588_v11 = vpack.c.bf16 %v5796_v24, %v5795_v43 }
 0x490   : > { %v4970_v28 = vpack.c.bf16 %v4946_v48, %v4946_v48  ;;  %v4516_v53 = vadd.f32 %v7579_v21, %v4440_v41  ;;  %v8096_v41 = vld [vmem:[#allocation24_spill] sm:$0xff] }
 0x491   : > { %v3328_v38 = vpop.f32.mrf.mxu2 }
 0x492   : > { %v3822_v40 = vpop.f32.mrf.mxu3  ;;  %4996 = vst.msk [vmem:[%s7351_s8 + $0x28] sm:$0xf] %vm4984_vm2, %v4970_v28  ;;  %v4588_v22 = vmax.f32 %v4516_v53, 0.0  ;;  %v3453_v0 = vadd.f32 %v3328_v38, %v2958_v34  ;;  %v5678_v38 = vld [vmem:[%s6078_s29 + $0x2b0] sm:$0xff] }
 0x493   : > { %v2836_v29 = vpop.f32.mrf.mxu1  ;;  %v4839_v55 = vld [vmem:[#allocation2 + $0x118] ss:$2 sm:$0xf]  ;;  %v4887_v19 = vld [vmem:[#allocation2 + $0x119] ss:$2 sm:$0xf] }
 0x494   : > { %v4923_v1 = vmax.f32 %v4839_v55, %v4887_v19  ;;  %4661 = vst.msk [vmem:[#allocation2 + $0x120] sm:$0xff] %vm4624_vm1, %v4588_v22  ;;  %v3947_v61 = vadd.f32 %v3822_v40, %v3453_v0  ;;  %v4319_v5 = vpop.f32.mrf.mxu0  ;;  %v2959_v36 = vadd.f32 %v2836_v29, %v6944_v4  ;;  %v5797_v40 = vld [vmem:[%s6078_s29 + $0x2a9] sm:$0xff]  ;;  %v8097_v0 = vld [vmem:[#allocation27_spill] sm:$0xff] }
 0x496   : > { %5610 = vmatmul.msk.bf16.gmra.mxu1 %vm409_vm0, %v2598_v30  ;;  %v4947_v44 = vmax.f32 %v4803_v8, %v4923_v1  ;;  %v4441_v45 = vadd.f32 %v4316_v47, %v3947_v61  ;;  %5730 = vmatmul.msk.bf16.gmra.mxu2 %vm409_vm0, %v3093_v27  ;;  %v5798_v30 = vld [vmem:[%s6078_s29 + $0x2b1] sm:$0xff] }
 0x497   : > { %5850 = vmatmul.msk.bf16.gmra.mxu3 %vm409_vm0, %v3587_v13  ;;  %5970 = vmatmul.msk.bf16.gmra.mxu0 %vm409_vm0, %v4081_v12  ;;  %v7749_v27 = vld [vmem:[%s6078_s29 + $0x2aa] sm:$0xff]  ;;  %v7752_v13 = vld [vmem:[%s6078_s29 + $0x2b2] sm:$0xff]  ;;  %v2600_v12 = vpack.c.bf16 %v5915_v63, %v7705_v52 }
 0x498   : > { %v4971_v7 = vpack.c.bf16 %v4947_v44, %v4947_v44  ;;  %v4517_v10 = vadd.f32 %v7579_v21, %v4441_v45  ;;  %v3589_v44 = vpack.c.bf16 %v5798_v30, %v5797_v40  ;;  %v4083_v45 = vpack.c.bf16 %v7752_v13, %v7749_v27 }
 0x499   : > { %v3331_v9 = vpop.f32.mrf.mxu2 }
 0x49a   : > { %v3825_v39 = vpop.f32.mrf.mxu3  ;;  %4997 = vst.msk [vmem:[%s7351_s8 + $0x2c] sm:$0x3] %vm4986_vm3, %v4971_v7  ;;  %v4589_v14 = vmax.f32 %v4517_v10, 0.0  ;;  %v3454_v49 = vadd.f32 %v3331_v9, %v2959_v36  ;;  %v8098_v9 = vld [vmem:[#allocation30_spill] sm:$0xff] }
 0x49b   : > { %v2838_v37 = vpop.f32.mrf.mxu1 }
 0x49c   : > { %4662 = vst.msk [vmem:[#allocation2 + $0x128] sm:$0xff] %vm4624_vm1, %v4589_v14  ;;  %v3948_v35 = vadd.f32 %v3825_v39, %v3454_v49  ;;  %v4321_v42 = vpop.f32.mrf.mxu0  ;;  %v2960_v46 = vadd.f32 %v2838_v37, %v8095_v31 }
 0x49e   : > { %v4442_v15 = vadd.f32 %v4319_v5, %v3948_v35  ;;  %v3095_v5 = vpack.c.bf16 %v5678_v38, %v5677_v26 }
 0x4a0   : > { %v4518_v4 = vadd.f32 %v7579_v21, %v4442_v15 }
 0x4a1   : > { %v3333_v20 = vpop.f32.mrf.mxu2 }
 0x4a2   : > { %v3827_v56 = vpop.f32.mrf.mxu3  ;;  %v4590_v54 = vmax.f32 %v4518_v4, 0.0  ;;  %v3455_v2 = vadd.f32 %v3333_v20, %v2960_v46 }
 0x4a3   : > { %v2841_v59 = vpop.f32.mrf.mxu1  ;;  %v4721_v14 = vld [vmem:[#allocation2 + $0x120] ss:$2 sm:$0xff]  ;;  %v4769_v49 = vld [vmem:[#allocation2 + $0x121] ss:$2 sm:$0xff] }
 0x4a4   : > { %4663 = vst.msk [vmem:[#allocation2 + $0x130] sm:$0xff] %vm4624_vm1, %v4590_v54  ;;  %v3949_v6 = vadd.f32 %v3827_v56, %v3455_v2  ;;  %v4324_v47 = vpop.f32.mrf.mxu0  ;;  %v2961_v62 = vadd.f32 %v2841_v59, %v8096_v41  ;;  %v4804_v24 = vmax.f32 %v4721_v14, %v4769_v49  ;;  %v5679_v56 = vld [vmem:[%s6078_s29 + $0x2c0] sm:$0xff]  ;;  %v5800_v2 = vld [vmem:[%s6078_s29 + $0x2c9] sm:$0xff] }
 0x4a5   : > { %v5799_v54 = vld [vmem:[%s6078_s29 + $0x2c1] sm:$0xff] }
 0x4a6   : > { %5611 = vmatmul.msk.bf16.gmra.mxu1 %vm409_vm0, %v2599_v25  ;;  %v4443_v48 = vadd.f32 %v4321_v42, %v3949_v6  ;;  %5731 = vmatmul.msk.bf16.gmra.mxu2 %vm409_vm0, %v3094_v51  ;;  %v5680_v25 = vld [vmem:[%s6078_s29 + $0x2c8] sm:$0xff]  ;;  %v8101_v14 = vld [vmem:[#allocation39_spill] sm:$0xff] }
 0x4a7   : > { %5851 = vmatmul.msk.bf16.gmra.mxu3 %vm409_vm0, %v3588_v11  ;;  %5971 = vmatmul.msk.bf16.gmra.mxu0 %vm409_vm0, %v4082_v57  ;;  %v8099_v11 = vld [vmem:[#allocation33_spill] sm:$0xff]  ;;  %v5919_v6 = vld [vmem:[%s6078_s29 + $0x2c2] sm:$0xff] }
 0x4a8   : > { %v4519_v58 = vadd.f32 %v7579_v21, %v4443_v48 }
 0x4a9   : > { %v3336_v33 = vpop.f32.mrf.mxu2 }
 0x4aa   : > { %v3830_v60 = vpop.f32.mrf.mxu3  ;;  %v4591_v18 = vmax.f32 %v4519_v58, 0.0  ;;  %v3456_v28 = vadd.f32 %v3336_v33, %v2961_v62  ;;  %v2601_v33 = vpack.c.bf16 %v7749_v27, %v7730_v16 }
 0x4ab   : > { %v2843_v53 = vpop.f32.mrf.mxu1  ;;  %v4723_v48 = vld [vmem:[#allocation2 + $0x130] ss:$2 sm:$0xf]  ;;  %v4771_v58 = vld [vmem:[#allocation2 + $0x131] ss:$2 sm:$0xf] }
 0x4ac   : > { %4664 = vst.msk [vmem:[#allocation2 + $0x138] sm:$0xff] %vm4624_vm1, %v4591_v18  ;;  %v3950_v34 = vadd.f32 %v3830_v60, %v3456_v28  ;;  %v4326_v3 = vpop.f32.mrf.mxu0  ;;  %v2962_v29 = vadd.f32 %v2843_v53, %v8097_v0  ;;  %v3096_v53 = vpack.c.bf16 %v5680_v25, %v5679_v56  ;;  %v4805_v38 = vmax.f32 %v4723_v48, %v4771_v58  ;;  %v8102_v25 = vld [vmem:[#allocation42_spill] sm:$0xff] }
 0x4ae   : > { %v4444_v32 = vadd.f32 %v4324_v47, %v3950_v34  ;;  %v7773_v47 = vld [vmem:[%s6078_s29 + $0x2ca] sm:$0xff]  ;;  %v3590_v34 = vpack.c.bf16 %v5800_v2, %v5799_v54 }
 0x4af   : > { %v4084_v26 = vpack.c.bf16 %v7773_v47, %v5919_v6 }
 0x4b0   : > { %v4520_v22 = vadd.f32 %v7579_v21, %v4444_v32 }
 0x4b1   : > { %v3338_v55 = vpop.f32.mrf.mxu2 }
 0x4b2   : > { %v3832_v19 = vpop.f32.mrf.mxu3  ;;  %v4592_v8 = vmax.f32 %v4520_v22, 0.0  ;;  %v3457_v1 = vadd.f32 %v3338_v55, %v2962_v29  ;;  %v8100_v55 = vld [vmem:[#allocation36_spill] sm:$0xff] }
 0x4b3   : > { %v2846_v61 = vpop.f32.mrf.mxu1 }
 0x4b4   : > { %4665 = vst.msk [vmem:[#allocation2 + $0x140] sm:$0xff] %vm4624_vm1, %v4592_v8  ;;  %v3951_v7 = vadd.f32 %v3832_v19, %v3457_v1  ;;  %v4329_v10 = vpop.f32.mrf.mxu0  ;;  %v2963_v39 = vadd.f32 %v2846_v61, %v8098_v9  ;;  %v5802_v9 = vld [vmem:[%s6078_s29 + $0x2e1] sm:$0xff] }
 0x4b6   : > { %5612 = vmatmul.msk.bf16.gmra.mxu1 %vm409_vm0, %v2600_v12  ;;  %v4445_v36 = vadd.f32 %v4326_v3, %v3951_v7  ;;  %5732 = vmatmul.msk.bf16.gmra.mxu2 %vm409_vm0, %v3095_v5 }
 0x4b7   : > { %5852 = vmatmul.msk.bf16.gmra.mxu3 %vm409_vm0, %v3589_v44  ;;  %5972 = vmatmul.msk.bf16.gmra.mxu0 %vm409_vm0, %v4083_v45 }
 0x4b8   : > { %v4521_v52 = vadd.f32 %v7579_v21, %v4445_v36  ;;  %v5682_v36 = vld [vmem:[%s6078_s29 + $0x2e0] sm:$0xff] }
 0x4b9   : > { %v3341_v37 = vpop.f32.mrf.mxu2 }
 0x4ba   : > { %v3835_v35 = vpop.f32.mrf.mxu3  ;;  %v4593_v42 = vmax.f32 %v4521_v52, 0.0  ;;  %v3458_v15 = vadd.f32 %v3341_v37, %v2963_v39  ;;  %v5801_v52 = vld [vmem:[%s6078_s29 + $0x2d1] sm:$0xff] }
 0x4bb   : > { %v2848_v50 = vpop.f32.mrf.mxu1  ;;  %v4841_v23 = vld [vmem:[#allocation2 + $0x138] ss:$2 sm:$0xff]  ;;  %v4889_v43 = vld [vmem:[#allocation2 + $0x139] ss:$2 sm:$0xff] }
 0x4bc   : > { %v4924_v4 = vmax.f32 %v4841_v23, %v4889_v43  ;;  %4666 = vst.msk [vmem:[#allocation2 + $0x148] sm:$0xff] %vm4624_vm1, %v4593_v42  ;;  %v3952_v31 = vadd.f32 %v3835_v35, %v3458_v15  ;;  %v4331_v46 = vpop.f32.mrf.mxu0  ;;  %v2964_v57 = vadd.f32 %v2848_v50, %v8099_v11  ;;  %v5921_v37 = vld [vmem:[%s6078_s29 + $0x2d2] sm:$0xff]  ;;  %v7798_v35 = vld [vmem:[%s6078_s29 + $0x2e2] sm:$0xff]  ;;  %v2602_v50 = vpack.c.bf16 %v5919_v6, %v7752_v13 }
 0x4be   : > { %v4948_v63 = vmax.f32 %v4804_v24, %v4924_v4  ;;  %v4446_v20 = vadd.f32 %v4329_v10, %v3952_v31  ;;  %v5681_v10 = vld [vmem:[%s6078_s29 + $0x2d0] sm:$0xff]  ;;  %v3591_v31 = vpack.c.bf16 %v5802_v9, %v5801_v52 }
 0x4bf   : > { %v3097_v4 = vpack.c.bf16 %v5682_v36, %v5681_v10 }
 0x4c0   : > { %v4972_v59 = vpack.c.bf16 %v4948_v63, %v4948_v63  ;;  %v4522_v51 = vadd.f32 %v7579_v21, %v4446_v20 }
 0x4c1   : > { %v3343_v41 = vpop.f32.mrf.mxu2 }
 0x4c2   : > { %v3837_v62 = vpop.f32.mrf.mxu3  ;;  %4998 = vst.msk [vmem:[%s7351_s8 + $0x30] sm:$0xf] %vm4984_vm2, %v4972_v59  ;;  %v4594_v60 = vmax.f32 %v4522_v51, 0.0  ;;  %v3459_v18 = vadd.f32 %v3343_v41, %v2964_v57  ;;  %v5683_v41 = vld [vmem:[%s6078_s29 + $0x2e8] sm:$0xff] }
 0x4c3   : > { %v2851_v28 = vpop.f32.mrf.mxu1  ;;  %v4843_v3 = vld [vmem:[#allocation2 + $0x148] ss:$2 sm:$0xf]  ;;  %v4891_v32 = vld [vmem:[#allocation2 + $0x149] ss:$2 sm:$0xf] }
 0x4c4   : > { %v4925_v40 = vmax.f32 %v4843_v3, %v4891_v32  ;;  %4667 = vst.msk [vmem:[#allocation2 + $0x150] sm:$0xff] %vm4624_vm1, %v4594_v60  ;;  %v3953_v30 = vadd.f32 %v3837_v62, %v3459_v18  ;;  %v4334_v22 = vpop.f32.mrf.mxu0  ;;  %v2965_v19 = vadd.f32 %v2851_v28, %v8100_v55  ;;  %v5684_v62 = vld [vmem:[%s6078_s29 + $0x2f0] sm:$0xff] }
 0x4c5   : > { %v5804_v60 = vld [vmem:[%s6078_s29 + $0x2f1] sm:$0xff] }
 0x4c6   : > { %5613 = vmatmul.msk.bf16.gmra.mxu1 %vm409_vm0, %v2601_v33  ;;  %v4949_v16 = vmax.f32 %v4805_v38, %v4925_v40  ;;  %v4447_v0 = vadd.f32 %v4331_v46, %v3953_v30  ;;  %5733 = vmatmul.msk.bf16.gmra.mxu2 %vm409_vm0, %v3096_v53  ;;  %v4085_v46 = vpack.c.bf16 %v7798_v35, %v5921_v37  ;;  %v5803_v33 = vld [vmem:[%s6078_s29 + $0x2e9] sm:$0xff]  ;;  %v7820_v3 = vld [vmem:[%s6078_s29 + $0x2f2] sm:$0xff] }
 0x4c7   : > { %5853 = vmatmul.msk.bf16.gmra.mxu3 %vm409_vm0, %v3590_v34  ;;  %5973 = vmatmul.msk.bf16.gmra.mxu0 %vm409_vm0, %v4084_v26  ;;  %v8103_v28 = vld [vmem:[#allocation45_spill] sm:$0xff]  ;;  %v2603_v38 = vpack.c.bf16 %v5921_v37, %v7773_v47 }
 0x4c8   : > { %v4973_v29 = vpack.c.bf16 %v4949_v16, %v4949_v16  ;;  %v4523_v27 = vadd.f32 %v7579_v21, %v4447_v0  ;;  %v7817_v34 = vld [vmem:[%s6078_s29 + $0x2ea] sm:$0xff]  ;;  %v3098_v16 = vpack.c.bf16 %v5684_v62, %v5683_v41  ;;  %v3592_v0 = vpack.c.bf16 %v5804_v60, %v5803_v33 }
 0x4c9   : > { %v3346_v12 = vpop.f32.mrf.mxu2 }
 0x4ca   : > { %v3840_v8 = vpop.f32.mrf.mxu3  ;;  %4999 = vst.msk [vmem:[%s7351_s8 + $0x34] sm:$0x3] %vm4986_vm3, %v4973_v29  ;;  %v4595_v1 = vmax.f32 %v4523_v27, 0.0  ;;  %v3460_v61 = vadd.f32 %v3346_v12, %v2965_v19  ;;  %v4086_v29 = vpack.c.bf16 %v7820_v3, %v7817_v34  ;;  %v8104_v12 = vld [vmem:[#allocation3_spill] sm:$0xff] }
 0x4cb   : > { %v2853_v5 = vpop.f32.mrf.mxu1 }
 0x4cc   : > { %4668 = vst.msk [vmem:[#allocation2 + $0x158] sm:$0xff] %vm4624_vm1, %v4595_v1  ;;  %v3954_v44 = vadd.f32 %v3840_v8, %v3460_v61  ;;  %v4336_v45 = vpop.f32.mrf.mxu0  ;;  %v2966_v49 = vadd.f32 %v2853_v5, %v8101_v14 }
 0x4ce   : > { %v4448_v7 = vadd.f32 %v4334_v22, %v3954_v44 }
 0x4d0   : > { %v4524_v39 = vadd.f32 %v7579_v21, %v4448_v7 }
 0x4d1   : > { %v3348_v42 = vpop.f32.mrf.mxu2 }
 0x4d2   : > { %v3842_v15 = vpop.f32.mrf.mxu3  ;;  %v4596_v23 = vmax.f32 %v4524_v39, 0.0  ;;  %v3461_v43 = vadd.f32 %v3348_v42, %v2966_v49 }
 0x4d3   : > { %v2856_v24 = vpop.f32.mrf.mxu1  ;;  %v4725_v1 = vld [vmem:[#allocation2 + $0x150] ss:$2 sm:$0xff]  ;;  %v4773_v61 = vld [vmem:[#allocation2 + $0x151] ss:$2 sm:$0xff] }
 0x4d4   : > { %4669 = vst.msk [vmem:[#allocation2 + $0x160] sm:$0xff] %vm4624_vm1, %v4596_v23  ;;  %v3955_v63 = vadd.f32 %v3842_v15, %v3461_v43  ;;  %v4339_v20 = vpop.f32.mrf.mxu0  ;;  %v2967_v54 = vadd.f32 %v2856_v24, %v8102_v25  ;;  %v4806_v9 = vmax.f32 %v4725_v1, %v4773_v61  ;;  %v5685_v15 = vld [vmem:[%s6078_s29 + $0x300] sm:$0xff]  ;;  %v5806_v43 = vld [vmem:[%s6078_s29 + $0x309] sm:$0xff]  ;;  %v5927_v1 = vld [vmem:[%s6078_s29 + $0x312] sm:$0xff] }
 0x4d5   : > { %v5805_v23 = vld [vmem:[%s6078_s29 + $0x301] sm:$0xff] }
 0x4d6   : > { %5614 = vmatmul.msk.bf16.gmra.mxu1 %vm409_vm0, %v2602_v50  ;;  %v4449_v56 = vadd.f32 %v4336_v45, %v3955_v63  ;;  %5734 = vmatmul.msk.bf16.gmra.mxu2 %vm409_vm0, %v3097_v4  ;;  %v5686_v50 = vld [vmem:[%s6078_s29 + $0x308] sm:$0xff] }
 0x4d7   : > { %5854 = vmatmul.msk.bf16.gmra.mxu3 %vm409_vm0, %v3591_v31  ;;  %5974 = vmatmul.msk.bf16.gmra.mxu0 %vm409_vm0, %v4085_v46  ;;  %v8105_v31 = vld [vmem:[#allocation5_spill] sm:$0xff]  ;;  %v5925_v63 = vld [vmem:[%s6078_s29 + $0x302] sm:$0xff] }
 0x4d8   : > { %v4525_v13 = vadd.f32 %v7579_v21, %v4449_v56  ;;  %v5928_v61 = vld [vmem:[%s6078_s29 + $0x322] sm:$0xff] }
 0x4d9   : > { %v3351_v2 = vpop.f32.mrf.mxu2 }
 0x4da   : > { %v3845_v59 = vpop.f32.mrf.mxu3  ;;  %v4597_v51 = vmax.f32 %v4525_v13, 0.0  ;;  %v3462_v11 = vadd.f32 %v3351_v2, %v2967_v54  ;;  %v2604_v2 = vpack.c.bf16 %v7817_v34, %v7798_v35 }
 0x4db   : > { %v2858_v57 = vpop.f32.mrf.mxu1  ;;  %v4727_v56 = vld [vmem:[#allocation2 + $0x160] ss:$2 sm:$0xf]  ;;  %v4775_v13 = vld [vmem:[#allocation2 + $0x161] ss:$2 sm:$0xf] }
 0x4dc   : > { %4670 = vst.msk [vmem:[#allocation2 + $0x168] sm:$0xff] %vm4624_vm1, %v4597_v51  ;;  %v3956_v6 = vadd.f32 %v3845_v59, %v3462_v11  ;;  %v4341_v48 = vpop.f32.mrf.mxu0  ;;  %v2968_v53 = vadd.f32 %v2858_v57, %v8103_v28  ;;  %v3099_v57 = vpack.c.bf16 %v5686_v50, %v5685_v15  ;;  %v4807_v62 = vmax.f32 %v4727_v56, %v4775_v13  ;;  %v5689_v56 = vld [vmem:[%s6078_s29 + $0x328] sm:$0xff]  ;;  %v5690_v13 = vld [vmem:[%s6078_s29 + $0x330] sm:$0xff] }
 0x4de   : > { %v4450_v58 = vadd.f32 %v4339_v20, %v3956_v6  ;;  %v7841_v20 = vld [vmem:[%s6078_s29 + $0x30a] sm:$0xff]  ;;  %v3593_v6 = vpack.c.bf16 %v5806_v43, %v5805_v23 }
 0x4df   : > { %v4087_v41 = vpack.c.bf16 %v7841_v20, %v5925_v63 }
 0x4e0   : > { %v4526_v18 = vadd.f32 %v7579_v21, %v4450_v58 }
 0x4e1   : > { %v3353_v32 = vpop.f32.mrf.mxu2 }
 0x4e2   : > { %v3847_v26 = vpop.f32.mrf.mxu3  ;;  %v4598_v40 = vmax.f32 %v4526_v18, 0.0  ;;  %v3463_v30 = vadd.f32 %v3353_v32, %v2968_v53 }
 0x4e3   : > { %v2861_v22 = vpop.f32.mrf.mxu1 }
 0x4e4   : > { %4671 = vst.msk [vmem:[#allocation2 + $0x170] sm:$0xff] %vm4624_vm1, %v4598_v40  ;;  %v3957_v27 = vadd.f32 %v3847_v26, %v3463_v30  ;;  %v4344_v55 = vpop.f32.mrf.mxu0  ;;  %v2969_v8 = vadd.f32 %v2861_v22, %v8104_v12  ;;  %v8106_v12 = vld [vmem:[#allocation7_spill] sm:$0xff] }
 0x4e6   : > { %5615 = vmatmul.msk.bf16.gmra.mxu1 %vm409_vm0, %v2603_v38  ;;  %v4451_v19 = vadd.f32 %v4341_v48, %v3957_v27  ;;  %5735 = vmatmul.msk.bf16.gmra.mxu2 %vm409_vm0, %v3098_v16  ;;  %v5687_v27 = vld [vmem:[%s6078_s29 + $0x310] sm:$0xff] }
 0x4e7   : > { %5855 = vmatmul.msk.bf16.gmra.mxu3 %vm409_vm0, %v3592_v0  ;;  %5975 = vmatmul.msk.bf16.gmra.mxu0 %vm409_vm0, %v4086_v29 }
 0x4e8   : > { %v4527_v47 = vadd.f32 %v7579_v21, %v4451_v19  ;;  %v5807_v19 = vld [vmem:[%s6078_s29 + $0x311] sm:$0xff] }
 0x4e9   : > { %v3356_v5 = vpop.f32.mrf.mxu2 }
 0x4ea   : > { %v3850_v44 = vpop.f32.mrf.mxu3  ;;  %v4599_v45 = vmax.f32 %v4527_v47, 0.0  ;;  %v3464_v7 = vadd.f32 %v3356_v5, %v2969_v8 }
 0x4eb   : > { %v2863_v10 = vpop.f32.mrf.mxu1  ;;  %v4845_v36 = vld [vmem:[#allocation2 + $0x168] ss:$2 sm:$0xff]  ;;  %v4893_v52 = vld [vmem:[#allocation2 + $0x169] ss:$2 sm:$0xff] }
 0x4ec   : > { %v4926_v39 = vmax.f32 %v4845_v36, %v4893_v52  ;;  %4672 = vst.msk [vmem:[#allocation2 + $0x178] sm:$0xff] %vm4624_vm1, %v4599_v45  ;;  %v3958_v14 = vadd.f32 %v3850_v44, %v3464_v7  ;;  %v4346_v49 = vpop.f32.mrf.mxu0  ;;  %v2970_v46 = vadd.f32 %v2863_v10, %v8105_v31  ;;  %v2605_v45 = vpack.c.bf16 %v5925_v63, %v7820_v3 }
 0x4ee   : > { %v4950_v37 = vmax.f32 %v4806_v9, %v4926_v39  ;;  %v4452_v42 = vadd.f32 %v4344_v55, %v3958_v14  ;;  %v5688_v55 = vld [vmem:[%s6078_s29 + $0x320] sm:$0xff]  ;;  %v4088_v39 = vpack.c.bf16 %v5928_v61, %v5927_v1 }
 0x4ef   : > { %v3100_v52 = vpack.c.bf16 %v5688_v55, %v5687_v27 }
 0x4f0   : > { %v4974_v24 = vpack.c.bf16 %v4950_v37, %v4950_v37  ;;  %v4528_v4 = vadd.f32 %v7579_v21, %v4452_v42  ;;  %v8107_v42 = vld [vmem:[#allocation9_spill] sm:$0xff] }
 0x4f1   : > { %v3358_v25 = vpop.f32.mrf.mxu2 }
 0x4f2   : > { %v3852_v54 = vpop.f32.mrf.mxu3  ;;  %5000 = vst.msk [vmem:[%s7351_s8 + $0x38] sm:$0xf] %vm4984_vm2, %v4974_v24  ;;  %v4600_v59 = vmax.f32 %v4528_v4, 0.0  ;;  %v3465_v51 = vadd.f32 %v3358_v25, %v2970_v46  ;;  %v5809_v25 = vld [vmem:[%s6078_s29 + $0x329] sm:$0xff] }
 0x4f3   : > { %v2866_v11 = vpop.f32.mrf.mxu1  ;;  %v4847_v48 = vld [vmem:[#allocation2 + $0x178] ss:$2 sm:$0xf]  ;;  %v4895_v58 = vld [vmem:[#allocation2 + $0x179] ss:$2 sm:$0xf] }
 0x4f4   : > { %v4927_v33 = vmax.f32 %v4847_v48, %v4895_v58  ;;  %4673 = vst.msk [vmem:[#allocation2 + $0x180] sm:$0xff] %vm4624_vm1, %v4600_v59  ;;  %v3959_v60 = vadd.f32 %v3852_v54, %v3465_v51  ;;  %v4349_v18 = vpop.f32.mrf.mxu0  ;;  %v2971_v32 = vadd.f32 %v2866_v11, %v7064_v17  ;;  %v7865_v17 = vld [vmem:[%s7971_s2] ss:$0 sm:$0xff]  ;;  %v5810_v54 = vld [vmem:[%s6078_s29 + $0x331] sm:$0xff]  ;;  %v2606_v58 = vpack.c.bf16 %v5927_v1, %v7841_v20 }
 0x4f5   : > { %v8108_v59 = vld [vmem:[#allocation11_spill] sm:$0xff]  ;;  %v5929_v11 = vld [vmem:[%s6078_s29 + $0x32a] sm:$0xff] }
 0x4f6   : > { %5616 = vmatmul.msk.bf16.gmra.mxu1 %vm409_vm0, %v2604_v2  ;;  %v4951_v35 = vmax.f32 %v4807_v62, %v4927_v33  ;;  %v4453_v28 = vadd.f32 %v4346_v49, %v3959_v60  ;;  %5736 = vmatmul.msk.bf16.gmra.mxu2 %vm409_vm0, %v3099_v57  ;;  %v5930_v57 = vld [vmem:[%s6078_s29 + $0x332] sm:$0xff]  ;;  %v3101_v60 = vpack.c.bf16 %v5690_v13, %v5689_v56 }
 0x4f7   : > { %5856 = vmatmul.msk.bf16.gmra.mxu3 %vm409_vm0, %v3593_v6  ;;  %5976 = vmatmul.msk.bf16.gmra.mxu0 %vm409_vm0, %v4087_v41 }
 0x4f8   : > { %v4975_v53 = vpack.c.bf16 %v4951_v35, %v4951_v35  ;;  %v4529_v34 = vadd.f32 %v7579_v21, %v4453_v28  ;;  %v5808_v21 = vld [vmem:[%s6078_s29 + $0x321] sm:$0xff]  ;;  %v4089_v35 = vpack.c.bf16 %v5930_v57, %v5929_v11 }
 0x4f9   : > { %v3361_v26 = vpop.f32.mrf.mxu2  ;;  %v3594_v9 = vpack.c.bf16 %v5808_v21, %v5807_v19  ;;  %v8112_v57 = vld [vmem:[#allocation19_spill] sm:$0xff] }
 0x4fa   : > { %v3855_v38 = vpop.f32.mrf.mxu3  ;;  %5001 = vst.msk [vmem:[%s7351_s8 + $0x3c] sm:$0x3] %vm4986_vm3, %v4975_v53  ;;  %v4601_v40 = vmax.f32 %v4529_v34, 0.0  ;;  %v3466_v30 = vadd.f32 %v3361_v26, %v2971_v32  ;;  %v8109_v32 = vld [vmem:[#allocation13_spill] sm:$0xff] }
 0x4fb   : > { %v2868_v22 = vpop.f32.mrf.mxu1 }
 0x4fc   : > { %4674 = vst.msk [vmem:[#allocation2 + $0x188] sm:$0xff] %vm4624_vm1, %v4601_v40  ;;  %v3960_v16 = vadd.f32 %v3855_v38, %v3466_v30  ;;  %v4351_v0 = vpop.f32.mrf.mxu0  ;;  %v2972_v8 = vadd.f32 %v2868_v22, %v8106_v12 }
 0x4fe   : > { %v4454_v29 = vadd.f32 %v4349_v18, %v3960_v16  ;;  %v3595_v18 = vpack.c.bf16 %v5810_v54, %v5809_v25 }
 0x500   : > { %v4530_v47 = vadd.f32 %v7865_v17, %v4454_v29 }
 0x501   : > { %v3363_v5 = vpop.f32.mrf.mxu2 }
 0x502   : > { %v3857_v44 = vpop.f32.mrf.mxu3  ;;  %v4602_v7 = vmax.f32 %v4530_v47, 0.0  ;;  %v3467_v10 = vadd.f32 %v3363_v5, %v2972_v8 }
 0x503   : > { %v2871_v36 = vpop.f32.mrf.mxu1  ;;  %v4729_v38 = vld [vmem:[#allocation2 + $0x180] ss:$2 sm:$0xff]  ;;  %v4777_v40 = vld [vmem:[#allocation2 + $0x181] ss:$2 sm:$0xff] }
 0x504   : > { %4675 = vst.msk [vmem:[#allocation2 + $0x190] sm:$0xff] %vm4624_vm1, %v4602_v7  ;;  %v3961_v14 = vadd.f32 %v3857_v44, %v3467_v10  ;;  %v4354_v49 = vpop.f32.mrf.mxu0  ;;  %v2973_v15 = vadd.f32 %v2871_v36, %v8107_v42  ;;  %v4808_v19 = vmax.f32 %v4729_v38, %v4777_v40  ;;  %v8110_v44 = vld [vmem:[#allocation15_spill] sm:$0xff] }
 0x506   : > { %5617 = vmatmul.msk.bf16.gmra.mxu1 %vm409_vm0, %v2605_v45  ;;  %v4455_v37 = vadd.f32 %v4351_v0, %v3961_v14  ;;  %5737 = vmatmul.msk.bf16.gmra.mxu2 %vm409_vm0, %v3100_v52 }
 0x507   : > { %5857 = vmatmul.msk.bf16.gmra.mxu3 %vm409_vm0, %v3594_v9  ;;  %5977 = vmatmul.msk.bf16.gmra.mxu0 %vm409_vm0, %v4088_v39 }
 0x508   : > { %v4531_v3 = vadd.f32 %v7865_v17, %v4455_v37 }
 0x509   : > { %v3366_v50 = vpop.f32.mrf.mxu2 }
 0x50a   : > { %v3860_v23 = vpop.f32.mrf.mxu3  ;;  %v4603_v43 = vmax.f32 %v4531_v3, 0.0  ;;  %v3468_v24 = vadd.f32 %v3366_v50, %v2973_v15 }
 0x50b   : > { %v2873_v4 = vpop.f32.mrf.mxu1  ;;  %v4731_v7 = vld [vmem:[#allocation2 + $0x190] ss:$2 sm:$0xf]  ;;  %v4779_v10 = vld [vmem:[#allocation2 + $0x191] ss:$2 sm:$0xf] }
 0x50c   : > { %4676 = vst.msk [vmem:[#allocation2 + $0x198] sm:$0xff] %vm4624_vm1, %v4603_v43  ;;  %v3962_v31 = vadd.f32 %v3860_v23, %v3468_v24  ;;  %v4356_v46 = vpop.f32.mrf.mxu0  ;;  %v2974_v51 = vadd.f32 %v2873_v4, %v8108_v59  ;;  %v4809_v3 = vmax.f32 %v4731_v7, %v4779_v10 }
 0x50e   : > { %v4456_v63 = vadd.f32 %v4354_v49, %v3962_v31  ;;  %v8111_v31 = vld [vmem:[#allocation17_spill] sm:$0xff] }
 0x510   : > { %v4532_v2 = vadd.f32 %v7865_v17, %v4456_v63 }
 0x511   : > { %v3368_v6 = vpop.f32.mrf.mxu2 }
 0x512   : > { %v3862_v48 = vpop.f32.mrf.mxu3  ;;  %v4604_v41 = vmax.f32 %v4532_v2, 0.0  ;;  %v3469_v62 = vadd.f32 %v3368_v6, %v2974_v51 }
 0x513   : > { %v2876_v33 = vpop.f32.mrf.mxu1 }
 0x514   : > { %4677 = vst.msk [vmem:[#allocation2 + $0x1a0] sm:$0xff] %vm4624_vm1, %v4604_v41  ;;  %v3963_v28 = vadd.f32 %v3862_v48, %v3469_v62  ;;  %v4359_v53 = vpop.f32.mrf.mxu0  ;;  %v2975_v26 = vadd.f32 %v2876_v33, %v8109_v32 }
 0x516   : > { %5618 = vmatmul.msk.bf16.gmra.mxu1 %vm409_vm0, %v2606_v58  ;;  %v4457_v34 = vadd.f32 %v4356_v46, %v3963_v28  ;;  %5738 = vmatmul.msk.bf16.gmra.mxu2 %vm409_vm0, %v3101_v60 }
 0x517   : > { %5858 = vmatmul.msk.bf16.gmra.mxu3 %vm409_vm0, %v3595_v18  ;;  %5978 = vmatmul.msk.bf16.gmra.mxu0 %vm409_vm0, %v4089_v35 }
 0x518   : > { %v4533_v20 = vadd.f32 %v7865_v17, %v4457_v34 }
 0x519   : > { %v3371_v30 = vpop.f32.mrf.mxu2 }
 0x51a   : > { %v3865_v22 = vpop.f32.mrf.mxu3  ;;  %v4605_v16 = vmax.f32 %v4533_v20, 0.0  ;;  %v3470_v0 = vadd.f32 %v3371_v30, %v2975_v26 }
 0x51b   : > { %v2878_v29 = vpop.f32.mrf.mxu1  ;;  %v4849_v27 = vld [vmem:[#allocation2 + $0x198] ss:$2 sm:$0xff]  ;;  %v4897_v55 = vld [vmem:[#allocation2 + $0x199] ss:$2 sm:$0xff] }
 0x51c   : > { %v4928_v21 = vmax.f32 %v4849_v27, %v4897_v55  ;;  %4678 = vst.msk [vmem:[#allocation2 + $0x1a8] sm:$0xff] %vm4624_vm1, %v4605_v16  ;;  %v3964_v47 = vadd.f32 %v3865_v22, %v3470_v0  ;;  %v4361_v12 = vpop.f32.mrf.mxu0  ;;  %v2976_v45 = vadd.f32 %v2878_v29, %v8110_v44  ;;  %v8114_v29 = vld [vmem:[#allocation25_spill] sm:$0xff]  ;;  %v8115_v44 = vld [vmem:[#allocation28_spill] sm:$0xff] }
 0x51e   : > { %v4952_v8 = vmax.f32 %v4808_v19, %v4928_v21  ;;  %v4458_v1 = vadd.f32 %v4359_v53, %v3964_v47  ;;  %v8113_v53 = vld [vmem:[#allocation22_spill] sm:$0xff] }
 0x520   : > { %v4976_v61 = vpack.c.bf16 %v4952_v8, %v4952_v8  ;;  %v4534_v5 = vadd.f32 %v7865_v17, %v4458_v1 }
 0x521   : > { %v3373_v36 = vpop.f32.mrf.mxu2 }
 0x522   : > { %v3867_v52 = vpop.f32.mrf.mxu3  ;;  %5002 = vst.msk [vmem:[%s7351_s8 + $0x40] sm:$0xf] %vm4984_vm2, %v4976_v61  ;;  %v4606_v9 = vmax.f32 %v4534_v5, 0.0  ;;  %v3471_v39 = vadd.f32 %v3373_v36, %v2976_v45 }
 0x523   : > { %v2881_v14 = vpop.f32.mrf.mxu1  ;;  %v4851_v49 = vld [vmem:[#allocation2 + $0x1a8] ss:$2 sm:$0xf]  ;;  %v4899_v37 = vld [vmem:[#allocation2 + $0x1a9] ss:$2 sm:$0xf] }
 0x524   : > { %v4929_v42 = vmax.f32 %v4851_v49, %v4899_v37  ;;  %4679 = vst.msk [vmem:[#allocation2 + $0x1b0] sm:$0xff] %vm4624_vm1, %v4606_v9  ;;  %v3965_v15 = vadd.f32 %v3867_v52, %v3471_v39  ;;  %v4364_v50 = vpop.f32.mrf.mxu0  ;;  %v2977_v46 = vadd.f32 %v2881_v14, %v8111_v31  ;;  %v8116_v31 = vld [vmem:[#allocation31_spill] sm:$0xff] }
 0x526   : > { %v4953_v23 = vmax.f32 %v4809_v3, %v4929_v42  ;;  %v4459_v43 = vadd.f32 %v4361_v12, %v3965_v15 }
 0x528   : > { %v4977_v24 = vpack.c.bf16 %v4953_v23, %v4953_v23  ;;  %v4535_v4 = vadd.f32 %v7865_v17, %v4459_v43 }
 0x529   : > { %v3376_v63 = vpop.f32.mrf.mxu2 }
 0x52a   : > { %v3870_v56 = vpop.f32.mrf.mxu3  ;;  %5003 = vst.msk [vmem:[%s7351_s8 + $0x44] sm:$0x3] %vm4986_vm3, %v4977_v24  ;;  %v4607_v13 = vmax.f32 %v4535_v4, 0.0  ;;  %v3472_v25 = vadd.f32 %v3376_v63, %v2977_v46 }
 0x52b   : > { %v2883_v54 = vpop.f32.mrf.mxu1 }
 0x52c   : > { %4680 = vst.msk [vmem:[#allocation2 + $0x1b8] sm:$0xff] %vm4624_vm1, %v4607_v13  ;;  %v3966_v2 = vadd.f32 %v3870_v56, %v3472_v25  ;;  %v4366_v59 = vpop.f32.mrf.mxu0  ;;  %v2978_v6 = vadd.f32 %v2883_v54, %v8112_v57 }
 0x52e   : > { %v4460_v51 = vadd.f32 %v4364_v50, %v3966_v2 }
 0x530   : > { %v4536_v11 = vadd.f32 %v7865_v17, %v4460_v51 }
 0x531   : > { %v3378_v48 = vpop.f32.mrf.mxu2 }
 0x532   : > { %v3872_v58 = vpop.f32.mrf.mxu3  ;;  %v4608_v41 = vmax.f32 %v4536_v11, 0.0  ;;  %v3473_v62 = vadd.f32 %v3378_v48, %v2978_v6 }
 0x533   : > { %v2886_v33 = vpop.f32.mrf.mxu1  ;;  %v4733_v7 = vld [vmem:[#allocation2 + $0x1b0] ss:$2 sm:$0xff]  ;;  %v4781_v10 = vld [vmem:[#allocation2 + $0x1b1] ss:$2 sm:$0xff] }
 0x534   : > { %4681 = vst.msk [vmem:[#allocation2 + $0x1c0] sm:$0xff] %vm4624_vm1, %v4608_v41  ;;  %v3967_v60 = vadd.f32 %v3872_v58, %v3473_v62  ;;  %v4369_v18 = vpop.f32.mrf.mxu0  ;;  %v2979_v34 = vadd.f32 %v2886_v33, %v8113_v53  ;;  %v4810_v3 = vmax.f32 %v4733_v7, %v4781_v10 }
 0x536   : > { %v4461_v35 = vadd.f32 %v4366_v59, %v3967_v60 }
 0x538   : > { %v4537_v28 = vadd.f32 %v7865_v17, %v4461_v35 }
 0x539   : > { %v3381_v20 = vpop.f32.mrf.mxu2 }
 0x53a   : > { %v3875_v32 = vpop.f32.mrf.mxu3  ;;  %v4609_v26 = vmax.f32 %v4537_v28, 0.0  ;;  %v3474_v38 = vadd.f32 %v3381_v20, %v2979_v34 }
 0x53b   : > { %v2888_v40 = vpop.f32.mrf.mxu1  ;;  %v4735_v63 = vld [vmem:[#allocation2 + $0x1c0] ss:$2 sm:$0xf]  ;;  %v4783_v56 = vld [vmem:[#allocation2 + $0x1c1] ss:$2 sm:$0xf] }
 0x53c   : > { %4682 = vst.msk [vmem:[#allocation2 + $0x1c8] sm:$0xff] %vm4624_vm1, %v4609_v26  ;;  %v3968_v30 = vadd.f32 %v3875_v32, %v3474_v38  ;;  %v4371_v22 = vpop.f32.mrf.mxu0  ;;  %v2980_v27 = vadd.f32 %v2888_v40, %v8114_v29  ;;  %v4811_v57 = vmax.f32 %v4735_v63, %v4783_v56 }
 0x53e   : > { %v4462_v16 = vadd.f32 %v4369_v18, %v3968_v30  ;;  %v8117_v18 = vld [vmem:[#allocation34_spill] sm:$0xff] }
 0x540   : > { %v4538_v0 = vadd.f32 %v7865_v17, %v4462_v16 }
 0x541   : > { %v3383_v55 = vpop.f32.mrf.mxu2 }
 0x542   : > { %v3877_v19 = vpop.f32.mrf.mxu3  ;;  %v4610_v21 = vmax.f32 %v4538_v0, 0.0  ;;  %v3475_v47 = vadd.f32 %v3383_v55, %v2980_v27 }
 0x543   : > { %v2891_v12 = vpop.f32.mrf.mxu1 }
 0x544   : > { %4683 = vst.msk [vmem:[#allocation2 + $0x1d0] sm:$0xff] %vm4624_vm1, %v4610_v21  ;;  %v3969_v8 = vadd.f32 %v3877_v19, %v3475_v47  ;;  %v4374_v1 = vpop.f32.mrf.mxu0  ;;  %v2981_v45 = vadd.f32 %v2891_v12, %v8115_v44 }
 0x546   : > { %v4463_v61 = vadd.f32 %v4371_v22, %v3969_v8  ;;  %v8118_v22 = vld [vmem:[#allocation37_spill] sm:$0xff] }
 0x548   : > { %v4539_v5 = vadd.f32 %v7865_v17, %v4463_v61 }
 0x549   : > { %v3386_v36 = vpop.f32.mrf.mxu2 }
 0x54a   : > { %v3880_v52 = vpop.f32.mrf.mxu3  ;;  %v4611_v9 = vmax.f32 %v4539_v5, 0.0  ;;  %v3476_v39 = vadd.f32 %v3386_v36, %v2981_v45 }
 0x54b   : > { %v2893_v14 = vpop.f32.mrf.mxu1  ;;  %v4853_v49 = vld [vmem:[#allocation2 + $0x1c8] ss:$2 sm:$0xff]  ;;  %v4901_v37 = vld [vmem:[#allocation2 + $0x1c9] ss:$2 sm:$0xff] }
 0x54c   : > { %v4930_v42 = vmax.f32 %v4853_v49, %v4901_v37  ;;  %4684 = vst.msk [vmem:[#allocation2 + $0x1d8] sm:$0xff] %vm4624_vm1, %v4611_v9  ;;  %v3970_v15 = vadd.f32 %v3880_v52, %v3476_v39  ;;  %v4376_v50 = vpop.f32.mrf.mxu0  ;;  %v2982_v46 = vadd.f32 %v2893_v14, %v8116_v31  ;;  %v8120_v14 = vld [vmem:[#allocation43_spill] sm:$0xff]  ;;  %v8121_v31 = vld [vmem:[#allocation46_spill] sm:$0xff] }
 0x54e   : > { %v4954_v23 = vmax.f32 %v4810_v3, %v4930_v42  ;;  %v4464_v43 = vadd.f32 %v4374_v1, %v3970_v15  ;;  %v8119_v1 = vld [vmem:[#allocation40_spill] sm:$0xff] }
 0x550   : > { %v4978_v24 = vpack.c.bf16 %v4954_v23, %v4954_v23  ;;  %v4540_v4 = vadd.f32 %v7865_v17, %v4464_v43 }
 0x551   : > { %v3388_v13 = vpop.f32.mrf.mxu2 }
 0x552   : > { %v3882_v25 = vpop.f32.mrf.mxu3  ;;  %5004 = vst.msk [vmem:[%s7351_s8 + $0x48] sm:$0xf] %vm4984_vm2, %v4978_v24  ;;  %v4612_v54 = vmax.f32 %v4540_v4, 0.0  ;;  %v3477_v2 = vadd.f32 %v3388_v13, %v2982_v46 }
 0x553   : > { %v2896_v59 = vpop.f32.mrf.mxu1  ;;  %v4855_v51 = vld [vmem:[#allocation2 + $0x1d8] ss:$2 sm:$0xf]  ;;  %v4903_v11 = vld [vmem:[#allocation2 + $0x1d9] ss:$2 sm:$0xf] }
 0x554   : > { %v4931_v6 = vmax.f32 %v4855_v51, %v4903_v11  ;;  %4685 = vst.msk [vmem:[#allocation2 + $0x1e0] sm:$0xff] %vm4624_vm1, %v4612_v54  ;;  %v3971_v48 = vadd.f32 %v3882_v25, %v3477_v2  ;;  %v4379_v58 = vpop.f32.mrf.mxu0  ;;  %v2983_v35 = vadd.f32 %v2896_v59, %v8117_v18  ;;  %v8122_v18 = vld [vmem:[#allocation4_spill] sm:$0xff] }
 0x556   : > { %v4955_v41 = vmax.f32 %v4811_v57, %v4931_v6  ;;  %v4465_v62 = vadd.f32 %v4376_v50, %v3971_v48 }
 0x558   : > { %v4979_v33 = vpack.c.bf16 %v4955_v41, %v4955_v41  ;;  %v4541_v60 = vadd.f32 %v7865_v17, %v4465_v62 }
 0x559   : > { %v3391_v28 = vpop.f32.mrf.mxu2 }
 0x55a   : > { %v3885_v53 = vpop.f32.mrf.mxu3  ;;  %5005 = vst.msk [vmem:[%s7351_s8 + $0x4c] sm:$0x3] %vm4986_vm3, %v4979_v33  ;;  %v4613_v34 = vmax.f32 %v4541_v60, 0.0  ;;  %v3478_v20 = vadd.f32 %v3391_v28, %v2983_v35 }
 0x55b   : > { %v2898_v32 = vpop.f32.mrf.mxu1 }
 0x55c   : > { %4686 = vst.msk [vmem:[#allocation2 + $0x1e8] sm:$0xff] %vm4624_vm1, %v4613_v34  ;;  %v3972_v26 = vadd.f32 %v3885_v53, %v3478_v20  ;;  %v4381_v38 = vpop.f32.mrf.mxu0  ;;  %v2984_v16 = vadd.f32 %v2898_v32, %v8118_v22 }
 0x55e   : > { %v4466_v40 = vadd.f32 %v4379_v58, %v3972_v26 }
 0x560   : > { %v4542_v30 = vadd.f32 %v7865_v17, %v4466_v40 }
 0x561   : > { %v3393_v0 = vpop.f32.mrf.mxu2 }
 0x562   : > { %v3887_v29 = vpop.f32.mrf.mxu3  ;;  %v4614_v27 = vmax.f32 %v4542_v30, 0.0  ;;  %v3479_v55 = vadd.f32 %v3393_v0, %v2984_v16 }
 0x563   : > { %v2901_v19 = vpop.f32.mrf.mxu1  ;;  %v4737_v63 = vld [vmem:[#allocation2 + $0x1e0] ss:$2 sm:$0xff]  ;;  %v4785_v56 = vld [vmem:[#allocation2 + $0x1e1] ss:$2 sm:$0xff] }
 0x564   : > { %4687 = vst.msk [vmem:[#allocation2 + $0x1f0] sm:$0xff] %vm4624_vm1, %v4614_v27  ;;  %v3973_v21 = vadd.f32 %v3887_v29, %v3479_v55  ;;  %v4384_v47 = vpop.f32.mrf.mxu0  ;;  %v2985_v61 = vadd.f32 %v2901_v19, %v8119_v1  ;;  %v4812_v57 = vmax.f32 %v4737_v63, %v4785_v56 }
 0x566   : > { %v4467_v12 = vadd.f32 %v4381_v38, %v3973_v21 }
 0x568   : > { %v4543_v8 = vadd.f32 %v7865_v17, %v4467_v12 }
 0x569   : > { %v3396_v5 = vpop.f32.mrf.mxu2 }
 0x56a   : > { %v3890_v44 = vpop.f32.mrf.mxu3  ;;  %v4615_v45 = vmax.f32 %v4543_v8, 0.0  ;;  %v3480_v7 = vadd.f32 %v3396_v5, %v2985_v61 }
 0x56b   : > { %v2903_v10 = vpop.f32.mrf.mxu1  ;;  %v4739_v28 = vld [vmem:[#allocation2 + $0x1f0] ss:$2 sm:$0xf]  ;;  %v4787_v53 = vld [vmem:[#allocation2 + $0x1f1] ss:$2 sm:$0xf] }
 0x56c   : > { %4688 = vst.msk [vmem:[#allocation2 + $0x1f8] sm:$0xff] %vm4624_vm1, %v4615_v45  ;;  %v3974_v36 = vadd.f32 %v3890_v44, %v3480_v7  ;;  %v4386_v52 = vpop.f32.mrf.mxu0  ;;  %v2986_v49 = vadd.f32 %v2903_v10, %v8120_v14  ;;  %v4813_v22 = vmax.f32 %v4739_v28, %v4787_v53 }
 0x56e   : > { %v4468_v9 = vadd.f32 %v4384_v47, %v3974_v36  ;;  %v8123_v47 = vld [vmem:[#allocation6_spill] sm:$0xff]  ;;  %v8124_v36 = vld [vmem:[#allocation8_spill] sm:$0xff] }
 0x570   : > { %v4544_v39 = vadd.f32 %v7865_v17, %v4468_v9 }
 0x571   : > { %v3398_v37 = vpop.f32.mrf.mxu2 }
 0x572   : > { %v3892_v3 = vpop.f32.mrf.mxu3  ;;  %v4616_v42 = vmax.f32 %v4544_v39, 0.0  ;;  %v3481_v15 = vadd.f32 %v3398_v37, %v2986_v49 }
 0x573   : > { %v2906_v50 = vpop.f32.mrf.mxu1 }
 0x574   : > { %4689 = vst.msk [vmem:[#allocation2 + $0x200] sm:$0xff] %vm4624_vm1, %v4616_v42  ;;  %v3975_v23 = vadd.f32 %v3892_v3, %v3481_v15  ;;  %v4389_v43 = vpop.f32.mrf.mxu0  ;;  %v2987_v46 = vadd.f32 %v2906_v50, %v8121_v31 }
 0x576   : > { %v4469_v24 = vadd.f32 %v4386_v52, %v3975_v23  ;;  %v8125_v23 = vld [vmem:[#allocation10_spill] sm:$0xff] }
 0x578   : > { %v4545_v4 = vadd.f32 %v7865_v17, %v4469_v24 }
 0x579   : > { %v3401_v13 = vpop.f32.mrf.mxu2 }
 0x57a   : > { %v3895_v25 = vpop.f32.mrf.mxu3  ;;  %v4617_v54 = vmax.f32 %v4545_v4, 0.0  ;;  %v3482_v2 = vadd.f32 %v3401_v13, %v2987_v46 }
 0x57b   : > { %v2908_v59 = vpop.f32.mrf.mxu1  ;;  %v4857_v51 = vld [vmem:[#allocation2 + $0x1f8] ss:$2 sm:$0xff]  ;;  %v4905_v11 = vld [vmem:[#allocation2 + $0x1f9] ss:$2 sm:$0xff] }
 0x57c   : > { %v4932_v6 = vmax.f32 %v4857_v51, %v4905_v11  ;;  %4690 = vst.msk [vmem:[#allocation2 + $0x208] sm:$0xff] %vm4624_vm1, %v4617_v54  ;;  %v3976_v48 = vadd.f32 %v3895_v25, %v3482_v2  ;;  %v4391_v58 = vpop.f32.mrf.mxu0  ;;  %v2988_v35 = vadd.f32 %v2908_v59, %v8122_v18  ;;  %v8126_v2 = vld [vmem:[#allocation12_spill] sm:$0xff] }
 0x57e   : > { %v4956_v41 = vmax.f32 %v4812_v57, %v4932_v6  ;;  %v4470_v62 = vadd.f32 %v4389_v43, %v3976_v48 }
 0x580   : > { %v4980_v33 = vpack.c.bf16 %v4956_v41, %v4956_v41  ;;  %v4546_v60 = vadd.f32 %v7865_v17, %v4470_v62 }
 0x581   : > { %v3403_v34 = vpop.f32.mrf.mxu2 }
 0x582   : > { %v3897_v20 = vpop.f32.mrf.mxu3  ;;  %5006 = vst.msk [vmem:[%s7351_s8 + $0x50] sm:$0xf] %vm4984_vm2, %v4980_v33  ;;  %v4618_v32 = vmax.f32 %v4546_v60, 0.0  ;;  %v3483_v26 = vadd.f32 %v3403_v34, %v2988_v35 }
 0x583   : > { %v2911_v38 = vpop.f32.mrf.mxu1  ;;  %v4859_v40 = vld [vmem:[#allocation2 + $0x208] ss:$2 sm:$0xf]  ;;  %v4907_v30 = vld [vmem:[#allocation2 + $0x209] ss:$2 sm:$0xf] }
 0x584   : > { %v4933_v16 = vmax.f32 %v4859_v40, %v4907_v30  ;;  %4691 = vst.msk [vmem:[#allocation2 + $0x210] sm:$0xff] %vm4624_vm1, %v4618_v32  ;;  %v3977_v0 = vadd.f32 %v3897_v20, %v3483_v26  ;;  %v4394_v55 = vpop.f32.mrf.mxu0  ;;  %v2989_v12 = vadd.f32 %v2911_v38, %v8123_v47 }
 0x586   : > { %v4957_v29 = vmax.f32 %v4813_v22, %v4933_v16  ;;  %v4471_v27 = vadd.f32 %v4391_v58, %v3977_v0 }
 0x588   : > { %v4981_v19 = vpack.c.bf16 %v4957_v29, %v4957_v29  ;;  %v4547_v21 = vadd.f32 %v7865_v17, %v4471_v27 }
 0x589   : > { %v3406_v8 = vpop.f32.mrf.mxu2 }
 0x58a   : > { %v3900_v1 = vpop.f32.mrf.mxu3  ;;  %5007 = vst.msk [vmem:[%s7351_s8 + $0x54] sm:$0x3] %vm4986_vm3, %v4981_v19  ;;  %v4619_v61 = vmax.f32 %v4547_v21, 0.0  ;;  %v3484_v5 = vadd.f32 %v3406_v8, %v2989_v12 }
 0x58b   : > { %v2913_v44 = vpop.f32.mrf.mxu1 }
 0x58c   : > { %4692 = vst.msk [vmem:[#allocation2 + $0x218] sm:$0xff] %vm4624_vm1, %v4619_v61  ;;  %v3978_v45 = vadd.f32 %v3900_v1, %v3484_v5  ;;  %v2990_v52 = vadd.f32 %v2913_v44, %v8124_v36  ;;  %v4396_v9 = vpop.f32.mrf.mxu0 }
 0x58e   : > { %v4472_v7 = vadd.f32 %v4394_v55, %v3978_v45 }
 0x590   : > { %v4548_v10 = vadd.f32 %v7865_v17, %v4472_v7 }
 0x591   : > { %v3408_v39 = vpop.f32.mrf.mxu2 }
 0x592   : > { %v3902_v14 = vpop.f32.mrf.mxu3  ;;  %v4620_v49 = vmax.f32 %v4548_v10, 0.0  ;;  %v3485_v37 = vadd.f32 %v3408_v39, %v2990_v52 }
 0x593   : > { %v2916_v3 = vpop.f32.mrf.mxu1  ;;  %v4741_v33 = vld [vmem:[#allocation2 + $0x210] ss:$2 sm:$0xff]  ;;  %v4789_v60 = vld [vmem:[#allocation2 + $0x211] ss:$2 sm:$0xff] }
 0x594   : > { %4693 = vst.msk [vmem:[#allocation2 + $0x220] sm:$0xff] %vm4624_vm1, %v4620_v49  ;;  %v3979_v42 = vadd.f32 %v3902_v14, %v3485_v37  ;;  %v2991_v43 = vadd.f32 %v2916_v3, %v8125_v23  ;;  %v4399_v63 = vpop.f32.mrf.mxu0  ;;  %v4814_v53 = vmax.f32 %v4741_v33, %v4789_v60 }
 0x596   : > { %v4473_v15 = vadd.f32 %v4396_v9, %v3979_v42 }
 0x598   : > { %v4549_v50 = vadd.f32 %v7865_v17, %v4473_v15 }
 0x599   : > { %v3411_v24 = vpop.f32.mrf.mxu2 }
 0x59a   : > { %v3905_v4 = vpop.f32.mrf.mxu3  ;;  %v4621_v31 = vmax.f32 %v4549_v50, 0.0  ;;  %v3486_v46 = vadd.f32 %v3411_v24, %v2991_v43 }
 0x59b   : > { %v2918_v13 = vpop.f32.mrf.mxu1  ;;  %v4743_v26 = vld [vmem:[#allocation2 + $0x220] ss:$2 sm:$0xf]  ;;  %v4791_v38 = vld [vmem:[#allocation2 + $0x221] ss:$2 sm:$0xf] }
 0x59c   : > { %4694 = vst.msk [vmem:[#allocation2 + $0x228] sm:$0xff] %vm4624_vm1, %v4621_v31  ;;  %v3980_v56 = vadd.f32 %v3905_v4, %v3486_v46  ;;  %v2992_v59 = vadd.f32 %v2918_v13, %v8126_v2  ;;  %v4401_v58 = vpop.f32.mrf.mxu0  ;;  %v4815_v22 = vmax.f32 %v4743_v26, %v4791_v38 }
 0x59e   : > { %v4474_v25 = vadd.f32 %v4399_v63, %v3980_v56 }
 0x5a0   : > { %v4550_v54 = vadd.f32 %v7865_v17, %v4474_v25 }
 0x5a1   : > { %v3413_v51 = vpop.f32.mrf.mxu2 }
 0x5a2   : > { %v4622_v11 = vmax.f32 %v4550_v54, 0.0  ;;  %v3487_v57 = vadd.f32 %v3413_v51, %v2992_v59  ;;  %v3907_v6 = vpop.f32.mrf.mxu3 }
 0x5a4   : > { %4695 = vst.msk [vmem:[#allocation2 + $0x230] sm:$0xff] %vm4624_vm1, %v4622_v11  ;;  %v3981_v48 = vadd.f32 %v3907_v6, %v3487_v57 }
 0x5a6   : > { %v4475_v41 = vadd.f32 %v4401_v58, %v3981_v48 }
 0x5a8   : > { %v4551_v62 = vadd.f32 %v7865_v17, %v4475_v41 }
 0x5aa   : > { %v4623_v18 = vmax.f32 %v4551_v62, 0.0 }
 0x5ab   : > { %v4861_v35 = vld [vmem:[#allocation2 + $0x228] ss:$2 sm:$0xff]  ;;  %v4909_v28 = vld [vmem:[#allocation2 + $0x229] ss:$2 sm:$0xff] }
 0x5ac   : > { %v4934_v34 = vmax.f32 %v4861_v35, %v4909_v28  ;;  %4696 = vst.msk [vmem:[#allocation2 + $0x238] sm:$0xff] %vm4624_vm1, %v4623_v18 }
 0x5ae   : > { %v4958_v20 = vmax.f32 %v4814_v53, %v4934_v34 }
 0x5b0   : > { %v4982_v32 = vpack.c.bf16 %v4958_v20, %v4958_v20 }
 0x5b2   : > { %5008 = vst.msk [vmem:[%s7351_s8 + $0x58] sm:$0xf] %vm4984_vm2, %v4982_v32 }
 0x5b3   : > { %v4863_v40 = vld [vmem:[#allocation2 + $0x238] ss:$2 sm:$0xf]  ;;  %v4911_v30 = vld [vmem:[#allocation2 + $0x239] ss:$2 sm:$0xf] }
 0x5b4   : > { %v4935_v17 = vmax.f32 %v4863_v40, %v4911_v30 }
 0x5b6   : > { %v4959_v16 = vmax.f32 %v4815_v22, %v4935_v17 }
 0x5b8   : > { %v4983_v0 = vpack.c.bf16 %v4959_v16, %v4959_v16 }
 0x5ba   : > { %5009 = vst.msk [vmem:[%s7351_s8 + $0x5c] sm:$0x3] %vm4986_vm3, %v4983_v0 }
 0x5bb PF: > { %s13_s12 = sadd.s32 1, %s6024_s12  }
 0x5bc   : > { %p10_p4 = scmp.ge.s32.totalorder %s13_s12, 4  }
 0x5be   :  { %12 = sbr.rel (!%p10_p4) target bundleno = 1 (0x1), region = 167 }

</bundles_post_ra>
